<compile_context>
chip_gen: v7x
topology: tpu7x:2x2x1
jax: 0.10.0
libtpu: 0.0.40
codegen_flags: <defaults>
</compile_context>

<pallas_src>
import math
import functools

import jax
import jax.numpy as jnp
from jax.experimental import pallas as pl
from jax.experimental.pallas import tpu as pltpu

CH = 32          # encoder width
Z_CHANNELS = 16  # encoder output channels
EMBED_DIM = 16   # quant_conv output / codebook dim
N_EMBED = 128    # codebook size (multiple of 128 keeps the P store lane-dense)
NUM_GROUPS = 8   # GroupNorm groups
GN_EPS = 1e-6    # taming's Normalize uses eps=1e-6


# ----------------------------- in-kernel helpers -----------------------------

def _conv3x3_from_slab(xpad_ref, w_ref, *, H, W, pad_val):
    """3x3 stride-1 conv (padding=1) on one image, without im2col.

    xpad_ref: ((H+2)*W + 2, Cin) flat slab -- image padded by one row of
              `pad_val` above/below plus one extra element on each end; the W
              boundary is handled by masking two edge taps.
    w_ref:    (9, Cin, Cout) per-tap weights, tap index = di*3 + dj.
    returns:  (H*W, Cout) float32.

    Kept as 9 small-K matmuls: Cin=3 makes the total MACs negligible and a
    lane-concat of 3-wide pieces would cost more in relayouts than it saves.
    """
    HW = H * W
    col = jax.lax.broadcasted_iota(jnp.int32, (HW, 1), 0) % W
    left = col == 0
    right = col == W - 1
    acc = None
    for di in range(3):
        for dj in range(3):
            lhs = xpad_ref[pl.ds(di * W + dj, HW), :]       # (HW, Cin)
            if dj == 0:                                     # wrapped left edge
                lhs = jnp.where(left, pad_val, lhs)
            elif dj == 2:                                   # wrapped right edge
                lhs = jnp.where(right, pad_val, lhs)
            t = jnp.dot(lhs, w_ref[di * 3 + dj],
                        preferred_element_type=jnp.float32)
            acc = t if acc is None else acc + t
    return acc


def _gn_swish(h, gamma, beta, gg, *, group_size, eps):
    """GroupNorm (per image) + swish on an (N, C) slab, all in registers.

    `gg` is the (C, C) 0/1 "same group" matrix, so a single (1,C)@(C,C)
    matmul both pools per-group sums and broadcasts them back onto channels.
    Variance is computed on mean-subtracted data (two-pass) for stability.
    """
    n = float(h.shape[0] * group_size)
    s1 = jnp.sum(h, axis=0, keepdims=True)                               # (1, C)
    mean_c = jnp.dot(s1, gg, preferred_element_type=jnp.float32) / n     # (1, C)
    hc = h - mean_c
    s2 = jnp.sum(hc * hc, axis=0, keepdims=True)                         # (1, C)
    var_c = jnp.dot(s2, gg, preferred_element_type=jnp.float32) / n      # (1, C)
    y = hc * jax.lax.rsqrt(var_c + eps) * gamma + beta
    return y * jax.nn.sigmoid(y)                                         # swish


# ----------------------------- fused Pallas kernel -----------------------------

def _encoder_fused_kernel(xpad_ref, w_in_ref, b_in_ref, g1_ref, bt1_ref, gg_ref,
                          sel2_ref, wd_ref, bd_ref, g2_ref, bt2_ref,
                          sel3_ref, woq_ref, boq_ref, et_ref, esq_ref,
                          o_ref, *, H, W, group_size, eps):
    # ---- stage 1: conv_in (2x-1 folded, pad 0.5) + GroupNorm + swish ----
    h1 = _conv3x3_from_slab(xpad_ref, w_in_ref, H=H, W=W, pad_val=0.5)
    h1 = _gn_swish(h1 + b_in_ref[...], g1_ref[...], bt1_ref[...], gg_ref[...],
                   group_size=group_size, eps=eps)                    # (H*W, CH)

    # ---- stage 2: stride-2 conv_down + GroupNorm + swish (all in VMEM) ----
    # Per-tap gather is a (HoWo, HW) selection matmul (boundary zeros baked
    # into sel2); the 9 taps are folded into the contraction by block
    # accumulation -> no HBM patch slab, no in-kernel boundary masks.
    acc2 = None
    for t in range(9):
        g = jnp.dot(sel2_ref[t], h1, preferred_element_type=jnp.float32)   # (HoWo, CH)
        p = jnp.dot(g, wd_ref[t], preferred_element_type=jnp.float32)
        acc2 = p if acc2 is None else acc2 + p
    h2 = _gn_swish(acc2 + bd_ref[...], g2_ref[...], bt2_ref[...], gg_ref[...],
                   group_size=group_size, eps=eps)                    # (HoWo, CH)

    # ---- stage 3: conv_out with quant_conv pre-composed + SCQ softmax ----
    acc3 = None
    for t in range(9):
        g = jnp.dot(sel3_ref[t], h2, preferred_element_type=jnp.float32)   # (HoWo, CH)
        p = jnp.dot(g, woq_ref[t], preferred_element_type=jnp.float32)
        acc3 = p if acc3 is None else acc3 + p
    h3 = acc3 + boq_ref[...]                                          # (HoWo, E)

    # P = softmax(-||h - e_k||^2); the -||h||^2 term is constant over codes
    # and cancels in the softmax, so it is dropped (||e||^2 is precomputed).
    logits = (2.0 * jnp.dot(h3, et_ref[...], preferred_element_type=jnp.float32)
              - esq_ref[...])                                         # (HoWo, K)
    m = jnp.max(logits, axis=1, keepdims=True)
    ex = jnp.exp(logits - m)
    d = jnp.sum(ex, axis=1, keepdims=True)
    r = pl.reciprocal(d, approx=True)
    r = r * (2.0 - d * r)            # one Newton step -> ~f32-exact normalization
    o_ref[...] = ex * r              # (HoWo, 128): lane-dense, unmasked store


# ----------------------------- wrapper-side glue -----------------------------

def _flat_pad(x_nhwc, pad_val):
    # One padded row of `pad_val` above/below, flatten spatial, one extra
    # element at each end -> (B, (H+2)*W + 2, C) flat slab.
    B, H, W, C = x_nhwc.shape
    xp = jnp.pad(x_nhwc, ((0, 0), (1, 1), (0, 0), (0, 0)),
                 constant_values=pad_val)
    flat = xp.reshape(B, (H + 2) * W, C)
    return jnp.pad(flat, ((0, 0), (1, 1), (0, 0)), constant_values=pad_val)


def _make_tap_select(Hin, Win, Hout, Wout, stride):
    # sel[t, o, i] = 1 iff flat input position i feeds tap t of flat output o
    # (zero rows where the tap falls into the zero padding).
    di = jnp.arange(3).reshape(3, 1, 1, 1, 1, 1)
    dj = jnp.arange(3).reshape(1, 3, 1, 1, 1, 1)
    ho = jnp.arange(Hout).reshape(1, 1, Hout, 1, 1, 1)
    wo = jnp.arange(Wout).reshape(1, 1, 1, Wout, 1, 1)
    r = jnp.arange(Hin).reshape(1, 1, 1, 1, Hin, 1)
    c = jnp.arange(Win).reshape(1, 1, 1, 1, 1, Win)
    hit = (r == stride * ho + di - 1) & (c == stride * wo + dj - 1)
    return hit.astype(jnp.float32).reshape(9, Hout * Wout, Hin * Win)


# ----------------------------- parameters & forward -----------------------------

def init_params(key):
    ks = jax.random.split(key, 8)

    def conv_init(k, kh, kw, cin, cout):
        k1, k2 = jax.random.split(k)
        scale = 1.0 / math.sqrt(kh * kw * cin)
        w = jax.random.normal(k1, (kh, kw, cin, cout), jnp.float32) * scale
        b = jax.random.normal(k2, (cout,), jnp.float32) * 0.01
        return w, b

    p = {}
    p["conv_in_w"], p["conv_in_b"] = conv_init(ks[0], 3, 3, 3, CH)
    p["gn1_gamma"] = jnp.ones((CH,), jnp.float32)
    p["gn1_beta"] = jnp.zeros((CH,), jnp.float32)
    p["conv_down_w"], p["conv_down_b"] = conv_init(ks[1], 3, 3, CH, CH)
    p["gn2_gamma"] = jnp.ones((CH,), jnp.float32)
    p["gn2_beta"] = jnp.zeros((CH,), jnp.float32)
    p["conv_out_w"], p["conv_out_b"] = conv_init(ks[2], 3, 3, CH, Z_CHANNELS)
    p["quant_conv_w"], p["quant_conv_b"] = conv_init(ks[3], 1, 1, Z_CHANNELS, EMBED_DIM)
    p["codebook"] = jax.random.normal(ks[4], (N_EMBED, EMBED_DIM), jnp.float32)
    return p


@jax.jit
def encoder_forward(x_nchw, params):
    # x_nchw: (B, C, H, W), matching the PyTorch reference signature (NCHW).
    x = jnp.transpose(x_nchw, (0, 2, 3, 1)).astype(jnp.float32)   # NCHW -> NHWC
    B, H, W, Cin = x.shape
    Ho = (H + 2 - 3) // 2 + 1
    Wo = (W + 2 - 3) // 2 + 1
    HW, HoWo = H * W, Ho * Wo
    gs = CH // NUM_GROUPS

    # (C, C) "same group" matrix for the one-matmul GroupNorm stat broadcast.
    cidx = jnp.arange(CH)
    gg = (cidx[:, None] // gs == cidx[None, :] // gs).astype(jnp.float32)

    # conv_in with `2x-1` folded in (w'=2w, b'=b-sum(w); pad value 0.5).
    w_in = (2.0 * params["conv_in_w"]).reshape(9, Cin, CH)
    b_in = (params["conv_in_b"]
            - jnp.sum(params["conv_in_w"], axis=(0, 1, 2))).reshape(1, CH)

    # Tap-gather selection matrices (stride 2 for conv_down, 1 for conv_out).
    sel2 = _make_tap_select(H, W, Ho, Wo, 2)          # (9, HoWo, HW)
    sel3 = _make_tap_select(Ho, Wo, Ho, Wo, 1)        # (9, HoWo, HoWo)

    wd = params["conv_down_w"].reshape(9, CH, CH)
    bd = params["conv_down_b"].reshape(1, CH)

    # quant_conv (1x1) pre-composed into conv_out.
    wq = params["quant_conv_w"].reshape(Z_CHANNELS, EMBED_DIM)
    woq = jnp.tensordot(params["conv_out_w"], wq,
                        axes=[[3], [0]]).reshape(9, CH, EMBED_DIM)
    boq = (params["conv_out_b"] @ wq + params["quant_conv_b"]).reshape(1, EMBED_DIM)

    et = params["codebook"].T                         # (D, K)
    esq = jnp.sum(params["codebook"] ** 2, axis=1).reshape(1, N_EMBED)

    xpad = _flat_pad(x, 0.5)                          # 0.5 == (0 + 1) / 2
    R1 = (H + 2) * W + 2

    def const(shape):
        return pl.BlockSpec(shape, lambda b, _s=shape: (0,) * len(_s))

    # TODO(synk): the exact SCQ internals (temperature, straight-through
    # outputs) are not defined by the reference wrapper; P here is
    # softmax(-||h - e_k||^2) over the synthetic codebook.
    P = pl.pallas_call(
        functools.partial(_encoder_fused_kernel, H=H, W=W,
                          group_size=gs, eps=GN_EPS),
        grid=(B,),
        out_shape=jax.ShapeDtypeStruct((B, HoWo, N_EMBED), jnp.float32),
        in_specs=[
            pl.BlockSpec((None, R1, Cin), lambda b: (b, 0, 0)),
            const((9, Cin, CH)),          # w_in
            const((1, CH)),               # b_in
            const((1, CH)),               # gn1 gamma
            const((1, CH)),               # gn1 beta
            const((CH, CH)),              # gg
            const((9, HoWo, HW)),         # sel2
            const((9, CH, CH)),           # wd
            const((1, CH)),               # bd
            const((1, CH)),               # gn2 gamma
            const((1, CH)),               # gn2 beta
            const((9, HoWo, HoWo)),       # sel3
            const((9, CH, EMBED_DIM)),    # woq
            const((1, EMBED_DIM)),        # boq
            const((EMBED_DIM, N_EMBED)),  # codebook^T
            const((1, N_EMBED)),          # ||e||^2
        ],
        out_specs=pl.BlockSpec((None, HoWo, N_EMBED), lambda b: (b, 0, 0)),
        compiler_params=pltpu.CompilerParams(
            dimension_semantics=("parallel",)),
    )(xpad, w_in, b_in,
      params["gn1_gamma"].reshape(1, CH), params["gn1_beta"].reshape(1, CH), gg,
      sel2, wd, bd,
      params["gn2_gamma"].reshape(1, CH), params["gn2_beta"].reshape(1, CH),
      sel3, woq, boq, et, esq)
    return P                                           # (B, Ho*Wo, K)


# ----------------------------- pure-JAX reference -----------------------------

@jax.jit
def _reference_forward(x_nchw, params):
    x = jnp.transpose(x_nchw, (0, 2, 3, 1)).astype(jnp.float32)
    xq = 2.0 * x - 1.0
    dn = ("NHWC", "HWIO", "NHWC")
    gs = CH // NUM_GROUPS

    def gn_swish(h, gamma, beta):
        B, H, W, C = h.shape
        hg = h.reshape(B, H, W, NUM_GROUPS, gs)
        mean = jnp.mean(hg, axis=(1, 2, 4), keepdims=True)
        var = jnp.mean((hg - mean) ** 2, axis=(1, 2, 4), keepdims=True)
        y = ((hg - mean) / jnp.sqrt(var + GN_EPS)).reshape(B, H, W, C)
        y = y * gamma + beta
        return y * jax.nn.sigmoid(y)

    h = jax.lax.conv_general_dilated(xq, params["conv_in_w"], (1, 1),
                                     ((1, 1), (1, 1)), dimension_numbers=dn)
    h = gn_swish(h + params["conv_in_b"], params["gn1_gamma"], params["gn1_beta"])
    h = jax.lax.conv_general_dilated(h, params["conv_down_w"], (2, 2),
                                     ((1, 1), (1, 1)), dimension_numbers=dn)
    h = gn_swish(h + params["conv_down_b"], params["gn2_gamma"], params["gn2_beta"])
    h = jax.lax.conv_general_dilated(h, params["conv_out_w"], (1, 1),
                                     ((1, 1), (1, 1)), dimension_numbers=dn)
    h = h + params["conv_out_b"]
    wq = params["quant_conv_w"].reshape(Z_CHANNELS, EMBED_DIM)
    h = jnp.einsum("bhwz,ze->bhwe", h, wq) + params["quant_conv_b"]
    B, Ho, Wo, E = h.shape
    hf = h.reshape(B, Ho * Wo, E)
    e = params["codebook"]                                           # (K, E)
    d2 = (jnp.sum(hf * hf, axis=-1, keepdims=True)
          - 2.0 * hf @ e.T + jnp.sum(e * e, axis=-1)[None, None, :])
    return jax.nn.softmax(-d2, axis=-1)


if __name__ == "__main__":
    x = jax.random.uniform(jax.random.PRNGKey(0), (2, 3, 16, 16),
                           dtype=jnp.float32)                        # NCHW, in [0,1]
    params = init_params(jax.random.PRNGKey(1))

    P = jax.block_until_ready(encoder_forward(x, params))
    assert P.shape == (2, 64, N_EMBED), P.shape
    assert bool(jnp.all(jnp.isfinite(P)))
    assert bool(jnp.allclose(jnp.sum(P, axis=-1), 1.0, atol=1e-4))

    P_ref = jax.block_until_ready(_reference_forward(x, params))
    err = float(jnp.max(jnp.abs(P - P_ref)))
    assert err < 5e-4, f"max |P - P_ref| = {err}"

    print("KERNEL_OK")
</pallas_src>

<mosaic_0001>
module attributes {stable_mosaic.version = 11 : i64} {
  func.func @_encoder_fused_kernel(%arg0: i32, %arg1: memref<1x290x3xf32, #tpu.memory_space<vmem>>, %arg2: memref<9x3x32xf32, #tpu.memory_space<vmem>>, %arg3: memref<1x32xf32, #tpu.memory_space<vmem>>, %arg4: memref<1x32xf32, #tpu.memory_space<vmem>>, %arg5: memref<1x32xf32, #tpu.memory_space<vmem>>, %arg6: memref<32x32xf32, #tpu.memory_space<vmem>>, %arg7: memref<9x64x256xf32, #tpu.memory_space<vmem>>, %arg8: memref<9x32x32xf32, #tpu.memory_space<vmem>>, %arg9: memref<1x32xf32, #tpu.memory_space<vmem>>, %arg10: memref<1x32xf32, #tpu.memory_space<vmem>>, %arg11: memref<1x32xf32, #tpu.memory_space<vmem>>, %arg12: memref<9x64x64xf32, #tpu.memory_space<vmem>>, %arg13: memref<9x32x16xf32, #tpu.memory_space<vmem>>, %arg14: memref<1x16xf32, #tpu.memory_space<vmem>>, %arg15: memref<16x128xf32, #tpu.memory_space<vmem>>, %arg16: memref<1x128xf32, #tpu.memory_space<vmem>>, %arg17: memref<1x64x128xf32, #tpu.memory_space<vmem>>) attributes {dimension_semantics = [#tpu.dimension_semantics<parallel>], iteration_bounds = array<i64: 2>, scalar_prefetch = 0 : i64, scratch_operands = 0 : i64, tpu.core_type = #tpu.core_type<tc>, window_params = [{transform_indices = @transform_0, window_bounds = array<i64: 1, 290, 3>}, {pipeline_mode = #tpu.pipeline_mode<synchronous>, transform_indices = @transform_1, window_bounds = array<i64: 9, 3, 32>}, {pipeline_mode = #tpu.pipeline_mode<synchronous>, transform_indices = @transform_2, window_bounds = array<i64: 1, 32>}, {pipeline_mode = #tpu.pipeline_mode<synchronous>, transform_indices = @transform_3, window_bounds = array<i64: 1, 32>}, {pipeline_mode = #tpu.pipeline_mode<synchronous>, transform_indices = @transform_4, window_bounds = array<i64: 1, 32>}, {pipeline_mode = #tpu.pipeline_mode<synchronous>, transform_indices = @transform_5, window_bounds = array<i64: 32, 32>}, {pipeline_mode = #tpu.pipeline_mode<synchronous>, transform_indices = @transform_6, window_bounds = array<i64: 9, 64, 256>}, {pipeline_mode = #tpu.pipeline_mode<synchronous>, transform_indices = @transform_7, window_bounds = array<i64: 9, 32, 32>}, {pipeline_mode = #tpu.pipeline_mode<synchronous>, transform_indices = @transform_8, window_bounds = array<i64: 1, 32>}, {pipeline_mode = #tpu.pipeline_mode<synchronous>, transform_indices = @transform_9, window_bounds = array<i64: 1, 32>}, {pipeline_mode = #tpu.pipeline_mode<synchronous>, transform_indices = @transform_10, window_bounds = array<i64: 1, 32>}, {pipeline_mode = #tpu.pipeline_mode<synchronous>, transform_indices = @transform_11, window_bounds = array<i64: 9, 64, 64>}, {pipeline_mode = #tpu.pipeline_mode<synchronous>, transform_indices = @transform_12, window_bounds = array<i64: 9, 32, 16>}, {pipeline_mode = #tpu.pipeline_mode<synchronous>, transform_indices = @transform_13, window_bounds = array<i64: 1, 16>}, {pipeline_mode = #tpu.pipeline_mode<synchronous>, transform_indices = @transform_14, window_bounds = array<i64: 16, 128>}, {pipeline_mode = #tpu.pipeline_mode<synchronous>, transform_indices = @transform_15, window_bounds = array<i64: 1, 128>}, {transform_indices = @transform_16, window_bounds = array<i64: 1, 64, 128>}]} {
    %0 = tpu.iota {dimensions = array<i32: 0>} : vector<256x1xi32>
    %c16_i32 = arith.constant 16 : i32
    %c0_i32 = arith.constant 0 : i32
    %1 = arith.cmpi eq, %c16_i32, %c0_i32 : i32
    %c1_i32 = arith.constant 1 : i32
    %2 = arith.select %1, %c1_i32, %c16_i32 : i32
    %3 = vector.broadcast %2 : i32 to vector<256x1xi32>
    %4 = arith.remsi %0, %3 : vector<256x1xi32>
    %c0_i32_0 = arith.constant 0 : i32
    %5 = vector.broadcast %c0_i32_0 : i32 to vector<256x1xi32>
    %6 = arith.cmpi ne, %4, %5 : vector<256x1xi32>
    %c0_i32_1 = arith.constant 0 : i32
    %7 = vector.broadcast %c0_i32_1 : i32 to vector<256x1xi32>
    %8 = arith.cmpi slt, %4, %7 : vector<256x1xi32>
    %c0_i32_2 = arith.constant 0 : i32
    %9 = arith.cmpi slt, %2, %c0_i32_2 : i32
    %10 = vector.broadcast %9 : i1 to vector<256x1xi1>
    %11 = vector.broadcast %10 : vector<256x1xi1> to vector<256x1xi1>
    %12 = arith.xori %8, %11 : vector<256x1xi1>
    %13 = arith.andi %12, %6 : vector<256x1xi1>
    %14 = vector.broadcast %2 : i32 to vector<256x1xi32>
    %15 = arith.addi %4, %14 : vector<256x1xi32>
    %16 = arith.select %13, %15, %4 : vector<256x1xi1>, vector<256x1xi32>
    %c0_i32_3 = arith.constant 0 : i32
    %17 = vector.broadcast %c0_i32_3 : i32 to vector<256x1xi32>
    %18 = arith.cmpi eq, %16, %17 : vector<256x1xi32>
    %c15_i32 = arith.constant 15 : i32
    %19 = vector.broadcast %c15_i32 : i32 to vector<256x1xi32>
    %20 = arith.cmpi eq, %16, %19 : vector<256x1xi32>
    %c0 = arith.constant 0 : index
    %c0_4 = arith.constant 0 : index
    %c0_5 = arith.constant 0 : index
    %21 = vector.load %arg1[%c0, %c0_4, %c0_5] : memref<1x290x3xf32, #tpu.memory_space<vmem>>, vector<1x256x3xf32>
    %22 = vector.shape_cast %21 : vector<1x256x3xf32> to vector<256x3xf32>
    %cst = arith.constant 5.000000e-01 : f32
    %23 = vector.shape_cast %18 : vector<256x1xi1> to vector<256x1xi1>
    %24 = vector.broadcast %23 : vector<256x1xi1> to vector<256x3xi1>
    %25 = vector.broadcast %cst : f32 to vector<256x3xf32>
    %26 = arith.select %24, %25, %22 : vector<256x3xi1>, vector<256x3xf32>
    %c0_6 = arith.constant 0 : index
    %c0_7 = arith.constant 0 : index
    %c0_8 = arith.constant 0 : index
    %27 = vector.load %arg2[%c0_6, %c0_7, %c0_8] : memref<9x3x32xf32, #tpu.memory_space<vmem>>, vector<1x3x32xf32>
    %28 = vector.shape_cast %27 : vector<1x3x32xf32> to vector<3x32xf32>
    %cst_9 = arith.constant dense<0.000000e+00> : vector<256x32xf32>
    %29 = tpu.matmul %26, %28, %cst_9 {dimension_numbers = #tpu.dot_dimension_numbers<[1], [0], [0], [1], [0, 0, 1, 1], [], []>} : vector<256x3xf32>, vector<3x32xf32>, vector<256x32xf32> -> vector<256x32xf32>
    %c0_10 = arith.constant 0 : index
    %c1 = arith.constant 1 : index
    %c0_11 = arith.constant 0 : index
    %30 = vector.load %arg1[%c0_10, %c1, %c0_11] : memref<1x290x3xf32, #tpu.memory_space<vmem>>, vector<1x256x3xf32>
    %31 = vector.shape_cast %30 : vector<1x256x3xf32> to vector<256x3xf32>
    %c1_12 = arith.constant 1 : index
    %c0_13 = arith.constant 0 : index
    %c0_14 = arith.constant 0 : index
    %32 = vector.load %arg2[%c1_12, %c0_13, %c0_14] : memref<9x3x32xf32, #tpu.memory_space<vmem>>, vector<1x3x32xf32>
    %33 = vector.shape_cast %32 : vector<1x3x32xf32> to vector<3x32xf32>
    %cst_15 = arith.constant dense<0.000000e+00> : vector<256x32xf32>
    %34 = tpu.matmul %31, %33, %cst_15 {dimension_numbers = #tpu.dot_dimension_numbers<[1], [0], [0], [1], [0, 0, 1, 1], [], []>} : vector<256x3xf32>, vector<3x32xf32>, vector<256x32xf32> -> vector<256x32xf32>
    %35 = arith.addf %29, %34 : vector<256x32xf32>
    %c0_16 = arith.constant 0 : index
    %c2 = arith.constant 2 : index
    %c0_17 = arith.constant 0 : index
    %36 = vector.load %arg1[%c0_16, %c2, %c0_17] : memref<1x290x3xf32, #tpu.memory_space<vmem>>, vector<1x256x3xf32>
    %37 = vector.shape_cast %36 : vector<1x256x3xf32> to vector<256x3xf32>
    %cst_18 = arith.constant 5.000000e-01 : f32
    %38 = vector.shape_cast %20 : vector<256x1xi1> to vector<256x1xi1>
    %39 = vector.broadcast %38 : vector<256x1xi1> to vector<256x3xi1>
    %40 = vector.broadcast %cst_18 : f32 to vector<256x3xf32>
    %41 = arith.select %39, %40, %37 : vector<256x3xi1>, vector<256x3xf32>
    %c2_19 = arith.constant 2 : index
    %c0_20 = arith.constant 0 : index
    %c0_21 = arith.constant 0 : index
    %42 = vector.load %arg2[%c2_19, %c0_20, %c0_21] : memref<9x3x32xf32, #tpu.memory_space<vmem>>, vector<1x3x32xf32>
    %43 = vector.shape_cast %42 : vector<1x3x32xf32> to vector<3x32xf32>
    %cst_22 = arith.constant dense<0.000000e+00> : vector<256x32xf32>
    %44 = tpu.matmul %41, %43, %cst_22 {dimension_numbers = #tpu.dot_dimension_numbers<[1], [0], [0], [1], [0, 0, 1, 1], [], []>} : vector<256x3xf32>, vector<3x32xf32>, vector<256x32xf32> -> vector<256x32xf32>
    %45 = arith.addf %35, %44 : vector<256x32xf32>
    %c0_23 = arith.constant 0 : index
    %c16 = arith.constant 16 : index
    %c0_24 = arith.constant 0 : index
    %46 = vector.load %arg1[%c0_23, %c16, %c0_24] : memref<1x290x3xf32, #tpu.memory_space<vmem>>, vector<1x256x3xf32>
    %47 = vector.shape_cast %46 : vector<1x256x3xf32> to vector<256x3xf32>
    %cst_25 = arith.constant 5.000000e-01 : f32
    %48 = vector.shape_cast %18 : vector<256x1xi1> to vector<256x1xi1>
    %49 = vector.broadcast %48 : vector<256x1xi1> to vector<256x3xi1>
    %50 = vector.broadcast %cst_25 : f32 to vector<256x3xf32>
    %51 = arith.select %49, %50, %47 : vector<256x3xi1>, vector<256x3xf32>
    %c3 = arith.constant 3 : index
    %c0_26 = arith.constant 0 : index
    %c0_27 = arith.constant 0 : index
    %52 = vector.load %arg2[%c3, %c0_26, %c0_27] : memref<9x3x32xf32, #tpu.memory_space<vmem>>, vector<1x3x32xf32>
    %53 = vector.shape_cast %52 : vector<1x3x32xf32> to vector<3x32xf32>
    %cst_28 = arith.constant dense<0.000000e+00> : vector<256x32xf32>
    %54 = tpu.matmul %51, %53, %cst_28 {dimension_numbers = #tpu.dot_dimension_numbers<[1], [0], [0], [1], [0, 0, 1, 1], [], []>} : vector<256x3xf32>, vector<3x32xf32>, vector<256x32xf32> -> vector<256x32xf32>
    %55 = arith.addf %45, %54 : vector<256x32xf32>
    %c0_29 = arith.constant 0 : index
    %c17 = arith.constant 17 : index
    %c0_30 = arith.constant 0 : index
    %56 = vector.load %arg1[%c0_29, %c17, %c0_30] : memref<1x290x3xf32, #tpu.memory_space<vmem>>, vector<1x256x3xf32>
    %57 = vector.shape_cast %56 : vector<1x256x3xf32> to vector<256x3xf32>
    %c4 = arith.constant 4 : index
    %c0_31 = arith.constant 0 : index
    %c0_32 = arith.constant 0 : index
    %58 = vector.load %arg2[%c4, %c0_31, %c0_32] : memref<9x3x32xf32, #tpu.memory_space<vmem>>, vector<1x3x32xf32>
    %59 = vector.shape_cast %58 : vector<1x3x32xf32> to vector<3x32xf32>
    %cst_33 = arith.constant dense<0.000000e+00> : vector<256x32xf32>
    %60 = tpu.matmul %57, %59, %cst_33 {dimension_numbers = #tpu.dot_dimension_numbers<[1], [0], [0], [1], [0, 0, 1, 1], [], []>} : vector<256x3xf32>, vector<3x32xf32>, vector<256x32xf32> -> vector<256x32xf32>
    %61 = arith.addf %55, %60 : vector<256x32xf32>
    %c0_34 = arith.constant 0 : index
    %c18 = arith.constant 18 : index
    %c0_35 = arith.constant 0 : index
    %62 = vector.load %arg1[%c0_34, %c18, %c0_35] : memref<1x290x3xf32, #tpu.memory_space<vmem>>, vector<1x256x3xf32>
    %63 = vector.shape_cast %62 : vector<1x256x3xf32> to vector<256x3xf32>
    %cst_36 = arith.constant 5.000000e-01 : f32
    %64 = vector.shape_cast %20 : vector<256x1xi1> to vector<256x1xi1>
    %65 = vector.broadcast %64 : vector<256x1xi1> to vector<256x3xi1>
    %66 = vector.broadcast %cst_36 : f32 to vector<256x3xf32>
    %67 = arith.select %65, %66, %63 : vector<256x3xi1>, vector<256x3xf32>
    %c5 = arith.constant 5 : index
    %c0_37 = arith.constant 0 : index
    %c0_38 = arith.constant 0 : index
    %68 = vector.load %arg2[%c5, %c0_37, %c0_38] : memref<9x3x32xf32, #tpu.memory_space<vmem>>, vector<1x3x32xf32>
    %69 = vector.shape_cast %68 : vector<1x3x32xf32> to vector<3x32xf32>
    %cst_39 = arith.constant dense<0.000000e+00> : vector<256x32xf32>
    %70 = tpu.matmul %67, %69, %cst_39 {dimension_numbers = #tpu.dot_dimension_numbers<[1], [0], [0], [1], [0, 0, 1, 1], [], []>} : vector<256x3xf32>, vector<3x32xf32>, vector<256x32xf32> -> vector<256x32xf32>
    %71 = arith.addf %61, %70 : vector<256x32xf32>
    %c0_40 = arith.constant 0 : index
    %c32 = arith.constant 32 : index
    %c0_41 = arith.constant 0 : index
    %72 = vector.load %arg1[%c0_40, %c32, %c0_41] : memref<1x290x3xf32, #tpu.memory_space<vmem>>, vector<1x256x3xf32>
    %73 = vector.shape_cast %72 : vector<1x256x3xf32> to vector<256x3xf32>
    %cst_42 = arith.constant 5.000000e-01 : f32
    %74 = vector.shape_cast %18 : vector<256x1xi1> to vector<256x1xi1>
    %75 = vector.broadcast %74 : vector<256x1xi1> to vector<256x3xi1>
    %76 = vector.broadcast %cst_42 : f32 to vector<256x3xf32>
    %77 = arith.select %75, %76, %73 : vector<256x3xi1>, vector<256x3xf32>
    %c6 = arith.constant 6 : index
    %c0_43 = arith.constant 0 : index
    %c0_44 = arith.constant 0 : index
    %78 = vector.load %arg2[%c6, %c0_43, %c0_44] : memref<9x3x32xf32, #tpu.memory_space<vmem>>, vector<1x3x32xf32>
    %79 = vector.shape_cast %78 : vector<1x3x32xf32> to vector<3x32xf32>
    %cst_45 = arith.constant dense<0.000000e+00> : vector<256x32xf32>
    %80 = tpu.matmul %77, %79, %cst_45 {dimension_numbers = #tpu.dot_dimension_numbers<[1], [0], [0], [1], [0, 0, 1, 1], [], []>} : vector<256x3xf32>, vector<3x32xf32>, vector<256x32xf32> -> vector<256x32xf32>
    %81 = arith.addf %71, %80 : vector<256x32xf32>
    %c0_46 = arith.constant 0 : index
    %c33 = arith.constant 33 : index
    %c0_47 = arith.constant 0 : index
    %82 = vector.load %arg1[%c0_46, %c33, %c0_47] : memref<1x290x3xf32, #tpu.memory_space<vmem>>, vector<1x256x3xf32>
    %83 = vector.shape_cast %82 : vector<1x256x3xf32> to vector<256x3xf32>
    %c7 = arith.constant 7 : index
    %c0_48 = arith.constant 0 : index
    %c0_49 = arith.constant 0 : index
    %84 = vector.load %arg2[%c7, %c0_48, %c0_49] : memref<9x3x32xf32, #tpu.memory_space<vmem>>, vector<1x3x32xf32>
    %85 = vector.shape_cast %84 : vector<1x3x32xf32> to vector<3x32xf32>
    %cst_50 = arith.constant dense<0.000000e+00> : vector<256x32xf32>
    %86 = tpu.matmul %83, %85, %cst_50 {dimension_numbers = #tpu.dot_dimension_numbers<[1], [0], [0], [1], [0, 0, 1, 1], [], []>} : vector<256x3xf32>, vector<3x32xf32>, vector<256x32xf32> -> vector<256x32xf32>
    %87 = arith.addf %81, %86 : vector<256x32xf32>
    %c0_51 = arith.constant 0 : index
    %c34 = arith.constant 34 : index
    %c0_52 = arith.constant 0 : index
    %88 = vector.load %arg1[%c0_51, %c34, %c0_52] : memref<1x290x3xf32, #tpu.memory_space<vmem>>, vector<1x256x3xf32>
    %89 = vector.shape_cast %88 : vector<1x256x3xf32> to vector<256x3xf32>
    %cst_53 = arith.constant 5.000000e-01 : f32
    %90 = vector.shape_cast %20 : vector<256x1xi1> to vector<256x1xi1>
    %91 = vector.broadcast %90 : vector<256x1xi1> to vector<256x3xi1>
    %92 = vector.broadcast %cst_53 : f32 to vector<256x3xf32>
    %93 = arith.select %91, %92, %89 : vector<256x3xi1>, vector<256x3xf32>
    %c8 = arith.constant 8 : index
    %c0_54 = arith.constant 0 : index
    %c0_55 = arith.constant 0 : index
    %94 = vector.load %arg2[%c8, %c0_54, %c0_55] : memref<9x3x32xf32, #tpu.memory_space<vmem>>, vector<1x3x32xf32>
    %95 = vector.shape_cast %94 : vector<1x3x32xf32> to vector<3x32xf32>
    %cst_56 = arith.constant dense<0.000000e+00> : vector<256x32xf32>
    %96 = tpu.matmul %93, %95, %cst_56 {dimension_numbers = #tpu.dot_dimension_numbers<[1], [0], [0], [1], [0, 0, 1, 1], [], []>} : vector<256x3xf32>, vector<3x32xf32>, vector<256x32xf32> -> vector<256x32xf32>
    %97 = arith.addf %87, %96 : vector<256x32xf32>
    %c0_57 = arith.constant 0 : index
    %c0_58 = arith.constant 0 : index
    %98 = vector.load %arg3[%c0_57, %c0_58] : memref<1x32xf32, #tpu.memory_space<vmem>>, vector<1x32xf32>
    %99 = vector.broadcast %98 : vector<1x32xf32> to vector<256x32xf32>
    %100 = arith.addf %97, %99 : vector<256x32xf32>
    %c0_59 = arith.constant 0 : index
    %c0_60 = arith.constant 0 : index
    %101 = vector.load %arg4[%c0_59, %c0_60] : memref<1x32xf32, #tpu.memory_space<vmem>>, vector<1x32xf32>
    %c0_61 = arith.constant 0 : index
    %c0_62 = arith.constant 0 : index
    %102 = vector.load %arg5[%c0_61, %c0_62] : memref<1x32xf32, #tpu.memory_space<vmem>>, vector<1x32xf32>
    %c0_63 = arith.constant 0 : index
    %c0_64 = arith.constant 0 : index
    %103 = vector.load %arg6[%c0_63, %c0_64] : memref<32x32xf32, #tpu.memory_space<vmem>>, vector<32x32xf32>
    %cst_65 = arith.constant dense<0.000000e+00> : vector<32xf32>
    %104 = vector.multi_reduction <add>, %100, %cst_65 [0] : vector<256x32xf32> to vector<32xf32>
    %105 = vector.shape_cast %104 : vector<32xf32> to vector<1x32xf32>
    %cst_66 = arith.constant dense<0.000000e+00> : vector<1x32xf32>
    %106 = tpu.matmul %105, %103, %cst_66 {dimension_numbers = #tpu.dot_dimension_numbers<[1], [0], [0], [1], [0, 0, 1, 1], [], []>} : vector<1x32xf32>, vector<32x32xf32>, vector<1x32xf32> -> vector<1x32xf32>
    %cst_67 = arith.constant 1.024000e+03 : f32
    %107 = vector.broadcast %cst_67 : f32 to vector<1x32xf32>
    %108 = arith.divf %106, %107 : vector<1x32xf32>
    %109 = vector.broadcast %108 : vector<1x32xf32> to vector<256x32xf32>
    %110 = arith.subf %100, %109 : vector<256x32xf32>
    %111 = arith.mulf %110, %110 : vector<256x32xf32>
    %cst_68 = arith.constant dense<0.000000e+00> : vector<32xf32>
    %112 = vector.multi_reduction <add>, %111, %cst_68 [0] : vector<256x32xf32> to vector<32xf32>
    %113 = vector.shape_cast %112 : vector<32xf32> to vector<1x32xf32>
    %cst_69 = arith.constant dense<0.000000e+00> : vector<1x32xf32>
    %114 = tpu.matmul %113, %103, %cst_69 {dimension_numbers = #tpu.dot_dimension_numbers<[1], [0], [0], [1], [0, 0, 1, 1], [], []>} : vector<1x32xf32>, vector<32x32xf32>, vector<1x32xf32> -> vector<1x32xf32>
    %cst_70 = arith.constant 1.024000e+03 : f32
    %115 = vector.broadcast %cst_70 : f32 to vector<1x32xf32>
    %116 = arith.divf %114, %115 : vector<1x32xf32>
    %cst_71 = arith.constant 9.99999997E-7 : f32
    %117 = vector.broadcast %cst_71 : f32 to vector<1x32xf32>
    %118 = arith.addf %116, %117 : vector<1x32xf32>
    %119 = math.rsqrt %118 : vector<1x32xf32>
    %120 = vector.broadcast %119 : vector<1x32xf32> to vector<256x32xf32>
    %121 = arith.mulf %110, %120 : vector<256x32xf32>
    %122 = vector.broadcast %101 : vector<1x32xf32> to vector<256x32xf32>
    %123 = arith.mulf %121, %122 : vector<256x32xf32>
    %124 = vector.broadcast %102 : vector<1x32xf32> to vector<256x32xf32>
    %125 = arith.addf %123, %124 : vector<256x32xf32>
    %126 = arith.negf %125 : vector<256x32xf32>
    %127 = math.exp %126 : vector<256x32xf32>
    %cst_72 = arith.constant 1.000000e+00 : f32
    %128 = vector.broadcast %cst_72 : f32 to vector<256x32xf32>
    %129 = arith.addf %128, %127 : vector<256x32xf32>
    %130 = arith.divf %128, %129 : vector<256x32xf32>
    %131 = arith.mulf %125, %130 : vector<256x32xf32>
    %c0_73 = arith.constant 0 : index
    %c0_74 = arith.constant 0 : index
    %c0_75 = arith.constant 0 : index
    %132 = vector.load %arg7[%c0_73, %c0_74, %c0_75] : memref<9x64x256xf32, #tpu.memory_space<vmem>>, vector<1x64x256xf32>
    %133 = vector.shape_cast %132 : vector<1x64x256xf32> to vector<64x256xf32>
    %cst_76 = arith.constant dense<0.000000e+00> : vector<64x32xf32>
    %134 = tpu.matmul %133, %131, %cst_76 {dimension_numbers = #tpu.dot_dimension_numbers<[1], [0], [0], [1], [0, 0, 1, 1], [], []>} : vector<64x256xf32>, vector<256x32xf32>, vector<64x32xf32> -> vector<64x32xf32>
    %c0_77 = arith.constant 0 : index
    %c0_78 = arith.constant 0 : index
    %c0_79 = arith.constant 0 : index
    %135 = vector.load %arg8[%c0_77, %c0_78, %c0_79] : memref<9x32x32xf32, #tpu.memory_space<vmem>>, vector<1x32x32xf32>
    %136 = vector.shape_cast %135 : vector<1x32x32xf32> to vector<32x32xf32>
    %cst_80 = arith.constant dense<0.000000e+00> : vector<64x32xf32>
    %137 = tpu.matmul %134, %136, %cst_80 {dimension_numbers = #tpu.dot_dimension_numbers<[1], [0], [0], [1], [0, 0, 1, 1], [], []>} : vector<64x32xf32>, vector<32x32xf32>, vector<64x32xf32> -> vector<64x32xf32>
    %c1_81 = arith.constant 1 : index
    %c0_82 = arith.constant 0 : index
    %c0_83 = arith.constant 0 : index
    %138 = vector.load %arg7[%c1_81, %c0_82, %c0_83] : memref<9x64x256xf32, #tpu.memory_space<vmem>>, vector<1x64x256xf32>
    %139 = vector.shape_cast %138 : vector<1x64x256xf32> to vector<64x256xf32>
    %cst_84 = arith.constant dense<0.000000e+00> : vector<64x32xf32>
    %140 = tpu.matmul %139, %131, %cst_84 {dimension_numbers = #tpu.dot_dimension_numbers<[1], [0], [0], [1], [0, 0, 1, 1], [], []>} : vector<64x256xf32>, vector<256x32xf32>, vector<64x32xf32> -> vector<64x32xf32>
    %c1_85 = arith.constant 1 : index
    %c0_86 = arith.constant 0 : index
    %c0_87 = arith.constant 0 : index
    %141 = vector.load %arg8[%c1_85, %c0_86, %c0_87] : memref<9x32x32xf32, #tpu.memory_space<vmem>>, vector<1x32x32xf32>
    %142 = vector.shape_cast %141 : vector<1x32x32xf32> to vector<32x32xf32>
    %cst_88 = arith.constant dense<0.000000e+00> : vector<64x32xf32>
    %143 = tpu.matmul %140, %142, %cst_88 {dimension_numbers = #tpu.dot_dimension_numbers<[1], [0], [0], [1], [0, 0, 1, 1], [], []>} : vector<64x32xf32>, vector<32x32xf32>, vector<64x32xf32> -> vector<64x32xf32>
    %144 = arith.addf %137, %143 : vector<64x32xf32>
    %c2_89 = arith.constant 2 : index
    %c0_90 = arith.constant 0 : index
    %c0_91 = arith.constant 0 : index
    %145 = vector.load %arg7[%c2_89, %c0_90, %c0_91] : memref<9x64x256xf32, #tpu.memory_space<vmem>>, vector<1x64x256xf32>
    %146 = vector.shape_cast %145 : vector<1x64x256xf32> to vector<64x256xf32>
    %cst_92 = arith.constant dense<0.000000e+00> : vector<64x32xf32>
    %147 = tpu.matmul %146, %131, %cst_92 {dimension_numbers = #tpu.dot_dimension_numbers<[1], [0], [0], [1], [0, 0, 1, 1], [], []>} : vector<64x256xf32>, vector<256x32xf32>, vector<64x32xf32> -> vector<64x32xf32>
    %c2_93 = arith.constant 2 : index
    %c0_94 = arith.constant 0 : index
    %c0_95 = arith.constant 0 : index
    %148 = vector.load %arg8[%c2_93, %c0_94, %c0_95] : memref<9x32x32xf32, #tpu.memory_space<vmem>>, vector<1x32x32xf32>
    %149 = vector.shape_cast %148 : vector<1x32x32xf32> to vector<32x32xf32>
    %cst_96 = arith.constant dense<0.000000e+00> : vector<64x32xf32>
    %150 = tpu.matmul %147, %149, %cst_96 {dimension_numbers = #tpu.dot_dimension_numbers<[1], [0], [0], [1], [0, 0, 1, 1], [], []>} : vector<64x32xf32>, vector<32x32xf32>, vector<64x32xf32> -> vector<64x32xf32>
    %151 = arith.addf %144, %150 : vector<64x32xf32>
    %c3_97 = arith.constant 3 : index
    %c0_98 = arith.constant 0 : index
    %c0_99 = arith.constant 0 : index
    %152 = vector.load %arg7[%c3_97, %c0_98, %c0_99] : memref<9x64x256xf32, #tpu.memory_space<vmem>>, vector<1x64x256xf32>
    %153 = vector.shape_cast %152 : vector<1x64x256xf32> to vector<64x256xf32>
    %cst_100 = arith.constant dense<0.000000e+00> : vector<64x32xf32>
    %154 = tpu.matmul %153, %131, %cst_100 {dimension_numbers = #tpu.dot_dimension_numbers<[1], [0], [0], [1], [0, 0, 1, 1], [], []>} : vector<64x256xf32>, vector<256x32xf32>, vector<64x32xf32> -> vector<64x32xf32>
    %c3_101 = arith.constant 3 : index
    %c0_102 = arith.constant 0 : index
    %c0_103 = arith.constant 0 : index
    %155 = vector.load %arg8[%c3_101, %c0_102, %c0_103] : memref<9x32x32xf32, #tpu.memory_space<vmem>>, vector<1x32x32xf32>
    %156 = vector.shape_cast %155 : vector<1x32x32xf32> to vector<32x32xf32>
    %cst_104 = arith.constant dense<0.000000e+00> : vector<64x32xf32>
    %157 = tpu.matmul %154, %156, %cst_104 {dimension_numbers = #tpu.dot_dimension_numbers<[1], [0], [0], [1], [0, 0, 1, 1], [], []>} : vector<64x32xf32>, vector<32x32xf32>, vector<64x32xf32> -> vector<64x32xf32>
    %158 = arith.addf %151, %157 : vector<64x32xf32>
    %c4_105 = arith.constant 4 : index
    %c0_106 = arith.constant 0 : index
    %c0_107 = arith.constant 0 : index
    %159 = vector.load %arg7[%c4_105, %c0_106, %c0_107] : memref<9x64x256xf32, #tpu.memory_space<vmem>>, vector<1x64x256xf32>
    %160 = vector.shape_cast %159 : vector<1x64x256xf32> to vector<64x256xf32>
    %cst_108 = arith.constant dense<0.000000e+00> : vector<64x32xf32>
    %161 = tpu.matmul %160, %131, %cst_108 {dimension_numbers = #tpu.dot_dimension_numbers<[1], [0], [0], [1], [0, 0, 1, 1], [], []>} : vector<64x256xf32>, vector<256x32xf32>, vector<64x32xf32> -> vector<64x32xf32>
    %c4_109 = arith.constant 4 : index
    %c0_110 = arith.constant 0 : index
    %c0_111 = arith.constant 0 : index
    %162 = vector.load %arg8[%c4_109, %c0_110, %c0_111] : memref<9x32x32xf32, #tpu.memory_space<vmem>>, vector<1x32x32xf32>
    %163 = vector.shape_cast %162 : vector<1x32x32xf32> to vector<32x32xf32>
    %cst_112 = arith.constant dense<0.000000e+00> : vector<64x32xf32>
    %164 = tpu.matmul %161, %163, %cst_112 {dimension_numbers = #tpu.dot_dimension_numbers<[1], [0], [0], [1], [0, 0, 1, 1], [], []>} : vector<64x32xf32>, vector<32x32xf32>, vector<64x32xf32> -> vector<64x32xf32>
    %165 = arith.addf %158, %164 : vector<64x32xf32>
    %c5_113 = arith.constant 5 : index
    %c0_114 = arith.constant 0 : index
    %c0_115 = arith.constant 0 : index
    %166 = vector.load %arg7[%c5_113, %c0_114, %c0_115] : memref<9x64x256xf32, #tpu.memory_space<vmem>>, vector<1x64x256xf32>
    %167 = vector.shape_cast %166 : vector<1x64x256xf32> to vector<64x256xf32>
    %cst_116 = arith.constant dense<0.000000e+00> : vector<64x32xf32>
    %168 = tpu.matmul %167, %131, %cst_116 {dimension_numbers = #tpu.dot_dimension_numbers<[1], [0], [0], [1], [0, 0, 1, 1], [], []>} : vector<64x256xf32>, vector<256x32xf32>, vector<64x32xf32> -> vector<64x32xf32>
    %c5_117 = arith.constant 5 : index
    %c0_118 = arith.constant 0 : index
    %c0_119 = arith.constant 0 : index
    %169 = vector.load %arg8[%c5_117, %c0_118, %c0_119] : memref<9x32x32xf32, #tpu.memory_space<vmem>>, vector<1x32x32xf32>
    %170 = vector.shape_cast %169 : vector<1x32x32xf32> to vector<32x32xf32>
    %cst_120 = arith.constant dense<0.000000e+00> : vector<64x32xf32>
    %171 = tpu.matmul %168, %170, %cst_120 {dimension_numbers = #tpu.dot_dimension_numbers<[1], [0], [0], [1], [0, 0, 1, 1], [], []>} : vector<64x32xf32>, vector<32x32xf32>, vector<64x32xf32> -> vector<64x32xf32>
    %172 = arith.addf %165, %171 : vector<64x32xf32>
    %c6_121 = arith.constant 6 : index
    %c0_122 = arith.constant 0 : index
    %c0_123 = arith.constant 0 : index
    %173 = vector.load %arg7[%c6_121, %c0_122, %c0_123] : memref<9x64x256xf32, #tpu.memory_space<vmem>>, vector<1x64x256xf32>
    %174 = vector.shape_cast %173 : vector<1x64x256xf32> to vector<64x256xf32>
    %cst_124 = arith.constant dense<0.000000e+00> : vector<64x32xf32>
    %175 = tpu.matmul %174, %131, %cst_124 {dimension_numbers = #tpu.dot_dimension_numbers<[1], [0], [0], [1], [0, 0, 1, 1], [], []>} : vector<64x256xf32>, vector<256x32xf32>, vector<64x32xf32> -> vector<64x32xf32>
    %c6_125 = arith.constant 6 : index
    %c0_126 = arith.constant 0 : index
    %c0_127 = arith.constant 0 : index
    %176 = vector.load %arg8[%c6_125, %c0_126, %c0_127] : memref<9x32x32xf32, #tpu.memory_space<vmem>>, vector<1x32x32xf32>
    %177 = vector.shape_cast %176 : vector<1x32x32xf32> to vector<32x32xf32>
    %cst_128 = arith.constant dense<0.000000e+00> : vector<64x32xf32>
    %178 = tpu.matmul %175, %177, %cst_128 {dimension_numbers = #tpu.dot_dimension_numbers<[1], [0], [0], [1], [0, 0, 1, 1], [], []>} : vector<64x32xf32>, vector<32x32xf32>, vector<64x32xf32> -> vector<64x32xf32>
    %179 = arith.addf %172, %178 : vector<64x32xf32>
    %c7_129 = arith.constant 7 : index
    %c0_130 = arith.constant 0 : index
    %c0_131 = arith.constant 0 : index
    %180 = vector.load %arg7[%c7_129, %c0_130, %c0_131] : memref<9x64x256xf32, #tpu.memory_space<vmem>>, vector<1x64x256xf32>
    %181 = vector.shape_cast %180 : vector<1x64x256xf32> to vector<64x256xf32>
    %cst_132 = arith.constant dense<0.000000e+00> : vector<64x32xf32>
    %182 = tpu.matmul %181, %131, %cst_132 {dimension_numbers = #tpu.dot_dimension_numbers<[1], [0], [0], [1], [0, 0, 1, 1], [], []>} : vector<64x256xf32>, vector<256x32xf32>, vector<64x32xf32> -> vector<64x32xf32>
    %c7_133 = arith.constant 7 : index
    %c0_134 = arith.constant 0 : index
    %c0_135 = arith.constant 0 : index
    %183 = vector.load %arg8[%c7_133, %c0_134, %c0_135] : memref<9x32x32xf32, #tpu.memory_space<vmem>>, vector<1x32x32xf32>
    %184 = vector.shape_cast %183 : vector<1x32x32xf32> to vector<32x32xf32>
    %cst_136 = arith.constant dense<0.000000e+00> : vector<64x32xf32>
    %185 = tpu.matmul %182, %184, %cst_136 {dimension_numbers = #tpu.dot_dimension_numbers<[1], [0], [0], [1], [0, 0, 1, 1], [], []>} : vector<64x32xf32>, vector<32x32xf32>, vector<64x32xf32> -> vector<64x32xf32>
    %186 = arith.addf %179, %185 : vector<64x32xf32>
    %c8_137 = arith.constant 8 : index
    %c0_138 = arith.constant 0 : index
    %c0_139 = arith.constant 0 : index
    %187 = vector.load %arg7[%c8_137, %c0_138, %c0_139] : memref<9x64x256xf32, #tpu.memory_space<vmem>>, vector<1x64x256xf32>
    %188 = vector.shape_cast %187 : vector<1x64x256xf32> to vector<64x256xf32>
    %cst_140 = arith.constant dense<0.000000e+00> : vector<64x32xf32>
    %189 = tpu.matmul %188, %131, %cst_140 {dimension_numbers = #tpu.dot_dimension_numbers<[1], [0], [0], [1], [0, 0, 1, 1], [], []>} : vector<64x256xf32>, vector<256x32xf32>, vector<64x32xf32> -> vector<64x32xf32>
    %c8_141 = arith.constant 8 : index
    %c0_142 = arith.constant 0 : index
    %c0_143 = arith.constant 0 : index
    %190 = vector.load %arg8[%c8_141, %c0_142, %c0_143] : memref<9x32x32xf32, #tpu.memory_space<vmem>>, vector<1x32x32xf32>
    %191 = vector.shape_cast %190 : vector<1x32x32xf32> to vector<32x32xf32>
    %cst_144 = arith.constant dense<0.000000e+00> : vector<64x32xf32>
    %192 = tpu.matmul %189, %191, %cst_144 {dimension_numbers = #tpu.dot_dimension_numbers<[1], [0], [0], [1], [0, 0, 1, 1], [], []>} : vector<64x32xf32>, vector<32x32xf32>, vector<64x32xf32> -> vector<64x32xf32>
    %193 = arith.addf %186, %192 : vector<64x32xf32>
    %c0_145 = arith.constant 0 : index
    %c0_146 = arith.constant 0 : index
    %194 = vector.load %arg9[%c0_145, %c0_146] : memref<1x32xf32, #tpu.memory_space<vmem>>, vector<1x32xf32>
    %195 = vector.broadcast %194 : vector<1x32xf32> to vector<64x32xf32>
    %196 = arith.addf %193, %195 : vector<64x32xf32>
    %c0_147 = arith.constant 0 : index
    %c0_148 = arith.constant 0 : index
    %197 = vector.load %arg10[%c0_147, %c0_148] : memref<1x32xf32, #tpu.memory_space<vmem>>, vector<1x32xf32>
    %c0_149 = arith.constant 0 : index
    %c0_150 = arith.constant 0 : index
    %198 = vector.load %arg11[%c0_149, %c0_150] : memref<1x32xf32, #tpu.memory_space<vmem>>, vector<1x32xf32>
    %c0_151 = arith.constant 0 : index
    %c0_152 = arith.constant 0 : index
    %199 = vector.load %arg6[%c0_151, %c0_152] : memref<32x32xf32, #tpu.memory_space<vmem>>, vector<32x32xf32>
    %cst_153 = arith.constant dense<0.000000e+00> : vector<32xf32>
    %200 = vector.multi_reduction <add>, %196, %cst_153 [0] : vector<64x32xf32> to vector<32xf32>
    %201 = vector.shape_cast %200 : vector<32xf32> to vector<1x32xf32>
    %cst_154 = arith.constant dense<0.000000e+00> : vector<1x32xf32>
    %202 = tpu.matmul %201, %199, %cst_154 {dimension_numbers = #tpu.dot_dimension_numbers<[1], [0], [0], [1], [0, 0, 1, 1], [], []>} : vector<1x32xf32>, vector<32x32xf32>, vector<1x32xf32> -> vector<1x32xf32>
    %cst_155 = arith.constant 2.560000e+02 : f32
    %203 = vector.broadcast %cst_155 : f32 to vector<1x32xf32>
    %204 = arith.divf %202, %203 : vector<1x32xf32>
    %205 = vector.broadcast %204 : vector<1x32xf32> to vector<64x32xf32>
    %206 = arith.subf %196, %205 : vector<64x32xf32>
    %207 = arith.mulf %206, %206 : vector<64x32xf32>
    %cst_156 = arith.constant dense<0.000000e+00> : vector<32xf32>
    %208 = vector.multi_reduction <add>, %207, %cst_156 [0] : vector<64x32xf32> to vector<32xf32>
    %209 = vector.shape_cast %208 : vector<32xf32> to vector<1x32xf32>
    %cst_157 = arith.constant dense<0.000000e+00> : vector<1x32xf32>
    %210 = tpu.matmul %209, %199, %cst_157 {dimension_numbers = #tpu.dot_dimension_numbers<[1], [0], [0], [1], [0, 0, 1, 1], [], []>} : vector<1x32xf32>, vector<32x32xf32>, vector<1x32xf32> -> vector<1x32xf32>
    %cst_158 = arith.constant 2.560000e+02 : f32
    %211 = vector.broadcast %cst_158 : f32 to vector<1x32xf32>
    %212 = arith.divf %210, %211 : vector<1x32xf32>
    %cst_159 = arith.constant 9.99999997E-7 : f32
    %213 = vector.broadcast %cst_159 : f32 to vector<1x32xf32>
    %214 = arith.addf %212, %213 : vector<1x32xf32>
    %215 = math.rsqrt %214 : vector<1x32xf32>
    %216 = vector.broadcast %215 : vector<1x32xf32> to vector<64x32xf32>
    %217 = arith.mulf %206, %216 : vector<64x32xf32>
    %218 = vector.broadcast %197 : vector<1x32xf32> to vector<64x32xf32>
    %219 = arith.mulf %217, %218 : vector<64x32xf32>
    %220 = vector.broadcast %198 : vector<1x32xf32> to vector<64x32xf32>
    %221 = arith.addf %219, %220 : vector<64x32xf32>
    %222 = arith.negf %221 : vector<64x32xf32>
    %223 = math.exp %222 : vector<64x32xf32>
    %cst_160 = arith.constant 1.000000e+00 : f32
    %224 = vector.broadcast %cst_160 : f32 to vector<64x32xf32>
    %225 = arith.addf %224, %223 : vector<64x32xf32>
    %226 = arith.divf %224, %225 : vector<64x32xf32>
    %227 = arith.mulf %221, %226 : vector<64x32xf32>
    %c0_161 = arith.constant 0 : index
    %c0_162 = arith.constant 0 : index
    %c0_163 = arith.constant 0 : index
    %228 = vector.load %arg12[%c0_161, %c0_162, %c0_163] : memref<9x64x64xf32, #tpu.memory_space<vmem>>, vector<1x64x64xf32>
    %229 = vector.shape_cast %228 : vector<1x64x64xf32> to vector<64x64xf32>
    %cst_164 = arith.constant dense<0.000000e+00> : vector<64x32xf32>
    %230 = tpu.matmul %229, %227, %cst_164 {dimension_numbers = #tpu.dot_dimension_numbers<[1], [0], [0], [1], [0, 0, 1, 1], [], []>} : vector<64x64xf32>, vector<64x32xf32>, vector<64x32xf32> -> vector<64x32xf32>
    %c0_165 = arith.constant 0 : index
    %c0_166 = arith.constant 0 : index
    %c0_167 = arith.constant 0 : index
    %231 = vector.load %arg13[%c0_165, %c0_166, %c0_167] : memref<9x32x16xf32, #tpu.memory_space<vmem>>, vector<1x32x16xf32>
    %232 = vector.shape_cast %231 : vector<1x32x16xf32> to vector<32x16xf32>
    %cst_168 = arith.constant dense<0.000000e+00> : vector<64x16xf32>
    %233 = tpu.matmul %230, %232, %cst_168 {dimension_numbers = #tpu.dot_dimension_numbers<[1], [0], [0], [1], [0, 0, 1, 1], [], []>} : vector<64x32xf32>, vector<32x16xf32>, vector<64x16xf32> -> vector<64x16xf32>
    %c1_169 = arith.constant 1 : index
    %c0_170 = arith.constant 0 : index
    %c0_171 = arith.constant 0 : index
    %234 = vector.load %arg12[%c1_169, %c0_170, %c0_171] : memref<9x64x64xf32, #tpu.memory_space<vmem>>, vector<1x64x64xf32>
    %235 = vector.shape_cast %234 : vector<1x64x64xf32> to vector<64x64xf32>
    %cst_172 = arith.constant dense<0.000000e+00> : vector<64x32xf32>
    %236 = tpu.matmul %235, %227, %cst_172 {dimension_numbers = #tpu.dot_dimension_numbers<[1], [0], [0], [1], [0, 0, 1, 1], [], []>} : vector<64x64xf32>, vector<64x32xf32>, vector<64x32xf32> -> vector<64x32xf32>
    %c1_173 = arith.constant 1 : index
    %c0_174 = arith.constant 0 : index
    %c0_175 = arith.constant 0 : index
    %237 = vector.load %arg13[%c1_173, %c0_174, %c0_175] : memref<9x32x16xf32, #tpu.memory_space<vmem>>, vector<1x32x16xf32>
    %238 = vector.shape_cast %237 : vector<1x32x16xf32> to vector<32x16xf32>
    %cst_176 = arith.constant dense<0.000000e+00> : vector<64x16xf32>
    %239 = tpu.matmul %236, %238, %cst_176 {dimension_numbers = #tpu.dot_dimension_numbers<[1], [0], [0], [1], [0, 0, 1, 1], [], []>} : vector<64x32xf32>, vector<32x16xf32>, vector<64x16xf32> -> vector<64x16xf32>
    %240 = arith.addf %233, %239 : vector<64x16xf32>
    %c2_177 = arith.constant 2 : index
    %c0_178 = arith.constant 0 : index
    %c0_179 = arith.constant 0 : index
    %241 = vector.load %arg12[%c2_177, %c0_178, %c0_179] : memref<9x64x64xf32, #tpu.memory_space<vmem>>, vector<1x64x64xf32>
    %242 = vector.shape_cast %241 : vector<1x64x64xf32> to vector<64x64xf32>
    %cst_180 = arith.constant dense<0.000000e+00> : vector<64x32xf32>
    %243 = tpu.matmul %242, %227, %cst_180 {dimension_numbers = #tpu.dot_dimension_numbers<[1], [0], [0], [1], [0, 0, 1, 1], [], []>} : vector<64x64xf32>, vector<64x32xf32>, vector<64x32xf32> -> vector<64x32xf32>
    %c2_181 = arith.constant 2 : index
    %c0_182 = arith.constant 0 : index
    %c0_183 = arith.constant 0 : index
    %244 = vector.load %arg13[%c2_181, %c0_182, %c0_183] : memref<9x32x16xf32, #tpu.memory_space<vmem>>, vector<1x32x16xf32>
    %245 = vector.shape_cast %244 : vector<1x32x16xf32> to vector<32x16xf32>
    %cst_184 = arith.constant dense<0.000000e+00> : vector<64x16xf32>
    %246 = tpu.matmul %243, %245, %cst_184 {dimension_numbers = #tpu.dot_dimension_numbers<[1], [0], [0], [1], [0, 0, 1, 1], [], []>} : vector<64x32xf32>, vector<32x16xf32>, vector<64x16xf32> -> vector<64x16xf32>
    %247 = arith.addf %240, %246 : vector<64x16xf32>
    %c3_185 = arith.constant 3 : index
    %c0_186 = arith.constant 0 : index
    %c0_187 = arith.constant 0 : index
    %248 = vector.load %arg12[%c3_185, %c0_186, %c0_187] : memref<9x64x64xf32, #tpu.memory_space<vmem>>, vector<1x64x64xf32>
    %249 = vector.shape_cast %248 : vector<1x64x64xf32> to vector<64x64xf32>
    %cst_188 = arith.constant dense<0.000000e+00> : vector<64x32xf32>
    %250 = tpu.matmul %249, %227, %cst_188 {dimension_numbers = #tpu.dot_dimension_numbers<[1], [0], [0], [1], [0, 0, 1, 1], [], []>} : vector<64x64xf32>, vector<64x32xf32>, vector<64x32xf32> -> vector<64x32xf32>
    %c3_189 = arith.constant 3 : index
    %c0_190 = arith.constant 0 : index
    %c0_191 = arith.constant 0 : index
    %251 = vector.load %arg13[%c3_189, %c0_190, %c0_191] : memref<9x32x16xf32, #tpu.memory_space<vmem>>, vector<1x32x16xf32>
    %252 = vector.shape_cast %251 : vector<1x32x16xf32> to vector<32x16xf32>
    %cst_192 = arith.constant dense<0.000000e+00> : vector<64x16xf32>
    %253 = tpu.matmul %250, %252, %cst_192 {dimension_numbers = #tpu.dot_dimension_numbers<[1], [0], [0], [1], [0, 0, 1, 1], [], []>} : vector<64x32xf32>, vector<32x16xf32>, vector<64x16xf32> -> vector<64x16xf32>
    %254 = arith.addf %247, %253 : vector<64x16xf32>
    %c4_193 = arith.constant 4 : index
    %c0_194 = arith.constant 0 : index
    %c0_195 = arith.constant 0 : index
    %255 = vector.load %arg12[%c4_193, %c0_194, %c0_195] : memref<9x64x64xf32, #tpu.memory_space<vmem>>, vector<1x64x64xf32>
    %256 = vector.shape_cast %255 : vector<1x64x64xf32> to vector<64x64xf32>
    %cst_196 = arith.constant dense<0.000000e+00> : vector<64x32xf32>
    %257 = tpu.matmul %256, %227, %cst_196 {dimension_numbers = #tpu.dot_dimension_numbers<[1], [0], [0], [1], [0, 0, 1, 1], [], []>} : vector<64x64xf32>, vector<64x32xf32>, vector<64x32xf32> -> vector<64x32xf32>
    %c4_197 = arith.constant 4 : index
    %c0_198 = arith.constant 0 : index
    %c0_199 = arith.constant 0 : index
    %258 = vector.load %arg13[%c4_197, %c0_198, %c0_199] : memref<9x32x16xf32, #tpu.memory_space<vmem>>, vector<1x32x16xf32>
    %259 = vector.shape_cast %258 : vector<1x32x16xf32> to vector<32x16xf32>
    %cst_200 = arith.constant dense<0.000000e+00> : vector<64x16xf32>
    %260 = tpu.matmul %257, %259, %cst_200 {dimension_numbers = #tpu.dot_dimension_numbers<[1], [0], [0], [1], [0, 0, 1, 1], [], []>} : vector<64x32xf32>, vector<32x16xf32>, vector<64x16xf32> -> vector<64x16xf32>
    %261 = arith.addf %254, %260 : vector<64x16xf32>
    %c5_201 = arith.constant 5 : index
    %c0_202 = arith.constant 0 : index
    %c0_203 = arith.constant 0 : index
    %262 = vector.load %arg12[%c5_201, %c0_202, %c0_203] : memref<9x64x64xf32, #tpu.memory_space<vmem>>, vector<1x64x64xf32>
    %263 = vector.shape_cast %262 : vector<1x64x64xf32> to vector<64x64xf32>
    %cst_204 = arith.constant dense<0.000000e+00> : vector<64x32xf32>
    %264 = tpu.matmul %263, %227, %cst_204 {dimension_numbers = #tpu.dot_dimension_numbers<[1], [0], [0], [1], [0, 0, 1, 1], [], []>} : vector<64x64xf32>, vector<64x32xf32>, vector<64x32xf32> -> vector<64x32xf32>
    %c5_205 = arith.constant 5 : index
    %c0_206 = arith.constant 0 : index
    %c0_207 = arith.constant 0 : index
    %265 = vector.load %arg13[%c5_205, %c0_206, %c0_207] : memref<9x32x16xf32, #tpu.memory_space<vmem>>, vector<1x32x16xf32>
    %266 = vector.shape_cast %265 : vector<1x32x16xf32> to vector<32x16xf32>
    %cst_208 = arith.constant dense<0.000000e+00> : vector<64x16xf32>
    %267 = tpu.matmul %264, %266, %cst_208 {dimension_numbers = #tpu.dot_dimension_numbers<[1], [0], [0], [1], [0, 0, 1, 1], [], []>} : vector<64x32xf32>, vector<32x16xf32>, vector<64x16xf32> -> vector<64x16xf32>
    %268 = arith.addf %261, %267 : vector<64x16xf32>
    %c6_209 = arith.constant 6 : index
    %c0_210 = arith.constant 0 : index
    %c0_211 = arith.constant 0 : index
    %269 = vector.load %arg12[%c6_209, %c0_210, %c0_211] : memref<9x64x64xf32, #tpu.memory_space<vmem>>, vector<1x64x64xf32>
    %270 = vector.shape_cast %269 : vector<1x64x64xf32> to vector<64x64xf32>
    %cst_212 = arith.constant dense<0.000000e+00> : vector<64x32xf32>
    %271 = tpu.matmul %270, %227, %cst_212 {dimension_numbers = #tpu.dot_dimension_numbers<[1], [0], [0], [1], [0, 0, 1, 1], [], []>} : vector<64x64xf32>, vector<64x32xf32>, vector<64x32xf32> -> vector<64x32xf32>
    %c6_213 = arith.constant 6 : index
    %c0_214 = arith.constant 0 : index
    %c0_215 = arith.constant 0 : index
    %272 = vector.load %arg13[%c6_213, %c0_214, %c0_215] : memref<9x32x16xf32, #tpu.memory_space<vmem>>, vector<1x32x16xf32>
    %273 = vector.shape_cast %272 : vector<1x32x16xf32> to vector<32x16xf32>
    %cst_216 = arith.constant dense<0.000000e+00> : vector<64x16xf32>
    %274 = tpu.matmul %271, %273, %cst_216 {dimension_numbers = #tpu.dot_dimension_numbers<[1], [0], [0], [1], [0, 0, 1, 1], [], []>} : vector<64x32xf32>, vector<32x16xf32>, vector<64x16xf32> -> vector<64x16xf32>
    %275 = arith.addf %268, %274 : vector<64x16xf32>
    %c7_217 = arith.constant 7 : index
    %c0_218 = arith.constant 0 : index
    %c0_219 = arith.constant 0 : index
    %276 = vector.load %arg12[%c7_217, %c0_218, %c0_219] : memref<9x64x64xf32, #tpu.memory_space<vmem>>, vector<1x64x64xf32>
    %277 = vector.shape_cast %276 : vector<1x64x64xf32> to vector<64x64xf32>
    %cst_220 = arith.constant dense<0.000000e+00> : vector<64x32xf32>
    %278 = tpu.matmul %277, %227, %cst_220 {dimension_numbers = #tpu.dot_dimension_numbers<[1], [0], [0], [1], [0, 0, 1, 1], [], []>} : vector<64x64xf32>, vector<64x32xf32>, vector<64x32xf32> -> vector<64x32xf32>
    %c7_221 = arith.constant 7 : index
    %c0_222 = arith.constant 0 : index
    %c0_223 = arith.constant 0 : index
    %279 = vector.load %arg13[%c7_221, %c0_222, %c0_223] : memref<9x32x16xf32, #tpu.memory_space<vmem>>, vector<1x32x16xf32>
    %280 = vector.shape_cast %279 : vector<1x32x16xf32> to vector<32x16xf32>
    %cst_224 = arith.constant dense<0.000000e+00> : vector<64x16xf32>
    %281 = tpu.matmul %278, %280, %cst_224 {dimension_numbers = #tpu.dot_dimension_numbers<[1], [0], [0], [1], [0, 0, 1, 1], [], []>} : vector<64x32xf32>, vector<32x16xf32>, vector<64x16xf32> -> vector<64x16xf32>
    %282 = arith.addf %275, %281 : vector<64x16xf32>
    %c8_225 = arith.constant 8 : index
    %c0_226 = arith.constant 0 : index
    %c0_227 = arith.constant 0 : index
    %283 = vector.load %arg12[%c8_225, %c0_226, %c0_227] : memref<9x64x64xf32, #tpu.memory_space<vmem>>, vector<1x64x64xf32>
    %284 = vector.shape_cast %283 : vector<1x64x64xf32> to vector<64x64xf32>
    %cst_228 = arith.constant dense<0.000000e+00> : vector<64x32xf32>
    %285 = tpu.matmul %284, %227, %cst_228 {dimension_numbers = #tpu.dot_dimension_numbers<[1], [0], [0], [1], [0, 0, 1, 1], [], []>} : vector<64x64xf32>, vector<64x32xf32>, vector<64x32xf32> -> vector<64x32xf32>
    %c8_229 = arith.constant 8 : index
    %c0_230 = arith.constant 0 : index
    %c0_231 = arith.constant 0 : index
    %286 = vector.load %arg13[%c8_229, %c0_230, %c0_231] : memref<9x32x16xf32, #tpu.memory_space<vmem>>, vector<1x32x16xf32>
    %287 = vector.shape_cast %286 : vector<1x32x16xf32> to vector<32x16xf32>
    %cst_232 = arith.constant dense<0.000000e+00> : vector<64x16xf32>
    %288 = tpu.matmul %285, %287, %cst_232 {dimension_numbers = #tpu.dot_dimension_numbers<[1], [0], [0], [1], [0, 0, 1, 1], [], []>} : vector<64x32xf32>, vector<32x16xf32>, vector<64x16xf32> -> vector<64x16xf32>
    %289 = arith.addf %282, %288 : vector<64x16xf32>
    %c0_233 = arith.constant 0 : index
    %c0_234 = arith.constant 0 : index
    %290 = vector.load %arg14[%c0_233, %c0_234] : memref<1x16xf32, #tpu.memory_space<vmem>>, vector<1x16xf32>
    %291 = vector.broadcast %290 : vector<1x16xf32> to vector<64x16xf32>
    %292 = arith.addf %289, %291 : vector<64x16xf32>
    %c0_235 = arith.constant 0 : index
    %c0_236 = arith.constant 0 : index
    %293 = vector.load %arg15[%c0_235, %c0_236] : memref<16x128xf32, #tpu.memory_space<vmem>>, vector<16x128xf32>
    %cst_237 = arith.constant dense<0.000000e+00> : vector<64x128xf32>
    %294 = tpu.matmul %292, %293, %cst_237 {dimension_numbers = #tpu.dot_dimension_numbers<[1], [0], [0], [1], [0, 0, 1, 1], [], []>} : vector<64x16xf32>, vector<16x128xf32>, vector<64x128xf32> -> vector<64x128xf32>
    %cst_238 = arith.constant 2.000000e+00 : f32
    %295 = vector.broadcast %cst_238 : f32 to vector<64x128xf32>
    %296 = arith.mulf %295, %294 : vector<64x128xf32>
    %c0_239 = arith.constant 0 : index
    %c0_240 = arith.constant 0 : index
    %297 = vector.load %arg16[%c0_239, %c0_240] : memref<1x128xf32, #tpu.memory_space<vmem>>, vector<1x128xf32>
    %298 = vector.broadcast %297 : vector<1x128xf32> to vector<64x128xf32>
    %299 = arith.subf %296, %298 : vector<64x128xf32>
    %cst_241 = arith.constant dense<0xFF800000> : vector<64xf32>
    %300 = vector.multi_reduction <maximumf>, %299, %cst_241 [1] : vector<64x128xf32> to vector<64xf32>
    %301 = vector.shape_cast %300 : vector<64xf32> to vector<64x1xf32>
    %302 = vector.broadcast %301 : vector<64x1xf32> to vector<64x128xf32>
    %303 = arith.subf %299, %302 : vector<64x128xf32>
    %304 = math.exp %303 : vector<64x128xf32>
    %cst_242 = arith.constant dense<0.000000e+00> : vector<64xf32>
    %305 = vector.multi_reduction <add>, %304, %cst_242 [1] : vector<64x128xf32> to vector<64xf32>
    %306 = vector.shape_cast %305 : vector<64xf32> to vector<64x1xf32>
    %307 = tpu.reciprocal %306 {approx = true} : vector<64x1xf32> -> vector<64x1xf32>
    %308 = arith.mulf %306, %307 : vector<64x1xf32>
    %cst_243 = arith.constant 2.000000e+00 : f32
    %309 = vector.broadcast %cst_243 : f32 to vector<64x1xf32>
    %310 = arith.subf %309, %308 : vector<64x1xf32>
    %311 = arith.mulf %307, %310 : vector<64x1xf32>
    %312 = vector.broadcast %311 : vector<64x1xf32> to vector<64x128xf32>
    %313 = arith.mulf %304, %312 : vector<64x128xf32>
    %c0_244 = arith.constant 0 : index
    %c0_245 = arith.constant 0 : index
    %c0_246 = arith.constant 0 : index
    %314 = vector.load %arg17[%c0_244, %c0_245, %c0_246] : memref<1x64x128xf32, #tpu.memory_space<vmem>>, vector<1x64x128xf32>
    %315 = vector.shape_cast %314 : vector<1x64x128xf32> to vector<64x128xf32>
    %316 = vector.shape_cast %313 : vector<64x128xf32> to vector<1x64x128xf32>
    tpu.vector_store %arg17[%c0_244, %c0_245, %c0_246], %316 {strides = array<i32>} : memref<1x64x128xf32, #tpu.memory_space<vmem>>, vector<1x64x128xf32>,
    return
  }
  func.func @transform_0(%arg0: i32) -> (i32, i32, i32) {
    %c0_i32 = arith.constant 0 : i32
    %c0_i32_0 = arith.constant 0 : i32
    %c0_i32_1 = arith.constant 0 : i32
    return %arg0, %c0_i32, %c0_i32_0 : i32, i32, i32
  }
  func.func @transform_1(%arg0: i32) -> (i32, i32, i32) {
    %c0_i32 = arith.constant 0 : i32
    %c0_i32_0 = arith.constant 0 : i32
    %c0_i32_1 = arith.constant 0 : i32
    %c0_i32_2 = arith.constant 0 : i32
    return %c0_i32, %c0_i32_0, %c0_i32_1 : i32, i32, i32
  }
  func.func @transform_2(%arg0: i32) -> (i32, i32) {
    %c0_i32 = arith.constant 0 : i32
    %c0_i32_0 = arith.constant 0 : i32
    %c0_i32_1 = arith.constant 0 : i32
    return %c0_i32, %c0_i32_0 : i32, i32
  }
  func.func @transform_3(%arg0: i32) -> (i32, i32) {
    %c0_i32 = arith.constant 0 : i32
    %c0_i32_0 = arith.constant 0 : i32
    %c0_i32_1 = arith.constant 0 : i32
    return %c0_i32, %c0_i32_0 : i32, i32
  }
  func.func @transform_4(%arg0: i32) -> (i32, i32) {
    %c0_i32 = arith.constant 0 : i32
    %c0_i32_0 = arith.constant 0 : i32
    %c0_i32_1 = arith.constant 0 : i32
    return %c0_i32, %c0_i32_0 : i32, i32
  }
  func.func @transform_5(%arg0: i32) -> (i32, i32) {
    %c0_i32 = arith.constant 0 : i32
    %c0_i32_0 = arith.constant 0 : i32
    %c0_i32_1 = arith.constant 0 : i32
    return %c0_i32, %c0_i32_0 : i32, i32
  }
  func.func @transform_6(%arg0: i32) -> (i32, i32, i32) {
    %c0_i32 = arith.constant 0 : i32
    %c0_i32_0 = arith.constant 0 : i32
    %c0_i32_1 = arith.constant 0 : i32
    %c0_i32_2 = arith.constant 0 : i32
    return %c0_i32, %c0_i32_0, %c0_i32_1 : i32, i32, i32
  }
  func.func @transform_7(%arg0: i32) -> (i32, i32, i32) {
    %c0_i32 = arith.constant 0 : i32
    %c0_i32_0 = arith.constant 0 : i32
    %c0_i32_1 = arith.constant 0 : i32
    %c0_i32_2 = arith.constant 0 : i32
    return %c0_i32, %c0_i32_0, %c0_i32_1 : i32, i32, i32
  }
  func.func @transform_8(%arg0: i32) -> (i32, i32) {
    %c0_i32 = arith.constant 0 : i32
    %c0_i32_0 = arith.constant 0 : i32
    %c0_i32_1 = arith.constant 0 : i32
    return %c0_i32, %c0_i32_0 : i32, i32
  }
  func.func @transform_9(%arg0: i32) -> (i32, i32) {
    %c0_i32 = arith.constant 0 : i32
    %c0_i32_0 = arith.constant 0 : i32
    %c0_i32_1 = arith.constant 0 : i32
    return %c0_i32, %c0_i32_0 : i32, i32
  }
  func.func @transform_10(%arg0: i32) -> (i32, i32) {
    %c0_i32 = arith.constant 0 : i32
    %c0_i32_0 = arith.constant 0 : i32
    %c0_i32_1 = arith.constant 0 : i32
    return %c0_i32, %c0_i32_0 : i32, i32
  }
  func.func @transform_11(%arg0: i32) -> (i32, i32, i32) {
    %c0_i32 = arith.constant 0 : i32
    %c0_i32_0 = arith.constant 0 : i32
    %c0_i32_1 = arith.constant 0 : i32
    %c0_i32_2 = arith.constant 0 : i32
    return %c0_i32, %c0_i32_0, %c0_i32_1 : i32, i32, i32
  }
  func.func @transform_12(%arg0: i32) -> (i32, i32, i32) {
    %c0_i32 = arith.constant 0 : i32
    %c0_i32_0 = arith.constant 0 : i32
    %c0_i32_1 = arith.constant 0 : i32
    %c0_i32_2 = arith.constant 0 : i32
    return %c0_i32, %c0_i32_0, %c0_i32_1 : i32, i32, i32
  }
  func.func @transform_13(%arg0: i32) -> (i32, i32) {
    %c0_i32 = arith.constant 0 : i32
    %c0_i32_0 = arith.constant 0 : i32
    %c0_i32_1 = arith.constant 0 : i32
    return %c0_i32, %c0_i32_0 : i32, i32
  }
  func.func @transform_14(%arg0: i32) -> (i32, i32) {
    %c0_i32 = arith.constant 0 : i32
    %c0_i32_0 = arith.constant 0 : i32
    %c0_i32_1 = arith.constant 0 : i32
    return %c0_i32, %c0_i32_0 : i32, i32
  }
  func.func @transform_15(%arg0: i32) -> (i32, i32) {
    %c0_i32 = arith.constant 0 : i32
    %c0_i32_0 = arith.constant 0 : i32
    %c0_i32_1 = arith.constant 0 : i32
    return %c0_i32, %c0_i32_0 : i32, i32
  }
  func.func @transform_16(%arg0: i32) -> (i32, i32, i32) {
    %c0_i32 = arith.constant 0 : i32
    %c0_i32_0 = arith.constant 0 : i32
    %c0_i32_1 = arith.constant 0 : i32
    return %arg0, %c0_i32, %c0_i32_0 : i32, i32, i32
  }
}

</mosaic_0001>

<bundles_post_ra>
// kernel: encoder_forward.1
= control target key start
LH: loop header
LB: loop body
LE: loop exit
PB: predicated region body
PF: predicated region fallthrough
CT: control target
= control target key end

     0   :  { %s19145_s0 = inlined_call_operand.vmem [shape: f32[2,290,3], index: 0, kind: input, shape index: {}]   ;;  %s19146_s1 = inlined_call_operand.vmem [shape: f32[9,3,32], index: 1, kind: input, shape index: {}]   ;;  %s19147_s2 = inlined_call_operand.vmem [shape: f32[1,32], index: 2, kind: input, shape index: {}]   ;;  %s19148_s3 = inlined_call_operand.vmem [shape: f32[1,32], index: 3, kind: input, shape index: {}]   ;;  %s19149_s4 = inlined_call_operand.vmem [shape: f32[1,32], index: 4, kind: input, shape index: {}]   ;;  %s19150_s5 = inlined_call_operand.vmem [shape: f32[32,32], index: 5, kind: input, shape index: {}]   ;;  %s19151_s6 = inlined_call_operand.vmem [shape: f32[9,64,256], index: 6, kind: input, shape index: {}]   ;;  %s19152_s7 = inlined_call_operand.vmem [shape: f32[9,32,32], index: 7, kind: input, shape index: {}]   ;;  %s19153_s8 = inlined_call_operand.vmem [shape: f32[1,32], index: 8, kind: input, shape index: {}]   ;;  %s19154_s9 = inlined_call_operand.vmem [shape: f32[1,32], index: 9, kind: input, shape index: {}]   ;;  %s19155_s10 = inlined_call_operand.vmem [shape: f32[1,32], index: 10, kind: input, shape index: {}]   ;;  %s19156_s11 = inlined_call_operand.vmem [shape: f32[9,64,64], index: 11, kind: input, shape index: {}]   ;;  %s19157_s12 = inlined_call_operand.vmem [shape: f32[9,32,16], index: 12, kind: input, shape index: {}]   ;;  %s19158_s13 = inlined_call_operand.vmem [shape: f32[1,16], index: 13, kind: input, shape index: {}]   ;;  %s19159_s14 = inlined_call_operand.vmem [shape: f32[16,128], index: 14, kind: input, shape index: {}]   ;;  %s19160_s15 = inlined_call_operand.vmem [shape: f32[1,128], index: 15, kind: input, shape index: {}]   ;;  %s19161_s16 = inlined_call_operand.hbm [shape: f32[2,64,128], index: 16, kind: output, shape index: {}]  }
   0x1   :  { %19319 = sst [smem:[#allocation74_spill]] %s19145_s0 }
   0x2   :  { %19320 = sst [smem:[#allocation75_spill]] %s19146_s1 }
   0x3   :  { %19321 = sst [smem:[#allocation76_spill]] %s19147_s2 }
   0x4   :  { %21 = vsyncpa [#allocation3], 0 }
   0x5   :  { %23 = vsyncpa [#allocation3 + $0x1], 0  ;;  %s15590_s21 = smov 0   ;;  %s15592_s22 = smov 0  }
   0x6   :  { %s15594_s23 = smov 0   ;;  %s15596_s24 = smov 0  }
   0x7 LB: > { %19322 = sst [smem:[#allocation5_spill]] %s15493_s23  ;;  %s15611_s25 = sadd.s32 4294967295, %s15497_s24   ;;  %s15497_s24 = sphi %s15596_s24, %s19627_s24   ;;  %s15493_s23 = sphi %s15594_s23, %s19624_s23   ;;  %s15489_s22 = sphi %s15592_s22, %s19626_s22   ;;  %s15485_s21 = sphi %s15590_s21, %s19625_s21  }
   0x8   : > { %s11044_s26 = sadd.s32 4294967294, %s15497_s24   ;;  %s15615_s27 = sadd.s32 1, %s15497_s24  }
   0x9   : > { %s377_s28 = sadd.s32 1, %s15493_s23  ;;  %s374_s29 = ssub.s32 %s15497_s24, %s15615_s27 }
   0xa   : > { %p387_p0 = scmp.ne.s32.totalorder %s15493_s23, %s15489_s22  ;;  %p375_p1 = scmp.eq.s32.totalorder %s374_s29, 0 }
   0xb   : > { %p388_p2 = scmp.eq.s32.totalorder %s15611_s25, 1  ;;  %p393_p3 = scmp.ne.s32.totalorder %s15489_s22, %s15485_s21 }
   0xc   : > { %p394_p4 = scmp.eq.s32.totalorder %s11044_s26, 1  ;;  %p11047_p7 = scmp.ge.s32.totalorder %s15497_s24, 1 }
   0xd   : > { %s15626_s30 = scalar_select %p375_p1, %s15493_s23, %s377_s28  }
   0xe   : > { %p15628_p5 = por %p388_p2, %p387_p0  ;;  %p15632_p6 = por %p394_p4, %p393_p3 }
   0xf   : > { %19323 = sst [smem:[#allocation6_spill]] %s15626_s30  ;;  %p465_p8 = scmp.lt.s32.totalorder %s15497_s24, 3 }
  0x11   : > { %p466_p9 = pnand %p11047_p7, %p465_p8 }
  0x13   : > { %469 = sbr.rel (%p466_p9) target bundleno = 5409 (0x1521), region = 84 }
  0x1a   : > { %s19326_s1 = sld [smem:[#allocation75_spill]]  ;;  %vm19175_vm0 = vcmask 1042432   ;;  %p515_p10 = scmp.lt.s32.totalorder %s15611_s25, 1  ;;  %vm1164_vm1 = vcmask 23552   ;;  %v520_v28 = vlaneseq  ;;  %v19354_v38 = vmov 0 }
  0x1b   : > { %s19327_s19 = sld [smem:[#allocation74_spill]]  ;;  %s19607_s2 = sld [smem:[#allocation76_spill]] }
  0x1c   : > { %s516_s28 = scalar_select %p515_p10, %s15611_s25, 1  ;;  %v15787_v31 = vshrl.u32 %v520_v28, 7 }
  0x1d   : > { %s512_s18 = sand.u32 1, %s15489_s22  }
  0x1e   : > { %s15194_s29 = smul.u32 296, %s516_s28  ;;  %19349 = vst [vmem:[#allocation28_spill] sm:$0xff] %v15787_v31  ;;  %v557_v34 = vand.u32 15, %v15787_v31  ;;  %v523_v35 = vadd.s32 16, %v15787_v31  ;;  %v525_v41 = vadd.s32 32, %v15787_v31  ;;  %v527_v47 = vadd.s32 48, %v15787_v31 }
  0x1f   : > { %v529_v53 = vadd.s32 64, %v15787_v31  ;;  %v531_v60 = vadd.s32 80, %v15787_v31 }
  0x20   : > { %v11050_v0 = vld [vmem:[%s19326_s1 + $0x4] sm:$0x7]  ;;  %v1129_v1 = vld [vmem:[%s19326_s1] sm:$0x7]  ;;  %v15663_v5 = vld [vmem:[%s19326_s1 + $0x8] sm:$0x7] }
  0x21   : > { %13084 = vmatprep.subr.msk.mxu0 %vm19175_vm0, %v11050_v0  ;;  %s15652_s23 = scalar_lea.vmem %s19327_s19, %s15194_s29  ;;  %vm15811_vm2 = vcmp.eq.s32.totalorder %v557_v34, 0  ;;  %v571_v40 = vand.u32 15, %v523_v35  ;;  %v585_v46 = vand.u32 15, %v525_v41  ;;  %v599_v52 = vand.u32 15, %v527_v47  ;;  %v15852_v54 = vld [vmem:[%s19326_s1 + $0xc] sm:$0x7] }
  0x22   : > { %13085 = vmatpush3.msk.msra.mxu0 %vm19175_vm0, %v11050_v0  ;;  %v1130_v2 = vld [vmem:[%s15652_s23 + $0x1] sm:$0xff]  ;;  %v1131_v3 = vld [vmem:[%s15652_s23 + $0x9] sm:$0xff]  ;;  %v15657_v4 = vld [vmem:[%s15652_s23 + $0x11] sm:$0xff]  ;;  %v19355_v38 = vsel %vm15811_vm2, 4294967295, %v19354_v38  ;;  %v613_v59 = vand.u32 15, %v529_v53  ;;  %s11048_s19 = sshll.u32 %s512_s18, 6 }
  0x23   : > { %13134 = vmatprep.subr.msk.mxu0 %vm19175_vm0, %v1129_v1  ;;  %13086 = vmatprep.mubr.msk.f32.mxu0 %vm1164_vm1, %v1130_v2  ;;  %v15670_v6 = vld [vmem:[%s15652_s23 + $0x19] sm:$0xff]  ;;  %v15673_v7 = vld [vmem:[%s15652_s23 + $0x21] sm:$0xff]  ;;  %v15682_v8 = vld [vmem:[%s15652_s23 + $0x29] sm:$0xff]  ;;  %vm15826_vm3 = vcmp.eq.s32.totalorder %v571_v40, 0  ;;  %vm15841_vm4 = vcmp.eq.s32.totalorder %v585_v46, 0  ;;  %vm15866_vm5 = vcmp.eq.s32.totalorder %v599_v52, 0 }
  0x24   : > { %13087 = vmatmul.mubr.msk.f32.vlgmr.msra.gmra.mrb[0].mxu0 %vm1164_vm1, %v1131_v3  ;;  %v15685_v9 = vld [vmem:[%s15652_s23 + $0x31] sm:$0xff]  ;;  %v15692_v10 = vld [vmem:[%s15652_s23 + $0x39] sm:$0xff]  ;;  %v15695_v11 = vld [vmem:[%s15652_s23 + $0x41] sm:$0xff]  ;;  %vm15883_vm6 = vcmp.eq.s32.totalorder %v613_v59, 0  ;;  %v533_v2 = vadd.s32 96, %v15787_v31  ;;  %s15502_s29 = smov [#allocation2]  }
  0x25   : > { %13135 = vmatpush3.msk.msra.mxu0 %vm19175_vm0, %v1129_v1  ;;  %13089 = vmatprep.mubr.msk.f32.mxu0 %vm1164_vm1, %v15657_v4  ;;  %19328 = vst [vmem:[#allocation7_spill] sm:$0xff] %v15685_v9  ;;  %19329 = vst [vmem:[#allocation8_spill] sm:$0xff] %v15692_v10  ;;  %v15702_v12 = vld [vmem:[%s15652_s23 + $0x49] sm:$0xff]  ;;  %v15705_v13 = vld [vmem:[%s15652_s23 + $0x51] sm:$0xff]  ;;  %v627_v1 = vand.u32 15, %v531_v60  ;;  %v539_v60 = vadd.s32 144, %v15787_v31 }
  0x26   : > { %13184 = vmatprep.subr.msk.mxu0 %vm19175_vm0, %v15663_v5  ;;  %19330 = vst [vmem:[#allocation9_spill] sm:$0xff] %v15695_v11  ;;  %19331 = vst [vmem:[#allocation10_spill] sm:$0xff] %v15702_v12  ;;  %v15712_v14 = vld [vmem:[%s15652_s23 + $0x59] sm:$0xff]  ;;  %v15715_v15 = vld [vmem:[%s15652_s23 + $0x61] sm:$0xff]  ;;  %v641_v35 = vand.u32 15, %v533_v2 }
  0x27   : > { %19332 = vst [vmem:[#allocation11_spill] sm:$0xff] %v15705_v13  ;;  %19333 = vst [vmem:[#allocation12_spill] sm:$0xff] %v15712_v14  ;;  %v15722_v16 = vld [vmem:[%s15652_s23 + $0x69] sm:$0xff]  ;;  %v15725_v17 = vld [vmem:[%s15652_s23 + $0x71] sm:$0xff]  ;;  %vm15900_vm7 = vcmp.eq.s32.totalorder %v627_v1, 0 }
  0x28   : > { %13090 = vmatmul.mubr.msk.f32.gmra.mrb[2].mxu0 %vm1164_vm1, %v15670_v6  ;;  %19334 = vst [vmem:[#allocation13_spill] sm:$0xff] %v15715_v15  ;;  %19335 = vst [vmem:[#allocation14_spill] sm:$0xff] %v15722_v16  ;;  %v15732_v18 = vld [vmem:[%s15652_s23 + $0x79] sm:$0xff]  ;;  %v15735_v19 = vld [vmem:[%s15652_s23 + $0x81] sm:$0xff]  ;;  %vm15917_vm8 = vcmp.eq.s32.totalorder %v641_v35, 0  ;;  %v683_v35 = vand.u32 15, %v539_v60 }
  0x29   : > { %13092 = vmatprep.mubr.msk.f32.mxu0 %vm1164_vm1, %v15673_v7  ;;  %19336 = vst [vmem:[#allocation15_spill] sm:$0xff] %v15725_v17  ;;  %19337 = vst [vmem:[#allocation16_spill] sm:$0xff] %v15732_v18  ;;  %v15742_v20 = vld [vmem:[%s15652_s23 + $0x89] sm:$0xff]  ;;  %v15745_v21 = vld [vmem:[%s15652_s23 + $0x91] sm:$0xff]  ;;  %v543_v60 = vadd.s32 176, %v15787_v31 }
  0x2a   : > { %19338 = vst [vmem:[#allocation17_spill] sm:$0xff] %v15735_v19  ;;  %19339 = vst [vmem:[#allocation18_spill] sm:$0xff] %v15742_v20  ;;  %v15752_v22 = vld [vmem:[%s15652_s23 + $0x99] sm:$0xff]  ;;  %v15755_v23 = vld [vmem:[%s15652_s23 + $0xa1] sm:$0xff]  ;;  %vm15968_vm11 = vcmp.eq.s32.totalorder %v683_v35, 0 }
  0x2b   : > { %19340 = vst [vmem:[#allocation19_spill] sm:$0xff] %v15745_v21  ;;  %19341 = vst [vmem:[#allocation20_spill] sm:$0xff] %v15752_v22  ;;  %v15762_v24 = vld [vmem:[%s15652_s23 + $0xa9] sm:$0xff]  ;;  %v15765_v25 = vld [vmem:[%s15652_s23 + $0xb1] sm:$0xff] }
  0x2c   : > { %13093 = vmatmul.mubr.msk.f32.gmra.mrb[4].mxu0 %vm1164_vm1, %v15682_v8  ;;  %19342 = vst [vmem:[#allocation21_spill] sm:$0xff] %v15755_v23  ;;  %19343 = vst [vmem:[#allocation22_spill] sm:$0xff] %v15762_v24  ;;  %v15772_v26 = vld [vmem:[%s15652_s23 + $0xb9] sm:$0xff]  ;;  %v15775_v27 = vld [vmem:[%s15652_s23 + $0xc1] sm:$0xff] }
  0x2d   : > { %13095 = vmatprep.mubr.msk.f32.mxu0 %vm1164_vm1, %v15685_v9  ;;  %19344 = vst [vmem:[#allocation23_spill] sm:$0xff] %v15765_v25  ;;  %19345 = vst [vmem:[#allocation24_spill] sm:$0xff] %v15772_v26  ;;  %v15782_v29 = vld [vmem:[%s15652_s23 + $0xc9] sm:$0xff]  ;;  %v15785_v30 = vld [vmem:[%s15652_s23 + $0xd1] sm:$0xff] }
  0x2e   : > { %19346 = vst [vmem:[#allocation25_spill] sm:$0xff] %v15775_v27  ;;  %19347 = vst [vmem:[#allocation26_spill] sm:$0xff] %v15782_v29  ;;  %v15794_v32 = vld [vmem:[%s15652_s23 + $0xd9] sm:$0xff]  ;;  %v15797_v33 = vld [vmem:[%s15652_s23 + $0xe1] sm:$0xff] }
  0x2f   : > { %19348 = vst [vmem:[#allocation27_spill] sm:$0xff] %v15785_v30  ;;  %19350 = vst [vmem:[#allocation29_spill] sm:$0xff] %v15794_v32  ;;  %v15806_v36 = vld [vmem:[%s15652_s23 + $0xe9] sm:$0xff]  ;;  %v15809_v37 = vld [vmem:[%s15652_s23 + $0xf1] sm:$0xff] }
  0x30   : > { %13096 = vmatmul.mubr.msk.f32.gmra.mrb[6].mxu0 %vm1164_vm1, %v15692_v10  ;;  %19351 = vst [vmem:[#allocation30_spill] sm:$0xff] %v15797_v33  ;;  %19352 = vst [vmem:[#allocation31_spill] sm:$0xff] %v15806_v36  ;;  %v1001_v39 = vld [vmem:[%s15652_s23] sm:$0xff]  ;;  %v15831_v45 = vld [vmem:[%s15652_s23 + $0x10] sm:$0xff]  ;;  %v528_v10 = vadd.s32 56, %v15787_v31 }
  0x31   : > { %13098 = vmatprep.mubr.msk.f32.mxu0 %vm1164_vm1, %v15695_v11  ;;  %19353 = vst [vmem:[#allocation32_spill] sm:$0xff] %v15809_v37  ;;  %v15822_v42 = vld [vmem:[%s15652_s23 + $0xf9] sm:$0xff]  ;;  %v1097_v43 = vsel %vm15811_vm2, 0.5, %v1001_v39  ;;  %v1002_v48 = vld [vmem:[%s15652_s23 + $0x8] sm:$0xff]  ;;  %v1099_v49 = vsel %vm15826_vm3, 0.5, %v15831_v45  ;;  %v15871_v58 = vld [vmem:[%s15652_s23 + $0x30] sm:$0xff] }
  0x32   : > { %19356 = vst [vmem:[#allocation33_spill] sm:$0xff] %v15822_v42  ;;  %v15846_v51 = vld [vmem:[%s15652_s23 + $0x20] sm:$0xff]  ;;  %v15859_v55 = vld [vmem:[%s15652_s23 + $0x18] sm:$0xff]  ;;  %v15878_v61 = vld [vmem:[%s15652_s23 + $0x28] sm:$0xff]  ;;  %v1103_v62 = vsel %vm15866_vm5, 0.5, %v15871_v58  ;;  %v535_v39 = vadd.s32 112, %v15787_v31 }
  0x33   : > { %v1101_v56 = vsel %vm15841_vm4, 0.5, %v15846_v51  ;;  %v15888_v0 = vld [vmem:[%s15652_s23 + $0x40] sm:$0xff]  ;;  %v15895_v3 = vld [vmem:[%s15652_s23 + $0x38] sm:$0xff]  ;;  %v15905_v34 = vld [vmem:[%s15652_s23 + $0x50] sm:$0xff] }
  0x34   : > { %13099 = vmatmul.mubr.msk.f32.gmra.mrb[8].mxu0 %vm1164_vm1, %v15702_v12  ;;  %v15912_v40 = vld [vmem:[%s15652_s23 + $0x48] sm:$0xff]  ;;  %v1107_v41 = vsel %vm15900_vm7, 0.5, %v15905_v34  ;;  %v15922_v46 = vld [vmem:[%s15652_s23 + $0x60] sm:$0xff]  ;;  %v655_v47 = vand.u32 15, %v535_v39  ;;  %v541_v39 = vadd.s32 160, %v15787_v31  ;;  %v526_v12 = vadd.s32 40, %v15787_v31 }
  0x35   : > { %13101 = vmatprep.mubr.msk.f32.mxu0 %vm1164_vm1, %v15705_v13  ;;  %v1109_v52 = vsel %vm15917_vm8, 0.5, %v15922_v46  ;;  %v16113_v11 = vld [vmem:[%s15652_s23 + $0x1a] sm:$0xff]  ;;  %v16119_v9 = vld [vmem:[%s19326_s1 + $0x10] sm:$0x7]  ;;  %v3572_v44 = vsel %vm15866_vm5, 0.5, %v15905_v34  ;;  %v3574_v50 = vsel %vm15883_vm6, 0.5, %v15922_v46 }
  0x36   : > { %vm15934_vm9 = vcmp.eq.s32.totalorder %v655_v47, 0  ;;  %19394 = vst [vmem:[#allocation37_spill] sm:$0xff] %v16113_v11  ;;  %v3959_v28 = vld [vmem:[%s15652_s23 + $0x39] sm:$0xff]  ;;  %v3965_v53 = vld [vmem:[%s15652_s23 + $0x69] sm:$0xff]  ;;  %v3968_v2 = vld [vmem:[%s15652_s23 + $0x81] sm:$0xff] }
  0x38   : > { %13102 = vmatmul.mubr.msk.f32.gmra.mrb[10].mxu0 %vm1164_vm1, %v15712_v14  ;;  %v1815_v14 = vld [vmem:[%s15652_s23 + $0xa] sm:$0xff] }
  0x39   : > { %13104 = vmatprep.mubr.msk.f32.mxu0 %vm1164_vm1, %v15715_v15  ;;  %v1814_v15 = vld [vmem:[%s15652_s23 + $0x2] sm:$0xff] }
  0x3c   : > { %13105 = vmatmul.mubr.msk.f32.gmra.mrb[12].mxu0 %vm1164_vm1, %v15722_v16  ;;  %v16091_v16 = vld [vmem:[%s15652_s23 + $0xf8] sm:$0xff] }
  0x3d   : > { %13107 = vmatprep.mubr.msk.f32.mxu0 %vm1164_vm1, %v15725_v17 }
  0x40   : > { %13108 = vmatmul.mubr.msk.f32.gmra.mrb[14].mxu0 %vm1164_vm1, %v15732_v18 }
  0x41   : > { %13110 = vmatprep.mubr.msk.f32.mxu0 %vm1164_vm1, %v15735_v19  ;;  %v19385_v19 = vmov 0 }
  0x44   : > { %13111 = vmatmul.mubr.msk.f32.gmra.mrb[16].mxu0 %vm1164_vm1, %v15742_v20  ;;  %v522_v20 = vadd.s32 8, %v15787_v31 }
  0x45   : > { %13113 = vmatprep.mubr.msk.f32.mxu0 %vm1164_vm1, %v15745_v21  ;;  %v16058_v21 = vld [vmem:[%s15652_s23 + $0xe0] sm:$0xff] }
  0x46   : > { %v564_v17 = vand.u32 15, %v522_v20  ;;  %v16106_v20 = vld [vmem:[%s15652_s23 + $0x12] sm:$0xff] }
  0x48   : > { %13114 = vmatmul.mubr.msk.f32.gmra.mrb[18].mxu0 %vm1164_vm1, %v15752_v22  ;;  %v19383_v22 = vmov 0 }
  0x49   : > { %13116 = vmatprep.mubr.msk.f32.mxu0 %vm1164_vm1, %v15755_v23  ;;  %v551_v23 = vadd.s32 240, %v15787_v31 }
  0x4c   : > { %13117 = vmatmul.mubr.msk.f32.gmra.mrb[20].mxu0 %vm1164_vm1, %v15762_v24  ;;  %v16041_v24 = vld [vmem:[%s15652_s23 + $0xd0] sm:$0xff] }
  0x4d   : > { %13119 = vmatprep.mubr.msk.f32.mxu0 %vm1164_vm1, %v15765_v25  ;;  %v19381_v25 = vmov 0 }
  0x50   : > { %13120 = vmatmul.mubr.msk.f32.gmra.mrb[22].mxu0 %vm1164_vm1, %v15772_v26  ;;  %v549_v26 = vadd.s32 224, %v15787_v31 }
  0x51   : > { %13122 = vmatprep.mubr.msk.f32.mxu0 %vm1164_vm1, %v15775_v27  ;;  %v16024_v27 = vld [vmem:[%s15652_s23 + $0xc0] sm:$0xff] }
  0x54   : > { %13123 = vmatmul.mubr.msk.f32.gmra.mrb[24].mxu0 %vm1164_vm1, %v15782_v29  ;;  %v19379_v29 = vmov 0 }
  0x55   : > { %13125 = vmatprep.mubr.msk.f32.mxu0 %vm1164_vm1, %v15785_v30  ;;  %v547_v30 = vadd.s32 208, %v15787_v31 }
  0x58   : > { %13126 = vmatmul.mubr.msk.f32.gmra.mrb[26].mxu0 %vm1164_vm1, %v15794_v32  ;;  %v16007_v32 = vld [vmem:[%s15652_s23 + $0xb0] sm:$0xff] }
  0x59   : > { %13128 = vmatprep.mubr.msk.f32.mxu0 %vm1164_vm1, %v15797_v33  ;;  %v19377_v33 = vmov 0  ;;  %v3584_v63 = vsel %vm15968_vm11, 0.5, %v16007_v32 }
  0x5c   : > { %13129 = vmatmul.mubr.msk.f32.gmra.mrb[28].mxu0 %vm1164_vm1, %v15806_v36  ;;  %v545_v36 = vadd.s32 192, %v15787_v31 }
  0x5d   : > { %13131 = vmatprep.mubr.msk.f32.mxu0 %vm1164_vm1, %v15809_v37  ;;  %v15990_v37 = vld [vmem:[%s15652_s23 + $0xa0] sm:$0xff] }
  0x60   : > { %13132 = vmatmul.mubr.msk.f32.gmra.mrb[30].mxu0 %vm1164_vm1, %v15822_v42  ;;  %v19375_v42 = vmov 0 }
  0x61   : > { %13136 = vmatprep.mubr.msk.f32.mxu0 %vm1164_vm1, %v1097_v43  ;;  %v3962_v43 = vld [vmem:[%s15652_s23 + $0x51] sm:$0xff] }
  0x64   : > { %13137 = vmatmul.mubr.msk.f32.vlgmr.msra.gmra.mrb[0].mxu0 %vm1164_vm1, %v1002_v48  ;;  %v537_v48 = vadd.s32 128, %v15787_v31 }
  0x65   : > { %13185 = vmatpush3.msk.msra.mxu0 %vm19175_vm0, %v15663_v5  ;;  %13139 = vmatprep.mubr.msk.f32.mxu0 %vm1164_vm1, %v1099_v49  ;;  %v1105_v5 = vsel %vm15883_vm6, 0.5, %v15888_v0  ;;  %v15929_v49 = vld [vmem:[%s15652_s23 + $0x58] sm:$0xff] }
  0x66   : > { %13234 = vmatprep.subr.msk.mxu0 %vm19175_vm0, %v15852_v54  ;;  %v669_v59 = vand.u32 15, %v537_v48  ;;  %v3971_v48 = vld [vmem:[%s15652_s23 + $0x99] sm:$0xff] }
  0x68   : > { %13140 = vmatmul.mubr.msk.f32.gmra.mrb[2].mxu0 %vm1164_vm1, %v15859_v55  ;;  %vm15951_vm10 = vcmp.eq.s32.totalorder %v669_v59, 0  ;;  %v697_v59 = vand.u32 15, %v541_v39  ;;  %v711_v39 = vand.u32 15, %v543_v60  ;;  %v725_v60 = vand.u32 15, %v545_v36 }
  0x69   : > { %13142 = vmatprep.mubr.msk.f32.mxu0 %vm1164_vm1, %v1101_v56  ;;  %v15939_v56 = vld [vmem:[%s15652_s23 + $0x70] sm:$0xff]  ;;  %v739_v36 = vand.u32 15, %v547_v30  ;;  %v753_v30 = vand.u32 15, %v549_v26  ;;  %v767_v26 = vand.u32 15, %v551_v23 }
  0x6a   : > { %v1111_v1 = vsel %vm15934_vm9, 0.5, %v15939_v56  ;;  %vm15985_vm12 = vcmp.eq.s32.totalorder %v697_v59, 0  ;;  %vm16002_vm13 = vcmp.eq.s32.totalorder %v711_v39, 0  ;;  %vm16019_vm14 = vcmp.eq.s32.totalorder %v725_v60, 0  ;;  %v16075_v23 = vld [vmem:[%s15652_s23 + $0xf0] sm:$0xff] }
  0x6b   : > { %v19376_v42 = vsel %vm15985_vm12, 4294967295, %v19375_v42  ;;  %v1117_v59 = vsel %vm15985_vm12, 0.5, %v15990_v37  ;;  %v19378_v33 = vsel %vm16002_vm13, 4294967295, %v19377_v33  ;;  %v1119_v39 = vsel %vm16002_vm13, 0.5, %v16007_v32 }
  0x6c   : > { %13143 = vmatmul.mubr.msk.f32.gmra.mrb[4].mxu0 %vm1164_vm1, %v15878_v61  ;;  %v19380_v29 = vsel %vm16019_vm14, 4294967295, %v19379_v29  ;;  %v1121_v60 = vsel %vm16019_vm14, 0.5, %v16024_v27  ;;  %vm16036_vm15 = vcmp.eq.s32.totalorder %v739_v36, 0  ;;  %vm16053_vm0 = vcmp.eq.s32.totalorder %v753_v30, 0 }
  0x6d   : > { %13145 = vmatprep.mubr.msk.f32.mxu0 %vm1164_vm1, %v1103_v62  ;;  %v15946_v62 = vld [vmem:[%s15652_s23 + $0x68] sm:$0xff]  ;;  %v19382_v25 = vsel %vm16036_vm15, 4294967295, %v19381_v25  ;;  %v1123_v36 = vsel %vm16036_vm15, 0.5, %v16041_v24  ;;  %v19384_v22 = vsel %vm16053_vm0, 4294967295, %v19383_v22  ;;  %v1125_v30 = vsel %vm16053_vm0, 0.5, %v16058_v21 }
  0x6e   : > { %vm16070_vm15 = vcmp.eq.s32.totalorder %v767_v26, 0  ;;  %v524_v26 = vadd.s32 24, %v15787_v31  ;;  %vm16094_vm0 = vcmp.eq.s32.totalorder %v564_v17, 15  ;;  %v19391_v17 = vmov 0 }
  0x6f   : > { %v19386_v19 = vsel %vm16070_vm15, 4294967295, %v19385_v19  ;;  %v1127_v18 = vsel %vm16070_vm15, 0.5, %v16075_v23 }
  0x70   : > { %13146 = vmatmul.mubr.msk.f32.gmra.mrb[6].mxu0 %vm1164_vm1, %v15895_v3  ;;  %19387 = vst [vmem:[#allocation34_spill] sm:$0xff] %v19386_v19  ;;  %v578_v13 = vand.u32 15, %v524_v26  ;;  %v592_v26 = vand.u32 15, %v526_v12 }
  0x71   : > { %13148 = vmatprep.mubr.msk.f32.mxu0 %vm1164_vm1, %v1105_v5  ;;  %v15956_v5 = vld [vmem:[%s15652_s23 + $0x80] sm:$0xff] }
  0x72   : > { %v1113_v47 = vsel %vm15951_vm10, 0.5, %v15956_v5  ;;  %vm16108_vm15 = vcmp.eq.s32.totalorder %v578_v13, 15  ;;  %v16130_v13 = vld [vmem:[%s15652_s23 + $0x22] sm:$0xff]  ;;  %vm16132_vm14 = vcmp.eq.s32.totalorder %v592_v26, 15  ;;  %v3578_v57 = vsel %vm15917_vm8, 0.5, %v15956_v5 }
  0x73   : > { %v19392_v17 = vsel %vm16108_vm15, 4294967295, %v19391_v17  ;;  %v1913_v12 = vsel %vm16108_vm15, 0.5, %v16113_v11  ;;  %19396 = vst [vmem:[#allocation38_spill] sm:$0xff] %v16130_v13 }
  0x74   : > { %13149 = vmatmul.mubr.msk.f32.gmra.mrb[8].mxu0 %vm1164_vm1, %v15912_v40  ;;  %19393 = vst [vmem:[#allocation36_spill] sm:$0xff] %v19392_v17  ;;  %v16149_v17 = vld [vmem:[%s15652_s23 + $0x32] sm:$0xff] }
  0x75   : > { %13151 = vmatprep.mubr.msk.f32.mxu0 %vm1164_vm1, %v1107_v41  ;;  %v15963_v41 = vld [vmem:[%s15652_s23 + $0x78] sm:$0xff]  ;;  %19401 = vst [vmem:[#allocation41_spill] sm:$0xff] %v16149_v17 }
  0x78   : > { %13152 = vmatmul.mubr.msk.f32.gmra.mrb[10].mxu0 %vm1164_vm1, %v15929_v49 }
  0x79   : > { %13154 = vmatprep.mubr.msk.f32.mxu0 %vm1164_vm1, %v1109_v52  ;;  %v15973_v52 = vld [vmem:[%s15652_s23 + $0x90] sm:$0xff] }
  0x7a   : > { %v1115_v35 = vsel %vm15968_vm11, 0.5, %v15973_v52 }
  0x7c   : > { %13155 = vmatmul.mubr.msk.f32.gmra.mrb[12].mxu0 %vm1164_vm1, %v15946_v62 }
  0x7d   : > { %13157 = vmatprep.mubr.msk.f32.mxu0 %vm1164_vm1, %v1111_v1  ;;  %v15980_v1 = vld [vmem:[%s15652_s23 + $0x88] sm:$0xff] }
  0x80   : > { %13158 = vmatmul.mubr.msk.f32.gmra.mrb[14].mxu0 %vm1164_vm1, %v15963_v41 }
  0x81   : > { %13160 = vmatprep.mubr.msk.f32.mxu0 %vm1164_vm1, %v1113_v47  ;;  %v15997_v47 = vld [vmem:[%s15652_s23 + $0x98] sm:$0xff] }
  0x84   : > { %13161 = vmatmul.mubr.msk.f32.gmra.mrb[16].mxu0 %vm1164_vm1, %v15980_v1 }
  0x85   : > { %13163 = vmatprep.mubr.msk.f32.mxu0 %vm1164_vm1, %v1115_v35  ;;  %v16014_v35 = vld [vmem:[%s15652_s23 + $0xa8] sm:$0xff] }
  0x88   : > { %13164 = vmatmul.mubr.msk.f32.gmra.mrb[18].mxu0 %vm1164_vm1, %v15997_v47 }
  0x89   : > { %13166 = vmatprep.mubr.msk.f32.mxu0 %vm1164_vm1, %v1117_v59  ;;  %v16031_v59 = vld [vmem:[%s15652_s23 + $0xb8] sm:$0xff] }
  0x8c   : > { %13167 = vmatmul.mubr.msk.f32.gmra.mrb[20].mxu0 %vm1164_vm1, %v16014_v35 }
  0x8d   : > { %13169 = vmatprep.mubr.msk.f32.mxu0 %vm1164_vm1, %v1119_v39  ;;  %v16048_v39 = vld [vmem:[%s15652_s23 + $0xc8] sm:$0xff] }
  0x90   : > { %13170 = vmatmul.mubr.msk.f32.gmra.mrb[22].mxu0 %vm1164_vm1, %v16031_v59 }
  0x91   : > { %13172 = vmatprep.mubr.msk.f32.mxu0 %vm1164_vm1, %v1121_v60  ;;  %v16064_v60 = vld [vmem:[%s15652_s23 + $0xd8] sm:$0xff] }
  0x94   : > { %13173 = vmatmul.mubr.msk.f32.gmra.mrb[24].mxu0 %vm1164_vm1, %v16048_v39 }
  0x95   : > { %13175 = vmatprep.mubr.msk.f32.mxu0 %vm1164_vm1, %v1123_v36  ;;  %v16081_v36 = vld [vmem:[%s15652_s23 + $0xe8] sm:$0xff] }
  0x98   : > { %13176 = vmatmul.mubr.msk.f32.gmra.mrb[26].mxu0 %vm1164_vm1, %v16064_v60 }
  0x99   : > { %13178 = vmatprep.mubr.msk.f32.mxu0 %vm1164_vm1, %v1125_v30  ;;  %v19388_v30 = vmov 0 }
  0x9a   : > { %v19389_v30 = vsel %vm16094_vm0, 4294967295, %v19388_v30 }
  0x9b   : > { %19390 = vst [vmem:[#allocation35_spill] sm:$0xff] %v19389_v30  ;;  %v16156_v30 = vld [vmem:[%s15652_s23 + $0x3a] sm:$0xff] }
  0x9c   : > { %13179 = vmatmul.mubr.msk.f32.gmra.mrb[28].mxu0 %vm1164_vm1, %v16081_v36  ;;  %19405 = vst [vmem:[#allocation43_spill] sm:$0xff] %v16156_v30 }
  0x9d   : > { %13181 = vmatprep.mubr.msk.f32.mxu0 %vm1164_vm1, %v1127_v18  ;;  %v1911_v18 = vsel %vm16094_vm0, 0.5, %v1815_v14  ;;  %vm19395_vm0 = vcmask 1042432   ;;  %v19397_v14 = vmov 0 }
  0x9e   : > { %v19398_v14 = vsel %vm16132_vm14, 4294967295, %v19397_v14 }
  0x9f   : > { %19399 = vst [vmem:[#allocation39_spill] sm:$0xff] %v19398_v14 }
  0xa0   : > { %13182 = vmatmul.mubr.msk.f32.gmra.mrb[30].mxu0 %vm1164_vm1, %v16091_v16 }
  0xa1   : > { %13186 = vmatprep.mubr.msk.f32.mxu0 %vm1164_vm1, %v1814_v15  ;;  %v16137_v15 = vld [vmem:[%s15652_s23 + $0x2a] sm:$0xff] }
  0xa2   : > { %19400 = vst [vmem:[#allocation40_spill] sm:$0xff] %v16137_v15  ;;  %v1915_v26 = vsel %vm16132_vm14, 0.5, %v16137_v15  ;;  %v16166_v15 = vld [vmem:[%s15652_s23 + $0x42] sm:$0xff] }
  0xa3   : > { %19406 = vst [vmem:[#allocation44_spill] sm:$0xff] %v16166_v15 }
  0xa4   : > { %13187 = vmatmul.mubr.msk.f32.vlgmr.msra.gmra.mrb[0].mxu0 %vm1164_vm1, %v1911_v18  ;;  %v606_v18 = vand.u32 15, %v528_v10  ;;  %v19402_v10 = vmov 0 }
  0xa5   : > { %13235 = vmatpush3.msk.msra.mxu0 %vm19395_vm0, %v15852_v54  ;;  %13189 = vmatprep.mubr.msk.f32.mxu0 %vm1164_vm1, %v16106_v20  ;;  %v530_v54 = vadd.s32 72, %v15787_v31 }
  0xa6   : > { %13284 = vmatprep.subr.msk.mxu0 %vm19395_vm0, %v16119_v9  ;;  %vm16151_vm15 = vcmp.eq.s32.totalorder %v606_v18, 15  ;;  %v19407_v18 = vmov 0 }
  0xa7   : > { %v19403_v10 = vsel %vm16151_vm15, 4294967295, %v19402_v10  ;;  %v620_v11 = vand.u32 15, %v530_v54  ;;  %v1917_v14 = vsel %vm16151_vm15, 0.5, %v16156_v30  ;;  %v16183_v30 = vld [vmem:[%s15652_s23 + $0x52] sm:$0xff] }
  0xa8   : > { %13190 = vmatmul.mubr.msk.f32.gmra.mrb[2].mxu0 %vm1164_vm1, %v1913_v12  ;;  %19404 = vst [vmem:[#allocation42_spill] sm:$0xff] %v19403_v10  ;;  %v532_v12 = vadd.s32 88, %v15787_v31  ;;  %19411 = vst [vmem:[#allocation47_spill] sm:$0xff] %v16183_v30 }
  0xa9   : > { %13192 = vmatprep.mubr.msk.f32.mxu0 %vm1164_vm1, %v16130_v13  ;;  %vm16168_vm0 = vcmp.eq.s32.totalorder %v620_v11, 15  ;;  %v16173_v13 = vld [vmem:[%s15652_s23 + $0x4a] sm:$0xff]  ;;  %v19412_v11 = vmov 0 }
  0xaa   : > { %v19408_v18 = vsel %vm16168_vm0, 4294967295, %v19407_v18  ;;  %19410 = vst [vmem:[#allocation46_spill] sm:$0xff] %v16173_v13  ;;  %v634_v54 = vand.u32 15, %v532_v12  ;;  %v1919_v10 = vsel %vm16168_vm0, 0.5, %v16173_v13  ;;  %v16200_v13 = vld [vmem:[%s15652_s23 + $0x62] sm:$0xff] }
  0xab   : > { %19409 = vst [vmem:[#allocation45_spill] sm:$0xff] %v19408_v18  ;;  %19416 = vst [vmem:[#allocation50_spill] sm:$0xff] %v16200_v13 }
  0xac   : > { %13193 = vmatmul.mubr.msk.f32.gmra.mrb[4].mxu0 %vm1164_vm1, %v1915_v26  ;;  %v534_v26 = vadd.s32 104, %v15787_v31  ;;  %vm16185_vm15 = vcmp.eq.s32.totalorder %v634_v54, 15  ;;  %v19417_v54 = vmov 0 }
  0xad   : > { %13195 = vmatprep.mubr.msk.f32.mxu0 %vm1164_vm1, %v16149_v17  ;;  %v19413_v11 = vsel %vm16185_vm15, 4294967295, %v19412_v11  ;;  %v16190_v17 = vld [vmem:[%s15652_s23 + $0x5a] sm:$0xff] }
  0xae   : > { %19414 = vst [vmem:[#allocation48_spill] sm:$0xff] %v19413_v11  ;;  %19415 = vst [vmem:[#allocation49_spill] sm:$0xff] %v16190_v17  ;;  %v648_v12 = vand.u32 15, %v534_v26  ;;  %v1921_v18 = vsel %vm16185_vm15, 0.5, %v16190_v17  ;;  %v16217_v17 = vld [vmem:[%s15652_s23 + $0x72] sm:$0xff] }
  0xaf   : > { %19421 = vst [vmem:[#allocation53_spill] sm:$0xff] %v16217_v17 }
  0xb0   : > { %13196 = vmatmul.mubr.msk.f32.gmra.mrb[6].mxu0 %vm1164_vm1, %v1917_v14  ;;  %v536_v14 = vadd.s32 120, %v15787_v31  ;;  %vm16202_vm0 = vcmp.eq.s32.totalorder %v648_v12, 15  ;;  %v19422_v12 = vmov 0 }
  0xb1   : > { %13198 = vmatprep.mubr.msk.f32.mxu0 %vm1164_vm1, %v16166_v15  ;;  %v19418_v54 = vsel %vm16202_vm0, 4294967295, %v19417_v54  ;;  %v16207_v15 = vld [vmem:[%s15652_s23 + $0x6a] sm:$0xff] }
  0xb2   : > { %19419 = vst [vmem:[#allocation51_spill] sm:$0xff] %v19418_v54  ;;  %19420 = vst [vmem:[#allocation52_spill] sm:$0xff] %v16207_v15  ;;  %v662_v26 = vand.u32 15, %v536_v14  ;;  %v1923_v11 = vsel %vm16202_vm0, 0.5, %v16207_v15  ;;  %v16234_v15 = vld [vmem:[%s15652_s23 + $0x82] sm:$0xff] }
  0xb3   : > { %19426 = vst [vmem:[#allocation56_spill] sm:$0xff] %v16234_v15 }
  0xb4   : > { %13199 = vmatmul.mubr.msk.f32.gmra.mrb[8].mxu0 %vm1164_vm1, %v1919_v10  ;;  %v538_v10 = vadd.s32 136, %v15787_v31  ;;  %vm16219_vm15 = vcmp.eq.s32.totalorder %v662_v26, 15  ;;  %v19427_v26 = vmov 0 }
  0xb5   : > { %13201 = vmatprep.mubr.msk.f32.mxu0 %vm1164_vm1, %v16183_v30  ;;  %v19423_v12 = vsel %vm16219_vm15, 4294967295, %v19422_v12  ;;  %v16224_v30 = vld [vmem:[%s15652_s23 + $0x7a] sm:$0xff] }
  0xb6   : > { %19424 = vst [vmem:[#allocation54_spill] sm:$0xff] %v19423_v12  ;;  %19425 = vst [vmem:[#allocation55_spill] sm:$0xff] %v16224_v30  ;;  %v676_v14 = vand.u32 15, %v538_v10  ;;  %v1925_v54 = vsel %vm16219_vm15, 0.5, %v16224_v30  ;;  %v16251_v30 = vld [vmem:[%s15652_s23 + $0x92] sm:$0xff] }
  0xb7   : > { %19431 = vst [vmem:[#allocation59_spill] sm:$0xff] %v16251_v30 }
  0xb8   : > { %13202 = vmatmul.mubr.msk.f32.gmra.mrb[10].mxu0 %vm1164_vm1, %v1921_v18  ;;  %v540_v18 = vadd.s32 152, %v15787_v31  ;;  %vm16236_vm0 = vcmp.eq.s32.totalorder %v676_v14, 15  ;;  %v19432_v14 = vmov 0 }
  0xb9   : > { %13204 = vmatprep.mubr.msk.f32.mxu0 %vm1164_vm1, %v16200_v13  ;;  %v19428_v26 = vsel %vm16236_vm0, 4294967295, %v19427_v26  ;;  %v16241_v13 = vld [vmem:[%s15652_s23 + $0x8a] sm:$0xff] }
  0xba   : > { %19429 = vst [vmem:[#allocation57_spill] sm:$0xff] %v19428_v26  ;;  %19430 = vst [vmem:[#allocation58_spill] sm:$0xff] %v16241_v13  ;;  %v690_v10 = vand.u32 15, %v540_v18  ;;  %v1927_v12 = vsel %vm16236_vm0, 0.5, %v16241_v13  ;;  %v16268_v13 = vld [vmem:[%s15652_s23 + $0xa2] sm:$0xff] }
  0xbb   : > { %19436 = vst [vmem:[#allocation62_spill] sm:$0xff] %v16268_v13 }
  0xbc   : > { %13205 = vmatmul.mubr.msk.f32.gmra.mrb[12].mxu0 %vm1164_vm1, %v1923_v11  ;;  %v542_v11 = vadd.s32 168, %v15787_v31  ;;  %vm16253_vm15 = vcmp.eq.s32.totalorder %v690_v10, 15  ;;  %v19437_v10 = vmov 0 }
  0xbd   : > { %13207 = vmatprep.mubr.msk.f32.mxu0 %vm1164_vm1, %v16217_v17  ;;  %v19433_v14 = vsel %vm16253_vm15, 4294967295, %v19432_v14  ;;  %v16258_v17 = vld [vmem:[%s15652_s23 + $0x9a] sm:$0xff] }
  0xbe   : > { %19434 = vst [vmem:[#allocation60_spill] sm:$0xff] %v19433_v14  ;;  %19435 = vst [vmem:[#allocation61_spill] sm:$0xff] %v16258_v17  ;;  %v704_v18 = vand.u32 15, %v542_v11  ;;  %v1929_v26 = vsel %vm16253_vm15, 0.5, %v16258_v17  ;;  %v16285_v17 = vld [vmem:[%s15652_s23 + $0xb2] sm:$0xff] }
  0xbf   : > { %19441 = vst [vmem:[#allocation65_spill] sm:$0xff] %v16285_v17 }
  0xc0   : > { %13208 = vmatmul.mubr.msk.f32.gmra.mrb[14].mxu0 %vm1164_vm1, %v1925_v54  ;;  %v544_v54 = vadd.s32 184, %v15787_v31  ;;  %vm16270_vm0 = vcmp.eq.s32.totalorder %v704_v18, 15  ;;  %v19442_v18 = vmov 0 }
  0xc1   : > { %13210 = vmatprep.mubr.msk.f32.mxu0 %vm1164_vm1, %v16234_v15  ;;  %v19438_v10 = vsel %vm16270_vm0, 4294967295, %v19437_v10  ;;  %v16275_v15 = vld [vmem:[%s15652_s23 + $0xaa] sm:$0xff] }
  0xc2   : > { %19439 = vst [vmem:[#allocation63_spill] sm:$0xff] %v19438_v10  ;;  %19440 = vst [vmem:[#allocation64_spill] sm:$0xff] %v16275_v15  ;;  %v718_v11 = vand.u32 15, %v544_v54  ;;  %v1931_v14 = vsel %vm16270_vm0, 0.5, %v16275_v15  ;;  %v16302_v15 = vld [vmem:[%s15652_s23 + $0xc2] sm:$0xff] }
  0xc3   : > { %19446 = vst [vmem:[#allocation68_spill] sm:$0xff] %v16302_v15 }
  0xc4   : > { %13211 = vmatmul.mubr.msk.f32.gmra.mrb[16].mxu0 %vm1164_vm1, %v1927_v12  ;;  %v546_v12 = vadd.s32 200, %v15787_v31  ;;  %vm16287_vm15 = vcmp.eq.s32.totalorder %v718_v11, 15  ;;  %v19447_v11 = vmov 0 }
  0xc5   : > { %13213 = vmatprep.mubr.msk.f32.mxu0 %vm1164_vm1, %v16251_v30  ;;  %v19443_v18 = vsel %vm16287_vm15, 4294967295, %v19442_v18  ;;  %v16292_v30 = vld [vmem:[%s15652_s23 + $0xba] sm:$0xff] }
  0xc6   : > { %19444 = vst [vmem:[#allocation66_spill] sm:$0xff] %v19443_v18  ;;  %19445 = vst [vmem:[#allocation67_spill] sm:$0xff] %v16292_v30  ;;  %v732_v54 = vand.u32 15, %v546_v12  ;;  %v1933_v10 = vsel %vm16287_vm15, 0.5, %v16292_v30  ;;  %v19451_v30 = vmov 0 }
  0xc8   : > { %13214 = vmatmul.mubr.msk.f32.gmra.mrb[18].mxu0 %vm1164_vm1, %v1929_v26  ;;  %v548_v26 = vadd.s32 216, %v15787_v31  ;;  %vm16304_vm0 = vcmp.eq.s32.totalorder %v732_v54, 15  ;;  %v16319_v54 = vld [vmem:[%s15652_s23 + $0xd2] sm:$0xff] }
  0xc9   : > { %13216 = vmatprep.mubr.msk.f32.mxu0 %vm1164_vm1, %v16268_v13  ;;  %v19448_v11 = vsel %vm16304_vm0, 4294967295, %v19447_v11  ;;  %v16309_v13 = vld [vmem:[%s15652_s23 + $0xca] sm:$0xff] }
  0xca   : > { %19449 = vst [vmem:[#allocation69_spill] sm:$0xff] %v19448_v11  ;;  %19450 = vst [vmem:[#allocation70_spill] sm:$0xff] %v16309_v13  ;;  %v746_v12 = vand.u32 15, %v548_v26  ;;  %v1935_v18 = vsel %vm16304_vm0, 0.5, %v16309_v13  ;;  %v16326_v26 = vld [vmem:[%s15652_s23 + $0xda] sm:$0xff]  ;;  %v16336_v13 = vld [vmem:[%s15652_s23 + $0xe2] sm:$0xff] }
  0xcc   : > { %13217 = vmatmul.mubr.msk.f32.gmra.mrb[20].mxu0 %vm1164_vm1, %v1931_v14  ;;  %v550_v14 = vadd.s32 232, %v15787_v31  ;;  %vm16321_vm15 = vcmp.eq.s32.totalorder %v746_v12, 15  ;;  %v19454_v12 = vmov 0 }
  0xcd   : > { %13219 = vmatprep.mubr.msk.f32.mxu0 %vm1164_vm1, %v16285_v17  ;;  %v19452_v30 = vsel %vm16321_vm15, 4294967295, %v19451_v30  ;;  %v1937_v11 = vsel %vm16321_vm15, 0.5, %v16326_v26 }
  0xce   : > { %19453 = vst [vmem:[#allocation71_spill] sm:$0xff] %v19452_v30  ;;  %v760_v17 = vand.u32 15, %v550_v14  ;;  %v19457_v30 = vmov 0 }
  0xd0   : > { %13220 = vmatmul.mubr.msk.f32.gmra.mrb[22].mxu0 %vm1164_vm1, %v1933_v10  ;;  %v552_v10 = vadd.s32 248, %v15787_v31  ;;  %vm16338_vm0 = vcmp.eq.s32.totalorder %v760_v17, 15  ;;  %v16352_v31 = vld [vmem:[%s15652_s23 + $0xf2] sm:$0xff]  ;;  %v16359_v17 = vld [vmem:[%s15652_s23 + $0xfa] sm:$0xff] }
  0xd1   : > { %13222 = vmatprep.mubr.msk.f32.mxu0 %vm1164_vm1, %v16302_v15  ;;  %v19455_v12 = vsel %vm16338_vm0, 4294967295, %v19454_v12  ;;  %v16343_v15 = vld [vmem:[%s15652_s23 + $0xea] sm:$0xff] }
  0xd2   : > { %19456 = vst [vmem:[#allocation72_spill] sm:$0xff] %v19455_v12  ;;  %v774_v14 = vand.u32 15, %v552_v10  ;;  %v2332_v10 = vsel %vm15811_vm2, 0.5, %v15831_v45  ;;  %v2336_v45 = vsel %vm15841_vm4, 0.5, %v15871_v58  ;;  %v3568_v12 = vsel %vm15826_vm3, 0.5, %v15871_v58 }
  0xd3   : > { %v3580_v58 = vsel %vm15934_vm9, 0.5, %v15973_v52 }
  0xd4   : > { %13223 = vmatmul.mubr.msk.f32.gmra.mrb[24].mxu0 %vm1164_vm1, %v1935_v18  ;;  %v1939_v18 = vsel %vm16338_vm0, 0.5, %v16343_v15  ;;  %vm16354_vm15 = vcmp.eq.s32.totalorder %v774_v14, 15  ;;  %v2334_v14 = vsel %vm15826_vm3, 0.5, %v15846_v51  ;;  %vm19551_vm3 = vnez %v19376_v42  ;;  %v3956_v42 = vld [vmem:[%s15652_s23 + $0x21] sm:$0xff] }
  0xd5   : > { %13225 = vmatprep.mubr.msk.f32.mxu0 %vm1164_vm1, %v16319_v54  ;;  %v19458_v30 = vsel %vm16354_vm15, 4294967295, %v19457_v30 }
  0xd8   : > { %13226 = vmatmul.mubr.msk.f32.gmra.mrb[26].mxu0 %vm1164_vm1, %v1937_v11  ;;  %v1941_v11 = vsel %vm16354_vm15, 0.5, %v16359_v17  ;;  %vm19459_vm15 = vcmask 1042432  }
  0xd9   : > { %13228 = vmatprep.mubr.msk.f32.mxu0 %vm1164_vm1, %v16336_v13  ;;  %vm19460_vm2 = vmmov %vm19459_vm15 }
  0xdc   : > { %13229 = vmatmul.mubr.msk.f32.gmra.mrb[28].mxu0 %vm1164_vm1, %v1939_v18  ;;  %v11219_v18 = vld [vmem:[%s19326_s1 + $0x14] sm:$0x7] }
  0xdd   : > { %13231 = vmatprep.mubr.msk.f32.mxu0 %vm1164_vm1, %v16352_v31 }
  0xe0   : > { %13232 = vmatmul.mubr.msk.f32.gmra.mrb[30].mxu0 %vm1164_vm1, %v1941_v11  ;;  %v2342_v11 = vsel %vm15900_vm7, 0.5, %v15922_v46  ;;  %v3963_v46 = vld [vmem:[%s15652_s23 + $0x59] sm:$0xff] }
  0xe1   : > { %13236 = vmatprep.mubr.msk.f32.mxu0 %vm1164_vm1, %v2332_v10  ;;  %v2344_v10 = vsel %vm15917_vm8, 0.5, %v15939_v56 }
  0xe4   : > { %13237 = vmatmul.mubr.msk.f32.vlgmr.msra.gmra.mrb[0].mxu0 %vm1164_vm1, %v15859_v55  ;;  %v2338_v55 = vsel %vm15866_vm5, 0.5, %v15888_v0  ;;  %vm19553_vm5 = vnez %v19380_v29 }
  0xe5   : > { %13285 = vmatpush3.msk.msra.mxu0 %vm19459_vm15, %v16119_v9  ;;  %13239 = vmatprep.mubr.msk.f32.mxu0 %vm1164_vm1, %v2334_v14  ;;  %v2340_v9 = vsel %vm15883_vm6, 0.5, %v15905_v34  ;;  %v2346_v14 = vsel %vm15934_vm9, 0.5, %v15956_v5  ;;  %vm19462_vm15 = vnez %v19382_v25  ;;  %vm19554_vm6 = vnez %v19382_v25  ;;  %v19556_v25 = vld [vmem:[#allocation34_spill] sm:$0xff]  ;;  %v3960_v34 = vld [vmem:[%s15652_s23 + $0x41] sm:$0xff]  ;;  %v3969_v5 = vld [vmem:[%s15652_s23 + $0x89] sm:$0xff] }
  0xe6   : > { %13334 = vmatprep.subr.msk.mxu0 %vm19460_vm2, %v11219_v18  ;;  %vm19461_vm2 = vnez %v19380_v29  ;;  %v3564_v29 = vld [vmem:[%s15652_s23 + $0x110] sm:$0xff]  ;;  %vm19557_vm8 = vnez %v19556_v25 }
  0xe7   : > { %v19573_v25 = vld [vmem:[#allocation49_spill] sm:$0xff] }
  0xe8   : > { %13240 = vmatmul.mubr.msk.f32.gmra.mrb[2].mxu0 %vm1164_vm1, %v15878_v61 }
  0xe9   : > { %13242 = vmatprep.mubr.msk.f32.mxu0 %vm1164_vm1, %v2336_v45  ;;  %v2348_v45 = vsel %vm15951_vm10, 0.5, %v15973_v52  ;;  %v3972_v52 = vld [vmem:[%s15652_s23 + $0xa1] sm:$0xff] }
  0xec   : > { %13243 = vmatmul.mubr.msk.f32.gmra.mrb[4].mxu0 %vm1164_vm1, %v15895_v3 }
  0xed   : > { %13245 = vmatprep.mubr.msk.f32.mxu0 %vm1164_vm1, %v2338_v55  ;;  %v2350_v55 = vsel %vm15968_vm11, 0.5, %v15990_v37 }
  0xf0   : > { %13246 = vmatmul.mubr.msk.f32.gmra.mrb[6].mxu0 %vm1164_vm1, %v15912_v40 }
  0xf1   : > { %13248 = vmatprep.mubr.msk.f32.mxu0 %vm1164_vm1, %v2340_v9  ;;  %v2352_v9 = vsel %vm15985_vm12, 0.5, %v16007_v32  ;;  %v3596_v32 = vsel %vm19557_vm8, 0.5, %v3564_v29  ;;  %v19572_v29 = vld [vmem:[#allocation47_spill] sm:$0xff]  ;;  %vm8199_vm8 = vcmask 523264  }
  0xf4   : > { %13249 = vmatmul.mubr.msk.f32.gmra.mrb[8].mxu0 %vm1164_vm1, %v15929_v49 }
  0xf5   : > { %13251 = vmatprep.mubr.msk.f32.mxu0 %vm1164_vm1, %v2342_v11  ;;  %v2354_v11 = vsel %vm16002_vm13, 0.5, %v16024_v27  ;;  %vm19463_vm13 = vnez %v19384_v22 }
  0xf8   : > { %13252 = vmatmul.mubr.msk.f32.gmra.mrb[10].mxu0 %vm1164_vm1, %v15946_v62 }
  0xf9   : > { %13254 = vmatprep.mubr.msk.f32.mxu0 %vm1164_vm1, %v2344_v10  ;;  %v2356_v10 = vsel %vm19461_vm2, 0.5, %v16041_v24  ;;  %vm19464_vm2 = vnez %v19386_v19 }
  0xfc   : > { %13255 = vmatmul.mubr.msk.f32.gmra.mrb[12].mxu0 %vm1164_vm1, %v15963_v41 }
  0xfd   : > { %13257 = vmatprep.mubr.msk.f32.mxu0 %vm1164_vm1, %v2346_v14  ;;  %v2358_v14 = vsel %vm19462_vm15, 0.5, %v16058_v21 }
 0x100   : > { %13258 = vmatmul.mubr.msk.f32.gmra.mrb[14].mxu0 %vm1164_vm1, %v15980_v1 }
 0x101   : > { %13260 = vmatprep.mubr.msk.f32.mxu0 %vm1164_vm1, %v2348_v45  ;;  %v2360_v45 = vsel %vm19463_vm13, 0.5, %v16075_v23 }
 0x104   : > { %13261 = vmatmul.mubr.msk.f32.gmra.mrb[16].mxu0 %vm1164_vm1, %v15997_v47 }
 0x105   : > { %13263 = vmatprep.mubr.msk.f32.mxu0 %vm1164_vm1, %v2350_v55  ;;  %v16460_v55 = vld [vmem:[%s15652_s23 + $0x100] sm:$0xff] }
 0x108   : > { %13264 = vmatmul.mubr.msk.f32.gmra.mrb[18].mxu0 %vm1164_vm1, %v16014_v35 }
 0x109   : > { %13266 = vmatprep.mubr.msk.f32.mxu0 %vm1164_vm1, %v2352_v9  ;;  %v2362_v9 = vsel %vm19464_vm2, 0.5, %v16460_v55  ;;  %vm19466_vm2 = vcmask 1042432  }
 0x10a   : > { %vm19467_vm13 = vmmov %vm19466_vm2 }
 0x10b   : > { %vm19503_vm12 = vmmov %vm19466_vm2 }
 0x10c   : > { %13267 = vmatmul.mubr.msk.f32.gmra.mrb[20].mxu0 %vm1164_vm1, %v16031_v59 }
 0x10d   : > { %13269 = vmatprep.mubr.msk.f32.mxu0 %vm1164_vm1, %v2354_v11  ;;  %v16472_v11 = vld [vmem:[%s15652_s23 + $0x108] sm:$0xff] }
 0x10e   : > { %19465 = vst [vmem:[#allocation73_spill] sm:$0xff] %v16472_v11 }
 0x110   : > { %13270 = vmatmul.mubr.msk.f32.gmra.mrb[22].mxu0 %vm1164_vm1, %v16048_v39 }
 0x111   : > { %13272 = vmatprep.mubr.msk.f32.mxu0 %vm1164_vm1, %v2356_v10  ;;  %v11253_v10 = vld [vmem:[%s19326_s1 + $0x18] sm:$0x7] }
 0x114   : > { %13273 = vmatmul.mubr.msk.f32.gmra.mrb[24].mxu0 %vm1164_vm1, %v16064_v60 }
 0x115   : > { %13275 = vmatprep.mubr.msk.f32.mxu0 %vm1164_vm1, %v2358_v14  ;;  %v19468_v14 = vld [vmem:[#allocation7_spill] sm:$0xff] }
 0x118   : > { %13276 = vmatmul.mubr.msk.f32.gmra.mrb[26].mxu0 %vm1164_vm1, %v16081_v36 }
 0x119   : > { %13278 = vmatprep.mubr.msk.f32.mxu0 %vm1164_vm1, %v2360_v45  ;;  %v19470_v45 = vld [vmem:[#allocation9_spill] sm:$0xff] }
 0x11c   : > { %13279 = vmatmul.mubr.msk.f32.gmra.mrb[28].mxu0 %vm1164_vm1, %v16091_v16 }
 0x11d   : > { %13281 = vmatprep.mubr.msk.f32.mxu0 %vm1164_vm1, %v2362_v9  ;;  %v19474_v9 = vld [vmem:[#allocation13_spill] sm:$0xff] }
 0x120   : > { %13282 = vmatmul.mubr.msk.f32.gmra.mrb[30].mxu0 %vm1164_vm1, %v16472_v11  ;;  %v19509_v11 = vld [vmem:[#allocation42_spill] sm:$0xff] }
 0x121   : > { %13286 = vmatprep.mubr.msk.f32.mxu0 %vm1164_vm1, %v15657_v4  ;;  %v19469_v4 = vld [vmem:[#allocation8_spill] sm:$0xff] }
 0x124   : > { %13287 = vmatmul.mubr.msk.f32.vlgmr.msra.gmra.mrb[0].mxu0 %vm1164_vm1, %v15670_v6  ;;  %v19471_v6 = vld [vmem:[#allocation10_spill] sm:$0xff] }
 0x125   : > { %13335 = vmatpush3.msk.msra.mxu0 %vm19466_vm2, %v11219_v18  ;;  %13289 = vmatprep.mubr.msk.f32.mxu0 %vm1164_vm1, %v15673_v7  ;;  %v19472_v18 = vld [vmem:[#allocation11_spill] sm:$0xff]  ;;  %v19473_v7 = vld [vmem:[#allocation12_spill] sm:$0xff] }
 0x126   : > { %13384 = vmatprep.subr.msk.mxu0 %vm19467_vm13, %v11253_v10 }
 0x128   : > { %13290 = vmatmul.mubr.msk.f32.gmra.mrb[2].mxu0 %vm1164_vm1, %v15682_v8  ;;  %v19475_v8 = vld [vmem:[#allocation14_spill] sm:$0xff] }
 0x129   : > { %13292 = vmatprep.mubr.msk.f32.mxu0 %vm1164_vm1, %v19468_v14  ;;  %v19476_v14 = vld [vmem:[#allocation15_spill] sm:$0xff] }
 0x12c   : > { %13293 = vmatmul.mubr.msk.f32.gmra.mrb[4].mxu0 %vm1164_vm1, %v19469_v4  ;;  %v19477_v4 = vld [vmem:[#allocation16_spill] sm:$0xff] }
 0x12d   : > { %13295 = vmatprep.mubr.msk.f32.mxu0 %vm1164_vm1, %v19470_v45  ;;  %v19478_v45 = vld [vmem:[#allocation17_spill] sm:$0xff] }
 0x130   : > { %13296 = vmatmul.mubr.msk.f32.gmra.mrb[6].mxu0 %vm1164_vm1, %v19471_v6  ;;  %v19479_v6 = vld [vmem:[#allocation18_spill] sm:$0xff] }
 0x131   : > { %13298 = vmatprep.mubr.msk.f32.mxu0 %vm1164_vm1, %v19472_v18  ;;  %v19480_v18 = vld [vmem:[#allocation19_spill] sm:$0xff] }
 0x134   : > { %13299 = vmatmul.mubr.msk.f32.gmra.mrb[8].mxu0 %vm1164_vm1, %v19473_v7  ;;  %v19481_v7 = vld [vmem:[#allocation20_spill] sm:$0xff] }
 0x135   : > { %13301 = vmatprep.mubr.msk.f32.mxu0 %vm1164_vm1, %v19474_v9  ;;  %v19482_v9 = vld [vmem:[#allocation21_spill] sm:$0xff] }
 0x138   : > { %13302 = vmatmul.mubr.msk.f32.gmra.mrb[10].mxu0 %vm1164_vm1, %v19475_v8  ;;  %v19483_v8 = vld [vmem:[#allocation22_spill] sm:$0xff] }
 0x139   : > { %13304 = vmatprep.mubr.msk.f32.mxu0 %vm1164_vm1, %v19476_v14  ;;  %v19484_v14 = vld [vmem:[#allocation23_spill] sm:$0xff] }
 0x13c   : > { %13305 = vmatmul.mubr.msk.f32.gmra.mrb[12].mxu0 %vm1164_vm1, %v19477_v4  ;;  %v19485_v4 = vld [vmem:[#allocation24_spill] sm:$0xff] }
 0x13d   : > { %13307 = vmatprep.mubr.msk.f32.mxu0 %vm1164_vm1, %v19478_v45  ;;  %v19486_v45 = vld [vmem:[#allocation25_spill] sm:$0xff] }
 0x140   : > { %13308 = vmatmul.mubr.msk.f32.gmra.mrb[14].mxu0 %vm1164_vm1, %v19479_v6  ;;  %v19487_v6 = vld [vmem:[#allocation26_spill] sm:$0xff] }
 0x141   : > { %13310 = vmatprep.mubr.msk.f32.mxu0 %vm1164_vm1, %v19480_v18  ;;  %v19488_v18 = vld [vmem:[#allocation27_spill] sm:$0xff] }
 0x144   : > { %13311 = vmatmul.mubr.msk.f32.gmra.mrb[16].mxu0 %vm1164_vm1, %v19481_v7  ;;  %v19489_v7 = vld [vmem:[#allocation29_spill] sm:$0xff] }
 0x145   : > { %13313 = vmatprep.mubr.msk.f32.mxu0 %vm1164_vm1, %v19482_v9  ;;  %v19490_v9 = vld [vmem:[#allocation30_spill] sm:$0xff] }
 0x148   : > { %13314 = vmatmul.mubr.msk.f32.gmra.mrb[18].mxu0 %vm1164_vm1, %v19483_v8  ;;  %v19491_v8 = vld [vmem:[#allocation31_spill] sm:$0xff] }
 0x149   : > { %13316 = vmatprep.mubr.msk.f32.mxu0 %vm1164_vm1, %v19484_v14  ;;  %v19492_v14 = vld [vmem:[#allocation32_spill] sm:$0xff] }
 0x14c   : > { %13317 = vmatmul.mubr.msk.f32.gmra.mrb[20].mxu0 %vm1164_vm1, %v19485_v4  ;;  %v16540_v4 = vld [vmem:[%s15652_s23 + $0x101] sm:$0xff] }
 0x14d   : > { %13319 = vmatprep.mubr.msk.f32.mxu0 %vm1164_vm1, %v19486_v45  ;;  %19493 = vst [vmem:[#allocation7_spill] sm:$0xff] %v16540_v4  ;;  %v19494_v45 = vld [vmem:[#allocation33_spill] sm:$0xff] }
 0x150   : > { %13320 = vmatmul.mubr.msk.f32.gmra.mrb[22].mxu0 %vm1164_vm1, %v19487_v6  ;;  %v16547_v6 = vld [vmem:[%s15652_s23 + $0x109] sm:$0xff] }
 0x151   : > { %13322 = vmatprep.mubr.msk.f32.mxu0 %vm1164_vm1, %v19488_v18  ;;  %19495 = vst [vmem:[#allocation8_spill] sm:$0xff] %v16547_v6  ;;  %v19496_v18 = vld [vmem:[#allocation37_spill] sm:$0xff] }
 0x154   : > { %13323 = vmatmul.mubr.msk.f32.gmra.mrb[24].mxu0 %vm1164_vm1, %v19489_v7  ;;  %v19497_v7 = vld [vmem:[#allocation35_spill] sm:$0xff] }
 0x155   : > { %13325 = vmatprep.mubr.msk.f32.mxu0 %vm1164_vm1, %v19490_v9  ;;  %vm19498_vm13 = vnez %v19497_v7  ;;  %v19515_v7 = vld [vmem:[#allocation50_spill] sm:$0xff] }
 0x156   : > { %v3145_v9 = vsel %vm19498_vm13, 0.5, %v19496_v18  ;;  %v19505_v18 = vld [vmem:[#allocation43_spill] sm:$0xff] }
 0x158   : > { %13326 = vmatmul.mubr.msk.f32.gmra.mrb[26].mxu0 %vm1164_vm1, %v19491_v8  ;;  %v11287_v8 = vld [vmem:[%s19326_s1 + $0x1c] sm:$0x7] }
 0x159   : > { %13328 = vmatprep.mubr.msk.f32.mxu0 %vm1164_vm1, %v19492_v14  ;;  %v19499_v14 = vld [vmem:[#allocation38_spill] sm:$0xff] }
 0x15c   : > { %13329 = vmatmul.mubr.msk.f32.gmra.mrb[28].mxu0 %vm1164_vm1, %v19494_v45  ;;  %v19500_v45 = vld [vmem:[#allocation40_spill] sm:$0xff] }
 0x15d   : > { %13331 = vmatprep.mubr.msk.f32.mxu0 %vm1164_vm1, %v16540_v4 }
 0x160   : > { %13332 = vmatmul.mubr.msk.f32.gmra.mrb[30].mxu0 %vm1164_vm1, %v16547_v6  ;;  %v19501_v6 = vld [vmem:[#allocation36_spill] sm:$0xff] }
 0x161   : > { %13336 = vmatprep.mubr.msk.f32.mxu0 %vm1164_vm1, %v16106_v20  ;;  %vm19502_vm15 = vnez %v19501_v6  ;;  %v19504_v20 = vld [vmem:[#allocation41_spill] sm:$0xff] }
 0x162   : > { %v3147_v4 = vsel %vm19502_vm15, 0.5, %v19500_v45  ;;  %v19511_v45 = vld [vmem:[#allocation47_spill] sm:$0xff] }
 0x164   : > { %13337 = vmatmul.mubr.msk.f32.vlgmr.msra.gmra.mrb[0].mxu0 %vm1164_vm1, %v3145_v9  ;;  %v3149_v9 = vsel %vm16132_vm14, 0.5, %v19505_v18 }
 0x165   : > { %13385 = vmatpush3.msk.msra.mxu0 %vm19466_vm2, %v11253_v10  ;;  %13339 = vmatprep.mubr.msk.f32.mxu0 %vm1164_vm1, %v19499_v14  ;;  %v19507_v10 = vld [vmem:[#allocation44_spill] sm:$0xff]  ;;  %v19508_v14 = vld [vmem:[#allocation46_spill] sm:$0xff]  ;;  %vm19510_vm2 = vnez %v19509_v11  ;;  %v19519_v11 = vld [vmem:[#allocation53_spill] sm:$0xff] }
 0x166   : > { %13434 = vmatprep.subr.msk.mxu0 %vm19503_vm12, %v11287_v8  ;;  %v3151_v6 = vsel %vm19510_vm2, 0.5, %v19508_v14 }
 0x168   : > { %13340 = vmatmul.mubr.msk.f32.gmra.mrb[2].mxu0 %vm1164_vm1, %v3147_v4  ;;  %v19512_v4 = vld [vmem:[#allocation49_spill] sm:$0xff] }
 0x169   : > { %13342 = vmatprep.mubr.msk.f32.mxu0 %vm1164_vm1, %v19504_v20  ;;  %v19513_v20 = vld [vmem:[#allocation45_spill] sm:$0xff] }
 0x16a   : > { %vm19514_vm12 = vnez %v19513_v20  ;;  %v19523_v20 = vld [vmem:[#allocation56_spill] sm:$0xff] }
 0x16b   : > { %v3153_v19 = vsel %vm19514_vm12, 0.5, %v19512_v4 }
 0x16c   : > { %13343 = vmatmul.mubr.msk.f32.gmra.mrb[4].mxu0 %vm1164_vm1, %v3149_v9  ;;  %v19516_v9 = vld [vmem:[#allocation52_spill] sm:$0xff] }
 0x16d   : > { %13345 = vmatprep.mubr.msk.f32.mxu0 %vm1164_vm1, %v19507_v10  ;;  %v19517_v10 = vld [vmem:[#allocation48_spill] sm:$0xff] }
 0x16e   : > { %vm19518_vm14 = vnez %v19517_v10  ;;  %v19527_v10 = vld [vmem:[#allocation59_spill] sm:$0xff] }
 0x16f   : > { %v3155_v18 = vsel %vm19518_vm14, 0.5, %v19516_v9 }
 0x170   : > { %13346 = vmatmul.mubr.msk.f32.gmra.mrb[6].mxu0 %vm1164_vm1, %v3151_v6  ;;  %v19520_v6 = vld [vmem:[#allocation55_spill] sm:$0xff] }
 0x171   : > { %13348 = vmatprep.mubr.msk.f32.mxu0 %vm1164_vm1, %v19511_v45  ;;  %v19521_v45 = vld [vmem:[#allocation51_spill] sm:$0xff] }
 0x172   : > { %vm19522_vm2 = vnez %v19521_v45  ;;  %v19531_v45 = vld [vmem:[#allocation62_spill] sm:$0xff] }
 0x173   : > { %v3157_v14 = vsel %vm19522_vm2, 0.5, %v19520_v6 }
 0x174   : > { %13349 = vmatmul.mubr.msk.f32.gmra.mrb[8].mxu0 %vm1164_vm1, %v3153_v19  ;;  %v19524_v19 = vld [vmem:[#allocation58_spill] sm:$0xff] }
 0x175   : > { %13351 = vmatprep.mubr.msk.f32.mxu0 %vm1164_vm1, %v19515_v7  ;;  %v19525_v7 = vld [vmem:[#allocation54_spill] sm:$0xff] }
 0x176   : > { %vm19526_vm12 = vnez %v19525_v7  ;;  %v19536_v7 = vld [vmem:[#allocation67_spill] sm:$0xff] }
 0x177   : > { %v3159_v4 = vsel %vm19526_vm12, 0.5, %v19524_v19 }
 0x178   : > { %13352 = vmatmul.mubr.msk.f32.gmra.mrb[10].mxu0 %vm1164_vm1, %v3155_v18  ;;  %v19528_v18 = vld [vmem:[#allocation61_spill] sm:$0xff] }
 0x179   : > { %13354 = vmatprep.mubr.msk.f32.mxu0 %vm1164_vm1, %v19519_v11  ;;  %v19529_v11 = vld [vmem:[#allocation57_spill] sm:$0xff] }
 0x17a   : > { %vm19530_vm14 = vnez %v19529_v11 }
 0x17b   : > { %v3161_v9 = vsel %vm19530_vm14, 0.5, %v19528_v18  ;;  %v19541_v18 = vld [vmem:[#allocation66_spill] sm:$0xff] }
 0x17c   : > { %13355 = vmatmul.mubr.msk.f32.gmra.mrb[12].mxu0 %vm1164_vm1, %v3157_v14  ;;  %v19532_v14 = vld [vmem:[#allocation64_spill] sm:$0xff]  ;;  %vm19542_vm14 = vnez %v19541_v18 }
 0x17d   : > { %13357 = vmatprep.mubr.msk.f32.mxu0 %vm1164_vm1, %v19523_v20  ;;  %v19533_v20 = vld [vmem:[#allocation60_spill] sm:$0xff] }
 0x17e   : > { %vm19534_vm2 = vnez %v19533_v20  ;;  %v16649_v18 = vld [vmem:[%s15652_s23 + $0x10a] sm:$0xff] }
 0x17f   : > { %v3163_v6 = vsel %vm19534_vm2, 0.5, %v19532_v14 }
 0x180   : > { %13358 = vmatmul.mubr.msk.f32.gmra.mrb[14].mxu0 %vm1164_vm1, %v3159_v4  ;;  %v19535_v4 = vld [vmem:[#allocation65_spill] sm:$0xff] }
 0x181   : > { %13360 = vmatprep.mubr.msk.f32.mxu0 %vm1164_vm1, %v19527_v10  ;;  %v19537_v10 = vld [vmem:[#allocation63_spill] sm:$0xff] }
 0x182   : > { %vm19538_vm12 = vnez %v19537_v10 }
 0x183   : > { %v3165_v11 = vsel %vm19538_vm12, 0.5, %v19536_v7 }
 0x184   : > { %13361 = vmatmul.mubr.msk.f32.gmra.mrb[16].mxu0 %vm1164_vm1, %v3161_v9  ;;  %v19539_v9 = vld [vmem:[#allocation68_spill] sm:$0xff] }
 0x185   : > { %13363 = vmatprep.mubr.msk.f32.mxu0 %vm1164_vm1, %v19531_v45  ;;  %v19540_v45 = vld [vmem:[#allocation70_spill] sm:$0xff] }
 0x186   : > { %v3167_v20 = vsel %vm19542_vm14, 0.5, %v19540_v45 }
 0x188   : > { %13364 = vmatmul.mubr.msk.f32.gmra.mrb[18].mxu0 %vm1164_vm1, %v3163_v6  ;;  %v19543_v6 = vld [vmem:[#allocation69_spill] sm:$0xff] }
 0x189   : > { %13366 = vmatprep.mubr.msk.f32.mxu0 %vm1164_vm1, %v19535_v4  ;;  %vm19544_vm2 = vnez %v19543_v6  ;;  %v16646_v6 = vld [vmem:[%s15652_s23 + $0x102] sm:$0xff] }
 0x18a   : > { %v3169_v4 = vsel %vm19544_vm2, 0.5, %v16326_v26  ;;  %vm19548_vm2 = vnez %v19355_v38  ;;  %v3570_v38 = vsel %vm15841_vm4, 0.5, %v15888_v0  ;;  %v3586_v0 = vsel %vm19551_vm3, 0.5, %v16024_v27 }
 0x18b   : > { %vm19552_vm4 = vnez %v19378_v33  ;;  %v3590_v27 = vsel %vm19553_vm5, 0.5, %v16058_v21  ;;  %v19558_v33 = vld [vmem:[#allocation73_spill] sm:$0xff] }
 0x18c   : > { %13367 = vmatmul.mubr.msk.f32.gmra.mrb[20].mxu0 %vm1164_vm1, %v3165_v11  ;;  %v19545_v11 = vld [vmem:[#allocation71_spill] sm:$0xff] }
 0x18d   : > { %13369 = vmatprep.mubr.msk.f32.mxu0 %vm1164_vm1, %v19539_v9  ;;  %vm19546_vm12 = vnez %v19545_v11 }
 0x18e   : > { %v3171_v10 = vsel %vm19546_vm12, 0.5, %v16343_v15  ;;  %vm19547_vm12 = vnez %v19458_v30 }
 0x190   : > { %13370 = vmatmul.mubr.msk.f32.gmra.mrb[22].mxu0 %vm1164_vm1, %v3167_v20  ;;  %v3173_v20 = vsel %vm16338_vm0, 0.5, %v16359_v17 }
 0x191   : > { %13372 = vmatprep.mubr.msk.f32.mxu0 %vm1164_vm1, %v16319_v54 }
 0x194   : > { %13373 = vmatmul.mubr.msk.f32.gmra.mrb[24].mxu0 %vm1164_vm1, %v3169_v4  ;;  %v3566_v4 = vsel %vm19548_vm2, 0.5, %v15846_v51  ;;  %v3576_v51 = vsel %vm15900_vm7, 0.5, %v15939_v56  ;;  %vm19555_vm7 = vnez %v19384_v22  ;;  %v3565_v22 = vld [vmem:[%s15652_s23 + $0x118] sm:$0xff] }
 0x195   : > { %13375 = vmatprep.mubr.msk.f32.mxu0 %vm1164_vm1, %v16336_v13  ;;  %v3594_v21 = vsel %vm19555_vm7, 0.5, %v16460_v55  ;;  %v3966_v56 = vld [vmem:[%s15652_s23 + $0x71] sm:$0xff]  ;;  %vm19602_vm7 = vnez %v19545_v11  ;;  %v19309_v11 = vmov 0.0|0.0  }
 0x196   : > { %v3982_v55 = vld [vmem:[%s15652_s23 + $0xf1] sm:$0xff]  ;;  %14206 = vmatprep.subr.bf16.mxu1 %v19309_v11 }
 0x198   : > { %13376 = vmatmul.mubr.msk.f32.gmra.mrb[26].mxu0 %vm1164_vm1, %v3171_v10  ;;  %v3175_v10 = vsel %vm19547_vm12, 0.5, %v16649_v18  ;;  %vm19549_vm12 = vcmask 1042432  }
 0x199   : > { %13378 = vmatprep.mubr.msk.f32.mxu0 %vm1164_vm1, %v16352_v31  ;;  %vm19550_vm2 = vmmov %vm19549_vm12 }
 0x19a   : > { %vm19559_vm9 = vmmov %vm19550_vm2 }
 0x19c   : > { %13379 = vmatmul.mubr.msk.f32.gmra.mrb[28].mxu0 %vm1164_vm1, %v3173_v20  ;;  %v11321_v20 = vld [vmem:[%s19326_s1 + $0x20] sm:$0x7]  ;;  %s19080_s1 = scalar_lea.vmem [#allocation2], %s11048_s19  ;;  %s15439_s19 = sshll.u32 %s15502_s29, 4  ;;  %s15440_s19 = int_to_ptr.vmem [resolvable:$false] %s15439_s19 }
 0x19d   : > { %13381 = vmatprep.mubr.msk.f32.mxu0 %vm1164_vm1, %v16646_v6  ;;  %s10982_s20 = sshll.u32 %s19080_s1, 4  ;;  %s19097_s20 = int_to_ptr.vmem [resolvable:$true] %s10982_s20 }
 0x19e   : > { %p15442_p0 = scmp.lt.s32.totalorder %s19097_s20, %s15440_s19 }
 0x1a0   : > { %13382 = vmatmul.mubr.msk.f32.gmra.mrb[30].mxu0 %vm1164_vm1, %v3175_v10  ;;  %v19560_v10 = vld [vmem:[#allocation7_spill] sm:$0xff] }
 0x1a1   : > { %13386 = vmatprep.mubr.msk.f32.mxu0 %vm1164_vm1, %v3566_v4  ;;  %v3986_v4 = vld [vmem:[%s15652_s23 + $0x111] sm:$0xff] }
 0x1a4   : > { %13387 = vmatmul.mubr.msk.f32.vlgmr.msra.gmra.mrb[0].mxu0 %vm1164_vm1, %v15878_v61  ;;  %v3582_v61 = vsel %vm15951_vm10, 0.5, %v15990_v37  ;;  %v3588_v37 = vsel %vm19552_vm4, 0.5, %v16041_v24  ;;  %v3592_v24 = vsel %vm19554_vm6, 0.5, %v16075_v23  ;;  %v3979_v23 = vld [vmem:[%s15652_s23 + $0xd9] sm:$0xff] }
 0x1a5   : > { %13435 = vmatpush3.msk.msra.mxu0 %vm19549_vm12, %v11287_v8  ;;  %13389 = vmatprep.mubr.msk.f32.mxu0 %vm1164_vm1, %v3568_v12  ;;  %v3981_v12 = vld [vmem:[%s15652_s23 + $0xe9] sm:$0xff]  ;;  %v3983_v8 = vld [vmem:[%s15652_s23 + $0xf9] sm:$0xff] }
 0x1a6   : > { %13484 = vmatprep.subr.msk.mxu0 %vm19550_vm2, %v11321_v20 }
 0x1a8   : > { %13390 = vmatmul.mubr.msk.f32.gmra.mrb[2].mxu0 %vm1164_vm1, %v15895_v3  ;;  %v3958_v3 = vld [vmem:[%s15652_s23 + $0x31] sm:$0xff] }
 0x1a9   : > { %13392 = vmatprep.mubr.msk.f32.mxu0 %vm1164_vm1, %v3570_v38  ;;  %v3987_v38 = vld [vmem:[%s15652_s23 + $0x119] sm:$0xff] }
 0x1ac   : > { %13393 = vmatmul.mubr.msk.f32.gmra.mrb[4].mxu0 %vm1164_vm1, %v15912_v40  ;;  %v3961_v40 = vld [vmem:[%s15652_s23 + $0x49] sm:$0xff] }
 0x1ad   : > { %13395 = vmatprep.mubr.msk.f32.mxu0 %vm1164_vm1, %v3572_v44  ;;  %v19562_v44 = vld [vmem:[#allocation38_spill] sm:$0xff] }
 0x1b0   : > { %13396 = vmatmul.mubr.msk.f32.gmra.mrb[6].mxu0 %vm1164_vm1, %v15929_v49  ;;  %v3964_v49 = vld [vmem:[%s15652_s23 + $0x61] sm:$0xff] }
 0x1b1   : > { %13398 = vmatprep.mubr.msk.f32.mxu0 %vm1164_vm1, %v3574_v50  ;;  %v19563_v50 = vld [vmem:[#allocation40_spill] sm:$0xff] }
 0x1b4   : > { %13399 = vmatmul.mubr.msk.f32.gmra.mrb[8].mxu0 %vm1164_vm1, %v15946_v62  ;;  %v3967_v62 = vld [vmem:[%s15652_s23 + $0x79] sm:$0xff] }
 0x1b5   : > { %13401 = vmatprep.mubr.msk.f32.mxu0 %vm1164_vm1, %v3576_v51 }
 0x1b8   : > { %13402 = vmatmul.mubr.msk.f32.gmra.mrb[10].mxu0 %vm1164_vm1, %v15963_v41  ;;  %v3970_v41 = vld [vmem:[%s15652_s23 + $0x91] sm:$0xff] }
 0x1b9   : > { %13404 = vmatprep.mubr.msk.f32.mxu0 %vm1164_vm1, %v3578_v57  ;;  %v4379_v57 = vsel %vm19498_vm13, 0.5, %v19563_v50 }
 0x1bc   : > { %13405 = vmatmul.mubr.msk.f32.gmra.mrb[12].mxu0 %vm1164_vm1, %v15980_v1  ;;  %v3973_v1 = vld [vmem:[%s15652_s23 + $0xa9] sm:$0xff] }
 0x1bd   : > { %13407 = vmatprep.mubr.msk.f32.mxu0 %vm1164_vm1, %v3580_v58  ;;  %v19565_v58 = vld [vmem:[#allocation41_spill] sm:$0xff] }
 0x1c0   : > { %13408 = vmatmul.mubr.msk.f32.gmra.mrb[14].mxu0 %vm1164_vm1, %v15997_v47  ;;  %v3974_v47 = vld [vmem:[%s15652_s23 + $0xb1] sm:$0xff] }
 0x1c1   : > { %13410 = vmatprep.mubr.msk.f32.mxu0 %vm1164_vm1, %v3582_v61  ;;  %v19566_v61 = vld [vmem:[#allocation43_spill] sm:$0xff] }
 0x1c4   : > { %13411 = vmatmul.mubr.msk.f32.gmra.mrb[16].mxu0 %vm1164_vm1, %v16014_v35  ;;  %v3975_v35 = vld [vmem:[%s15652_s23 + $0xb9] sm:$0xff] }
 0x1c5   : > { %13413 = vmatprep.mubr.msk.f32.mxu0 %vm1164_vm1, %v3584_v63 }
 0x1c8   : > { %13414 = vmatmul.mubr.msk.f32.gmra.mrb[18].mxu0 %vm1164_vm1, %v16031_v59  ;;  %v3976_v59 = vld [vmem:[%s15652_s23 + $0xc1] sm:$0xff] }
 0x1c9   : > { %13416 = vmatprep.mubr.msk.f32.mxu0 %vm1164_vm1, %v3586_v0  ;;  %v4381_v0 = vsel %vm19502_vm15, 0.5, %v19566_v61 }
 0x1cc   : > { %13417 = vmatmul.mubr.msk.f32.gmra.mrb[20].mxu0 %vm1164_vm1, %v16048_v39  ;;  %v3977_v39 = vld [vmem:[%s15652_s23 + $0xc9] sm:$0xff] }
 0x1cd   : > { %13419 = vmatprep.mubr.msk.f32.mxu0 %vm1164_vm1, %v3588_v37  ;;  %v19568_v37 = vld [vmem:[#allocation44_spill] sm:$0xff] }
 0x1d0   : > { %13420 = vmatmul.mubr.msk.f32.gmra.mrb[22].mxu0 %vm1164_vm1, %v16064_v60  ;;  %v3978_v60 = vld [vmem:[%s15652_s23 + $0xd1] sm:$0xff] }
 0x1d1   : > { %13422 = vmatprep.mubr.msk.f32.mxu0 %vm1164_vm1, %v3590_v27  ;;  %v19569_v27 = vld [vmem:[#allocation46_spill] sm:$0xff] }
 0x1d4   : > { %13423 = vmatmul.mubr.msk.f32.gmra.mrb[24].mxu0 %vm1164_vm1, %v16081_v36  ;;  %v3980_v36 = vld [vmem:[%s15652_s23 + $0xe1] sm:$0xff] }
 0x1d5   : > { %13425 = vmatprep.mubr.msk.f32.mxu0 %vm1164_vm1, %v3592_v24  ;;  %v19570_v24 = vld [vmem:[#allocation39_spill] sm:$0xff] }
 0x1d6   : > { %vm19571_vm10 = vnez %v19570_v24 }
 0x1d8   : > { %13426 = vmatmul.mubr.msk.f32.gmra.mrb[26].mxu0 %vm1164_vm1, %v16091_v16  ;;  %v3957_v16 = vld [vmem:[%s15652_s23 + $0x29] sm:$0xff] }
 0x1d9   : > { %13428 = vmatprep.mubr.msk.f32.mxu0 %vm1164_vm1, %v3594_v21  ;;  %v4383_v21 = vsel %vm19571_vm10, 0.5, %v19569_v27 }
 0x1dc   : > { %13429 = vmatmul.mubr.msk.f32.gmra.mrb[28].mxu0 %vm1164_vm1, %v19558_v33 }
 0x1dd   : > { %13431 = vmatprep.mubr.msk.f32.mxu0 %vm1164_vm1, %v3596_v32  ;;  %v19574_v32 = vld [vmem:[#allocation42_spill] sm:$0xff] }
 0x1de   : > { %vm19575_vm11 = vnez %v19574_v32 }
 0x1df   : > { %v4385_v33 = vsel %vm19575_vm11, 0.5, %v19573_v25 }
 0x1e0   : > { %13432 = vmatmul.mubr.msk.f32.gmra.mrb[30].mxu0 %vm1164_vm1, %v3565_v22  ;;  %v19576_v22 = vld [vmem:[#allocation50_spill] sm:$0xff] }
 0x1e1   : > { %13436 = vmatprep.mubr.msk.f32.mxu0 %vm1164_vm1, %v3956_v42  ;;  %v19577_v42 = vld [vmem:[#allocation52_spill] sm:$0xff] }
 0x1e4   : > { %13437 = vmatmul.mubr.msk.f32.vlgmr.msra.gmra.mrb[0].mxu0 %vm1164_vm1, %v3957_v16  ;;  %v19578_v16 = vld [vmem:[#allocation45_spill] sm:$0xff] }
 0x1e5   : > { %13485 = vmatpush3.msk.msra.mxu0 %vm19559_vm9, %v11321_v20  ;;  %13439 = vmatprep.mubr.msk.f32.mxu0 %vm1164_vm1, %v3958_v3  ;;  %v19561_v20 = vld [vmem:[#allocation8_spill] sm:$0xff]  ;;  %vm19579_vm15 = vnez %v19578_v16  ;;  %vm10711_vm9 = vcmask 130048  }
 0x1e6   : > { %v4387_v3 = vsel %vm19579_vm15, 0.5, %v19577_v42  ;;  %14578 = vmatprep.subr.bf16.mxu0 %v19309_v11 }
 0x1e8   : > { %13440 = vmatmul.mubr.msk.f32.gmra.mrb[2].mxu0 %vm1164_vm1, %v3959_v28  ;;  %v19580_v28 = vld [vmem:[#allocation53_spill] sm:$0xff] }
 0x1e9   : > { %13442 = vmatprep.mubr.msk.f32.mxu0 %vm1164_vm1, %v3960_v34  ;;  %v19581_v34 = vld [vmem:[#allocation55_spill] sm:$0xff] }
 0x1ec   : > { %13443 = vmatmul.mubr.msk.f32.gmra.mrb[4].mxu0 %vm1164_vm1, %v3961_v40  ;;  %v19582_v40 = vld [vmem:[#allocation48_spill] sm:$0xff] }
 0x1ed   : > { %13445 = vmatprep.mubr.msk.f32.mxu0 %vm1164_vm1, %v3962_v43  ;;  %vm19583_vm13 = vnez %v19582_v40 }
 0x1ee   : > { %v4389_v43 = vsel %vm19583_vm13, 0.5, %v19581_v34 }
 0x1f0   : > { %13446 = vmatmul.mubr.msk.f32.gmra.mrb[6].mxu0 %vm1164_vm1, %v3963_v46  ;;  %v19584_v46 = vld [vmem:[#allocation56_spill] sm:$0xff] }
 0x1f1   : > { %13448 = vmatprep.mubr.msk.f32.mxu0 %vm1164_vm1, %v3964_v49  ;;  %v19585_v49 = vld [vmem:[#allocation51_spill] sm:$0xff] }
 0x1f2   : > { %vm19586_vm12 = vnez %v19585_v49 }
 0x1f4   : > { %13449 = vmatmul.mubr.msk.f32.gmra.mrb[8].mxu0 %vm1164_vm1, %v3965_v53  ;;  %v4391_v53 = vsel %vm19586_vm12, 0.5, %v19524_v19  ;;  %v19594_v19 = vld [vmem:[#allocation65_spill] sm:$0xff] }
 0x1f5   : > { %13451 = vmatprep.mubr.msk.f32.mxu0 %vm1164_vm1, %v3966_v56  ;;  %v19587_v56 = vld [vmem:[#allocation59_spill] sm:$0xff] }
 0x1f8   : > { %13452 = vmatmul.mubr.msk.f32.gmra.mrb[10].mxu0 %vm1164_vm1, %v3967_v62  ;;  %v19588_v62 = vld [vmem:[#allocation61_spill] sm:$0xff] }
 0x1f9   : > { %13454 = vmatprep.mubr.msk.f32.mxu0 %vm1164_vm1, %v3968_v2  ;;  %v19589_v2 = vld [vmem:[#allocation54_spill] sm:$0xff] }
 0x1fa   : > { %vm19590_vm2 = vnez %v19589_v2 }
 0x1fc   : > { %13455 = vmatmul.mubr.msk.f32.gmra.mrb[12].mxu0 %vm1164_vm1, %v3969_v5  ;;  %v4393_v5 = vsel %vm19590_vm2, 0.5, %v19588_v62 }
 0x1fd   : > { %13457 = vmatprep.mubr.msk.f32.mxu0 %vm1164_vm1, %v3970_v41  ;;  %v19591_v41 = vld [vmem:[#allocation62_spill] sm:$0xff] }
 0x200   : > { %13458 = vmatmul.mubr.msk.f32.gmra.mrb[14].mxu0 %vm1164_vm1, %v3971_v48  ;;  %v19592_v48 = vld [vmem:[#allocation57_spill] sm:$0xff] }
 0x201   : > { %13460 = vmatprep.mubr.msk.f32.mxu0 %vm1164_vm1, %v3972_v52  ;;  %vm19593_vm3 = vnez %v19592_v48 }
 0x202   : > { %v4395_v52 = vsel %vm19593_vm3, 0.5, %v19532_v14 }
 0x204   : > { %13461 = vmatmul.mubr.msk.f32.gmra.mrb[16].mxu0 %vm1164_vm1, %v3973_v1  ;;  %v19595_v1 = vld [vmem:[#allocation60_spill] sm:$0xff] }
 0x205   : > { %13463 = vmatprep.mubr.msk.f32.mxu0 %vm1164_vm1, %v3974_v47  ;;  %vm19596_vm4 = vnez %v19595_v1 }
 0x206   : > { %v4397_v47 = vsel %vm19596_vm4, 0.5, %v19536_v7  ;;  %v4401_v7 = vsel %vm19542_vm14, 0.5, %v16326_v26  ;;  %v4407_v26 = vsel %vm16338_vm0, 0.5, %v16649_v18  ;;  %vm19604_vm14 = vnez %v19458_v30  ;;  %v4811_v30 = vld [vmem:[%s19150_s5 + $0x10] sm:$0xff] }
 0x207   : > { %vm4813_vm0 = vcmask 261120  }
 0x208   : > { %13464 = vmatmul.mubr.msk.f32.gmra.mrb[18].mxu0 %vm1164_vm1, %v3975_v35  ;;  %v19597_v35 = vld [vmem:[#allocation63_spill] sm:$0xff] }
 0x209   : > { %13466 = vmatprep.mubr.msk.f32.mxu0 %vm1164_vm1, %v3976_v59  ;;  %vm19598_vm5 = vnez %v19597_v35 }
 0x20a   : > { %v4399_v14 = vsel %vm19598_vm5, 0.5, %v19540_v45  ;;  %v4376_v45 = vld [vmem:[%s15652_s23 + $0x112] sm:$0xff] }
 0x20c   : > { %13467 = vmatmul.mubr.msk.f32.gmra.mrb[20].mxu0 %vm1164_vm1, %v3977_v39 }
 0x20d   : > { %13469 = vmatprep.mubr.msk.f32.mxu0 %vm1164_vm1, %v3978_v60  ;;  %v4812_v60 = vld [vmem:[%s19150_s5 + $0x18] sm:$0xff] }
 0x210   : > { %13470 = vmatmul.mubr.msk.f32.gmra.mrb[22].mxu0 %vm1164_vm1, %v3979_v23  ;;  %v16937_v23 = vpack.c.bf16 %v4812_v60, %v4811_v30 }
 0x211   : > { %13472 = vmatprep.mubr.msk.f32.mxu0 %vm1164_vm1, %v3980_v36  ;;  %v19310_v36 = vmov 0.0  }
 0x212   : > { %19606 = vst [vmem:[#allocation10_spill] sm:$0xff] %v16937_v23 }
 0x214   : > { %13473 = vmatmul.mubr.msk.f32.gmra.mrb[24].mxu0 %vm1164_vm1, %v3981_v12  ;;  %v16953_v12 = vld [vmem:[%s19607_s2] ss:$0 sm:$0xff]  ;;  %s11892_s2 = sshll.u32 %s15611_s25, 10  ;;  %s19104_s25 = scalar_lea.sflag [#allocation3], %s512_s18 }
 0x215   : > { %13475 = vmatprep.mubr.msk.f32.mxu0 %vm1164_vm1, %v3982_v55  ;;  %s19095_s28 = scalar_lea.hbm %s19161_s16, %s11892_s2  ;;  %s15441_s2 = scalar_lea.vmem %s15440_s19, 2048 }
 0x218   : > { %13476 = vmatmul.mubr.msk.f32.gmra.mrb[26].mxu0 %vm1164_vm1, %v3983_v8 }
 0x219   : > { %13478 = vmatprep.mubr.msk.f32.mxu0 %vm1164_vm1, %v19560_v10 }
 0x21c   : > { %13479 = vmatmul.mubr.msk.f32.gmra.mrb[28].mxu0 %vm1164_vm1, %v19561_v20 }
 0x21d   : > { %13481 = vmatprep.mubr.msk.f32.mxu0 %vm1164_vm1, %v3986_v4 }
 0x220   : > { %13482 = vmatmul.mubr.msk.f32.gmra.mrb[30].mxu0 %vm1164_vm1, %v3987_v38 }
 0x221   : > { %13486 = vmatprep.mubr.msk.f32.mxu0 %vm1164_vm1, %v19562_v44 }
 0x224   : > { %13487 = vmatmul.mubr.msk.f32.vlgmr.msra.gmra.mrb[0].mxu0 %vm1164_vm1, %v4379_v57 }
 0x225   : > { %13489 = vmatprep.mubr.msk.f32.mxu0 %vm1164_vm1, %v19565_v58 }
 0x228   : > { %13490 = vmatmul.mubr.msk.f32.gmra.mrb[2].mxu0 %vm1164_vm1, %v4381_v0 }
 0x229   : > { %13492 = vmatprep.mubr.msk.f32.mxu0 %vm1164_vm1, %v19568_v37 }
 0x22c   : > { %13493 = vmatmul.mubr.msk.f32.gmra.mrb[4].mxu0 %vm1164_vm1, %v4383_v21 }
 0x22d   : > { %13495 = vmatprep.mubr.msk.f32.mxu0 %vm1164_vm1, %v19572_v29 }
 0x230   : > { %13496 = vmatmul.mubr.msk.f32.gmra.mrb[6].mxu0 %vm1164_vm1, %v4385_v33 }
 0x231   : > { %13498 = vmatprep.mubr.msk.f32.mxu0 %vm1164_vm1, %v19576_v22 }
 0x234   : > { %13499 = vmatmul.mubr.msk.f32.gmra.mrb[8].mxu0 %vm1164_vm1, %v4387_v3 }
 0x235   : > { %13501 = vmatprep.mubr.msk.f32.mxu0 %vm1164_vm1, %v19580_v28 }
 0x238   : > { %13502 = vmatmul.mubr.msk.f32.gmra.mrb[10].mxu0 %vm1164_vm1, %v4389_v43 }
 0x239   : > { %13504 = vmatprep.mubr.msk.f32.mxu0 %vm1164_vm1, %v19584_v46 }
 0x23c   : > { %13505 = vmatmul.mubr.msk.f32.gmra.mrb[12].mxu0 %vm1164_vm1, %v4391_v53 }
 0x23d   : > { %13507 = vmatprep.mubr.msk.f32.mxu0 %vm1164_vm1, %v19587_v56 }
 0x240   : > { %13508 = vmatmul.mubr.msk.f32.gmra.mrb[14].mxu0 %vm1164_vm1, %v4393_v5 }
 0x241   : > { %13510 = vmatprep.mubr.msk.f32.mxu0 %vm1164_vm1, %v19591_v41 }
 0x244   : > { %13511 = vmatmul.mubr.msk.f32.gmra.mrb[16].mxu0 %vm1164_vm1, %v4395_v52 }
 0x245   : > { %13513 = vmatprep.mubr.msk.f32.mxu0 %vm1164_vm1, %v19594_v19 }
 0x248   : > { %13514 = vmatmul.mubr.msk.f32.gmra.mrb[18].mxu0 %vm1164_vm1, %v4397_v47 }
 0x249   : > { %13516 = vmatprep.mubr.msk.f32.mxu0 %vm1164_vm1, %v19539_v9  ;;  %v19600_v9 = vld [vmem:[#allocation69_spill] sm:$0xff] }
 0x24a   : > { %vm19601_vm6 = vnez %v19600_v9 }
 0x24b   : > { %v4403_v39 = vsel %vm19601_vm6, 0.5, %v16343_v15  ;;  %v4377_v15 = vld [vmem:[%s15652_s23 + $0x11a] sm:$0xff]  ;;  %s15435_s23 = scalar_lea.vmem %s19097_s20, 1024 }
 0x24c   : > { %13517 = vmatmul.mubr.msk.f32.gmra.mrb[20].mxu0 %vm1164_vm1, %v4399_v14  ;;  %p15436_p11 = scmp.ne.s32.totalorder %s19097_s20, %s15435_s23  ;;  %p15443_p1 = scmp.lt.s32.totalorder %s15441_s2, %s15435_s23 }
 0x24d   : > { %13519 = vmatprep.mubr.msk.f32.mxu0 %vm1164_vm1, %v16319_v54  ;;  %v4405_v54 = vsel %vm19602_vm7, 0.5, %v16359_v17  ;;  %v4809_v17 = vld [vmem:[%s19150_s5] sm:$0xff] }
 0x24e   : > { %p15437_p12 = pnand %p15436_p11, %p15628_p5  ;;  %p15444_p2 = por %p15443_p1, %p15442_p0 }
 0x250   : > { %13520 = vmatmul.mubr.msk.f32.gmra.mrb[22].mxu0 %vm1164_vm1, %v4401_v7  ;;  %p15438_p13 = pneg %p15437_p12 }
 0x251   : > { %13522 = vmatprep.mubr.msk.f32.mxu0 %vm1164_vm1, %v16336_v13 }
 0x252   : > { %p15445_p3 = pnand %p15444_p2, %p15438_p13 }
 0x254   : > { %13523 = vmatmul.mubr.msk.f32.gmra.mrb[24].mxu0 %vm1164_vm1, %v4403_v39 }
 0x255   : > { %13525 = vmatprep.mubr.msk.f32.mxu0 %vm1164_vm1, %v16352_v31  ;;  %v4409_v31 = vsel %vm19604_vm14, 0.5, %v4377_v15 }
 0x258   : > { %13526 = vmatmul.mubr.msk.f32.gmra.mrb[26].mxu0 %vm1164_vm1, %v4405_v54 }
 0x259   : > { %13528 = vmatprep.mubr.msk.f32.mxu0 %vm1164_vm1, %v16646_v6  ;;  %v4810_v6 = vld [vmem:[%s19150_s5 + $0x8] sm:$0xff] }
 0x25a   : > { %v16926_v18 = vpack.c.bf16 %v4810_v6, %v4809_v17 }
 0x25c   : > { %13529 = vmatmul.mubr.msk.f32.gmra.mrb[28].mxu0 %vm1164_vm1, %v4407_v26  ;;  %19605 = vst [vmem:[#allocation9_spill] sm:$0xff] %v16926_v18  ;;  %14208 = vmatpush3.bf16.msra.mxu1 %v16926_v18 }
 0x25d   : > { %13531 = vmatprep.mubr.msk.f32.mxu0 %vm1164_vm1, %v4376_v45  ;;  %14209 = vmatprep.subr.bf16.mxu1 %v19309_v11 }
 0x25e   : > { %14580 = vmatpush3.bf16.msra.mxu0 %v16926_v18 }
 0x25f   : > { %14581 = vmatprep.subr.bf16.mxu0 %v19309_v11 }
 0x260   : > { %13532 = vmatmul.mubr.msk.f32.gmra.mrb[30].mxu0 %vm1164_vm1, %v4409_v31  ;;  %vm15500_vm1 = vmmov 0   ;;  %14211 = vmatpush3.bf16.msra.mxu1 %v16937_v23 }
 0x261   : > { %13542 = vmatprep.mubr.msk.f32.mxu1 %vm15500_vm1, %v19310_v36  ;;  %13744 = vmatprep.mubr.msk.f32.mxu0 %vm15500_vm1, %v19310_v36 }
 0x262   : > { %14212 = vmatprep.subr.bf16.mxu1 %v19309_v11  ;;  %14583 = vmatpush3.bf16.msra.mxu0 %v16937_v23 }
 0x263   : > { %14584 = vmatprep.subr.bf16.mxu0 %v19309_v11 }
 0x2f7   : > { %v13488_v55 = vpop.f32.mrb[0].mxu0 }
 0x2f8   : > { %v16956_v8 = vadd.f32 %v13488_v55, %v16953_v12  ;;  %v4577_v10 = vpop.f32.mrb[1].mxu0 }
 0x2f9   : > { %v16959_v4 = vadd.f32 %v16953_v12, %v4577_v10 }
 0x2fa   : > { %v4815_v20 = vsel %vm4813_vm0, %v16956_v8, 0.0 }
 0x2fb   : > { %v4814_v38 = vsel %vm4813_vm0, %v16959_v4, 0.0  ;;  %v13491_v44 = vpop.f32.mrb[2].mxu0 }
 0x2fc   : > { %v4587_v50 = vpop.f32.mrb[3].mxu0  ;;  %v16966_v51 = vadd.f32 %v13491_v44, %v16953_v12  ;;  %v4816_v58 = vadd.f32 %v4815_v20, %v4814_v38 }
 0x2fd   : > { %v16969_v57 = vadd.f32 %v16953_v12, %v4587_v50 }
 0x2fe   : > { %v4819_v27 = vsel %vm4813_vm0, %v16966_v51, 0.0 }
 0x2ff   : > { %v4817_v61 = vsel %vm4813_vm0, %v16969_v57, 0.0  ;;  %v13494_v63 = vpop.f32.mrb[4].mxu0 }
 0x300   : > { %v4818_v0 = vadd.f32 %v4817_v61, %v4816_v58  ;;  %v4597_v37 = vpop.f32.mrb[5].mxu0  ;;  %v16976_v24 = vadd.f32 %v13494_v63, %v16953_v12 }
 0x301   : > { %v16979_v21 = vadd.f32 %v16953_v12, %v4597_v37 }
 0x302   : > { %v4820_v29 = vadd.f32 %v4819_v27, %v4818_v0  ;;  %v4823_v42 = vsel %vm4813_vm0, %v16976_v24, 0.0 }
 0x303   : > { %v4821_v25 = vsel %vm4813_vm0, %v16979_v21, 0.0  ;;  %v13497_v32 = vpop.f32.mrb[6].mxu0 }
 0x304   : > { %v4822_v33 = vadd.f32 %v4821_v25, %v4820_v29  ;;  %v4607_v22 = vpop.f32.mrb[7].mxu0  ;;  %v16986_v16 = vadd.f32 %v13497_v32, %v16953_v12 }
 0x305   : > { %v16989_v3 = vadd.f32 %v16953_v12, %v4607_v22 }
 0x306   : > { %v4824_v28 = vadd.f32 %v4823_v42, %v4822_v33  ;;  %v4827_v49 = vsel %vm4813_vm0, %v16986_v16, 0.0 }
 0x307   : > { %v4825_v34 = vsel %vm4813_vm0, %v16989_v3, 0.0  ;;  %v13500_v40 = vpop.f32.mrb[8].mxu0 }
 0x308   : > { %v4826_v43 = vadd.f32 %v4825_v34, %v4824_v28  ;;  %v4617_v46 = vpop.f32.mrb[9].mxu0  ;;  %v16996_v53 = vadd.f32 %v13500_v40, %v16953_v12 }
 0x309   : > { %v16999_v56 = vadd.f32 %v16953_v12, %v4617_v46 }
 0x30a   : > { %v4828_v62 = vadd.f32 %v4827_v49, %v4826_v43  ;;  %v4831_v52 = vsel %vm4813_vm0, %v16996_v53, 0.0 }
 0x30b   : > { %v4829_v2 = vsel %vm4813_vm0, %v16999_v56, 0.0  ;;  %v13503_v5 = vpop.f32.mrb[10].mxu0 }
 0x30c   : > { %v4830_v41 = vadd.f32 %v4829_v2, %v4828_v62  ;;  %v4627_v48 = vpop.f32.mrb[11].mxu0  ;;  %v17006_v19 = vadd.f32 %v13503_v5, %v16953_v12 }
 0x30d   : > { %v17009_v1 = vadd.f32 %v16953_v12, %v4627_v48 }
 0x30e   : > { %v4832_v47 = vadd.f32 %v4831_v52, %v4830_v41  ;;  %v4835_v9 = vsel %vm4813_vm0, %v17006_v19, 0.0 }
 0x30f   : > { %v4833_v35 = vsel %vm4813_vm0, %v17009_v1, 0.0  ;;  %v13506_v14 = vpop.f32.mrb[12].mxu0 }
 0x310   : > { %v4834_v59 = vadd.f32 %v4833_v35, %v4832_v47  ;;  %v4637_v7 = vpop.f32.mrb[13].mxu0  ;;  %v17016_v39 = vadd.f32 %v13506_v14, %v16953_v12 }
 0x311   : > { %v17019_v54 = vadd.f32 %v16953_v12, %v4637_v7 }
 0x312   : > { %v4836_v13 = vadd.f32 %v4835_v9, %v4834_v59  ;;  %v4839_v17 = vsel %vm4813_vm0, %v17016_v39, 0.0 }
 0x313   : > { %v4837_v26 = vsel %vm4813_vm0, %v17019_v54, 0.0  ;;  %v13509_v45 = vpop.f32.mrb[14].mxu0 }
 0x314   : > { %v4838_v15 = vadd.f32 %v4837_v26, %v4836_v13  ;;  %v4647_v31 = vpop.f32.mrb[15].mxu0  ;;  %v17026_v6 = vadd.f32 %v13509_v45, %v16953_v12 }
 0x315   : > { %v17029_v30 = vadd.f32 %v16953_v12, %v4647_v31 }
 0x316   : > { %v4840_v60 = vadd.f32 %v4839_v17, %v4838_v15  ;;  %v4843_v44 = vsel %vm4813_vm0, %v17026_v6, 0.0 }
 0x317   : > { %v4841_v55 = vsel %vm4813_vm0, %v17029_v30, 0.0  ;;  %v13512_v10 = vpop.f32.mrb[16].mxu0 }
 0x318   : > { %v4842_v20 = vadd.f32 %v4841_v55, %v4840_v60  ;;  %v4657_v38 = vpop.f32.mrb[17].mxu0  ;;  %v17036_v50 = vadd.f32 %v13512_v10, %v16953_v12 }
 0x319   : > { %v17039_v58 = vadd.f32 %v16953_v12, %v4657_v38 }
 0x31a   : > { %v4844_v61 = vadd.f32 %v4843_v44, %v4842_v20  ;;  %v4847_v29 = vsel %vm4813_vm0, %v17036_v50, 0.0 }
 0x31b   : > { %v4845_v63 = vsel %vm4813_vm0, %v17039_v58, 0.0  ;;  %v13515_v0 = vpop.f32.mrb[18].mxu0 }
 0x31c   : > { %v4846_v37 = vadd.f32 %v4845_v63, %v4844_v61  ;;  %v4667_v27 = vpop.f32.mrb[19].mxu0  ;;  %v17046_v25 = vadd.f32 %v13515_v0, %v16953_v12 }
 0x31d   : > { %v17049_v32 = vadd.f32 %v16953_v12, %v4667_v27 }
 0x31e   : > { %v4848_v33 = vadd.f32 %v4847_v29, %v4846_v37  ;;  %v4851_v40 = vsel %vm4813_vm0, %v17046_v25, 0.0 }
 0x31f   : > { %v4849_v22 = vsel %vm4813_vm0, %v17049_v32, 0.0  ;;  %v13518_v42 = vpop.f32.mrb[20].mxu0 }
 0x320   : > { %v4850_v28 = vadd.f32 %v4849_v22, %v4848_v33  ;;  %v4677_v34 = vpop.f32.mrb[21].mxu0  ;;  %v17056_v43 = vadd.f32 %v13518_v42, %v16953_v12 }
 0x321   : > { %v17059_v46 = vadd.f32 %v16953_v12, %v4677_v34 }
 0x322   : > { %v4852_v49 = vadd.f32 %v4851_v40, %v4850_v28  ;;  %v4855_v48 = vsel %vm4813_vm0, %v17056_v43, 0.0 }
 0x323   : > { %v4853_v62 = vsel %vm4813_vm0, %v17059_v46, 0.0  ;;  %v13521_v2 = vpop.f32.mrb[22].mxu0 }
 0x324   : > { %v4854_v5 = vadd.f32 %v4853_v62, %v4852_v49  ;;  %v4687_v41 = vpop.f32.mrb[23].mxu0  ;;  %v17066_v52 = vadd.f32 %v13521_v2, %v16953_v12 }
 0x325   : > { %v17069_v47 = vadd.f32 %v16953_v12, %v4687_v41 }
 0x326   : > { %v4856_v35 = vadd.f32 %v4855_v48, %v4854_v5  ;;  %v4859_v13 = vsel %vm4813_vm0, %v17066_v52, 0.0 }
 0x327   : > { %v4857_v14 = vsel %vm4813_vm0, %v17069_v47, 0.0  ;;  %v13524_v59 = vpop.f32.mrb[24].mxu0 }
 0x328   : > { %v4858_v7 = vadd.f32 %v4857_v14, %v4856_v35  ;;  %v4697_v9 = vpop.f32.mrb[25].mxu0  ;;  %v17076_v26 = vadd.f32 %v13524_v59, %v16953_v12 }
 0x329   : > { %v17079_v45 = vadd.f32 %v16953_v12, %v4697_v9 }
 0x32a   : > { %v4860_v15 = vadd.f32 %v4859_v13, %v4858_v7  ;;  %v4863_v10 = vsel %vm4813_vm0, %v17076_v26, 0.0 }
 0x32b   : > { %v4861_v31 = vsel %vm4813_vm0, %v17079_v45, 0.0  ;;  %v13527_v17 = vpop.f32.mrb[26].mxu0 }
 0x32c   : > { %v4862_v60 = vadd.f32 %v4861_v31, %v4860_v15  ;;  %v4707_v55 = vpop.f32.mrb[27].mxu0  ;;  %v17086_v20 = vadd.f32 %v13527_v17, %v16953_v12 }
 0x32d   : > { %v17089_v38 = vadd.f32 %v16953_v12, %v4707_v55  ;;  %v19608_v55 = vld [vmem:[#allocation28_spill] sm:$0xff] }
 0x32e   : > { %v4864_v44 = vadd.f32 %v4863_v10, %v4862_v60  ;;  %v4867_v27 = vsel %vm4813_vm0, %v17086_v20, 0.0  ;;  %v17122_v10 = vsub.s32 0, %v19608_v55 }
 0x32f   : > { %v4865_v61 = vsel %vm4813_vm0, %v17089_v38, 0.0  ;;  %v13530_v63 = vpop.f32.mrb[28].mxu0 }
 0x330   : > { %v4866_v0 = vadd.f32 %v4865_v61, %v4864_v44  ;;  %v4717_v37 = vpop.f32.mrb[29].mxu0  ;;  %v17096_v29 = vadd.f32 %v13530_v63, %v16953_v12  ;;  %19609 = vst [vmem:[#allocation11_spill] sm:$0xff] %v17122_v10 }
 0x331   : > { %v17099_v33 = vadd.f32 %v16953_v12, %v4717_v37 }
 0x332   : > { %v4868_v22 = vadd.f32 %v4867_v27, %v4866_v0  ;;  %v4871_v49 = vsel %vm4813_vm0, %v17096_v29, 0.0 }
 0x333   : > { %v4869_v42 = vsel %vm4813_vm0, %v17099_v33, 0.0  ;;  %v13533_v28 = vpop.f32.mrb[30].mxu0 }
 0x334   : > { %v4870_v34 = vadd.f32 %v4869_v42, %v4868_v22  ;;  %v4727_v40 = vpop.f32.mrb[31].mxu0  ;;  %v17106_v62 = vadd.f32 %v13533_v28, %v16953_v12 }
 0x335   : > { %v17109_v2 = vadd.f32 %v16953_v12, %v4727_v40 }
 0x336   : > { %v4872_v5 = vadd.f32 %v4871_v49, %v4870_v34  ;;  %v4875_v35 = vsel %vm4813_vm0, %v17106_v62, 0.0 }
 0x337   : > { %v4873_v41 = vsel %vm4813_vm0, %v17109_v2, 0.0 }
 0x338   : > { %v4874_v48 = vadd.f32 %v4873_v41, %v4872_v5 }
 0x33a   : > { %v4876_v14 = vadd.f32 %v4875_v35, %v4874_v48 }
 0x33c   : > { %v4877_v59 = vrot.slane %v4876_v14, 4 }
 0x33e   : > { %v4878_v7 = vadd.f32 %v4877_v59, %v4876_v14 }
 0x340   : > { %v4879_v9 = vrot.slane %v4878_v7, 2 }
 0x342   : > { %v4880_v13 = vadd.f32 %v4879_v9, %v4878_v7 }
 0x344   : > { %v4881_v15 = vrot.slane %v4880_v13, 1 }
 0x346   : > { %v4882_v31 = vadd.f32 %v4881_v15, %v4880_v13 }
 0x348   : > { %13543 = vmatmul.mubr.msk.f32.vlgmr.msra.gmra.mrb[0].mxu1 %vm4813_vm0, %v4882_v31 }
 0x349   : > { %14214 = vmatpush3.bf16.msra.mxu1 %v16926_v18  ;;  %13553 = vmatprep.mubr.msk.f32.mxu1 %vm15500_vm1, %v19310_v36 }
 0x34a   : > { %14215 = vmatprep.subr.bf16.mxu1 %v19309_v11 }
 0x34d   : > { %14217 = vmatpush3.bf16.msra.mxu1 %v16937_v23 }
 0x41b   : > { %v4952_v12 = vpop.f32.mrb[0].mxu1 }
 0x41c   : > { %v13544_v17 = vpop.f32.mrb[1].mxu1  ;;  %v4957_v60 = vmul.f32 0.0009765625, %v4952_v12 }
 0x41e   : > { %v17125_v44 = vrot.slane %v4957_v60, %v17122_v10 }
 0x420   : > { %v17129_v61 = vsub.f32 %v16959_v4, %v17125_v44  ;;  %v17133_v63 = vsub.f32 %v16956_v8, %v17125_v44  ;;  %v17137_v0 = vsub.f32 %v16969_v57, %v17125_v44  ;;  %v17141_v37 = vsub.f32 %v16966_v51, %v17125_v44 }
 0x421   : > { %v17149_v4 = vsub.f32 %v16979_v21, %v17125_v44  ;;  %v17155_v57 = vsub.f32 %v16976_v24, %v17125_v44  ;;  %v17163_v40 = vsub.f32 %v16989_v3, %v17125_v44  ;;  %v17170_v24 = vsub.f32 %v16986_v16, %v17125_v44 }
 0x422   : > { %v4994_v27 = vmul.f32 %v17129_v61, %v17129_v61  ;;  %v4995_v22 = vmul.f32 %v17133_v63, %v17133_v63  ;;  %v4996_v8 = vmul.f32 %v17137_v0, %v17137_v0  ;;  %v4997_v51 = vmul.f32 %v17141_v37, %v17141_v37 }
 0x423   : > { %v4998_v21 = vmul.f32 %v17149_v4, %v17149_v4  ;;  %v4999_v41 = vmul.f32 %v17155_v57, %v17155_v57  ;;  %v17177_v3 = vsub.f32 %v16999_v56, %v17125_v44  ;;  %v5000_v14 = vmul.f32 %v17163_v40, %v17163_v40 }
 0x424   : > { %v5026_v42 = vsel %vm4813_vm0, %v4994_v27, 0.0  ;;  %v5027_v28 = vsel %vm4813_vm0, %v4995_v22, 0.0  ;;  %v5029_v49 = vsel %vm4813_vm0, %v4996_v8, 0.0  ;;  %v5031_v48 = vsel %vm4813_vm0, %v4997_v51, 0.0 }
 0x425   : > { %v5028_v34 = vadd.f32 %v5027_v28, %v5026_v42  ;;  %v5033_v59 = vsel %vm4813_vm0, %v4998_v21, 0.0  ;;  %v17184_v16 = vsub.f32 %v16996_v53, %v17125_v44  ;;  %v5001_v9 = vmul.f32 %v17170_v24, %v17170_v24 }
 0x426   : > { %v5035_v13 = vsel %vm4813_vm0, %v4999_v41, 0.0  ;;  %v17191_v56 = vsub.f32 %v17009_v1, %v17125_v44  ;;  %v5002_v31 = vmul.f32 %v17177_v3, %v17177_v3  ;;  %v5037_v12 = vsel %vm4813_vm0, %v5000_v14, 0.0 }
 0x427   : > { %v5030_v5 = vadd.f32 %v5029_v49, %v5028_v34  ;;  %v17198_v53 = vsub.f32 %v17006_v19, %v17125_v44  ;;  %v5003_v60 = vmul.f32 %v17184_v16, %v17184_v16  ;;  %v5039_v55 = vsel %vm4813_vm0, %v5001_v9, 0.0 }
 0x428   : > { %v17205_v1 = vsub.f32 %v17019_v54, %v17125_v44  ;;  %v5004_v22 = vmul.f32 %v17191_v56, %v17191_v56  ;;  %v5041_v8 = vsel %vm4813_vm0, %v5002_v31, 0.0  ;;  %v17212_v19 = vsub.f32 %v17016_v39, %v17125_v44 }
 0x429   : > { %v5032_v35 = vadd.f32 %v5031_v48, %v5030_v5  ;;  %v5005_v42 = vmul.f32 %v17198_v53, %v17198_v53  ;;  %v5043_v28 = vsel %vm4813_vm0, %v5003_v60, 0.0  ;;  %v17219_v54 = vsub.f32 %v17029_v30, %v17125_v44 }
 0x42a   : > { %v5006_v21 = vmul.f32 %v17205_v1, %v17205_v1  ;;  %v5045_v49 = vsel %vm4813_vm0, %v5004_v22, 0.0  ;;  %v17226_v39 = vsub.f32 %v17026_v6, %v17125_v44  ;;  %v5007_v41 = vmul.f32 %v17212_v19, %v17212_v19 }
 0x42b   : > { %v5034_v7 = vadd.f32 %v5033_v59, %v5032_v35  ;;  %v5047_v48 = vsel %vm4813_vm0, %v5005_v42, 0.0  ;;  %v17233_v30 = vsub.f32 %v17039_v58, %v17125_v44  ;;  %v5008_v14 = vmul.f32 %v17219_v54, %v17219_v54 }
 0x42c   : > { %v5049_v59 = vsel %vm4813_vm0, %v5006_v21, 0.0  ;;  %v17240_v6 = vsub.f32 %v17036_v50, %v17125_v44  ;;  %v5009_v9 = vmul.f32 %v17226_v39, %v17226_v39  ;;  %v17247_v58 = vsub.f32 %v17049_v32, %v17125_v44 }
 0x42d   : > { %v5036_v15 = vadd.f32 %v5035_v13, %v5034_v7  ;;  %v5051_v13 = vsel %vm4813_vm0, %v5007_v41, 0.0  ;;  %v5010_v31 = vmul.f32 %v17233_v30, %v17233_v30  ;;  %v17254_v50 = vsub.f32 %v17046_v25, %v17125_v44 }
 0x42e   : > { %v5011_v60 = vmul.f32 %v17240_v6, %v17240_v6  ;;  %v17261_v32 = vsub.f32 %v17059_v46, %v17125_v44  ;;  %v5012_v22 = vmul.f32 %v17247_v58, %v17247_v58  ;;  %v17268_v25 = vsub.f32 %v17056_v43, %v17125_v44 }
 0x42f   : > { %v5038_v17 = vadd.f32 %v5037_v12, %v5036_v15  ;;  %v5053_v12 = vsel %vm4813_vm0, %v5008_v14, 0.0  ;;  %v5013_v42 = vmul.f32 %v17254_v50, %v17254_v50  ;;  %v17275_v46 = vsub.f32 %v17069_v47, %v17125_v44 }
 0x430   : > { %v5014_v21 = vmul.f32 %v17261_v32, %v17261_v32  ;;  %v17282_v43 = vsub.f32 %v17066_v52, %v17125_v44  ;;  %v5015_v41 = vmul.f32 %v17268_v25, %v17268_v25  ;;  %v17289_v47 = vsub.f32 %v17079_v45, %v17125_v44 }
 0x431   : > { %v5040_v27 = vadd.f32 %v5039_v55, %v5038_v17  ;;  %v5055_v55 = vsel %vm4813_vm0, %v5009_v9, 0.0  ;;  %v5016_v14 = vmul.f32 %v17275_v46, %v17275_v46  ;;  %v17296_v52 = vsub.f32 %v17076_v26, %v17125_v44 }
 0x432   : > { %v5017_v9 = vmul.f32 %v17282_v43, %v17282_v43  ;;  %v17303_v45 = vsub.f32 %v17089_v38, %v17125_v44  ;;  %v17310_v26 = vsub.f32 %v17086_v20, %v17125_v44  ;;  %v17317_v38 = vsub.f32 %v17099_v33, %v17125_v44 }
 0x433   : > { %v5042_v51 = vadd.f32 %v5041_v8, %v5040_v27  ;;  %v5057_v8 = vsel %vm4813_vm0, %v5010_v31, 0.0  ;;  %v5018_v31 = vmul.f32 %v17289_v47, %v17289_v47  ;;  %v17324_v20 = vsub.f32 %v17096_v29, %v17125_v44 }
 0x434   : > { %v17331_v33 = vsub.f32 %v17109_v2, %v17125_v44  ;;  %v17338_v29 = vsub.f32 %v17106_v62, %v17125_v44 }
 0x435   : > { %v5044_v34 = vadd.f32 %v5043_v28, %v5042_v51  ;;  %v5059_v28 = vsel %vm4813_vm0, %v5011_v60, 0.0  ;;  %v5019_v60 = vmul.f32 %v17296_v52, %v17296_v52 }
 0x436   : > { %v5024_v2 = vmul.f32 %v17331_v33, %v17331_v33 }
 0x437   : > { %v5046_v5 = vadd.f32 %v5045_v49, %v5044_v34  ;;  %v5061_v49 = vsel %vm4813_vm0, %v5012_v22, 0.0  ;;  %v5020_v22 = vmul.f32 %v17303_v45, %v17303_v45 }
 0x438   : > { %v5085_v62 = vsel %vm4813_vm0, %v5024_v2, 0.0 }
 0x439   : > { %v5048_v35 = vadd.f32 %v5047_v48, %v5046_v5  ;;  %v5063_v48 = vsel %vm4813_vm0, %v5013_v42, 0.0  ;;  %v5021_v42 = vmul.f32 %v17310_v26, %v17310_v26 }
 0x43b   : > { %v5050_v7 = vadd.f32 %v5049_v59, %v5048_v35  ;;  %v5065_v59 = vsel %vm4813_vm0, %v5014_v21, 0.0  ;;  %v5022_v21 = vmul.f32 %v17317_v38, %v17317_v38 }
 0x43d   : > { %v5052_v15 = vadd.f32 %v5051_v13, %v5050_v7  ;;  %v5067_v13 = vsel %vm4813_vm0, %v5015_v41, 0.0  ;;  %v5023_v41 = vmul.f32 %v17324_v20, %v17324_v20 }
 0x43f   : > { %v5054_v17 = vadd.f32 %v5053_v12, %v5052_v15  ;;  %v5069_v12 = vsel %vm4813_vm0, %v5016_v14, 0.0  ;;  %v5081_v14 = vsel %vm4813_vm0, %v5022_v21, 0.0 }
 0x441   : > { %v5056_v27 = vadd.f32 %v5055_v55, %v5054_v17  ;;  %v5071_v55 = vsel %vm4813_vm0, %v5017_v9, 0.0  ;;  %v5083_v9 = vsel %vm4813_vm0, %v5023_v41, 0.0  ;;  %v17360_v41 = vld [vmem:[%s19148_s3] ss:$0 sm:$0xff] }
 0x443   : > { %v5058_v51 = vadd.f32 %v5057_v8, %v5056_v27  ;;  %v5073_v8 = vsel %vm4813_vm0, %v5018_v31, 0.0 }
 0x445   : > { %v5060_v34 = vadd.f32 %v5059_v28, %v5058_v51  ;;  %v5075_v28 = vsel %vm4813_vm0, %v5019_v60, 0.0 }
 0x447   : > { %v5062_v5 = vadd.f32 %v5061_v49, %v5060_v34  ;;  %v5077_v49 = vsel %vm4813_vm0, %v5020_v22, 0.0 }
 0x449   : > { %v5064_v35 = vadd.f32 %v5063_v48, %v5062_v5  ;;  %v5079_v48 = vsel %vm4813_vm0, %v5021_v42, 0.0  ;;  %v5508_v42 = vld [vmem:[%s19151_s6 + $0x8] sm:$0xff] }
 0x44b   : > { %v5066_v7 = vadd.f32 %v5065_v59, %v5064_v35 }
 0x44d   : > { %v5068_v15 = vadd.f32 %v5067_v13, %v5066_v7  ;;  %v5025_v7 = vmul.f32 %v17338_v29, %v17338_v29 }
 0x44f   : > { %v5070_v17 = vadd.f32 %v5069_v12, %v5068_v15  ;;  %v5087_v15 = vsel %vm4813_vm0, %v5025_v7, 0.0 }
 0x451   : > { %v5072_v27 = vadd.f32 %v5071_v55, %v5070_v17 }
 0x453   : > { %v5074_v51 = vadd.f32 %v5073_v8, %v5072_v27 }
 0x455   : > { %v5076_v34 = vadd.f32 %v5075_v28, %v5074_v51 }
 0x457   : > { %v5078_v5 = vadd.f32 %v5077_v49, %v5076_v34 }
 0x459   : > { %v5080_v35 = vadd.f32 %v5079_v48, %v5078_v5 }
 0x45b   : > { %v5082_v59 = vadd.f32 %v5081_v14, %v5080_v35 }
 0x45d   : > { %v5084_v13 = vadd.f32 %v5083_v9, %v5082_v59 }
 0x45f   : > { %v5086_v44 = vadd.f32 %v5085_v62, %v5084_v13 }
 0x461   : > { %v5088_v31 = vadd.f32 %v5087_v15, %v5086_v44 }
 0x463   : > { %v5089_v12 = vrot.slane %v5088_v31, 4 }
 0x465   : > { %v5090_v17 = vadd.f32 %v5089_v12, %v5088_v31 }
 0x467   : > { %v5091_v60 = vrot.slane %v5090_v17, 2 }
 0x469   : > { %v5092_v55 = vadd.f32 %v5091_v60, %v5090_v17 }
 0x46b   : > { %v5093_v27 = vrot.slane %v5092_v55, 1 }
 0x46d   : > { %v5094_v22 = vadd.f32 %v5093_v27, %v5092_v55 }
 0x46f   : > { %13554 = vmatmul.mubr.msk.f32.vlgmr.msra.gmra.mrb[2].mxu1 %vm4813_vm0, %v5094_v22 }
 0x470   : > { %5587 = vmatprep.mubr.f32.mxu1 %v5508_v42 }
 0x542   : > { %v5164_v8 = vpop.f32.mrb[2].mxu1 }
 0x543   : > { %v13555_v51 = vpop.f32.mrb[3].mxu1  ;;  %v5168_v28 = vmul.f32 0.0009765625, %v5164_v8 }
 0x545   : > { %v5169_v34 = vadd.f32 1e-06, %v5168_v28 }
 0x547   : > { %15239 = vrsqrt.f32 %v5169_v34 }
 0x551   : > { %v15240_v21 = vpop.eup %15239 }
 0x552   : > { %v5174_v49 = vrot.slane %v15240_v21, %v17122_v10 }
 0x554   : > { %v5175_v5 = vmul.f32 %v5174_v49, %v17129_v61  ;;  %v5176_v48 = vmul.f32 %v5174_v49, %v17133_v63  ;;  %v5177_v35 = vmul.f32 %v5174_v49, %v17137_v0  ;;  %v5178_v2 = vmul.f32 %v5174_v49, %v17141_v37  ;;  %v17376_v0 = vld [vmem:[%s19149_s4] ss:$0 sm:$0xff] }
 0x555   : > { %v5179_v14 = vmul.f32 %v5174_v49, %v17149_v4  ;;  %v5180_v59 = vmul.f32 %v5174_v49, %v17155_v57  ;;  %v5181_v7 = vmul.f32 %v5174_v49, %v17163_v40  ;;  %v5182_v9 = vmul.f32 %v5174_v49, %v17170_v24 }
 0x556   : > { %v5183_v61 = vmul.f32 %v5174_v49, %v17177_v3  ;;  %v5184_v13 = vmul.f32 %v5174_v49, %v17184_v16  ;;  %v5185_v62 = vmul.f32 %v5174_v49, %v17191_v56  ;;  %v5213_v63 = vmul.f32 %v17360_v41, %v5175_v5 }
 0x557   : > { %v5186_v37 = vmul.f32 %v5174_v49, %v17198_v53  ;;  %v5187_v4 = vmul.f32 %v5174_v49, %v17205_v1  ;;  %v5188_v57 = vmul.f32 %v5174_v49, %v17212_v19  ;;  %v5214_v40 = vmul.f32 %v17360_v41, %v5176_v48 }
 0x558   : > { %v5189_v24 = vmul.f32 %v5174_v49, %v17219_v54  ;;  %v5190_v3 = vmul.f32 %v5174_v49, %v17226_v39  ;;  %v5191_v16 = vmul.f32 %v5174_v49, %v17233_v30  ;;  %v5215_v56 = vmul.f32 %v17360_v41, %v5177_v35 }
 0x559   : > { %v5192_v44 = vmul.f32 %v5174_v49, %v17240_v6  ;;  %v5193_v15 = vmul.f32 %v5174_v49, %v17247_v58  ;;  %v5194_v53 = vmul.f32 %v5174_v49, %v17254_v50  ;;  %v5216_v1 = vmul.f32 %v17360_v41, %v5178_v2 }
 0x55a   : > { %v17391_v19 = vmul.f32 %v5174_v49, %v17261_v32  ;;  %v17394_v31 = vmul.f32 %v5174_v49, %v17268_v25  ;;  %v5217_v54 = vmul.f32 %v17360_v41, %v5179_v14  ;;  %v17398_v39 = vadd.f32 %v17376_v0, %v5213_v63 }
 0x55b   : > { %v17401_v30 = vmul.f32 %v5174_v49, %v17275_v46  ;;  %v17404_v6 = vmul.f32 %v5174_v49, %v17282_v43  ;;  %v5218_v58 = vmul.f32 %v17360_v41, %v5180_v59  ;;  %v17408_v50 = vadd.f32 %v17376_v0, %v5214_v40 }
 0x55c   : > { %v17411_v32 = vmul.f32 %v5174_v49, %v17289_v47  ;;  %v17414_v25 = vmul.f32 %v5174_v49, %v17296_v52  ;;  %v5219_v12 = vmul.f32 %v17360_v41, %v5181_v7  ;;  %v17418_v17 = vadd.f32 %v17376_v0, %v5215_v56 }
 0x55d   : > { %v17421_v46 = vmul.f32 %v5174_v49, %v17303_v45  ;;  %v17424_v43 = vmul.f32 %v5174_v49, %v17310_v26  ;;  %v5220_v60 = vmul.f32 %v17360_v41, %v5182_v9  ;;  %v17428_v55 = vadd.f32 %v17376_v0, %v5216_v1 }
 0x55e   : > { %v17431_v47 = vmul.f32 %v5174_v49, %v17317_v38  ;;  %v5221_v52 = vmul.f32 %v17360_v41, %v5183_v61  ;;  %v17435_v27 = vadd.f32 %v17376_v0, %v5217_v54  ;;  %v11360_v22 = vmul.f32 -1.442695, %v17398_v39 }
 0x55f   : > { %v17439_v45 = vmul.f32 %v5174_v49, %v17324_v20  ;;  %v5222_v26 = vmul.f32 %v17360_v41, %v5184_v13  ;;  %v17443_v8 = vadd.f32 %v17376_v0, %v5218_v58  ;;  %v11361_v51 = vmul.f32 -1.442695, %v17408_v50 }
 0x560   : > { %v17447_v38 = vmul.f32 %v5174_v49, %v17331_v33  ;;  %v5223_v42 = vmul.f32 %v17360_v41, %v5185_v62  ;;  %v17451_v28 = vadd.f32 %v17376_v0, %v5219_v12  ;;  %v11362_v34 = vmul.f32 -1.442695, %v17418_v17 }
 0x561   : > { %v17455_v20 = vmul.f32 %v5174_v49, %v17338_v29  ;;  %v5224_v21 = vmul.f32 %v17360_v41, %v5186_v37  ;;  %v17459_v5 = vadd.f32 %v17376_v0, %v5220_v60  ;;  %v11363_v48 = vmul.f32 -1.442695, %v17428_v55 }
 0x562   : > { %v5225_v33 = vmul.f32 %v17360_v41, %v5187_v4  ;;  %v17464_v35 = vadd.f32 %v17376_v0, %v5221_v52  ;;  %15241 = vpow2.f32 %v11360_v22  ;;  %v11364_v2 = vmul.f32 -1.442695, %v17435_v27 }
 0x563   : > { %v5226_v14 = vmul.f32 %v17360_v41, %v5188_v57  ;;  %v17469_v29 = vadd.f32 %v17376_v0, %v5222_v26  ;;  %15243 = vpow2.f32 %v11361_v51  ;;  %v11365_v49 = vmul.f32 -1.442695, %v17443_v8 }
 0x564   : > { %v5227_v59 = vmul.f32 %v17360_v41, %v5189_v24  ;;  %v17474_v7 = vadd.f32 %v17376_v0, %v5223_v42  ;;  %15245 = vpow2.f32 %v11362_v34  ;;  %v11366_v9 = vmul.f32 -1.442695, %v17451_v28 }
 0x565   : > { %v5228_v61 = vmul.f32 %v17360_v41, %v5190_v3  ;;  %v17479_v13 = vadd.f32 %v17376_v0, %v5224_v21  ;;  %15247 = vpow2.f32 %v11363_v48  ;;  %v11367_v62 = vmul.f32 -1.442695, %v17459_v5 }
 0x566   : > { %v5229_v63 = vmul.f32 %v17360_v41, %v5191_v16  ;;  %v17484_v37 = vadd.f32 %v17376_v0, %v5225_v33  ;;  %15249 = vpow2.f32 %v11364_v2  ;;  %v11368_v4 = vmul.f32 -1.442695, %v17464_v35 }
 0x567   : > { %v5230_v57 = vmul.f32 %v17360_v41, %v5192_v44  ;;  %v17489_v40 = vadd.f32 %v17376_v0, %v5226_v14  ;;  %15251 = vpow2.f32 %v11365_v49  ;;  %v11369_v24 = vmul.f32 -1.442695, %v17469_v29 }
 0x568   : > { %v5231_v3 = vmul.f32 %v17360_v41, %v5193_v15  ;;  %v17494_v56 = vadd.f32 %v17376_v0, %v5227_v59  ;;  %15253 = vpow2.f32 %v11366_v9  ;;  %v11370_v16 = vmul.f32 -1.442695, %v17474_v7 }
 0x569   : > { %v5232_v1 = vmul.f32 %v17360_v41, %v5194_v53  ;;  %v17499_v54 = vadd.f32 %v17376_v0, %v5228_v61  ;;  %15255 = vpow2.f32 %v11367_v62  ;;  %v11371_v44 = vmul.f32 -1.442695, %v17479_v13 }
 0x56a   : > { %19610 = vst [vmem:[#allocation12_spill] sm:$0xff] %v17494_v56  ;;  %v5233_v58 = vmul.f32 %v17360_v41, %v17391_v19  ;;  %v17505_v12 = vadd.f32 %v17376_v0, %v5229_v63  ;;  %15257 = vpow2.f32 %v11368_v4  ;;  %v11372_v15 = vmul.f32 -1.442695, %v17484_v37 }
 0x56b   : > { %19611 = vst [vmem:[#allocation13_spill] sm:$0xff] %v17499_v54  ;;  %v5234_v60 = vmul.f32 %v17360_v41, %v17394_v31  ;;  %v17511_v53 = vadd.f32 %v17376_v0, %v5230_v57  ;;  %15259 = vpow2.f32 %v11369_v24  ;;  %v11373_v52 = vmul.f32 -1.442695, %v17489_v40 }
 0x56c   : > { %v17514_v22 = vpop.eup %15241  ;;  %v5235_v19 = vmul.f32 %v17360_v41, %v17401_v30  ;;  %v17519_v26 = vadd.f32 %v17376_v0, %v5231_v3  ;;  %15261 = vpow2.f32 %v11370_v16  ;;  %v11374_v51 = vmul.f32 -1.442695, %v17494_v56 }
 0x56d   : > { %v17522_v42 = vpop.eup %15243  ;;  %v5236_v31 = vmul.f32 %v17360_v41, %v17404_v6  ;;  %v17527_v34 = vadd.f32 %v17376_v0, %v5232_v1  ;;  %15263 = vpow2.f32 %v11371_v44  ;;  %v11375_v21 = vmul.f32 -1.442695, %v17499_v54 }
 0x56e   : > { %v17530_v48 = vpop.eup %15245  ;;  %v5237_v30 = vmul.f32 %v17360_v41, %v17411_v32  ;;  %v17535_v33 = vadd.f32 %v17376_v0, %v5233_v58  ;;  %15265 = vpow2.f32 %v11372_v15  ;;  %v11376_v2 = vmul.f32 -1.442695, %v17505_v12 }
 0x56f   : > { %v17538_v14 = vpop.eup %15247  ;;  %v5238_v6 = vmul.f32 %v17360_v41, %v17414_v25  ;;  %v17543_v49 = vadd.f32 %v17376_v0, %v5234_v60  ;;  %15267 = vpow2.f32 %v11373_v52  ;;  %v11377_v59 = vmul.f32 -1.442695, %v17511_v53 }
 0x570   : > { %v17546_v9 = vpop.eup %15249  ;;  %v5239_v32 = vmul.f32 %v17360_v41, %v17421_v46  ;;  %v17551_v61 = vadd.f32 %v17376_v0, %v5235_v19  ;;  %15269 = vpow2.f32 %v11374_v51  ;;  %v11378_v62 = vmul.f32 -1.442695, %v17519_v26 }
 0x571   : > { %v17554_v63 = vpop.eup %15251  ;;  %v5240_v25 = vmul.f32 %v17360_v41, %v17424_v43  ;;  %v17559_v4 = vadd.f32 %v17376_v0, %v5236_v31  ;;  %15271 = vpow2.f32 %v11375_v21  ;;  %v11379_v57 = vmul.f32 -1.442695, %v17527_v34 }
 0x572   : > { %v17562_v24 = vpop.eup %15253  ;;  %v5241_v46 = vmul.f32 %v17360_v41, %v17431_v47  ;;  %v17567_v3 = vadd.f32 %v17376_v0, %v5237_v30  ;;  %15273 = vpow2.f32 %v11376_v2  ;;  %v11380_v16 = vmul.f32 -1.442695, %v17535_v33 }
 0x573   : > { %v17570_v1 = vpop.eup %15255  ;;  %v5242_v43 = vmul.f32 %v17360_v41, %v17439_v45  ;;  %v17575_v44 = vadd.f32 %v17376_v0, %v5238_v6  ;;  %15275 = vpow2.f32 %v11377_v59  ;;  %v11381_v58 = vmul.f32 -1.442695, %v17543_v49 }
 0x574   : > { %v17578_v15 = vpop.eup %15257  ;;  %v5243_v47 = vmul.f32 %v17360_v41, %v17447_v38  ;;  %v17583_v60 = vadd.f32 %v17376_v0, %v5239_v32  ;;  %15277 = vpow2.f32 %v11378_v62  ;;  %v11382_v52 = vmul.f32 -1.442695, %v17551_v61 }
 0x575   : > { %v17586_v19 = vpop.eup %15259  ;;  %v5244_v45 = vmul.f32 %v17360_v41, %v17455_v20  ;;  %v17591_v51 = vadd.f32 %v17376_v0, %v5240_v25  ;;  %15279 = vpow2.f32 %v11379_v57  ;;  %v11383_v31 = vmul.f32 -1.442695, %v17559_v4 }
 0x576   : > { %v17594_v21 = vpop.eup %15261  ;;  %v17597_v38 = vadd.f32 %v17376_v0, %v5241_v46  ;;  %15281 = vpow2.f32 %v11380_v16  ;;  %v11384_v30 = vmul.f32 -1.442695, %v17567_v3  ;;  %v17603_v6 = vadd.f32 %v17376_v0, %v5242_v43 }
 0x577   : > { %v17600_v2 = vpop.eup %15263  ;;  %15283 = vpow2.f32 %v11381_v58  ;;  %v11385_v41 = vmul.f32 -1.442695, %v17575_v44  ;;  %v17609_v59 = vadd.f32 %v17376_v0, %v5243_v47  ;;  %v11386_v32 = vmul.f32 -1.442695, %v17583_v60 }
 0x578   : > { %v17606_v20 = vpop.eup %15265  ;;  %15285 = vpow2.f32 %v11382_v52  ;;  %v17615_v25 = vadd.f32 %v17376_v0, %v5244_v45  ;;  %v11387_v57 = vmul.f32 -1.442695, %v17591_v51  ;;  %v11388_v16 = vmul.f32 -1.442695, %v17597_v38 }
 0x579   : > { %19612 = vst [vmem:[#allocation14_spill] sm:$0xff] %v17609_v59  ;;  %v17612_v62 = vpop.eup %15267  ;;  %15287 = vpow2.f32 %v11383_v31  ;;  %v11389_v58 = vmul.f32 -1.442695, %v17603_v6  ;;  %v11390_v52 = vmul.f32 -1.442695, %v17609_v59  ;;  %v5379_v31 = vadd.f32 1.0, %v17514_v22 }
 0x57a   : > { %19613 = vst [vmem:[#allocation15_spill] sm:$0xff] %v17615_v25  ;;  %v17618_v46 = vpop.eup %15269  ;;  %15289 = vpow2.f32 %v11384_v30  ;;  %v11391_v0 = vmul.f32 -1.442695, %v17615_v25  ;;  %v5380_v36 = vadd.f32 1.0, %v17522_v42 }
 0x57b   : > { %v17621_v43 = vpop.eup %15271  ;;  %15291 = vpow2.f32 %v11385_v41  ;;  %v5381_v41 = vadd.f32 1.0, %v17530_v48 }
 0x57c   : > { %v15274_v47 = vpop.eup %15273  ;;  %15293 = vpow2.f32 %v11386_v32  ;;  %v5382_v32 = vadd.f32 1.0, %v17538_v14 }
 0x57d   : > { %v15276_v11 = vpop.eup %15275  ;;  %15295 = vpow2.f32 %v11387_v57  ;;  %v5383_v57 = vadd.f32 1.0, %v17546_v9 }
 0x57e   : > { %v15278_v45 = vpop.eup %15277  ;;  %15297 = vpow2.f32 %v11388_v16  ;;  %v5384_v16 = vadd.f32 1.0, %v17554_v63  ;;  %v5396_v56 = vadd.f32 1.0, %v15276_v11 }
 0x57f   : > { %v15280_v30 = vpop.eup %15279  ;;  %15299 = vpow2.f32 %v11389_v58  ;;  %v5395_v58 = vadd.f32 1.0, %v15274_v47  ;;  %v5397_v48 = vadd.f32 1.0, %v15278_v45  ;;  %v5385_v45 = vadd.f32 1.0, %v17562_v24 }
 0x580   : > { %v15282_v10 = vpop.eup %15281  ;;  %15301 = vpow2.f32 %v11390_v52  ;;  %v5398_v25 = vadd.f32 1.0, %v15280_v30  ;;  %v5386_v30 = vadd.f32 1.0, %v17570_v1 }
 0x581   : > { %v15284_v23 = vpop.eup %15283  ;;  %15303 = vpow2.f32 %v11391_v0  ;;  %v5399_v59 = vadd.f32 1.0, %v15282_v10 }
 0x582   : > { %v15286_v18 = vpop.eup %15285  ;;  %15305 = vrcp.f32 %v5379_v31  ;;  %v5400_v31 = vadd.f32 1.0, %v15284_v23 }
 0x583   : > { %v15288_v54 = vpop.eup %15287  ;;  %15307 = vrcp.f32 %v5380_v36  ;;  %v5401_v36 = vadd.f32 1.0, %v15286_v18  ;;  %v5387_v18 = vadd.f32 1.0, %v17578_v15  ;;  %v5389_v15 = vadd.f32 1.0, %v17594_v21 }
 0x584   : > { %v15290_v22 = vpop.eup %15289  ;;  %15309 = vrcp.f32 %v5381_v41  ;;  %v5402_v41 = vadd.f32 1.0, %v15288_v54 }
 0x585   : > { %v15292_v42 = vpop.eup %15291  ;;  %15311 = vrcp.f32 %v5382_v32 }
 0x586   : > { %v15294_v52 = vpop.eup %15293  ;;  %15313 = vrcp.f32 %v5383_v57  ;;  %v5403_v57 = vadd.f32 1.0, %v15290_v22 }
 0x587   : > { %v15296_v0 = vpop.eup %15295  ;;  %15315 = vrcp.f32 %v5384_v16 }
 0x588   : > { %v15298_v14 = vpop.eup %15297  ;;  %15317 = vrcp.f32 %v5395_v58  ;;  %v5405_v58 = vadd.f32 1.0, %v15294_v52 }
 0x589   : > { %v15300_v9 = vpop.eup %15299  ;;  %15319 = vrcp.f32 %v5396_v56  ;;  %v5404_v56 = vadd.f32 1.0, %v15292_v42 }
 0x58a   : > { %v17632_v63 = vpop.eup %15301  ;;  %15321 = vrcp.f32 %v5397_v48  ;;  %v5406_v48 = vadd.f32 1.0, %v15296_v0 }
 0x58b   : > { %v15304_v47 = vpop.eup %15303  ;;  %15323 = vrcp.f32 %v5398_v25  ;;  %v5388_v25 = vadd.f32 1.0, %v17586_v19 }
 0x58c   : > { %v15306_v11 = vpop.eup %15305  ;;  %15325 = vrcp.f32 %v5399_v59 }
 0x58d   : > { %v15308_v32 = vpop.eup %15307  ;;  %15327 = vrcp.f32 %v5400_v31  ;;  %v5475_v24 = vmul.f32 %v15306_v11, %v17398_v39  ;;  %v5391_v39 = vadd.f32 1.0, %v17606_v20  ;;  %v5407_v11 = vadd.f32 1.0, %v15298_v14 }
 0x58e   : > { %v15310_v10 = vpop.eup %15309  ;;  %15329 = vrcp.f32 %v5401_v36  ;;  %v5476_v59 = vmul.f32 %v15308_v32, %v17408_v50  ;;  %v5390_v36 = vadd.f32 1.0, %v17600_v2  ;;  %v5408_v2 = vadd.f32 1.0, %v15300_v9 }
 0x58f   : > { %v15312_v23 = vpop.eup %15311  ;;  %15331 = vrcp.f32 %v5402_v41 }
 0x590   : > { %v15314_v16 = vpop.eup %15313  ;;  %15333 = vrcp.f32 %v5385_v45  ;;  %v17646_v52 = vpack.c.bf16 %v5476_v59, %v5475_v24  ;;  %v5478_v32 = vmul.f32 %v15312_v23, %v17428_v55  ;;  %v5410_v55 = vadd.f32 1.0, %v15304_v47 }
 0x591   : > { %v15316_v54 = vpop.eup %15315  ;;  %15335 = vrcp.f32 %v5386_v30  ;;  %v5393_v47 = vadd.f32 1.0, %v17618_v46 }
 0x592   : > { %v15318_v1 = vpop.eup %15317  ;;  %15337 = vrcp.f32 %v5403_v57  ;;  %v5392_v57 = vadd.f32 1.0, %v17612_v62 }
 0x593   : > { %v15320_v22 = vpop.eup %15319  ;;  %15339 = vrcp.f32 %v5404_v56  ;;  %v5491_v42 = vmul.f32 %v15318_v1, %v17505_v12 }
 0x594   : > { %v15322_v31 = vpop.eup %15321  ;;  %15341 = vrcp.f32 %v5387_v18  ;;  %v5492_v19 = vmul.f32 %v15320_v22, %v17511_v53  ;;  %v5477_v53 = vmul.f32 %v15310_v10, %v17418_v17  ;;  %v5409_v17 = vadd.f32 1.0, %v17632_v63 }
 0x595   : > { %v15324_v41 = vpop.eup %15323  ;;  %15343 = vrcp.f32 %v5388_v25  ;;  %v5493_v50 = vmul.f32 %v15322_v31, %v17519_v26  ;;  %v5480_v10 = vmul.f32 %v15316_v54, %v17443_v8 }
 0x596   : > { %v15326_v0 = vpop.eup %15325  ;;  %15345 = vrcp.f32 %v5405_v58  ;;  %v5494_v12 = vmul.f32 %v15324_v41, %v17527_v34  ;;  %v17649_v45 = vpack.c.bf16 %v5492_v19, %v5491_v42  ;;  %v17664_v23 = vpack.c.bf16 %v5478_v32, %v5477_v53 }
 0x597   : > { %v15328_v21 = vpop.eup %15327  ;;  %15347 = vrcp.f32 %v5406_v48  ;;  %v5495_v26 = vmul.f32 %v15326_v0, %v17535_v33 }
 0x598   : > { %v15330_v20 = vpop.eup %15329  ;;  %15349 = vrcp.f32 %v5389_v15  ;;  %v5496_v30 = vmul.f32 %v15328_v21, %v17543_v49  ;;  %14219 = vmatprep.subr.bf16.mxu1 %v17649_v45  ;;  %v17656_v14 = vpack.c.bf16 %v5494_v12, %v5493_v50  ;;  %v5479_v49 = vmul.f32 %v15314_v16, %v17435_v27 }
 0x599   : > { %v15332_v34 = vpop.eup %15331  ;;  %15351 = vrcp.f32 %v5390_v36  ;;  %14221 = vmatpush3.bf16.msra.mxu1 %v17646_v52  ;;  %v5497_v62 = vmul.f32 %v15330_v20, %v17551_v61  ;;  %v5394_v27 = vadd.f32 1.0, %v17621_v43  ;;  %v19616_v20 = vld [vmem:[#allocation12_spill] sm:$0xff] }
 0x59a   : > { %v15334_v9 = vpop.eup %15333  ;;  %15353 = vrcp.f32 %v5407_v11  ;;  %14223 = vmatprep.subr.bf16.mxu1 %v17656_v14  ;;  %v5498_v18 = vmul.f32 %v15332_v34, %v17559_v4  ;;  %v17668_v25 = vpack.c.bf16 %v5496_v30, %v5495_v26  ;;  %v17676_v16 = vpack.c.bf16 %v5480_v10, %v5479_v49  ;;  %v19617_v30 = vld [vmem:[#allocation13_spill] sm:$0xff]  ;;  %v5511_v49 = vld [vmem:[%s19151_s6 + $0x20] sm:$0xff]  ;;  %v5514_v10 = vld [vmem:[%s19151_s6 + $0x38] sm:$0xff] }
 0x59b   : > { %v15336_v33 = vpop.eup %15335  ;;  %15355 = vrcp.f32 %v5408_v2  ;;  %v5481_v61 = vmul.f32 %v15334_v9, %v17451_v28  ;;  %v19614_v2 = vld [vmem:[#allocation14_spill] sm:$0xff]  ;;  %v5507_v9 = vld [vmem:[%s19151_s6] sm:$0xff] }
 0x59c   : > { %v15338_v56 = vpop.eup %15337  ;;  %15357 = vrcp.f32 %v5391_v39  ;;  %v5482_v4 = vmul.f32 %v15336_v33, %v17459_v5  ;;  %v17680_v1 = vpack.c.bf16 %v5498_v18, %v5497_v62  ;;  %v5512_v33 = vld [vmem:[%s19151_s6 + $0x28] sm:$0xff]  ;;  %v5515_v18 = vld [vmem:[%s19151_s6 + $0x40] sm:$0xff] }
 0x59d   : > { %v15340_v63 = vpop.eup %15339  ;;  %15359 = vrcp.f32 %v5392_v57  ;;  %14225 = vmatpush3.bf16.msra.mxu1 %v17664_v23  ;;  %v5499_v46 = vmul.f32 %v15338_v56, %v17567_v3  ;;  %v5513_v56 = vld [vmem:[%s19151_s6 + $0x30] sm:$0xff]  ;;  %v5516_v62 = vld [vmem:[%s19151_s6 + $0x48] sm:$0xff] }
 0x59e   : > { %v15342_v24 = vpop.eup %15341  ;;  %15361 = vrcp.f32 %v5409_v17  ;;  %14227 = vmatprep.subr.bf16.mxu1 %v17668_v25  ;;  %v5500_v59 = vmul.f32 %v15340_v63, %v17575_v44  ;;  %v17686_v48 = vpack.c.bf16 %v5482_v4, %v5481_v61  ;;  %v5510_v17 = vld [vmem:[%s19151_s6 + $0x18] sm:$0xff]  ;;  %v5521_v61 = vld [vmem:[%s19151_s6 + $0x70] sm:$0xff]  ;;  %v11393_v4 = vld [vmem:[%s19151_s6 + $0x88] sm:$0xff] }
 0x59f   : > { %v15344_v8 = vpop.eup %15343  ;;  %15363 = vrcp.f32 %v5410_v55  ;;  %v5483_v5 = vmul.f32 %v15342_v24, %v17464_v35  ;;  %v5509_v55 = vld [vmem:[%s19151_s6 + $0x10] sm:$0xff]  ;;  %v5518_v63 = vld [vmem:[%s19151_s6 + $0x58] sm:$0xff]  ;;  %v5520_v24 = vld [vmem:[%s19151_s6 + $0x68] sm:$0xff] }
 0x5a0   : > { %v15346_v54 = vpop.eup %15345  ;;  %15365 = vrcp.f32 %v5393_v47  ;;  %v5484_v22 = vmul.f32 %v15344_v8, %v17469_v29  ;;  %v17690_v31 = vpack.c.bf16 %v5500_v59, %v5499_v46  ;;  %v5517_v47 = vld [vmem:[%s19151_s6 + $0x50] sm:$0xff]  ;;  %v5522_v8 = vld [vmem:[%s19151_s6 + $0x78] sm:$0xff] }
 0x5a1   : > { %v15348_v58 = vpop.eup %15347  ;;  %14229 = vmatpush3.bf16.msra.mxu1 %v17676_v16  ;;  %15367 = vrcp.f32 %v5394_v27  ;;  %v5501_v44 = vmul.f32 %v15346_v54, %v17583_v60  ;;  %v5519_v27 = vld [vmem:[%s19151_s6 + $0x60] sm:$0xff]  ;;  %v11395_v46 = vld [vmem:[%s19151_s6 + $0x98] sm:$0xff]  ;;  %v11394_v59 = vld [vmem:[%s19151_s6 + $0x90] sm:$0xff] }
 0x5a2   : > { %v15350_v43 = vpop.eup %15349  ;;  %14231 = vmatprep.subr.bf16.mxu1 %v17680_v1  ;;  %v5502_v42 = vmul.f32 %v15348_v58, %v17591_v51  ;;  %v17696_v41 = vpack.c.bf16 %v5484_v22, %v5483_v5  ;;  %v11392_v54 = vld [vmem:[%s19151_s6 + $0x80] sm:$0xff]  ;;  %v11397_v58 = vld [vmem:[%s19151_s6 + $0xa8] sm:$0xff]  ;;  %v11398_v5 = vld [vmem:[%s19151_s6 + $0xb0] sm:$0xff] }
 0x5a3   : > { %v15352_v28 = vpop.eup %15351  ;;  %v5485_v35 = vmul.f32 %v15350_v43, %v17474_v7  ;;  %v11396_v43 = vld [vmem:[%s19151_s6 + $0xa0] sm:$0xff]  ;;  %v11401_v22 = vld [vmem:[%s19151_s6 + $0xc8] sm:$0xff] }
 0x5a4   : > { %v15354_v3 = vpop.eup %15353  ;;  %v5486_v29 = vmul.f32 %v15352_v28, %v17479_v13  ;;  %v17700_v50 = vpack.c.bf16 %v5502_v42, %v5501_v44  ;;  %v11399_v28 = vld [vmem:[%s19151_s6 + $0xb8] sm:$0xff]  ;;  %v11402_v42 = vld [vmem:[%s19151_s6 + $0xd0] sm:$0xff] }
 0x5a5   : > { %v15356_v15 = vpop.eup %15355  ;;  %14233 = vmatpush3.bf16.msra.mxu1 %v17686_v48  ;;  %v5503_v60 = vmul.f32 %v15354_v3, %v17597_v38  ;;  %v19615_v38 = vld [vmem:[#allocation15_spill] sm:$0xff]  ;;  %v11403_v44 = vld [vmem:[%s19151_s6 + $0xd8] sm:$0xff] }
 0x5a6   : > { %v15358_v36 = vpop.eup %15357  ;;  %14235 = vmatprep.subr.bf16.mxu1 %v17690_v31  ;;  %v5504_v51 = vmul.f32 %v15356_v15, %v17603_v6  ;;  %v17706_v13 = vpack.c.bf16 %v5486_v29, %v5485_v35  ;;  %v11400_v3 = vld [vmem:[%s19151_s6 + $0xc0] sm:$0xff]  ;;  %v11405_v15 = vld [vmem:[%s19151_s6 + $0xe8] sm:$0xff]  ;;  %v11406_v35 = vld [vmem:[%s19151_s6 + $0xf0] sm:$0xff] }
 0x5a7   : > { %v15360_v19 = vpop.eup %15359  ;;  %v5487_v12 = vmul.f32 %v15358_v36, %v17484_v37  ;;  %v11404_v36 = vld [vmem:[%s19151_s6 + $0xe0] sm:$0xff] }
 0x5a8   : > { %v15362_v39 = vpop.eup %15361  ;;  %v5488_v7 = vmul.f32 %v15360_v19, %v17489_v40  ;;  %v17710_v6 = vpack.c.bf16 %v5504_v51, %v5503_v60  ;;  %v11407_v19 = vld [vmem:[%s19151_s6 + $0xf8] sm:$0xff]  ;;  %v11408_v29 = vld [vmem:[%s19152_s7 + $0x20] sm:$0xff]  ;;  %v11410_v51 = vld [vmem:[%s19152_s7 + $0x30] sm:$0xff] }
 0x5a9   : > { %v15364_v0 = vpop.eup %15363  ;;  %14237 = vmatpush3.bf16.msra.mxu1 %v17696_v41  ;;  %v5505_v53 = vmul.f32 %v15362_v39, %v19614_v2  ;;  %v11409_v39 = vld [vmem:[%s19152_s7 + $0x28] sm:$0xff] }
 0x5aa   : > { %14239 = vmatprep.subr.bf16.mxu1 %v17700_v50  ;;  %v15366_v11 = vpop.eup %15365  ;;  %v5506_v32 = vmul.f32 %v15364_v0, %v19615_v38  ;;  %v17716_v37 = vpack.c.bf16 %v5488_v7, %v5487_v12  ;;  %v14282_v60 = vpack.c.bf16 %v11409_v39, %v11408_v29  ;;  %v11411_v0 = vld [vmem:[%s19152_s7 + $0x38] sm:$0xff]  ;;  %v5628_v12 = vld [vmem:[%s19152_s7] sm:$0xff]  ;;  %v5629_v7 = vld [vmem:[%s19152_s7 + $0x8] sm:$0xff] }
 0x5ab   : > { %v15368_v21 = vpop.eup %15367  ;;  %v5489_v26 = vmul.f32 %v15366_v11, %v19616_v20  ;;  %v14286_v11 = vpack.c.bf16 %v11411_v0, %v11410_v51 }
 0x5ac   : > { %v5490_v34 = vmul.f32 %v15368_v21, %v19617_v30  ;;  %v17718_v40 = vpack.c.bf16 %v5506_v32, %v5505_v53  ;;  %v14290_v21 = vpack.c.bf16 %v5629_v7, %v5628_v12 }
 0x5ad   : > { %14241 = vmatpush3.bf16.msra.mxu1 %v17706_v13 }
 0x5ae   : > { %14243 = vmatprep.subr.bf16.mxu1 %v17710_v6  ;;  %v17722_v57 = vpack.c.bf16 %v5490_v34, %v5489_v26 }
 0x5b1   : > { %14245 = vmatpush3.bf16.msra.mxu1 %v17716_v37 }
 0x5b2   : > { %14247 = vmatprep.subr.bf16.mxu1 %v17718_v40 }
 0x5b5   : > { %14249 = vmatpush3.bf16.msra.mxu1 %v17722_v57 }
 0x5b6   : > { %14251 = vmatprep.subr.bf16.mxu1 %v17649_v45 }
 0x5b8   : > { %5588 = vmatmul.mubr.f32.vlgmr.msra.gmra.mrb[4].mxu1 %v5507_v9 }
 0x5b9   : > { %14253 = vmatpush3.bf16.msra.mxu1 %v17646_v52  ;;  %5592 = vmatprep.mubr.f32.mxu1 %v5510_v17 }
 0x5ba   : > { %14255 = vmatprep.subr.bf16.mxu1 %v17656_v14 }
 0x5bc   : > { %5593 = vmatmul.mubr.f32.gmra.mrb[6].mxu1 %v5509_v55 }
 0x5bd   : > { %14257 = vmatpush3.bf16.msra.mxu1 %v17664_v23  ;;  %5597 = vmatprep.mubr.f32.mxu1 %v5512_v33 }
 0x5be   : > { %14259 = vmatprep.subr.bf16.mxu1 %v17668_v25 }
 0x5c0   : > { %5598 = vmatmul.mubr.f32.gmra.mrb[8].mxu1 %v5511_v49 }
 0x5c1   : > { %14261 = vmatpush3.bf16.msra.mxu1 %v17676_v16  ;;  %5602 = vmatprep.mubr.f32.mxu1 %v5514_v10 }
 0x5c2   : > { %14263 = vmatprep.subr.bf16.mxu1 %v17680_v1 }
 0x5c4   : > { %5603 = vmatmul.mubr.f32.gmra.mrb[10].mxu1 %v5513_v56 }
 0x5c5   : > { %14265 = vmatpush3.bf16.msra.mxu1 %v17686_v48  ;;  %5607 = vmatprep.mubr.f32.mxu1 %v5516_v62 }
 0x5c6   : > { %14267 = vmatprep.subr.bf16.mxu1 %v17690_v31 }
 0x5c8   : > { %5608 = vmatmul.mubr.f32.gmra.mrb[12].mxu1 %v5515_v18 }
 0x5c9   : > { %14269 = vmatpush3.bf16.msra.mxu1 %v17696_v41  ;;  %5612 = vmatprep.mubr.f32.mxu1 %v5518_v63 }
 0x5ca   : > { %14271 = vmatprep.subr.bf16.mxu1 %v17700_v50 }
 0x5cc   : > { %5613 = vmatmul.mubr.f32.gmra.mrb[14].mxu1 %v5517_v47 }
 0x5cd   : > { %14273 = vmatpush3.bf16.msra.mxu1 %v17706_v13  ;;  %5617 = vmatprep.mubr.f32.mxu1 %v5520_v24 }
 0x5ce   : > { %14275 = vmatprep.subr.bf16.mxu1 %v17710_v6 }
 0x5d0   : > { %5618 = vmatmul.mubr.f32.gmra.mrb[16].mxu1 %v5519_v27 }
 0x5d1   : > { %14277 = vmatpush3.bf16.msra.mxu1 %v17716_v37  ;;  %5622 = vmatprep.mubr.f32.mxu1 %v5522_v8 }
 0x5d2   : > { %14279 = vmatprep.subr.bf16.mxu1 %v17718_v40 }
 0x5d4   : > { %5623 = vmatmul.mubr.f32.gmra.mrb[18].mxu1 %v5521_v61 }
 0x5d5   : > { %14281 = vmatpush3.bf16.msra.mxu1 %v17722_v57  ;;  %5713 = vmatprep.mubr.f32.mxu1 %v11393_v4 }
 0x5d6   : > { %14283 = vmatprep.subr.bf16.mxu1 %v14282_v60 }
 0x5d8   : > { %5714 = vmatmul.mubr.f32.vlgmr.msra.gmra.mrb[20].mxu1 %v11392_v54 }
 0x5d9   : > { %5718 = vmatprep.mubr.f32.mxu1 %v11395_v46  ;;  %14285 = vmatpush3.bf16.msra.mxu1 %v14282_v60 }
 0x5da   : > { %14287 = vmatprep.subr.bf16.mxu1 %v14286_v11 }
 0x5dc   : > { %5719 = vmatmul.mubr.f32.gmra.mrb[22].mxu1 %v11394_v59 }
 0x5dd   : > { %5723 = vmatprep.mubr.f32.mxu1 %v11397_v58  ;;  %14289 = vmatpush3.bf16.msra.mxu1 %v14286_v11  ;;  %v5630_v58 = vld [vmem:[%s19152_s7 + $0x10] sm:$0xff] }
 0x5de   : > { %14291 = vmatprep.subr.bf16.mxu1 %v14290_v21 }
 0x5e0   : > { %5724 = vmatmul.mubr.f32.gmra.mrb[24].mxu1 %v11396_v43  ;;  %v5631_v43 = vld [vmem:[%s19152_s7 + $0x18] sm:$0xff] }
 0x5e1   : > { %5728 = vmatprep.mubr.f32.mxu1 %v11399_v28 }
 0x5e4   : > { %5729 = vmatmul.mubr.f32.gmra.mrb[26].mxu1 %v11398_v5 }
 0x5e5   : > { %5733 = vmatprep.mubr.f32.mxu1 %v11401_v22 }
 0x5e8   : > { %5734 = vmatmul.mubr.f32.gmra.mrb[28].mxu1 %v11400_v3  ;;  %v14294_v3 = vpack.c.bf16 %v5631_v43, %v5630_v58 }
 0x5e9   : > { %5738 = vmatprep.mubr.f32.mxu1 %v11403_v44 }
 0x5ec   : > { %5739 = vmatmul.mubr.f32.gmra.mrb[30].mxu1 %v11402_v42 }
 0x5ed   : > { %5743 = vmatprep.mubr.f32.mxu1 %v11405_v15 }
 0x5f0   : > { %5744 = vmatmul.mubr.f32.gmra.mrb[32].mxu1 %v11404_v36 }
 0x5f1   : > { %5748 = vmatprep.mubr.f32.mxu1 %v11407_v19 }
 0x5f4   : > { %5749 = vmatmul.mubr.f32.gmra.mrb[34].mxu1 %v11406_v35 }
 0x68b   : > { %v12232_v2 = vpop.f32.mrb[4].mxu1 }
 0x68c   : > { %v12233_v53 = vpop.f32.mrb[5].mxu1 }
 0x68d   : > { %v12234_v38 = vadd.f32 %v12233_v53, %v12232_v2 }
 0x68f   : > { %v12235_v32 = vpop.f32.mrb[6].mxu1 }
 0x690   : > { %v12236_v20 = vpop.f32.mrb[7].mxu1 }
 0x691   : > { %v12237_v26 = vadd.f32 %v12236_v20, %v12235_v32  ;;  %v11444_v20 = vld [vmem:[%s19152_s7 + $0x40] sm:$0xff] }
 0x693   : > { %v12238_v30 = vpop.f32.mrb[8].mxu1 }
 0x694   : > { %v12239_v34 = vpop.f32.mrb[9].mxu1 }
 0x695   : > { %v12240_v9 = vadd.f32 %v12239_v34, %v12238_v30  ;;  %v11446_v34 = vld [vmem:[%s19152_s7 + $0x50] sm:$0xff] }
 0x697   : > { %v12241_v17 = vpop.f32.mrb[10].mxu1 }
 0x698   : > { %v12242_v55 = vpop.f32.mrb[11].mxu1 }
 0x699   : > { %v12243_v33 = vadd.f32 %v12242_v55, %v12241_v17  ;;  %v11428_v17 = vld [vmem:[%s19151_s6 + $0x100] sm:$0xff]  ;;  %v11431_v55 = vld [vmem:[%s19151_s6 + $0x118] sm:$0xff] }
 0x69b   : > { %v12244_v49 = vpop.f32.mrb[12].mxu1 }
 0x69c   : > { %v12245_v10 = vpop.f32.mrb[13].mxu1 }
 0x69d   : > { %v12246_v56 = vadd.f32 %v12245_v10, %v12244_v49  ;;  %v11430_v49 = vld [vmem:[%s19151_s6 + $0x110] sm:$0xff]  ;;  %v11433_v10 = vld [vmem:[%s19151_s6 + $0x128] sm:$0xff] }
 0x69f   : > { %v12247_v62 = vpop.f32.mrb[14].mxu1 }
 0x6a0   : > { %v12248_v18 = vpop.f32.mrb[15].mxu1 }
 0x6a1   : > { %v12249_v63 = vadd.f32 %v12248_v18, %v12247_v62  ;;  %v11435_v62 = vld [vmem:[%s19151_s6 + $0x138] sm:$0xff]  ;;  %v11434_v18 = vld [vmem:[%s19151_s6 + $0x130] sm:$0xff] }
 0x6a3   : > { %v12250_v47 = vpop.f32.mrb[16].mxu1 }
 0x6a4   : > { %v12251_v24 = vpop.f32.mrb[17].mxu1 }
 0x6a5   : > { %v12252_v27 = vadd.f32 %v12251_v24, %v12250_v47  ;;  %v11436_v47 = vld [vmem:[%s19151_s6 + $0x140] sm:$0xff]  ;;  %v11439_v24 = vld [vmem:[%s19151_s6 + $0x158] sm:$0xff] }
 0x6a7   : > { %v12253_v8 = vpop.f32.mrb[18].mxu1 }
 0x6a8   : > { %v12254_v61 = vpop.f32.mrb[19].mxu1 }
 0x6a9   : > { %v12255_v4 = vadd.f32 %v12254_v61, %v12253_v8  ;;  %v11441_v8 = vld [vmem:[%s19151_s6 + $0x168] sm:$0xff]  ;;  %v11440_v61 = vld [vmem:[%s19151_s6 + $0x160] sm:$0xff] }
 0x6ab   : > { %v12288_v54 = vpop.f32.mrb[20].mxu1 }
 0x6ac   : > { %v12289_v46 = vpop.f32.mrb[21].mxu1 }
 0x6ad   : > { %v12290_v59 = vadd.f32 %v12289_v46, %v12288_v54  ;;  %v11442_v54 = vld [vmem:[%s19151_s6 + $0x170] sm:$0xff] }
 0x6af   : > { %v12291_v28 = vpop.f32.mrb[22].mxu1  ;;  %13564 = vmatprep.mubr.msk.f32.mxu1 %vm4813_vm0, %v12290_v59 }
 0x6b0   : > { %v12292_v5 = vpop.f32.mrb[23].mxu1 }
 0x6b1   : > { %v12293_v22 = vadd.f32 %v12292_v5, %v12291_v28 }
 0x6b3   : > { %v12294_v44 = vpop.f32.mrb[24].mxu1  ;;  %13565 = vmatmul.mubr.msk.f32.vlgmr.msra.gmra.mrb[36].mxu1 %vm4813_vm0, %v12293_v22 }
 0x6b4   : > { %14293 = vmatpush3.bf16.msra.mxu1 %v14290_v21  ;;  %v12295_v42 = vpop.f32.mrb[25].mxu1 }
 0x6b5   : > { %v12296_v15 = vadd.f32 %v12295_v42, %v12294_v44  ;;  %14295 = vmatprep.subr.bf16.mxu1 %v14294_v3 }
 0x6b7   : > { %v12297_v36 = vpop.f32.mrb[26].mxu1  ;;  %13567 = vmatprep.mubr.msk.f32.mxu1 %vm4813_vm0, %v12296_v15 }
 0x6b8   : > { %14297 = vmatpush3.bf16.msra.mxu1 %v14294_v3  ;;  %v12298_v19 = vpop.f32.mrb[27].mxu1 }
 0x6b9   : > { %v12299_v35 = vadd.f32 %v12298_v19, %v12297_v36  ;;  %14299 = vmatprep.subr.bf16.mxu1 %v17649_v45 }
 0x6bb   : > { %v12300_v29 = vpop.f32.mrb[28].mxu1  ;;  %13568 = vmatmul.mubr.msk.f32.gmra.mrb[38].mxu1 %vm4813_vm0, %v12299_v35 }
 0x6bc   : > { %v12301_v39 = vpop.f32.mrb[29].mxu1 }
 0x6bd   : > { %v12302_v60 = vadd.f32 %v12301_v39, %v12300_v29 }
 0x6bf   : > { %v12303_v51 = vpop.f32.mrb[30].mxu1  ;;  %13570 = vmatprep.mubr.msk.f32.mxu1 %vm4813_vm0, %v12302_v60 }
 0x6c0   : > { %v12304_v0 = vpop.f32.mrb[31].mxu1 }
 0x6c1   : > { %v12305_v11 = vadd.f32 %v12304_v0, %v12303_v51 }
 0x6c3   : > { %v12306_v12 = vpop.f32.mrb[32].mxu1  ;;  %13571 = vmatmul.mubr.msk.f32.gmra.mrb[40].mxu1 %vm4813_vm0, %v12305_v11 }
 0x6c4   : > { %v12307_v7 = vpop.f32.mrb[33].mxu1 }
 0x6c5   : > { %v12308_v21 = vadd.f32 %v12307_v7, %v12306_v12 }
 0x6c7   : > { %v12309_v2 = vpop.f32.mrb[34].mxu1  ;;  %13573 = vmatprep.mubr.msk.f32.mxu1 %vm4813_vm0, %v12308_v21 }
 0x6c8   : > { %v12310_v53 = vpop.f32.mrb[35].mxu1 }
 0x6c9   : > { %v12311_v32 = vadd.f32 %v12310_v53, %v12309_v2  ;;  %v11457_v53 = vld [vmem:[%s19151_s6 + $0x188] sm:$0xff] }
 0x6cb   : > { %13574 = vmatmul.mubr.msk.f32.gmra.mrb[42].mxu1 %vm4813_vm0, %v12311_v32  ;;  %v11472_v32 = vld [vmem:[%s19152_s7 + $0x60] sm:$0xff] }
 0x6cc   : > { %13584 = vmatprep.mubr.msk.f32.mxu1 %vm4813_vm0, %v12234_v38  ;;  %v11429_v38 = vld [vmem:[%s19151_s6 + $0x108] sm:$0xff] }
 0x6cf   : > { %13585 = vmatmul.mubr.msk.f32.vlgmr.msra.gmra.mrb[36].mxu1 %vm4813_vm0, %v12237_v26  ;;  %v11445_v26 = vld [vmem:[%s19152_s7 + $0x48] sm:$0xff] }
 0x6d0   : > { %14301 = vmatpush3.bf16.msra.mxu1 %v17646_v52  ;;  %13587 = vmatprep.mubr.msk.f32.mxu1 %vm4813_vm0, %v12240_v9  ;;  %v14330_v30 = vpack.c.bf16 %v11445_v26, %v11444_v20  ;;  %v11447_v9 = vld [vmem:[%s19152_s7 + $0x58] sm:$0xff]  ;;  %v11474_v26 = vld [vmem:[%s19152_s7 + $0x70] sm:$0xff] }
 0x6d1   : > { %14303 = vmatprep.subr.bf16.mxu1 %v17656_v14 }
 0x6d3   : > { %13588 = vmatmul.mubr.msk.f32.gmra.mrb[38].mxu1 %vm4813_vm0, %v12243_v33  ;;  %v14334_v33 = vpack.c.bf16 %v11447_v9, %v11446_v34  ;;  %v11456_v34 = vld [vmem:[%s19151_s6 + $0x180] sm:$0xff]  ;;  %v11459_v9 = vld [vmem:[%s19151_s6 + $0x198] sm:$0xff] }
 0x6d4   : > { %14305 = vmatpush3.bf16.msra.mxu1 %v17664_v23  ;;  %13590 = vmatprep.mubr.msk.f32.mxu1 %vm4813_vm0, %v12246_v56  ;;  %v11432_v56 = vld [vmem:[%s19151_s6 + $0x120] sm:$0xff] }
 0x6d5   : > { %14307 = vmatprep.subr.bf16.mxu1 %v17668_v25 }
 0x6d7   : > { %13591 = vmatmul.mubr.msk.f32.gmra.mrb[40].mxu1 %vm4813_vm0, %v12249_v63  ;;  %v11437_v63 = vld [vmem:[%s19151_s6 + $0x148] sm:$0xff] }
 0x6d8   : > { %14309 = vmatpush3.bf16.msra.mxu1 %v17676_v16  ;;  %13593 = vmatprep.mubr.msk.f32.mxu1 %vm4813_vm0, %v12252_v27  ;;  %v11438_v27 = vld [vmem:[%s19151_s6 + $0x150] sm:$0xff] }
 0x6d9   : > { %14311 = vmatprep.subr.bf16.mxu1 %v17680_v1 }
 0x6db   : > { %13594 = vmatmul.mubr.msk.f32.gmra.mrb[42].mxu1 %vm4813_vm0, %v12255_v4  ;;  %v11443_v4 = vld [vmem:[%s19151_s6 + $0x178] sm:$0xff] }
 0x6dc   : > { %14313 = vmatpush3.bf16.msra.mxu1 %v17686_v48  ;;  %6098 = vmatprep.mubr.f32.mxu1 %v11429_v38  ;;  %v11473_v38 = vld [vmem:[%s19152_s7 + $0x68] sm:$0xff] }
 0x6dd   : > { %14315 = vmatprep.subr.bf16.mxu1 %v17690_v31  ;;  %v14370_v20 = vpack.c.bf16 %v11473_v38, %v11472_v32  ;;  %v11502_v38 = vld [vmem:[%s19152_s7 + $0x90] sm:$0xff] }
 0x6e0   : > { %14317 = vmatpush3.bf16.msra.mxu1 %v17696_v41 }
 0x6e1   : > { %14319 = vmatprep.subr.bf16.mxu1 %v17700_v50 }
 0x6e4   : > { %14321 = vmatpush3.bf16.msra.mxu1 %v17706_v13 }
 0x6e5   : > { %14323 = vmatprep.subr.bf16.mxu1 %v17710_v6 }
 0x6e8   : > { %14325 = vmatpush3.bf16.msra.mxu1 %v17716_v37 }
 0x6e9   : > { %14327 = vmatprep.subr.bf16.mxu1 %v17718_v40 }
 0x6ec   : > { %14329 = vmatpush3.bf16.msra.mxu1 %v17722_v57 }
 0x6ed   : > { %14331 = vmatprep.subr.bf16.mxu1 %v14330_v30 }
 0x6ef   : > { %6099 = vmatmul.mubr.f32.vlgmr.msra.gmra.mrb[44].mxu1 %v11428_v17 }
 0x6f0   : > { %14333 = vmatpush3.bf16.msra.mxu1 %v14330_v30  ;;  %6103 = vmatprep.mubr.f32.mxu1 %v11431_v55  ;;  %v11475_v30 = vld [vmem:[%s19152_s7 + $0x78] sm:$0xff]  ;;  %v11458_v55 = vld [vmem:[%s19151_s6 + $0x190] sm:$0xff] }
 0x6f1   : > { %14335 = vmatprep.subr.bf16.mxu1 %v14334_v33  ;;  %v14374_v17 = vpack.c.bf16 %v11475_v30, %v11474_v26  ;;  %v11484_v26 = vld [vmem:[%s19151_s6 + $0x200] sm:$0xff]  ;;  %v11487_v30 = vld [vmem:[%s19151_s6 + $0x218] sm:$0xff] }
 0x6f3   : > { %6104 = vmatmul.mubr.f32.gmra.mrb[46].mxu1 %v11430_v49  ;;  %v11460_v49 = vld [vmem:[%s19151_s6 + $0x1a0] sm:$0xff] }
 0x6f4   : > { %14337 = vmatpush3.bf16.msra.mxu1 %v14334_v33  ;;  %6108 = vmatprep.mubr.f32.mxu1 %v11433_v10  ;;  %v11461_v33 = vld [vmem:[%s19151_s6 + $0x1a8] sm:$0xff]  ;;  %v11463_v10 = vld [vmem:[%s19151_s6 + $0x1b8] sm:$0xff] }
 0x6f5   : > { %14339 = vmatprep.subr.bf16.mxu1 %v17649_v45 }
 0x6f7   : > { %6109 = vmatmul.mubr.f32.gmra.mrb[48].mxu1 %v11432_v56  ;;  %v11462_v56 = vld [vmem:[%s19151_s6 + $0x1b0] sm:$0xff] }
 0x6f8   : > { %6113 = vmatprep.mubr.f32.mxu1 %v11435_v62  ;;  %v11465_v62 = vld [vmem:[%s19151_s6 + $0x1c8] sm:$0xff] }
 0x6fb   : > { %6114 = vmatmul.mubr.f32.gmra.mrb[50].mxu1 %v11434_v18  ;;  %v11464_v18 = vld [vmem:[%s19151_s6 + $0x1c0] sm:$0xff] }
 0x6fc   : > { %6118 = vmatprep.mubr.f32.mxu1 %v11437_v63  ;;  %v11467_v63 = vld [vmem:[%s19151_s6 + $0x1d8] sm:$0xff] }
 0x6ff   : > { %6119 = vmatmul.mubr.f32.gmra.mrb[52].mxu1 %v11436_v47  ;;  %v11466_v47 = vld [vmem:[%s19151_s6 + $0x1d0] sm:$0xff] }
 0x700   : > { %6123 = vmatprep.mubr.f32.mxu1 %v11439_v24  ;;  %v11469_v24 = vld [vmem:[%s19151_s6 + $0x1e8] sm:$0xff] }
 0x703   : > { %6124 = vmatmul.mubr.f32.gmra.mrb[54].mxu1 %v11438_v27  ;;  %v11468_v27 = vld [vmem:[%s19151_s6 + $0x1e0] sm:$0xff] }
 0x704   : > { %6128 = vmatprep.mubr.f32.mxu1 %v11441_v8  ;;  %v11471_v8 = vld [vmem:[%s19151_s6 + $0x1f8] sm:$0xff] }
 0x707   : > { %6129 = vmatmul.mubr.f32.gmra.mrb[56].mxu1 %v11440_v61  ;;  %v11470_v61 = vld [vmem:[%s19151_s6 + $0x1f0] sm:$0xff] }
 0x708   : > { %6133 = vmatprep.mubr.f32.mxu1 %v11443_v4 }
 0x70b   : > { %6134 = vmatmul.mubr.f32.gmra.mrb[58].mxu1 %v11442_v54 }
 0x7c2   : > { %v12368_v46 = vpop.f32.mrb[44].mxu1 }
 0x7c3   : > { %v12369_v59 = vpop.f32.mrb[45].mxu1 }
 0x7c4   : > { %v12370_v58 = vadd.f32 %v12369_v59, %v12368_v46 }
 0x7c6   : > { %v12371_v43 = vpop.f32.mrb[46].mxu1  ;;  %13604 = vmatprep.mubr.msk.f32.mxu1 %vm4813_vm0, %v12370_v58 }
 0x7c7   : > { %v12372_v28 = vpop.f32.mrb[47].mxu1 }
 0x7c8   : > { %v12373_v5 = vadd.f32 %v12372_v28, %v12371_v43 }
 0x7ca   : > { %13605 = vmatmul.mubr.msk.f32.vlgmr.msra.gmra.mrb[36].mxu1 %vm4813_vm0, %v12373_v5  ;;  %v12374_v22 = vpop.f32.mrb[48].mxu1 }
 0x7cb   : > { %14341 = vmatpush3.bf16.msra.mxu1 %v17646_v52  ;;  %v12375_v3 = vpop.f32.mrb[49].mxu1 }
 0x7cc   : > { %14343 = vmatprep.subr.bf16.mxu1 %v17656_v14  ;;  %v12376_v44 = vadd.f32 %v12375_v3, %v12374_v22 }
 0x7ce   : > { %v12377_v42 = vpop.f32.mrb[50].mxu1  ;;  %13607 = vmatprep.mubr.msk.f32.mxu1 %vm4813_vm0, %v12376_v44 }
 0x7cf   : > { %14345 = vmatpush3.bf16.msra.mxu1 %v17664_v23  ;;  %v12378_v15 = vpop.f32.mrb[51].mxu1 }
 0x7d0   : > { %14347 = vmatprep.subr.bf16.mxu1 %v17668_v25  ;;  %v12379_v36 = vadd.f32 %v12378_v15, %v12377_v42 }
 0x7d2   : > { %v12380_v19 = vpop.f32.mrb[52].mxu1  ;;  %13608 = vmatmul.mubr.msk.f32.gmra.mrb[38].mxu1 %vm4813_vm0, %v12379_v36 }
 0x7d3   : > { %14349 = vmatpush3.bf16.msra.mxu1 %v17676_v16  ;;  %v12381_v35 = vpop.f32.mrb[53].mxu1 }
 0x7d4   : > { %14351 = vmatprep.subr.bf16.mxu1 %v17680_v1  ;;  %v12382_v29 = vadd.f32 %v12381_v35, %v12380_v19 }
 0x7d6   : > { %v12383_v39 = vpop.f32.mrb[54].mxu1  ;;  %13610 = vmatprep.mubr.msk.f32.mxu1 %vm4813_vm0, %v12382_v29 }
 0x7d7   : > { %14353 = vmatpush3.bf16.msra.mxu1 %v17686_v48  ;;  %v12384_v60 = vpop.f32.mrb[55].mxu1 }
 0x7d8   : > { %14355 = vmatprep.subr.bf16.mxu1 %v17690_v31  ;;  %v12385_v51 = vadd.f32 %v12384_v60, %v12383_v39 }
 0x7da   : > { %v12386_v0 = vpop.f32.mrb[56].mxu1  ;;  %13611 = vmatmul.mubr.msk.f32.gmra.mrb[40].mxu1 %vm4813_vm0, %v12385_v51 }
 0x7db   : > { %14357 = vmatpush3.bf16.msra.mxu1 %v17696_v41  ;;  %v12387_v11 = vpop.f32.mrb[57].mxu1 }
 0x7dc   : > { %14359 = vmatprep.subr.bf16.mxu1 %v17700_v50  ;;  %v12388_v12 = vadd.f32 %v12387_v11, %v12386_v0 }
 0x7de   : > { %v12389_v7 = vpop.f32.mrb[58].mxu1  ;;  %13613 = vmatprep.mubr.msk.f32.mxu1 %vm4813_vm0, %v12388_v12 }
 0x7df   : > { %14361 = vmatpush3.bf16.msra.mxu1 %v17706_v13  ;;  %v12390_v21 = vpop.f32.mrb[59].mxu1 }
 0x7e0   : > { %14363 = vmatprep.subr.bf16.mxu1 %v17710_v6  ;;  %v12391_v2 = vadd.f32 %v12390_v21, %v12389_v7  ;;  %v11485_v21 = vld [vmem:[%s19151_s6 + $0x208] sm:$0xff] }
 0x7e2   : > { %13614 = vmatmul.mubr.msk.f32.gmra.mrb[42].mxu1 %vm4813_vm0, %v12391_v2  ;;  %v11500_v2 = vld [vmem:[%s19152_s7 + $0x80] sm:$0xff] }
 0x7e3   : > { %14365 = vmatpush3.bf16.msra.mxu1 %v17716_v37  ;;  %6362 = vmatprep.mubr.f32.mxu1 %v11457_v53  ;;  %v11501_v53 = vld [vmem:[%s19152_s7 + $0x88] sm:$0xff] }
 0x7e4   : > { %14367 = vmatprep.subr.bf16.mxu1 %v17718_v40  ;;  %v14410_v32 = vpack.c.bf16 %v11501_v53, %v11500_v2  ;;  %v11530_v53 = vld [vmem:[%s19152_s7 + $0xb0] sm:$0xff] }
 0x7e7   : > { %14369 = vmatpush3.bf16.msra.mxu1 %v17722_v57 }
 0x7e8   : > { %14371 = vmatprep.subr.bf16.mxu1 %v14370_v20 }
 0x7ea   : > { %6363 = vmatmul.mubr.f32.vlgmr.msra.gmra.mrb[60].mxu1 %v11456_v34 }
 0x7eb   : > { %14373 = vmatpush3.bf16.msra.mxu1 %v14370_v20  ;;  %6367 = vmatprep.mubr.f32.mxu1 %v11459_v9  ;;  %v11503_v20 = vld [vmem:[%s19152_s7 + $0x98] sm:$0xff]  ;;  %v11486_v9 = vld [vmem:[%s19151_s6 + $0x210] sm:$0xff] }
 0x7ec   : > { %14375 = vmatprep.subr.bf16.mxu1 %v14374_v17  ;;  %v14414_v34 = vpack.c.bf16 %v11503_v20, %v11502_v38  ;;  %v11512_v38 = vld [vmem:[%s19151_s6 + $0x280] sm:$0xff]  ;;  %v11515_v20 = vld [vmem:[%s19151_s6 + $0x298] sm:$0xff] }
 0x7ee   : > { %6368 = vmatmul.mubr.f32.gmra.mrb[62].mxu1 %v11458_v55  ;;  %v11488_v55 = vld [vmem:[%s19151_s6 + $0x220] sm:$0xff] }
 0x7ef   : > { %14377 = vmatpush3.bf16.msra.mxu1 %v14374_v17  ;;  %6372 = vmatprep.mubr.f32.mxu1 %v11461_v33  ;;  %v11489_v17 = vld [vmem:[%s19151_s6 + $0x228] sm:$0xff]  ;;  %v11491_v33 = vld [vmem:[%s19151_s6 + $0x238] sm:$0xff] }
 0x7f0   : > { %14379 = vmatprep.subr.bf16.mxu1 %v17649_v45 }
 0x7f2   : > { %6373 = vmatmul.mubr.f32.gmra.mrb[64].mxu1 %v11460_v49  ;;  %v11490_v49 = vld [vmem:[%s19151_s6 + $0x230] sm:$0xff] }
 0x7f3   : > { %6377 = vmatprep.mubr.f32.mxu1 %v11463_v10  ;;  %v11493_v10 = vld [vmem:[%s19151_s6 + $0x248] sm:$0xff] }
 0x7f6   : > { %6378 = vmatmul.mubr.f32.gmra.mrb[66].mxu1 %v11462_v56  ;;  %v11492_v56 = vld [vmem:[%s19151_s6 + $0x240] sm:$0xff] }
 0x7f7   : > { %6382 = vmatprep.mubr.f32.mxu1 %v11465_v62  ;;  %v11495_v62 = vld [vmem:[%s19151_s6 + $0x258] sm:$0xff] }
 0x7fa   : > { %6383 = vmatmul.mubr.f32.gmra.mrb[68].mxu1 %v11464_v18  ;;  %v11494_v18 = vld [vmem:[%s19151_s6 + $0x250] sm:$0xff] }
 0x7fb   : > { %6387 = vmatprep.mubr.f32.mxu1 %v11467_v63  ;;  %v11497_v63 = vld [vmem:[%s19151_s6 + $0x268] sm:$0xff] }
 0x7fe   : > { %6388 = vmatmul.mubr.f32.gmra.mrb[70].mxu1 %v11466_v47  ;;  %v11496_v47 = vld [vmem:[%s19151_s6 + $0x260] sm:$0xff] }
 0x7ff   : > { %6392 = vmatprep.mubr.f32.mxu1 %v11469_v24  ;;  %v11499_v24 = vld [vmem:[%s19151_s6 + $0x278] sm:$0xff] }
 0x802   : > { %6393 = vmatmul.mubr.f32.gmra.mrb[72].mxu1 %v11468_v27  ;;  %v11498_v27 = vld [vmem:[%s19151_s6 + $0x270] sm:$0xff] }
 0x803   : > { %6397 = vmatprep.mubr.f32.mxu1 %v11471_v8 }
 0x806   : > { %6398 = vmatmul.mubr.f32.gmra.mrb[74].mxu1 %v11470_v61 }
 0x8bd   : > { %v12436_v4 = vpop.f32.mrb[60].mxu1 }
 0x8be   : > { %v12437_v54 = vpop.f32.mrb[61].mxu1 }
 0x8bf   : > { %v12438_v46 = vadd.f32 %v12437_v54, %v12436_v4 }
 0x8c1   : > { %v12439_v59 = vpop.f32.mrb[62].mxu1  ;;  %13624 = vmatprep.mubr.msk.f32.mxu1 %vm4813_vm0, %v12438_v46 }
 0x8c2   : > { %v12440_v58 = vpop.f32.mrb[63].mxu1 }
 0x8c3   : > { %v12441_v43 = vadd.f32 %v12440_v58, %v12439_v59 }
 0x8c5   : > { %13625 = vmatmul.mubr.msk.f32.vlgmr.msra.gmra.mrb[36].mxu1 %vm4813_vm0, %v12441_v43  ;;  %v12442_v28 = vpop.f32.mrb[64].mxu1 }
 0x8c6   : > { %14381 = vmatpush3.bf16.msra.mxu1 %v17646_v52  ;;  %v12443_v5 = vpop.f32.mrb[65].mxu1 }
 0x8c7   : > { %14383 = vmatprep.subr.bf16.mxu1 %v17656_v14  ;;  %v12444_v22 = vadd.f32 %v12443_v5, %v12442_v28 }
 0x8c9   : > { %v12445_v3 = vpop.f32.mrb[66].mxu1  ;;  %13627 = vmatprep.mubr.msk.f32.mxu1 %vm4813_vm0, %v12444_v22 }
 0x8ca   : > { %14385 = vmatpush3.bf16.msra.mxu1 %v17664_v23  ;;  %v12446_v44 = vpop.f32.mrb[67].mxu1 }
 0x8cb   : > { %14387 = vmatprep.subr.bf16.mxu1 %v17668_v25  ;;  %v12447_v42 = vadd.f32 %v12446_v44, %v12445_v3 }
 0x8cd   : > { %v12448_v15 = vpop.f32.mrb[68].mxu1  ;;  %13628 = vmatmul.mubr.msk.f32.gmra.mrb[38].mxu1 %vm4813_vm0, %v12447_v42 }
 0x8ce   : > { %14389 = vmatpush3.bf16.msra.mxu1 %v17676_v16  ;;  %v12449_v36 = vpop.f32.mrb[69].mxu1 }
 0x8cf   : > { %14391 = vmatprep.subr.bf16.mxu1 %v17680_v1  ;;  %v12450_v19 = vadd.f32 %v12449_v36, %v12448_v15 }
 0x8d1   : > { %v12451_v35 = vpop.f32.mrb[70].mxu1  ;;  %13630 = vmatprep.mubr.msk.f32.mxu1 %vm4813_vm0, %v12450_v19 }
 0x8d2   : > { %14393 = vmatpush3.bf16.msra.mxu1 %v17686_v48  ;;  %v12452_v29 = vpop.f32.mrb[71].mxu1 }
 0x8d3   : > { %14395 = vmatprep.subr.bf16.mxu1 %v17690_v31  ;;  %v12453_v39 = vadd.f32 %v12452_v29, %v12451_v35 }
 0x8d5   : > { %v12454_v60 = vpop.f32.mrb[72].mxu1  ;;  %13631 = vmatmul.mubr.msk.f32.gmra.mrb[40].mxu1 %vm4813_vm0, %v12453_v39 }
 0x8d6   : > { %14397 = vmatpush3.bf16.msra.mxu1 %v17696_v41  ;;  %v12455_v51 = vpop.f32.mrb[73].mxu1 }
 0x8d7   : > { %14399 = vmatprep.subr.bf16.mxu1 %v17700_v50  ;;  %v12456_v0 = vadd.f32 %v12455_v51, %v12454_v60 }
 0x8d9   : > { %v12457_v11 = vpop.f32.mrb[74].mxu1  ;;  %13633 = vmatprep.mubr.msk.f32.mxu1 %vm4813_vm0, %v12456_v0 }
 0x8da   : > { %14401 = vmatpush3.bf16.msra.mxu1 %v17706_v13  ;;  %v12458_v12 = vpop.f32.mrb[75].mxu1 }
 0x8db   : > { %14403 = vmatprep.subr.bf16.mxu1 %v17710_v6  ;;  %v12459_v7 = vadd.f32 %v12458_v12, %v12457_v11  ;;  %v11513_v12 = vld [vmem:[%s19151_s6 + $0x288] sm:$0xff] }
 0x8dd   : > { %13634 = vmatmul.mubr.msk.f32.gmra.mrb[42].mxu1 %vm4813_vm0, %v12459_v7  ;;  %v11528_v7 = vld [vmem:[%s19152_s7 + $0xa0] sm:$0xff] }
 0x8de   : > { %14405 = vmatpush3.bf16.msra.mxu1 %v17716_v37  ;;  %6626 = vmatprep.mubr.f32.mxu1 %v11485_v21  ;;  %v11529_v21 = vld [vmem:[%s19152_s7 + $0xa8] sm:$0xff] }
 0x8df   : > { %14407 = vmatprep.subr.bf16.mxu1 %v17718_v40  ;;  %v14450_v2 = vpack.c.bf16 %v11529_v21, %v11528_v7  ;;  %v11558_v21 = vld [vmem:[%s19152_s7 + $0xd0] sm:$0xff] }
 0x8e2   : > { %14409 = vmatpush3.bf16.msra.mxu1 %v17722_v57 }
 0x8e3   : > { %14411 = vmatprep.subr.bf16.mxu1 %v14410_v32 }
 0x8e5   : > { %6627 = vmatmul.mubr.f32.vlgmr.msra.gmra.mrb[76].mxu1 %v11484_v26 }
 0x8e6   : > { %14413 = vmatpush3.bf16.msra.mxu1 %v14410_v32  ;;  %6631 = vmatprep.mubr.f32.mxu1 %v11487_v30  ;;  %v11531_v32 = vld [vmem:[%s19152_s7 + $0xb8] sm:$0xff]  ;;  %v11514_v30 = vld [vmem:[%s19151_s6 + $0x290] sm:$0xff] }
 0x8e7   : > { %14415 = vmatprep.subr.bf16.mxu1 %v14414_v34  ;;  %v14454_v26 = vpack.c.bf16 %v11531_v32, %v11530_v53  ;;  %v11540_v53 = vld [vmem:[%s19151_s6 + $0x300] sm:$0xff]  ;;  %v11543_v32 = vld [vmem:[%s19151_s6 + $0x318] sm:$0xff] }
 0x8e9   : > { %6632 = vmatmul.mubr.f32.gmra.mrb[78].mxu1 %v11486_v9  ;;  %v11516_v9 = vld [vmem:[%s19151_s6 + $0x2a0] sm:$0xff] }
 0x8ea   : > { %14417 = vmatpush3.bf16.msra.mxu1 %v14414_v34  ;;  %6636 = vmatprep.mubr.f32.mxu1 %v11489_v17  ;;  %v11517_v34 = vld [vmem:[%s19151_s6 + $0x2a8] sm:$0xff]  ;;  %v11519_v17 = vld [vmem:[%s19151_s6 + $0x2b8] sm:$0xff] }
 0x8eb   : > { %14419 = vmatprep.subr.bf16.mxu1 %v17649_v45 }
 0x8ed   : > { %6637 = vmatmul.mubr.f32.gmra.mrb[80].mxu1 %v11488_v55  ;;  %v11518_v55 = vld [vmem:[%s19151_s6 + $0x2b0] sm:$0xff] }
 0x8ee   : > { %6641 = vmatprep.mubr.f32.mxu1 %v11491_v33  ;;  %v11521_v33 = vld [vmem:[%s19151_s6 + $0x2c8] sm:$0xff] }
 0x8f1   : > { %6642 = vmatmul.mubr.f32.gmra.mrb[82].mxu1 %v11490_v49  ;;  %v11520_v49 = vld [vmem:[%s19151_s6 + $0x2c0] sm:$0xff] }
 0x8f2   : > { %6646 = vmatprep.mubr.f32.mxu1 %v11493_v10  ;;  %v11523_v10 = vld [vmem:[%s19151_s6 + $0x2d8] sm:$0xff] }
 0x8f5   : > { %6647 = vmatmul.mubr.f32.gmra.mrb[84].mxu1 %v11492_v56  ;;  %v11522_v56 = vld [vmem:[%s19151_s6 + $0x2d0] sm:$0xff] }
 0x8f6   : > { %6651 = vmatprep.mubr.f32.mxu1 %v11495_v62  ;;  %v11525_v62 = vld [vmem:[%s19151_s6 + $0x2e8] sm:$0xff] }
 0x8f9   : > { %6652 = vmatmul.mubr.f32.gmra.mrb[86].mxu1 %v11494_v18  ;;  %v11524_v18 = vld [vmem:[%s19151_s6 + $0x2e0] sm:$0xff] }
 0x8fa   : > { %6656 = vmatprep.mubr.f32.mxu1 %v11497_v63  ;;  %v11527_v63 = vld [vmem:[%s19151_s6 + $0x2f8] sm:$0xff] }
 0x8fd   : > { %6657 = vmatmul.mubr.f32.gmra.mrb[88].mxu1 %v11496_v47  ;;  %v11526_v47 = vld [vmem:[%s19151_s6 + $0x2f0] sm:$0xff] }
 0x8fe   : > { %6661 = vmatprep.mubr.f32.mxu1 %v11499_v24 }
 0x901   : > { %6662 = vmatmul.mubr.f32.gmra.mrb[90].mxu1 %v11498_v27 }
 0x9b8   : > { %v12504_v8 = vpop.f32.mrb[76].mxu1 }
 0x9b9   : > { %v12505_v61 = vpop.f32.mrb[77].mxu1 }
 0x9ba   : > { %v12506_v4 = vadd.f32 %v12505_v61, %v12504_v8 }
 0x9bc   : > { %v12507_v54 = vpop.f32.mrb[78].mxu1  ;;  %13644 = vmatprep.mubr.msk.f32.mxu1 %vm4813_vm0, %v12506_v4 }
 0x9bd   : > { %v12508_v46 = vpop.f32.mrb[79].mxu1 }
 0x9be   : > { %v12509_v59 = vadd.f32 %v12508_v46, %v12507_v54 }
 0x9c0   : > { %13645 = vmatmul.mubr.msk.f32.vlgmr.msra.gmra.mrb[36].mxu1 %vm4813_vm0, %v12509_v59  ;;  %v12510_v58 = vpop.f32.mrb[80].mxu1 }
 0x9c1   : > { %14421 = vmatpush3.bf16.msra.mxu1 %v17646_v52  ;;  %v12511_v43 = vpop.f32.mrb[81].mxu1 }
 0x9c2   : > { %14423 = vmatprep.subr.bf16.mxu1 %v17656_v14  ;;  %v12512_v28 = vadd.f32 %v12511_v43, %v12510_v58 }
 0x9c4   : > { %v12513_v5 = vpop.f32.mrb[82].mxu1  ;;  %13647 = vmatprep.mubr.msk.f32.mxu1 %vm4813_vm0, %v12512_v28 }
 0x9c5   : > { %14425 = vmatpush3.bf16.msra.mxu1 %v17664_v23  ;;  %v12514_v22 = vpop.f32.mrb[83].mxu1 }
 0x9c6   : > { %14427 = vmatprep.subr.bf16.mxu1 %v17668_v25  ;;  %v12515_v3 = vadd.f32 %v12514_v22, %v12513_v5 }
 0x9c8   : > { %v12516_v44 = vpop.f32.mrb[84].mxu1  ;;  %13648 = vmatmul.mubr.msk.f32.gmra.mrb[38].mxu1 %vm4813_vm0, %v12515_v3 }
 0x9c9   : > { %14429 = vmatpush3.bf16.msra.mxu1 %v17676_v16  ;;  %v12517_v42 = vpop.f32.mrb[85].mxu1 }
 0x9ca   : > { %14431 = vmatprep.subr.bf16.mxu1 %v17680_v1  ;;  %v12518_v15 = vadd.f32 %v12517_v42, %v12516_v44 }
 0x9cc   : > { %v12519_v36 = vpop.f32.mrb[86].mxu1  ;;  %13650 = vmatprep.mubr.msk.f32.mxu1 %vm4813_vm0, %v12518_v15 }
 0x9cd   : > { %14433 = vmatpush3.bf16.msra.mxu1 %v17686_v48  ;;  %v12520_v19 = vpop.f32.mrb[87].mxu1 }
 0x9ce   : > { %14435 = vmatprep.subr.bf16.mxu1 %v17690_v31  ;;  %v12521_v35 = vadd.f32 %v12520_v19, %v12519_v36 }
 0x9d0   : > { %v12522_v29 = vpop.f32.mrb[88].mxu1  ;;  %13651 = vmatmul.mubr.msk.f32.gmra.mrb[40].mxu1 %vm4813_vm0, %v12521_v35 }
 0x9d1   : > { %14437 = vmatpush3.bf16.msra.mxu1 %v17696_v41  ;;  %v12523_v39 = vpop.f32.mrb[89].mxu1 }
 0x9d2   : > { %14439 = vmatprep.subr.bf16.mxu1 %v17700_v50  ;;  %v12524_v60 = vadd.f32 %v12523_v39, %v12522_v29 }
 0x9d4   : > { %v12525_v51 = vpop.f32.mrb[90].mxu1  ;;  %13653 = vmatprep.mubr.msk.f32.mxu1 %vm4813_vm0, %v12524_v60 }
 0x9d5   : > { %14441 = vmatpush3.bf16.msra.mxu1 %v17706_v13  ;;  %v12526_v0 = vpop.f32.mrb[91].mxu1 }
 0x9d6   : > { %14443 = vmatprep.subr.bf16.mxu1 %v17710_v6  ;;  %v12527_v11 = vadd.f32 %v12526_v0, %v12525_v51  ;;  %v11541_v0 = vld [vmem:[%s19151_s6 + $0x308] sm:$0xff] }
 0x9d8   : > { %13654 = vmatmul.mubr.msk.f32.gmra.mrb[42].mxu1 %vm4813_vm0, %v12527_v11  ;;  %v11556_v11 = vld [vmem:[%s19152_s7 + $0xc0] sm:$0xff] }
 0x9d9   : > { %14445 = vmatpush3.bf16.msra.mxu1 %v17716_v37  ;;  %6890 = vmatprep.mubr.f32.mxu1 %v11513_v12  ;;  %v11557_v12 = vld [vmem:[%s19152_s7 + $0xc8] sm:$0xff] }
 0x9da   : > { %14447 = vmatprep.subr.bf16.mxu1 %v17718_v40  ;;  %v14490_v7 = vpack.c.bf16 %v11557_v12, %v11556_v11  ;;  %v11586_v12 = vld [vmem:[%s19152_s7 + $0xf0] sm:$0xff] }
 0x9dd   : > { %14449 = vmatpush3.bf16.msra.mxu1 %v17722_v57 }
 0x9de   : > { %14451 = vmatprep.subr.bf16.mxu1 %v14450_v2 }
 0x9e0   : > { %6891 = vmatmul.mubr.f32.vlgmr.msra.gmra.mrb[92].mxu1 %v11512_v38 }
 0x9e1   : > { %14453 = vmatpush3.bf16.msra.mxu1 %v14450_v2  ;;  %6895 = vmatprep.mubr.f32.mxu1 %v11515_v20  ;;  %v11559_v2 = vld [vmem:[%s19152_s7 + $0xd8] sm:$0xff]  ;;  %v11542_v20 = vld [vmem:[%s19151_s6 + $0x310] sm:$0xff] }
 0x9e2   : > { %14455 = vmatprep.subr.bf16.mxu1 %v14454_v26  ;;  %v14494_v38 = vpack.c.bf16 %v11559_v2, %v11558_v21  ;;  %v11568_v21 = vld [vmem:[%s19151_s6 + $0x380] sm:$0xff]  ;;  %v11571_v2 = vld [vmem:[%s19151_s6 + $0x398] sm:$0xff] }
 0x9e4   : > { %6896 = vmatmul.mubr.f32.gmra.mrb[94].mxu1 %v11514_v30  ;;  %v11544_v30 = vld [vmem:[%s19151_s6 + $0x320] sm:$0xff] }
 0x9e5   : > { %14457 = vmatpush3.bf16.msra.mxu1 %v14454_v26  ;;  %6900 = vmatprep.mubr.f32.mxu1 %v11517_v34  ;;  %v11545_v26 = vld [vmem:[%s19151_s6 + $0x328] sm:$0xff]  ;;  %v11547_v34 = vld [vmem:[%s19151_s6 + $0x338] sm:$0xff] }
 0x9e6   : > { %14459 = vmatprep.subr.bf16.mxu1 %v17649_v45 }
 0x9e8   : > { %6901 = vmatmul.mubr.f32.gmra.mrb[96].mxu1 %v11516_v9  ;;  %v11546_v9 = vld [vmem:[%s19151_s6 + $0x330] sm:$0xff] }
 0x9e9   : > { %6905 = vmatprep.mubr.f32.mxu1 %v11519_v17  ;;  %v11549_v17 = vld [vmem:[%s19151_s6 + $0x348] sm:$0xff] }
 0x9ec   : > { %6906 = vmatmul.mubr.f32.gmra.mrb[98].mxu1 %v11518_v55  ;;  %v11548_v55 = vld [vmem:[%s19151_s6 + $0x340] sm:$0xff] }
 0x9ed   : > { %6910 = vmatprep.mubr.f32.mxu1 %v11521_v33  ;;  %v11551_v33 = vld [vmem:[%s19151_s6 + $0x358] sm:$0xff] }
 0x9f0   : > { %6911 = vmatmul.mubr.f32.gmra.mrb[100].mxu1 %v11520_v49  ;;  %v11550_v49 = vld [vmem:[%s19151_s6 + $0x350] sm:$0xff] }
 0x9f1   : > { %6915 = vmatprep.mubr.f32.mxu1 %v11523_v10  ;;  %v11553_v10 = vld [vmem:[%s19151_s6 + $0x368] sm:$0xff] }
 0x9f4   : > { %6916 = vmatmul.mubr.f32.gmra.mrb[102].mxu1 %v11522_v56  ;;  %v11552_v56 = vld [vmem:[%s19151_s6 + $0x360] sm:$0xff] }
 0x9f5   : > { %6920 = vmatprep.mubr.f32.mxu1 %v11525_v62  ;;  %v11555_v62 = vld [vmem:[%s19151_s6 + $0x378] sm:$0xff] }
 0x9f8   : > { %6921 = vmatmul.mubr.f32.gmra.mrb[104].mxu1 %v11524_v18  ;;  %v11554_v18 = vld [vmem:[%s19151_s6 + $0x370] sm:$0xff] }
 0x9f9   : > { %6925 = vmatprep.mubr.f32.mxu1 %v11527_v63 }
 0x9fc   : > { %6926 = vmatmul.mubr.f32.gmra.mrb[106].mxu1 %v11526_v47 }
 0xab3   : > { %v12572_v24 = vpop.f32.mrb[92].mxu1 }
 0xab4   : > { %v12573_v27 = vpop.f32.mrb[93].mxu1 }
 0xab5   : > { %v12574_v8 = vadd.f32 %v12573_v27, %v12572_v24 }
 0xab7   : > { %v12575_v61 = vpop.f32.mrb[94].mxu1  ;;  %13664 = vmatprep.mubr.msk.f32.mxu1 %vm4813_vm0, %v12574_v8 }
 0xab8   : > { %v12576_v4 = vpop.f32.mrb[95].mxu1 }
 0xab9   : > { %v12577_v54 = vadd.f32 %v12576_v4, %v12575_v61 }
 0xabb   : > { %13665 = vmatmul.mubr.msk.f32.vlgmr.msra.gmra.mrb[36].mxu1 %vm4813_vm0, %v12577_v54  ;;  %v12578_v46 = vpop.f32.mrb[96].mxu1 }
 0xabc   : > { %14461 = vmatpush3.bf16.msra.mxu1 %v17646_v52  ;;  %v12579_v59 = vpop.f32.mrb[97].mxu1 }
 0xabd   : > { %14463 = vmatprep.subr.bf16.mxu1 %v17656_v14  ;;  %v12580_v58 = vadd.f32 %v12579_v59, %v12578_v46 }
 0xabf   : > { %v12581_v43 = vpop.f32.mrb[98].mxu1  ;;  %13667 = vmatprep.mubr.msk.f32.mxu1 %vm4813_vm0, %v12580_v58 }
 0xac0   : > { %14465 = vmatpush3.bf16.msra.mxu1 %v17664_v23  ;;  %v12582_v28 = vpop.f32.mrb[99].mxu1 }
 0xac1   : > { %14467 = vmatprep.subr.bf16.mxu1 %v17668_v25  ;;  %v12583_v5 = vadd.f32 %v12582_v28, %v12581_v43 }
 0xac3   : > { %v12584_v22 = vpop.f32.mrb[100].mxu1  ;;  %13668 = vmatmul.mubr.msk.f32.gmra.mrb[38].mxu1 %vm4813_vm0, %v12583_v5 }
 0xac4   : > { %14469 = vmatpush3.bf16.msra.mxu1 %v17676_v16  ;;  %v12585_v3 = vpop.f32.mrb[101].mxu1 }
 0xac5   : > { %14471 = vmatprep.subr.bf16.mxu1 %v17680_v1  ;;  %v12586_v44 = vadd.f32 %v12585_v3, %v12584_v22 }
 0xac7   : > { %v12587_v42 = vpop.f32.mrb[102].mxu1  ;;  %13670 = vmatprep.mubr.msk.f32.mxu1 %vm4813_vm0, %v12586_v44 }
 0xac8   : > { %14473 = vmatpush3.bf16.msra.mxu1 %v17686_v48  ;;  %v12588_v15 = vpop.f32.mrb[103].mxu1 }
 0xac9   : > { %14475 = vmatprep.subr.bf16.mxu1 %v17690_v31  ;;  %v12589_v36 = vadd.f32 %v12588_v15, %v12587_v42 }
 0xacb   : > { %v12590_v19 = vpop.f32.mrb[104].mxu1  ;;  %13671 = vmatmul.mubr.msk.f32.gmra.mrb[40].mxu1 %vm4813_vm0, %v12589_v36 }
 0xacc   : > { %14477 = vmatpush3.bf16.msra.mxu1 %v17696_v41  ;;  %v12591_v35 = vpop.f32.mrb[105].mxu1 }
 0xacd   : > { %14479 = vmatprep.subr.bf16.mxu1 %v17700_v50  ;;  %v12592_v29 = vadd.f32 %v12591_v35, %v12590_v19 }
 0xacf   : > { %v12593_v39 = vpop.f32.mrb[106].mxu1  ;;  %13673 = vmatprep.mubr.msk.f32.mxu1 %vm4813_vm0, %v12592_v29 }
 0xad0   : > { %14481 = vmatpush3.bf16.msra.mxu1 %v17706_v13  ;;  %v12594_v60 = vpop.f32.mrb[107].mxu1 }
 0xad1   : > { %14483 = vmatprep.subr.bf16.mxu1 %v17710_v6  ;;  %v12595_v51 = vadd.f32 %v12594_v60, %v12593_v39  ;;  %v11569_v60 = vld [vmem:[%s19151_s6 + $0x388] sm:$0xff] }
 0xad3   : > { %13674 = vmatmul.mubr.msk.f32.gmra.mrb[42].mxu1 %vm4813_vm0, %v12595_v51  ;;  %v11584_v51 = vld [vmem:[%s19152_s7 + $0xe0] sm:$0xff] }
 0xad4   : > { %14485 = vmatpush3.bf16.msra.mxu1 %v17716_v37  ;;  %7154 = vmatprep.mubr.f32.mxu1 %v11541_v0  ;;  %v11585_v0 = vld [vmem:[%s19152_s7 + $0xe8] sm:$0xff] }
 0xad5   : > { %14487 = vmatprep.subr.bf16.mxu1 %v17718_v40  ;;  %v14530_v11 = vpack.c.bf16 %v11585_v0, %v11584_v51  ;;  %v11614_v51 = vld [vmem:[%s19152_s7 + $0x110] sm:$0xff]  ;;  %v11615_v0 = vld [vmem:[%s19152_s7 + $0x118] sm:$0xff] }
 0xad8   : > { %14489 = vmatpush3.bf16.msra.mxu1 %v17722_v57 }
 0xad9   : > { %14491 = vmatprep.subr.bf16.mxu1 %v14490_v7 }
 0xadb   : > { %7155 = vmatmul.mubr.f32.vlgmr.msra.gmra.mrb[108].mxu1 %v11540_v53 }
 0xadc   : > { %14493 = vmatpush3.bf16.msra.mxu1 %v14490_v7  ;;  %7159 = vmatprep.mubr.f32.mxu1 %v11543_v32  ;;  %v11587_v7 = vld [vmem:[%s19152_s7 + $0xf8] sm:$0xff]  ;;  %v11570_v32 = vld [vmem:[%s19151_s6 + $0x390] sm:$0xff] }
 0xadd   : > { %14495 = vmatprep.subr.bf16.mxu1 %v14494_v38  ;;  %v14534_v53 = vpack.c.bf16 %v11587_v7, %v11586_v12 }
 0xadf   : > { %7160 = vmatmul.mubr.f32.gmra.mrb[110].mxu1 %v11542_v20  ;;  %v11572_v20 = vld [vmem:[%s19151_s6 + $0x3a0] sm:$0xff] }
 0xae0   : > { %14497 = vmatpush3.bf16.msra.mxu1 %v14494_v38  ;;  %7164 = vmatprep.mubr.f32.mxu1 %v11545_v26  ;;  %v11573_v38 = vld [vmem:[%s19151_s6 + $0x3a8] sm:$0xff]  ;;  %v11575_v26 = vld [vmem:[%s19151_s6 + $0x3b8] sm:$0xff] }
 0xae1   : > { %14499 = vmatprep.subr.bf16.mxu1 %v17649_v45 }
 0xae3   : > { %7165 = vmatmul.mubr.f32.gmra.mrb[112].mxu1 %v11544_v30  ;;  %v11574_v30 = vld [vmem:[%s19151_s6 + $0x3b0] sm:$0xff] }
 0xae4   : > { %7169 = vmatprep.mubr.f32.mxu1 %v11547_v34  ;;  %v11577_v34 = vld [vmem:[%s19151_s6 + $0x3c8] sm:$0xff] }
 0xae7   : > { %7170 = vmatmul.mubr.f32.gmra.mrb[114].mxu1 %v11546_v9  ;;  %v11579_v9 = vld [vmem:[%s19151_s6 + $0x3d8] sm:$0xff] }
 0xae8   : > { %7174 = vmatprep.mubr.f32.mxu1 %v11549_v17  ;;  %v11578_v17 = vld [vmem:[%s19151_s6 + $0x3d0] sm:$0xff] }
 0xaeb   : > { %7175 = vmatmul.mubr.f32.gmra.mrb[116].mxu1 %v11548_v55  ;;  %v11581_v55 = vld [vmem:[%s19151_s6 + $0x3e8] sm:$0xff] }
 0xaec   : > { %7179 = vmatprep.mubr.f32.mxu1 %v11551_v33  ;;  %v11580_v33 = vld [vmem:[%s19151_s6 + $0x3e0] sm:$0xff] }
 0xaef   : > { %7180 = vmatmul.mubr.f32.gmra.mrb[118].mxu1 %v11550_v49  ;;  %v11583_v49 = vld [vmem:[%s19151_s6 + $0x3f8] sm:$0xff] }
 0xaf0   : > { %7184 = vmatprep.mubr.f32.mxu1 %v11553_v10  ;;  %v11582_v10 = vld [vmem:[%s19151_s6 + $0x3f0] sm:$0xff] }
 0xaf3   : > { %7185 = vmatmul.mubr.f32.gmra.mrb[120].mxu1 %v11552_v56 }
 0xaf4   : > { %7189 = vmatprep.mubr.f32.mxu1 %v11555_v62 }
 0xaf7   : > { %7190 = vmatmul.mubr.f32.gmra.mrb[122].mxu1 %v11554_v18 }
 0xbae   : > { %v12640_v63 = vpop.f32.mrb[108].mxu1 }
 0xbaf   : > { %v12641_v47 = vpop.f32.mrb[109].mxu1 }
 0xbb0   : > { %v12642_v24 = vadd.f32 %v12641_v47, %v12640_v63 }
 0xbb2   : > { %v12643_v27 = vpop.f32.mrb[110].mxu1  ;;  %13684 = vmatprep.mubr.msk.f32.mxu1 %vm4813_vm0, %v12642_v24 }
 0xbb3   : > { %v12644_v8 = vpop.f32.mrb[111].mxu1 }
 0xbb4   : > { %v12645_v61 = vadd.f32 %v12644_v8, %v12643_v27 }
 0xbb6   : > { %13685 = vmatmul.mubr.msk.f32.vlgmr.msra.gmra.mrb[36].mxu1 %vm4813_vm0, %v12645_v61  ;;  %v12646_v4 = vpop.f32.mrb[112].mxu1 }
 0xbb7   : > { %14501 = vmatpush3.bf16.msra.mxu1 %v17646_v52  ;;  %v12647_v54 = vpop.f32.mrb[113].mxu1 }
 0xbb8   : > { %14503 = vmatprep.subr.bf16.mxu1 %v17656_v14  ;;  %v12648_v46 = vadd.f32 %v12647_v54, %v12646_v4 }
 0xbba   : > { %v12649_v59 = vpop.f32.mrb[114].mxu1  ;;  %13687 = vmatprep.mubr.msk.f32.mxu1 %vm4813_vm0, %v12648_v46 }
 0xbbb   : > { %14505 = vmatpush3.bf16.msra.mxu1 %v17664_v23  ;;  %v12650_v58 = vpop.f32.mrb[115].mxu1 }
 0xbbc   : > { %14507 = vmatprep.subr.bf16.mxu1 %v17668_v25  ;;  %v12651_v43 = vadd.f32 %v12650_v58, %v12649_v59 }
 0xbbe   : > { %v12652_v28 = vpop.f32.mrb[116].mxu1  ;;  %13688 = vmatmul.mubr.msk.f32.gmra.mrb[38].mxu1 %vm4813_vm0, %v12651_v43 }
 0xbbf   : > { %14509 = vmatpush3.bf16.msra.mxu1 %v17676_v16  ;;  %v12653_v5 = vpop.f32.mrb[117].mxu1 }
 0xbc0   : > { %14511 = vmatprep.subr.bf16.mxu1 %v17680_v1  ;;  %v12654_v22 = vadd.f32 %v12653_v5, %v12652_v28 }
 0xbc2   : > { %v12655_v3 = vpop.f32.mrb[118].mxu1  ;;  %13690 = vmatprep.mubr.msk.f32.mxu1 %vm4813_vm0, %v12654_v22  ;;  %v11599_v22 = vld [vmem:[%s19151_s6 + $0x418] sm:$0xff] }
 0xbc3   : > { %14513 = vmatpush3.bf16.msra.mxu1 %v17686_v48  ;;  %v12656_v44 = vpop.f32.mrb[119].mxu1 }
 0xbc4   : > { %14515 = vmatprep.subr.bf16.mxu1 %v17690_v31  ;;  %v12657_v42 = vadd.f32 %v12656_v44, %v12655_v3  ;;  %v11603_v3 = vld [vmem:[%s19151_s6 + $0x438] sm:$0xff]  ;;  %v11602_v44 = vld [vmem:[%s19151_s6 + $0x430] sm:$0xff] }
 0xbc6   : > { %v12658_v15 = vpop.f32.mrb[120].mxu1  ;;  %13691 = vmatmul.mubr.msk.f32.gmra.mrb[40].mxu1 %vm4813_vm0, %v12657_v42  ;;  %v11605_v42 = vld [vmem:[%s19151_s6 + $0x448] sm:$0xff] }
 0xbc7   : > { %14517 = vmatpush3.bf16.msra.mxu1 %v17696_v41  ;;  %v12659_v36 = vpop.f32.mrb[121].mxu1 }
 0xbc8   : > { %14519 = vmatprep.subr.bf16.mxu1 %v17700_v50  ;;  %v12660_v19 = vadd.f32 %v12659_v36, %v12658_v15  ;;  %v11604_v15 = vld [vmem:[%s19151_s6 + $0x440] sm:$0xff]  ;;  %v11607_v36 = vld [vmem:[%s19151_s6 + $0x458] sm:$0xff] }
 0xbca   : > { %v12661_v35 = vpop.f32.mrb[122].mxu1  ;;  %13693 = vmatprep.mubr.msk.f32.mxu1 %vm4813_vm0, %v12660_v19  ;;  %v11606_v19 = vld [vmem:[%s19151_s6 + $0x450] sm:$0xff] }
 0xbcb   : > { %14521 = vmatpush3.bf16.msra.mxu1 %v17706_v13  ;;  %v12662_v29 = vpop.f32.mrb[123].mxu1 }
 0xbcc   : > { %14523 = vmatprep.subr.bf16.mxu1 %v17710_v6  ;;  %v12663_v39 = vadd.f32 %v12662_v29, %v12661_v35  ;;  %v11609_v35 = vld [vmem:[%s19151_s6 + $0x468] sm:$0xff]  ;;  %v11608_v29 = vld [vmem:[%s19151_s6 + $0x460] sm:$0xff] }
 0xbce   : > { %13694 = vmatmul.mubr.msk.f32.gmra.mrb[42].mxu1 %vm4813_vm0, %v12663_v39  ;;  %v11611_v39 = vld [vmem:[%s19151_s6 + $0x478] sm:$0xff] }
 0xbcf   : > { %14525 = vmatpush3.bf16.msra.mxu1 %v17716_v37  ;;  %7418 = vmatprep.mubr.f32.mxu1 %v11569_v60  ;;  %v11610_v60 = vld [vmem:[%s19151_s6 + $0x470] sm:$0xff] }
 0xbd0   : > { %14527 = vmatprep.subr.bf16.mxu1 %v17718_v40 }
 0xbd3   : > { %14529 = vmatpush3.bf16.msra.mxu1 %v17722_v57 }
 0xbd4   : > { %14531 = vmatprep.subr.bf16.mxu1 %v14530_v11 }
 0xbd6   : > { %7419 = vmatmul.mubr.f32.vlgmr.msra.gmra.mrb[124].mxu1 %v11568_v21 }
 0xbd7   : > { %14533 = vmatpush3.bf16.msra.mxu1 %v14530_v11  ;;  %7423 = vmatprep.mubr.f32.mxu1 %v11571_v2  ;;  %v14574_v11 = vpack.c.bf16 %v11615_v0, %v11614_v51  ;;  %v19618_v0 = vld [vmem:[#allocation9_spill] sm:$0xff] }
 0xbd8   : > { %14535 = vmatprep.subr.bf16.mxu1 %v14534_v53 }
 0xbda   : > { %7424 = vmatmul.mubr.f32.gmra.mrb[126].mxu1 %v11570_v32 }
 0xbdb   : > { %14537 = vmatpush3.bf16.msra.mxu1 %v14534_v53  ;;  %7428 = vmatprep.mubr.f32.mxu1 %v11573_v38 }
 0xbdc   : > { %14539 = vmatprep.subr.bf16.mxu1 %v17649_v45  ;;  %v11576_v45 = vld [vmem:[%s19151_s6 + $0x3c0] sm:$0xff] }
 0xbde   : > { %7429 = vmatmul.mubr.f32.gmra.mrb[128].mxu1 %v11572_v20 }
 0xbdf   : > { %7433 = vmatprep.mubr.f32.mxu1 %v11575_v26 }
 0xbe2   : > { %7434 = vmatmul.mubr.f32.gmra.mrb[130].mxu1 %v11574_v30 }
 0xbe3   : > { %7438 = vmatprep.mubr.f32.mxu1 %v11577_v34 }
 0xbe6   : > { %7439 = vmatmul.mubr.f32.gmra.mrb[132].mxu1 %v11576_v45 }
 0xbe7   : > { %7443 = vmatprep.mubr.f32.mxu1 %v11579_v9 }
 0xbea   : > { %7444 = vmatmul.mubr.f32.gmra.mrb[134].mxu1 %v11578_v17 }
 0xbeb   : > { %7448 = vmatprep.mubr.f32.mxu1 %v11581_v55 }
 0xbee   : > { %7449 = vmatmul.mubr.f32.gmra.mrb[136].mxu1 %v11580_v33 }
 0xbef   : > { %7453 = vmatprep.mubr.f32.mxu1 %v11583_v49 }
 0xbf2   : > { %7454 = vmatmul.mubr.f32.gmra.mrb[138].mxu1 %v11582_v10 }
 0xca9   : > { %v12708_v56 = vpop.f32.mrb[124].mxu1 }
 0xcaa   : > { %v12709_v62 = vpop.f32.mrb[125].mxu1 }
 0xcab   : > { %v12710_v18 = vadd.f32 %v12709_v62, %v12708_v56 }
 0xcad   : > { %v12711_v63 = vpop.f32.mrb[126].mxu1  ;;  %13704 = vmatprep.mubr.msk.f32.mxu1 %vm4813_vm0, %v12710_v18 }
 0xcae   : > { %v12712_v47 = vpop.f32.mrb[127].mxu1 }
 0xcaf   : > { %v12713_v24 = vadd.f32 %v12712_v47, %v12711_v63 }
 0xcb1   : > { %13705 = vmatmul.mubr.msk.f32.vlgmr.msra.gmra.mrb[36].mxu1 %vm4813_vm0, %v12713_v24  ;;  %v12714_v27 = vpop.f32.mrb[128].mxu1 }
 0xcb2   : > { %14541 = vmatpush3.bf16.msra.mxu1 %v17646_v52  ;;  %v12715_v8 = vpop.f32.mrb[129].mxu1 }
 0xcb3   : > { %14543 = vmatprep.subr.bf16.mxu1 %v17656_v14  ;;  %v12716_v61 = vadd.f32 %v12715_v8, %v12714_v27 }
 0xcb5   : > { %v12717_v4 = vpop.f32.mrb[130].mxu1  ;;  %13707 = vmatprep.mubr.msk.f32.mxu1 %vm4813_vm0, %v12716_v61  ;;  %v11624_v61 = vld [vmem:[%s19153_s8] ss:$0 sm:$0xff] }
 0xcb6   : > { %14545 = vmatpush3.bf16.msra.mxu1 %v17664_v23  ;;  %v12718_v54 = vpop.f32.mrb[131].mxu1 }
 0xcb7   : > { %14547 = vmatprep.subr.bf16.mxu1 %v17668_v25  ;;  %v12719_v46 = vadd.f32 %v12718_v54, %v12717_v4 }
 0xcb9   : > { %v12720_v59 = vpop.f32.mrb[132].mxu1  ;;  %13708 = vmatmul.mubr.msk.f32.gmra.mrb[38].mxu1 %vm4813_vm0, %v12719_v46 }
 0xcba   : > { %14549 = vmatpush3.bf16.msra.mxu1 %v17676_v16  ;;  %v12721_v58 = vpop.f32.mrb[133].mxu1 }
 0xcbb   : > { %14551 = vmatprep.subr.bf16.mxu1 %v17680_v1  ;;  %v12722_v52 = vadd.f32 %v12721_v58, %v12720_v59 }
 0xcbd   : > { %v12723_v14 = vpop.f32.mrb[134].mxu1  ;;  %13710 = vmatprep.mubr.msk.f32.mxu1 %vm4813_vm0, %v12722_v52 }
 0xcbe   : > { %14553 = vmatpush3.bf16.msra.mxu1 %v17686_v48  ;;  %v12724_v43 = vpop.f32.mrb[135].mxu1 }
 0xcbf   : > { %14555 = vmatprep.subr.bf16.mxu1 %v17690_v31  ;;  %v12725_v23 = vadd.f32 %v12724_v43, %v12723_v14  ;;  %v11597_v31 = vld [vmem:[%s19151_s6 + $0x408] sm:$0xff] }
 0xcc1   : > { %v12726_v25 = vpop.f32.mrb[136].mxu1  ;;  %13711 = vmatmul.mubr.msk.f32.gmra.mrb[40].mxu1 %vm4813_vm0, %v12725_v23 }
 0xcc2   : > { %14557 = vmatpush3.bf16.msra.mxu1 %v17696_v41  ;;  %v12727_v28 = vpop.f32.mrb[137].mxu1  ;;  %v11612_v41 = vld [vmem:[%s19152_s7 + $0x100] sm:$0xff] }
 0xcc3   : > { %14559 = vmatprep.subr.bf16.mxu1 %v17700_v50  ;;  %v12728_v16 = vadd.f32 %v12727_v28, %v12726_v25  ;;  %v11613_v50 = vld [vmem:[%s19152_s7 + $0x108] sm:$0xff] }
 0xcc5   : > { %v12729_v1 = vpop.f32.mrb[138].mxu1  ;;  %13713 = vmatprep.mubr.msk.f32.mxu1 %vm4813_vm0, %v12728_v16 }
 0xcc6   : > { %14561 = vmatpush3.bf16.msra.mxu1 %v17706_v13  ;;  %v12730_v5 = vpop.f32.mrb[139].mxu1  ;;  %v14570_v13 = vpack.c.bf16 %v11613_v50, %v11612_v41 }
 0xcc7   : > { %14563 = vmatprep.subr.bf16.mxu1 %v17710_v6  ;;  %v12731_v48 = vadd.f32 %v12730_v5, %v12729_v1  ;;  %v11596_v6 = vld [vmem:[%s19151_s6 + $0x400] sm:$0xff] }
 0xcc9   : > { %13714 = vmatmul.mubr.msk.f32.gmra.mrb[42].mxu1 %vm4813_vm0, %v12731_v48 }
 0xcca   : > { %14565 = vmatpush3.bf16.msra.mxu1 %v17716_v37  ;;  %7682 = vmatprep.mubr.f32.mxu1 %v11597_v31  ;;  %v11598_v37 = vld [vmem:[%s19151_s6 + $0x410] sm:$0xff] }
 0xccb   : > { %14567 = vmatprep.subr.bf16.mxu1 %v17718_v40  ;;  %v11601_v40 = vld [vmem:[%s19151_s6 + $0x428] sm:$0xff] }
 0xcce   : > { %14569 = vmatpush3.bf16.msra.mxu1 %v17722_v57  ;;  %v11600_v57 = vld [vmem:[%s19151_s6 + $0x420] sm:$0xff] }
 0xccf   : > { %14571 = vmatprep.subr.bf16.mxu1 %v14570_v13 }
 0xcd1   : > { %7683 = vmatmul.mubr.f32.vlgmr.msra.gmra.mrb[140].mxu1 %v11596_v6 }
 0xcd2   : > { %7687 = vmatprep.mubr.f32.mxu1 %v11599_v22  ;;  %14573 = vmatpush3.bf16.msra.mxu1 %v14570_v13 }
 0xcd3   : > { %14575 = vmatprep.subr.bf16.mxu1 %v14574_v11 }
 0xcd5   : > { %7688 = vmatmul.mubr.f32.gmra.mrb[142].mxu1 %v11598_v37 }
 0xcd6   : > { %7692 = vmatprep.mubr.f32.mxu1 %v11601_v40  ;;  %14577 = vmatpush3.bf16.msra.mxu1 %v14574_v11  ;;  %v19619_v11 = vmov 0.0  }
 0xcd9   : > { %7693 = vmatmul.mubr.f32.gmra.mrb[144].mxu1 %v11600_v57 }
 0xcda   : > { %7697 = vmatprep.mubr.f32.mxu1 %v11603_v3 }
 0xcdd   : > { %7698 = vmatmul.mubr.f32.gmra.mrb[146].mxu1 %v11602_v44 }
 0xcde   : > { %7702 = vmatprep.mubr.f32.mxu1 %v11605_v42 }
 0xce1   : > { %7703 = vmatmul.mubr.f32.gmra.mrb[148].mxu1 %v11604_v15 }
 0xce2   : > { %7707 = vmatprep.mubr.f32.mxu1 %v11607_v36 }
 0xce5   : > { %7708 = vmatmul.mubr.f32.gmra.mrb[150].mxu1 %v11606_v19 }
 0xce6   : > { %7712 = vmatprep.mubr.f32.mxu1 %v11609_v35 }
 0xce9   : > { %7713 = vmatmul.mubr.f32.gmra.mrb[152].mxu1 %v11608_v29 }
 0xcea   : > { %7717 = vmatprep.mubr.f32.mxu1 %v11611_v39 }
 0xced   : > { %7718 = vmatmul.mubr.f32.gmra.mrb[154].mxu1 %v11610_v60 }
 0xda4   : > { %v12776_v12 = vpop.f32.mrb[140].mxu1 }
 0xda5   : > { %v12777_v7 = vpop.f32.mrb[141].mxu1 }
 0xda6   : > { %v12778_v21 = vadd.f32 %v12777_v7, %v12776_v12  ;;  %v19620_v12 = vmov 0.0|0.0   ;;  %v19621_v7 = vld [vmem:[#allocation10_spill] sm:$0xff] }
 0xda8   : > { %v12779_v2 = vpop.f32.mrb[142].mxu1  ;;  %13724 = vmatprep.mubr.msk.f32.mxu1 %vm4813_vm0, %v12778_v21 }
 0xda9   : > { %v12780_v53 = vpop.f32.mrb[143].mxu1 }
 0xdaa   : > { %v12781_v32 = vadd.f32 %v12780_v53, %v12779_v2 }
 0xdac   : > { %v12782_v38 = vpop.f32.mrb[144].mxu1  ;;  %13725 = vmatmul.mubr.msk.f32.vlgmr.msra.gmra.mrb[36].mxu1 %vm4813_vm0, %v12781_v32  ;;  %v19622_v32 = vld [vmem:[#allocation11_spill] sm:$0xff] }
 0xdad   : > { %v12783_v20 = vpop.f32.mrb[145].mxu1 }
 0xdae   : > { %v12784_v26 = vadd.f32 %v12783_v20, %v12782_v38 }
 0xdb0   : > { %v12785_v30 = vpop.f32.mrb[146].mxu1  ;;  %13727 = vmatprep.mubr.msk.f32.mxu1 %vm4813_vm0, %v12784_v26 }
 0xdb1   : > { %v12786_v34 = vpop.f32.mrb[147].mxu1 }
 0xdb2   : > { %v12787_v45 = vadd.f32 %v12786_v34, %v12785_v30 }
 0xdb4   : > { %v12788_v9 = vpop.f32.mrb[148].mxu1  ;;  %13728 = vmatmul.mubr.msk.f32.gmra.mrb[38].mxu1 %vm4813_vm0, %v12787_v45 }
 0xdb5   : > { %v12789_v17 = vpop.f32.mrb[149].mxu1 }
 0xdb6   : > { %v12790_v55 = vadd.f32 %v12789_v17, %v12788_v9 }
 0xdb8   : > { %v12791_v33 = vpop.f32.mrb[150].mxu1  ;;  %13730 = vmatprep.mubr.msk.f32.mxu1 %vm4813_vm0, %v12790_v55 }
 0xdb9   : > { %v12792_v49 = vpop.f32.mrb[151].mxu1 }
 0xdba   : > { %v12793_v10 = vadd.f32 %v12792_v49, %v12791_v33 }
 0xdbc   : > { %v12794_v56 = vpop.f32.mrb[152].mxu1  ;;  %13731 = vmatmul.mubr.msk.f32.gmra.mrb[40].mxu1 %vm4813_vm0, %v12793_v10 }
 0xdbd   : > { %v12795_v62 = vpop.f32.mrb[153].mxu1 }
 0xdbe   : > { %v12796_v18 = vadd.f32 %v12795_v62, %v12794_v56 }
 0xdc0   : > { %v12797_v63 = vpop.f32.mrb[154].mxu1  ;;  %13733 = vmatprep.mubr.msk.f32.mxu1 %vm4813_vm0, %v12796_v18 }
 0xdc1   : > { %v12798_v47 = vpop.f32.mrb[155].mxu1 }
 0xdc2   : > { %v12799_v24 = vadd.f32 %v12798_v47, %v12797_v63 }
 0xdc4   : > { %13734 = vmatmul.mubr.msk.f32.gmra.mrb[42].mxu1 %vm4813_vm0, %v12799_v24 }
 0xe7f   : > { %v13726_v27 = vpop.f32.mrb[36].mxu1 }
 0xe80   : > { %v7818_v8 = vpop.f32.mrb[37].mxu1  ;;  %v7873_v4 = vadd.f32 %v13726_v27, %v11624_v61 }
 0xe81   : > { %v7872_v54 = vadd.f32 %v11624_v61, %v7818_v8 }
 0xe82   : > { %v7883_v52 = vsel %vm4813_vm0, %v7873_v4, 0.0 }
 0xe83   : > { %v7882_v14 = vsel %vm4813_vm0, %v7872_v54, 0.0 }
 0xe84   : > { %v7884_v23 = vadd.f32 %v7883_v52, %v7882_v14 }
 0xe87   : > { %v13729_v46 = vpop.f32.mrb[38].mxu1 }
 0xe88   : > { %v7828_v59 = vpop.f32.mrb[39].mxu1  ;;  %v7875_v25 = vadd.f32 %v13729_v46, %v11624_v61 }
 0xe89   : > { %v7874_v58 = vadd.f32 %v11624_v61, %v7828_v59 }
 0xe8a   : > { %v7887_v48 = vsel %vm4813_vm0, %v7875_v25, 0.0 }
 0xe8b   : > { %v7885_v43 = vsel %vm4813_vm0, %v7874_v58, 0.0 }
 0xe8c   : > { %v7886_v16 = vadd.f32 %v7885_v43, %v7884_v23 }
 0xe8e   : > { %v7888_v41 = vadd.f32 %v7887_v48, %v7886_v16 }
 0xe8f   : > { %v13732_v28 = vpop.f32.mrb[40].mxu1 }
 0xe90   : > { %v7838_v1 = vpop.f32.mrb[41].mxu1  ;;  %v7877_v50 = vadd.f32 %v13732_v28, %v11624_v61 }
 0xe91   : > { %v7876_v5 = vadd.f32 %v11624_v61, %v7838_v1 }
 0xe92   : > { %v7891_v37 = vsel %vm4813_vm0, %v7877_v50, 0.0 }
 0xe93   : > { %v7889_v31 = vsel %vm4813_vm0, %v7876_v5, 0.0 }
 0xe94   : > { %v7890_v13 = vadd.f32 %v7889_v31, %v7888_v41 }
 0xe96   : > { %v7892_v3 = vadd.f32 %v7891_v37, %v7890_v13  ;;  %v8191_v13 = vld [vmem:[%s19156_s11] sm:$0xff] }
 0xe97   : > { %v13735_v6 = vpop.f32.mrb[42].mxu1  ;;  %13774 = vmatprep.mubr.msk.f32.mxu1 %vm8199_vm8, %v8191_v13 }
 0xe98   : > { %v7848_v22 = vpop.f32.mrb[43].mxu1  ;;  %v7879_v40 = vadd.f32 %v13735_v6, %v11624_v61 }
 0xe99   : > { %v7878_v57 = vadd.f32 %v11624_v61, %v7848_v22 }
 0xe9a   : > { %v7895_v15 = vsel %vm4813_vm0, %v7879_v40, 0.0 }
 0xe9b   : > { %v7893_v44 = vsel %vm4813_vm0, %v7878_v57, 0.0 }
 0xe9c   : > { %v7894_v42 = vadd.f32 %v7893_v44, %v7892_v3  ;;  %v11627_v44 = vld [vmem:[%s19154_s9] ss:$0 sm:$0xff] }
 0xe9e   : > { %v7896_v36 = vadd.f32 %v7895_v15, %v7894_v42 }
 0xea0   : > { %v7897_v19 = vrot.slane %v7896_v36, 4 }
 0xea2   : > { %v7898_v35 = vadd.f32 %v7897_v19, %v7896_v36 }
 0xea4   : > { %v7899_v29 = vrot.slane %v7898_v35, 2 }
 0xea6   : > { %v7900_v39 = vadd.f32 %v7899_v29, %v7898_v35  ;;  %v11628_v35 = vld [vmem:[%s19155_s10] ss:$0 sm:$0xff] }
 0xea8   : > { %v7901_v60 = vrot.slane %v7900_v39, 1 }
 0xeaa   : > { %v7902_v51 = vadd.f32 %v7901_v60, %v7900_v39 }
 0xeac   : > { %13745 = vmatmul.mubr.msk.f32.vlgmr.msra.gmra.mrb[32].mxu0 %vm4813_vm0, %v7902_v51 }
 0xead   : > { %14586 = vmatpush3.bf16.msra.mxu0 %v19618_v0  ;;  %13755 = vmatprep.mubr.msk.f32.mxu0 %vm15500_vm1, %v19619_v11 }
 0xeae   : > { %14587 = vmatprep.subr.bf16.mxu0 %v19620_v12 }
 0xeb1   : > { %14589 = vmatpush3.bf16.msra.mxu0 %v19621_v7 }
 0xf7f   : > { %v7972_v21 = vpop.f32.mrb[32].mxu0 }
 0xf80   : > { %v7977_v2 = vmul.f32 0.00390625, %v7972_v21  ;;  %v13746_v53 = vpop.f32.mrb[33].mxu0 }
 0xf82   : > { %v7981_v38 = vrot.slane %v7977_v2, %v19622_v32 }
 0xf84   : > { %v7982_v20 = vsub.f32 %v7872_v54, %v7981_v38  ;;  %v7983_v26 = vsub.f32 %v7873_v4, %v7981_v38  ;;  %v7984_v30 = vsub.f32 %v7874_v58, %v7981_v38  ;;  %v7985_v34 = vsub.f32 %v7875_v25, %v7981_v38 }
 0xf85   : > { %v7986_v45 = vsub.f32 %v7876_v5, %v7981_v38  ;;  %v7987_v33 = vsub.f32 %v7877_v50, %v7981_v38  ;;  %v7988_v18 = vsub.f32 %v7878_v57, %v7981_v38  ;;  %v7989_v27 = vsub.f32 %v7879_v40, %v7981_v38  ;;  %v11645_v50 = vld [vmem:[%s19156_s11 + $0x40] sm:$0xff] }
 0xf86   : > { %v7990_v9 = vmul.f32 %v7982_v20, %v7982_v20  ;;  %v7991_v17 = vmul.f32 %v7983_v26, %v7983_v26  ;;  %v7992_v55 = vmul.f32 %v7984_v30, %v7984_v30  ;;  %v7993_v49 = vmul.f32 %v7985_v34, %v7985_v34 }
 0xf87   : > { %v7994_v63 = vmul.f32 %v7986_v45, %v7986_v45  ;;  %v7995_v8 = vmul.f32 %v7987_v33, %v7987_v33  ;;  %v7996_v54 = vmul.f32 %v7988_v18, %v7988_v18  ;;  %v7997_v58 = vmul.f32 %v7989_v27, %v7989_v27 }
 0xf88   : > { %v7998_v10 = vsel %vm4813_vm0, %v7990_v9, 0.0  ;;  %v7999_v56 = vsel %vm4813_vm0, %v7991_v17, 0.0  ;;  %v8001_v47 = vsel %vm4813_vm0, %v7992_v55, 0.0  ;;  %v8003_v61 = vsel %vm4813_vm0, %v7993_v49, 0.0 }
 0xf89   : > { %v8000_v62 = vadd.f32 %v7999_v56, %v7998_v10  ;;  %v8005_v46 = vsel %vm4813_vm0, %v7994_v63, 0.0  ;;  %v8007_v52 = vsel %vm4813_vm0, %v7995_v8, 0.0  ;;  %v8009_v43 = vsel %vm4813_vm0, %v7996_v54, 0.0 }
 0xf8a   : > { %v8011_v25 = vsel %vm4813_vm0, %v7997_v58, 0.0 }
 0xf8b   : > { %v8002_v24 = vadd.f32 %v8001_v47, %v8000_v62 }
 0xf8d   : > { %v8004_v4 = vadd.f32 %v8003_v61, %v8002_v24 }
 0xf8f   : > { %v8006_v59 = vadd.f32 %v8005_v46, %v8004_v4 }
 0xf91   : > { %v8008_v14 = vadd.f32 %v8007_v52, %v8006_v59 }
 0xf93   : > { %v8010_v23 = vadd.f32 %v8009_v43, %v8008_v14 }
 0xf95   : > { %v8012_v28 = vadd.f32 %v8011_v25, %v8010_v23 }
 0xf97   : > { %v8013_v16 = vrot.slane %v8012_v28, 4 }
 0xf99   : > { %v8014_v1 = vadd.f32 %v8013_v16, %v8012_v28 }
 0xf9b   : > { %v8015_v5 = vrot.slane %v8014_v1, 2 }
 0xf9d   : > { %v8016_v48 = vadd.f32 %v8015_v5, %v8014_v1 }
 0xf9f   : > { %v8017_v31 = vrot.slane %v8016_v48, 1 }
 0xfa1   : > { %v8018_v41 = vadd.f32 %v8017_v31, %v8016_v48 }
 0xfa3   : > { %13756 = vmatmul.mubr.msk.f32.vlgmr.msra.gmra.mrb[34].mxu0 %vm4813_vm0, %v8018_v41 }
 0xfa4   : > { %13802 = vmatprep.mubr.msk.f32.mxu0 %vm8199_vm8, %v11645_v50 }
0x1076   : > { %v8088_v6 = vpop.f32.mrb[34].mxu0 }
0x1077   : > { %v8092_v22 = vmul.f32 0.00390625, %v8088_v6  ;;  %v13757_v37 = vpop.f32.mrb[35].mxu0 }
0x1079   : > { %v8093_v40 = vadd.f32 1e-06, %v8092_v22 }
0x107b   : > { %15369 = vrsqrt.f32 %v8093_v40 }
0x1085   : > { %v15370_v57 = vpop.eup %15369 }
0x1086   : > { %v8098_v3 = vrot.slane %v15370_v57, %v19622_v32 }
0x1088   : > { %v8099_v42 = vmul.f32 %v8098_v3, %v7982_v20  ;;  %v8100_v15 = vmul.f32 %v8098_v3, %v7983_v26  ;;  %v8101_v36 = vmul.f32 %v8098_v3, %v7984_v30  ;;  %v8102_v19 = vmul.f32 %v8098_v3, %v7985_v34 }
0x1089   : > { %v8103_v29 = vmul.f32 %v8098_v3, %v7986_v45  ;;  %v8104_v39 = vmul.f32 %v8098_v3, %v7987_v33  ;;  %v8105_v60 = vmul.f32 %v8098_v3, %v7988_v18  ;;  %v8106_v51 = vmul.f32 %v8098_v3, %v7989_v27 }
0x108a   : > { %v8113_v0 = vmul.f32 %v11627_v44, %v8099_v42  ;;  %v8114_v11 = vmul.f32 %v11627_v44, %v8100_v15  ;;  %v8115_v12 = vmul.f32 %v11627_v44, %v8101_v36  ;;  %v8116_v7 = vmul.f32 %v11627_v44, %v8102_v19 }
0x108b   : > { %v8117_v21 = vmul.f32 %v11627_v44, %v8103_v29  ;;  %v8118_v2 = vmul.f32 %v11627_v44, %v8104_v39  ;;  %v8119_v53 = vmul.f32 %v11627_v44, %v8105_v60  ;;  %v8120_v32 = vmul.f32 %v11627_v44, %v8106_v51  ;;  %v11661_v29 = vld [vmem:[%s19157_s12 + $0x20] sm:$0xff]  ;;  %v11662_v39 = vld [vmem:[%s19157_s12 + $0x28] sm:$0xff] }
0x108c   : > { %v8127_v38 = vadd.f32 %v11628_v35, %v8113_v0  ;;  %v8128_v20 = vadd.f32 %v11628_v35, %v8114_v11  ;;  %v8129_v26 = vadd.f32 %v11628_v35, %v8115_v12  ;;  %v8130_v30 = vadd.f32 %v11628_v35, %v8116_v7  ;;  %v11646_v60 = vld [vmem:[%s19156_s11 + $0x48] sm:$0xff]  ;;  %v11647_v11 = vld [vmem:[%s19156_s11 + $0x50] sm:$0xff] }
0x108d   : > { %v8131_v34 = vadd.f32 %v11628_v35, %v8117_v21  ;;  %v8132_v9 = vadd.f32 %v11628_v35, %v8118_v2  ;;  %v18504_v17 = vadd.f32 %v11628_v35, %v8119_v53  ;;  %v8134_v49 = vadd.f32 %v11628_v35, %v8120_v32  ;;  %v8192_v51 = vld [vmem:[%s19156_s11 + $0x8] sm:$0xff]  ;;  %v8193_v12 = vld [vmem:[%s19156_s11 + $0x10] sm:$0xff]  ;;  %v11664_v21 = vld [vmem:[%s19157_s12 + $0x38] sm:$0xff] }
0x108e   : > { %v11629_v45 = vmul.f32 -1.442695, %v8127_v38  ;;  %v11630_v55 = vmul.f32 -1.442695, %v8128_v20  ;;  %v11631_v33 = vmul.f32 -1.442695, %v8129_v26  ;;  %v14622_v0 = vpack.c.bf16 %v11662_v39, %v11661_v29 }
0x108f   : > { %v11632_v10 = vmul.f32 -1.442695, %v8130_v30  ;;  %v11633_v56 = vmul.f32 -1.442695, %v8131_v34  ;;  %v11634_v62 = vmul.f32 -1.442695, %v8132_v9 }
0x1090   : > { %15371 = vpow2.f32 %v11629_v45  ;;  %v11635_v18 = vmul.f32 -1.442695, %v18504_v17  ;;  %v11636_v63 = vmul.f32 -1.442695, %v8134_v49  ;;  %v11663_v7 = vld [vmem:[%s19157_s12 + $0x30] sm:$0xff]  ;;  %v11648_v2 = vld [vmem:[%s19156_s11 + $0x58] sm:$0xff] }
0x1091   : > { %15373 = vpow2.f32 %v11630_v55  ;;  %v8194_v53 = vld [vmem:[%s19156_s11 + $0x18] sm:$0xff]  ;;  %v11649_v32 = vld [vmem:[%s19156_s11 + $0x60] sm:$0xff]  ;;  %v8330_v29 = vld [vmem:[%s19157_s12 + $0x8] sm:$0xff] }
0x1092   : > { %15375 = vpow2.f32 %v11631_v33  ;;  %v8198_v45 = vld [vmem:[%s19156_s11 + $0x38] sm:$0xff]  ;;  %v11681_v55 = vld [vmem:[%s19156_s11 + $0x80] sm:$0xff]  ;;  %v11682_v33 = vld [vmem:[%s19156_s11 + $0x88] sm:$0xff] }
0x1093   : > { %15377 = vpow2.f32 %v11632_v10  ;;  %v11684_v10 = vld [vmem:[%s19156_s11 + $0x98] sm:$0xff] }
0x1094   : > { %15379 = vpow2.f32 %v11633_v56  ;;  %v11685_v56 = vld [vmem:[%s19156_s11 + $0xa0] sm:$0xff] }
0x1095   : > { %15381 = vpow2.f32 %v11634_v62  ;;  %v11686_v62 = vld [vmem:[%s19156_s11 + $0xa8] sm:$0xff] }
0x1096   : > { %15383 = vpow2.f32 %v11635_v18  ;;  %v11687_v18 = vld [vmem:[%s19156_s11 + $0xb0] sm:$0xff] }
0x1097   : > { %15385 = vpow2.f32 %v11636_v63  ;;  %v11688_v63 = vld [vmem:[%s19156_s11 + $0xb8] sm:$0xff] }
0x109a   : > { %v15372_v47 = vpop.eup %15371 }
0x109b   : > { %v15374_v24 = vpop.eup %15373  ;;  %v8159_v27 = vadd.f32 1.0, %v15372_v47  ;;  %v11709_v47 = vld [vmem:[%s19156_s11 + $0xc0] sm:$0xff] }
0x109c   : > { %v15376_v8 = vpop.eup %15375  ;;  %v8160_v61 = vadd.f32 1.0, %v15374_v24  ;;  %v11710_v24 = vld [vmem:[%s19156_s11 + $0xc8] sm:$0xff] }
0x109d   : > { %v15378_v4 = vpop.eup %15377  ;;  %v8161_v54 = vadd.f32 1.0, %v15376_v8  ;;  %15387 = vrcp.f32 %v8159_v27  ;;  %v11711_v27 = vld [vmem:[%s19156_s11 + $0xd0] sm:$0xff]  ;;  %v11712_v8 = vld [vmem:[%s19156_s11 + $0xd8] sm:$0xff] }
0x109e   : > { %v15380_v46 = vpop.eup %15379  ;;  %v8162_v59 = vadd.f32 1.0, %v15378_v4  ;;  %15389 = vrcp.f32 %v8160_v61  ;;  %v11713_v61 = vld [vmem:[%s19156_s11 + $0xe0] sm:$0xff]  ;;  %v11714_v4 = vld [vmem:[%s19156_s11 + $0xe8] sm:$0xff] }
0x109f   : > { %v15382_v58 = vpop.eup %15381  ;;  %v8163_v52 = vadd.f32 1.0, %v15380_v46  ;;  %15391 = vrcp.f32 %v8161_v54  ;;  %v11715_v54 = vld [vmem:[%s19156_s11 + $0xf0] sm:$0xff]  ;;  %v11716_v46 = vld [vmem:[%s19156_s11 + $0xf8] sm:$0xff] }
0x10a0   : > { %v15384_v14 = vpop.eup %15383  ;;  %v8164_v43 = vadd.f32 1.0, %v15382_v58  ;;  %15393 = vrcp.f32 %v8162_v59  ;;  %v11737_v59 = vld [vmem:[%s19156_s11 + $0x100] sm:$0xff]  ;;  %v11738_v58 = vld [vmem:[%s19156_s11 + $0x108] sm:$0xff] }
0x10a1   : > { %v15386_v23 = vpop.eup %15385  ;;  %v8165_v25 = vadd.f32 1.0, %v15384_v14  ;;  %15395 = vrcp.f32 %v8163_v52  ;;  %v11739_v52 = vld [vmem:[%s19156_s11 + $0x110] sm:$0xff]  ;;  %v11740_v14 = vld [vmem:[%s19156_s11 + $0x118] sm:$0xff] }
0x10a2   : > { %v8166_v28 = vadd.f32 1.0, %v15386_v23  ;;  %15397 = vrcp.f32 %v8164_v43  ;;  %v11741_v43 = vld [vmem:[%s19156_s11 + $0x120] sm:$0xff]  ;;  %v11742_v23 = vld [vmem:[%s19156_s11 + $0x128] sm:$0xff] }
0x10a3   : > { %15399 = vrcp.f32 %v8165_v25  ;;  %v11743_v25 = vld [vmem:[%s19156_s11 + $0x130] sm:$0xff] }
0x10a4   : > { %15401 = vrcp.f32 %v8166_v28  ;;  %v11744_v28 = vld [vmem:[%s19156_s11 + $0x138] sm:$0xff] }
0x10a7   : > { %v15388_v16 = vpop.eup %15387 }
0x10a8   : > { %v15390_v1 = vpop.eup %15389  ;;  %v8183_v5 = vmul.f32 %v15388_v16, %v8127_v38  ;;  %v8195_v38 = vld [vmem:[%s19156_s11 + $0x20] sm:$0xff] }
0x10a9   : > { %v15392_v48 = vpop.eup %15391  ;;  %v8184_v31 = vmul.f32 %v15390_v1, %v8128_v20  ;;  %v14626_v20 = vpack.c.bf16 %v11664_v21, %v11663_v7  ;;  %v11765_v16 = vld [vmem:[%s19156_s11 + $0x140] sm:$0xff]  ;;  %v11766_v1 = vld [vmem:[%s19156_s11 + $0x148] sm:$0xff]  ;;  %v11827_v21 = vld [vmem:[%s19156_s11 + $0x1f0] sm:$0xff] }
0x10aa   : > { %v15394_v41 = vpop.eup %15393  ;;  %v8185_v50 = vmul.f32 %v15392_v48, %v8129_v26  ;;  %v11650_v26 = vld [vmem:[%s19156_s11 + $0x68] sm:$0xff]  ;;  %v11768_v48 = vld [vmem:[%s19156_s11 + $0x158] sm:$0xff]  ;;  %v11825_v7 = vld [vmem:[%s19156_s11 + $0x1e0] sm:$0xff] }
0x10ab   : > { %v15396_v13 = vpop.eup %15395  ;;  %v8186_v6 = vmul.f32 %v15394_v41, %v8130_v30  ;;  %v18507_v22 = vpack.c.bf16 %v8184_v31, %v8183_v5  ;;  %v8196_v30 = vld [vmem:[%s19156_s11 + $0x28] sm:$0xff]  ;;  %v11767_v5 = vld [vmem:[%s19156_s11 + $0x150] sm:$0xff]  ;;  %v11769_v31 = vld [vmem:[%s19156_s11 + $0x160] sm:$0xff] }
0x10ac   : > { %v15398_v37 = vpop.eup %15397  ;;  %v8187_v57 = vmul.f32 %v15396_v13, %v8131_v34  ;;  %v11651_v34 = vld [vmem:[%s19156_s11 + $0x70] sm:$0xff]  ;;  %v11770_v41 = vld [vmem:[%s19156_s11 + $0x168] sm:$0xff]  ;;  %v11772_v13 = vld [vmem:[%s19156_s11 + $0x178] sm:$0xff] }
0x10ad   : > { %v15400_v40 = vpop.eup %15399  ;;  %v8188_v3 = vmul.f32 %v15398_v37, %v8132_v9  ;;  %v18509_v44 = vpack.c.bf16 %v8186_v6, %v8185_v50  ;;  %14591 = vmatprep.subr.bf16.mxu1 %v18507_v22  ;;  %14607 = vmatprep.subr.bf16.mxu0 %v18507_v22  ;;  %v8197_v9 = vld [vmem:[%s19156_s11 + $0x30] sm:$0xff]  ;;  %v11793_v6 = vld [vmem:[%s19156_s11 + $0x180] sm:$0xff]  ;;  %v11794_v37 = vld [vmem:[%s19156_s11 + $0x188] sm:$0xff] }
0x10ae   : > { %v15402_v42 = vpop.eup %15401  ;;  %14593 = vmatpush3.bf16.msra.mxu1 %v18507_v22  ;;  %14609 = vmatpush3.bf16.msra.mxu0 %v18507_v22  ;;  %v8189_v15 = vmul.f32 %v15400_v40, %v18504_v17  ;;  %v11652_v17 = vld [vmem:[%s19156_s11 + $0x78] sm:$0xff]  ;;  %v11771_v50 = vld [vmem:[%s19156_s11 + $0x170] sm:$0xff] }
0x10af   : > { %14595 = vmatprep.subr.bf16.mxu1 %v18509_v44  ;;  %14611 = vmatprep.subr.bf16.mxu0 %v18509_v44  ;;  %v8190_v36 = vmul.f32 %v15402_v42, %v8134_v49  ;;  %v18518_v19 = vpack.c.bf16 %v8188_v3, %v8187_v57  ;;  %v11683_v49 = vld [vmem:[%s19156_s11 + $0x90] sm:$0xff]  ;;  %v11796_v57 = vld [vmem:[%s19156_s11 + $0x198] sm:$0xff]  ;;  %v11797_v3 = vld [vmem:[%s19156_s11 + $0x1a0] sm:$0xff] }
0x10b0   : > { %v11795_v40 = vld [vmem:[%s19156_s11 + $0x190] sm:$0xff]  ;;  %v11798_v42 = vld [vmem:[%s19156_s11 + $0x1a8] sm:$0xff] }
0x10b1   : > { %v18524_v35 = vpack.c.bf16 %v8190_v36, %v8189_v15  ;;  %v11799_v15 = vld [vmem:[%s19156_s11 + $0x1b0] sm:$0xff]  ;;  %v8329_v36 = vld [vmem:[%s19157_s12] sm:$0xff] }
0x10b2   : > { %14597 = vmatpush3.bf16.msra.mxu1 %v18509_v44  ;;  %14613 = vmatpush3.bf16.msra.mxu0 %v18509_v44  ;;  %v14630_v39 = vpack.c.bf16 %v8330_v29, %v8329_v36  ;;  %v11753_v36 = vld [vmem:[%s19157_s12 + $0x80] sm:$0xff]  ;;  %v11754_v29 = vld [vmem:[%s19157_s12 + $0x88] sm:$0xff] }
0x10b3   : > { %14599 = vmatprep.subr.bf16.mxu1 %v18518_v19  ;;  %14615 = vmatprep.subr.bf16.mxu0 %v18518_v19 }
0x10b6   : > { %14601 = vmatpush3.bf16.msra.mxu1 %v18518_v19  ;;  %14617 = vmatpush3.bf16.msra.mxu0 %v18518_v19 }
0x10b7   : > { %14603 = vmatprep.subr.bf16.mxu1 %v18524_v35  ;;  %14619 = vmatprep.subr.bf16.mxu0 %v18524_v35 }
0x10ba   : > { %14605 = vmatpush3.bf16.msra.mxu1 %v18524_v35  ;;  %14621 = vmatpush3.bf16.msra.mxu0 %v18524_v35 }
0x10bb   : > { %14639 = vmatprep.subr.bf16.mxu0 %v18507_v22  ;;  %14623 = vmatprep.subr.bf16.mxu1 %v14622_v0 }
0x10bd   : > { %13803 = vmatmul.mubr.msk.f32.vlgmr.msra.gmra.mrb[36].mxu0 %vm8199_vm8, %v11646_v60  ;;  %13775 = vmatmul.mubr.msk.f32.vlgmr.msra.gmra.mrb[156].mxu1 %vm8199_vm8, %v8192_v51  ;;  %v11800_v60 = vld [vmem:[%s19156_s11 + $0x1b8] sm:$0xff]  ;;  %v11821_v51 = vld [vmem:[%s19156_s11 + $0x1c0] sm:$0xff] }
0x10be   : > { %14641 = vmatpush3.bf16.msra.mxu0 %v18507_v22  ;;  %13805 = vmatprep.mubr.msk.f32.mxu0 %vm8199_vm8, %v11647_v11  ;;  %v11823_v11 = vld [vmem:[%s19156_s11 + $0x1d0] sm:$0xff] }
0x10bf   : > { %14643 = vmatprep.subr.bf16.mxu0 %v18509_v44  ;;  %13777 = vmatprep.mubr.msk.f32.mxu1 %vm8199_vm8, %v8193_v12  ;;  %v11824_v12 = vld [vmem:[%s19156_s11 + $0x1d8] sm:$0xff] }
0x10c0   : > { %14625 = vmatpush3.bf16.msra.mxu1 %v14622_v0  ;;  %v11822_v0 = vld [vmem:[%s19156_s11 + $0x1c8] sm:$0xff] }
0x10c1   : > { %13806 = vmatmul.mubr.msk.f32.gmra.mrb[38].mxu0 %vm8199_vm8, %v11648_v2  ;;  %13778 = vmatmul.mubr.msk.f32.gmra.mrb[158].mxu1 %vm8199_vm8, %v8194_v53  ;;  %v11849_v2 = vld [vmem:[%s19156_s11 + $0x200] sm:$0xff]  ;;  %v11851_v53 = vld [vmem:[%s19156_s11 + $0x210] sm:$0xff] }
0x10c2   : > { %14645 = vmatpush3.bf16.msra.mxu0 %v18509_v44  ;;  %13808 = vmatprep.mubr.msk.f32.mxu0 %vm8199_vm8, %v11649_v32  ;;  %v11852_v32 = vld [vmem:[%s19156_s11 + $0x218] sm:$0xff] }
0x10c3   : > { %14647 = vmatprep.subr.bf16.mxu0 %v18518_v19  ;;  %13780 = vmatprep.mubr.msk.f32.mxu1 %vm8199_vm8, %v8195_v38  ;;  %v11854_v38 = vld [vmem:[%s19156_s11 + $0x228] sm:$0xff] }
0x10c4   : > { %14627 = vmatprep.subr.bf16.mxu1 %v14626_v20 }
0x10c5   : > { %13809 = vmatmul.mubr.msk.f32.gmra.mrb[40].mxu0 %vm8199_vm8, %v11650_v26  ;;  %13781 = vmatmul.mubr.msk.f32.gmra.mrb[160].mxu1 %vm8199_vm8, %v8196_v30  ;;  %v11856_v26 = vld [vmem:[%s19156_s11 + $0x238] sm:$0xff]  ;;  %v8331_v30 = vld [vmem:[%s19157_s12 + $0x10] sm:$0xff] }
0x10c6   : > { %14649 = vmatpush3.bf16.msra.mxu0 %v18518_v19  ;;  %13811 = vmatprep.mubr.msk.f32.mxu0 %vm8199_vm8, %v11651_v34  ;;  %v8332_v34 = vld [vmem:[%s19157_s12 + $0x18] sm:$0xff] }
0x10c7   : > { %14651 = vmatprep.subr.bf16.mxu0 %v18524_v35  ;;  %13783 = vmatprep.mubr.msk.f32.mxu1 %vm8199_vm8, %v8197_v9 }
0x10c8   : > { %14629 = vmatpush3.bf16.msra.mxu1 %v14626_v20  ;;  %v11855_v20 = vld [vmem:[%s19156_s11 + $0x230] sm:$0xff] }
0x10c9   : > { %13812 = vmatmul.mubr.msk.f32.gmra.mrb[42].mxu0 %vm8199_vm8, %v11652_v17  ;;  %13784 = vmatmul.mubr.msk.f32.gmra.mrb[162].mxu1 %vm8199_vm8, %v8198_v45 }
0x10ca   : > { %14653 = vmatpush3.bf16.msra.mxu0 %v18524_v35  ;;  %13870 = vmatprep.mubr.msk.f32.mxu0 %vm8199_vm8, %v11681_v55  ;;  %v14634_v55 = vpack.c.bf16 %v8332_v34, %v8331_v30 }
0x10cb   : > { %14663 = vmatprep.subr.bf16.mxu0 %v18507_v22  ;;  %14631 = vmatprep.subr.bf16.mxu1 %v14630_v39 }
0x10cd   : > { %13871 = vmatmul.mubr.msk.f32.vlgmr.msra.gmra.mrb[44].mxu0 %vm8199_vm8, %v11682_v33 }
0x10ce   : > { %14665 = vmatpush3.bf16.msra.mxu0 %v18507_v22  ;;  %13873 = vmatprep.mubr.msk.f32.mxu0 %vm8199_vm8, %v11683_v49  ;;  %v11697_v49 = vld [vmem:[%s19157_s12 + $0x40] sm:$0xff] }
0x10cf   : > { %14667 = vmatprep.subr.bf16.mxu0 %v18509_v44 }
0x10d1   : > { %13874 = vmatmul.mubr.msk.f32.gmra.mrb[46].mxu0 %vm8199_vm8, %v11684_v10  ;;  %v11698_v10 = vld [vmem:[%s19157_s12 + $0x48] sm:$0xff] }
0x10d2   : > { %14669 = vmatpush3.bf16.msra.mxu0 %v18509_v44  ;;  %13876 = vmatprep.mubr.msk.f32.mxu0 %vm8199_vm8, %v11685_v56 }
0x10d3   : > { %14671 = vmatprep.subr.bf16.mxu0 %v18518_v19 }
0x10d5   : > { %13877 = vmatmul.mubr.msk.f32.gmra.mrb[48].mxu0 %vm8199_vm8, %v11686_v62 }
0x10d6   : > { %14673 = vmatpush3.bf16.msra.mxu0 %v18518_v19  ;;  %13879 = vmatprep.mubr.msk.f32.mxu0 %vm8199_vm8, %v11687_v18 }
0x10d7   : > { %14675 = vmatprep.subr.bf16.mxu0 %v18524_v35 }
0x10d9   : > { %13880 = vmatmul.mubr.msk.f32.gmra.mrb[50].mxu0 %vm8199_vm8, %v11688_v63  ;;  %v14654_v63 = vpack.c.bf16 %v11698_v10, %v11697_v49  ;;  %v11809_v10 = vld [vmem:[%s19157_s12 + $0xc0] sm:$0xff] }
0x10da   : > { %14677 = vmatpush3.bf16.msra.mxu0 %v18524_v35  ;;  %13918 = vmatprep.mubr.msk.f32.mxu0 %vm8199_vm8, %v11709_v47 }
0x10db   : > { %14687 = vmatprep.subr.bf16.mxu0 %v18507_v22 }
0x10dd   : > { %13919 = vmatmul.mubr.msk.f32.vlgmr.msra.gmra.mrb[52].mxu0 %vm8199_vm8, %v11710_v24 }
0x10de   : > { %14689 = vmatpush3.bf16.msra.mxu0 %v18507_v22  ;;  %13921 = vmatprep.mubr.msk.f32.mxu0 %vm8199_vm8, %v11711_v27 }
0x10df   : > { %14691 = vmatprep.subr.bf16.mxu0 %v18509_v44 }
0x10e1   : > { %13922 = vmatmul.mubr.msk.f32.gmra.mrb[54].mxu0 %vm8199_vm8, %v11712_v8 }
0x10e2   : > { %14693 = vmatpush3.bf16.msra.mxu0 %v18509_v44  ;;  %13924 = vmatprep.mubr.msk.f32.mxu0 %vm8199_vm8, %v11713_v61 }
0x10e3   : > { %14695 = vmatprep.subr.bf16.mxu0 %v18518_v19 }
0x10e5   : > { %13925 = vmatmul.mubr.msk.f32.gmra.mrb[56].mxu0 %vm8199_vm8, %v11714_v4 }
0x10e6   : > { %14697 = vmatpush3.bf16.msra.mxu0 %v18518_v19  ;;  %13927 = vmatprep.mubr.msk.f32.mxu0 %vm8199_vm8, %v11715_v54 }
0x10e7   : > { %14699 = vmatprep.subr.bf16.mxu0 %v18524_v35 }
0x10e9   : > { %13928 = vmatmul.mubr.msk.f32.gmra.mrb[58].mxu0 %vm8199_vm8, %v11716_v46 }
0x10ea   : > { %14701 = vmatpush3.bf16.msra.mxu0 %v18524_v35  ;;  %13966 = vmatprep.mubr.msk.f32.mxu0 %vm8199_vm8, %v11737_v59 }
0x10eb   : > { %14711 = vmatprep.subr.bf16.mxu0 %v18507_v22 }
0x10ed   : > { %13967 = vmatmul.mubr.msk.f32.vlgmr.msra.gmra.mrb[60].mxu0 %vm8199_vm8, %v11738_v58  ;;  %v11699_v58 = vld [vmem:[%s19157_s12 + $0x50] sm:$0xff] }
0x10ee   : > { %14713 = vmatpush3.bf16.msra.mxu0 %v18507_v22  ;;  %13969 = vmatprep.mubr.msk.f32.mxu0 %vm8199_vm8, %v11739_v52  ;;  %v11700_v52 = vld [vmem:[%s19157_s12 + $0x58] sm:$0xff] }
0x10ef   : > { %14715 = vmatprep.subr.bf16.mxu0 %v18509_v44 }
0x10f1   : > { %13970 = vmatmul.mubr.msk.f32.gmra.mrb[62].mxu0 %vm8199_vm8, %v11740_v14  ;;  %v10709_v14 = vld [vmem:[%s19159_s14] sm:$0xff] }
0x10f2   : > { %14717 = vmatpush3.bf16.msra.mxu0 %v18509_v44  ;;  %13972 = vmatprep.mubr.msk.f32.mxu0 %vm8199_vm8, %v11741_v43  ;;  %v10710_v43 = vld [vmem:[%s19159_s14 + $0x8] sm:$0xff] }
0x10f3   : > { %14719 = vmatprep.subr.bf16.mxu0 %v18518_v19 }
0x10f5   : > { %13973 = vmatmul.mubr.msk.f32.gmra.mrb[64].mxu0 %vm8199_vm8, %v11742_v23 }
0x10f6   : > { %14721 = vmatpush3.bf16.msra.mxu0 %v18518_v19  ;;  %13975 = vmatprep.mubr.msk.f32.mxu0 %vm8199_vm8, %v11743_v25  ;;  %v14806_v25 = vpack.c.bf16 %v10710_v43, %v10709_v14 }
0x10f7   : > { %14723 = vmatprep.subr.bf16.mxu0 %v18524_v35 }
0x10f9   : > { %13976 = vmatmul.mubr.msk.f32.gmra.mrb[66].mxu0 %vm8199_vm8, %v11744_v28  ;;  %v14658_v28 = vpack.c.bf16 %v11700_v52, %v11699_v58  ;;  %v11837_v58 = vld [vmem:[%s19157_s12 + $0xe0] sm:$0xff]  ;;  %v11838_v52 = vld [vmem:[%s19157_s12 + $0xe8] sm:$0xff] }
0x10fa   : > { %14725 = vmatpush3.bf16.msra.mxu0 %v18524_v35  ;;  %14014 = vmatprep.mubr.msk.f32.mxu0 %vm8199_vm8, %v11765_v16  ;;  %v14774_v43 = vpack.c.bf16 %v11838_v52, %v11837_v58 }
0x10fb   : > { %14735 = vmatprep.subr.bf16.mxu0 %v18507_v22 }
0x10fd   : > { %14015 = vmatmul.mubr.msk.f32.vlgmr.msra.gmra.mrb[68].mxu0 %vm8199_vm8, %v11766_v1  ;;  %v11725_v1 = vld [vmem:[%s19157_s12 + $0x60] sm:$0xff] }
0x10fe   : > { %14737 = vmatpush3.bf16.msra.mxu0 %v18507_v22  ;;  %14017 = vmatprep.mubr.msk.f32.mxu0 %vm8199_vm8, %v11767_v5  ;;  %v11726_v5 = vld [vmem:[%s19157_s12 + $0x68] sm:$0xff] }
0x10ff   : > { %14739 = vmatprep.subr.bf16.mxu0 %v18509_v44 }
0x1101   : > { %14018 = vmatmul.mubr.msk.f32.gmra.mrb[70].mxu0 %vm8199_vm8, %v11768_v48 }
0x1102   : > { %14741 = vmatpush3.bf16.msra.mxu0 %v18509_v44  ;;  %14020 = vmatprep.mubr.msk.f32.mxu0 %vm8199_vm8, %v11769_v31  ;;  %v14678_v31 = vpack.c.bf16 %v11726_v5, %v11725_v1  ;;  %v11839_v5 = vld [vmem:[%s19157_s12 + $0xf0] sm:$0xff] }
0x1103   : > { %14743 = vmatprep.subr.bf16.mxu0 %v18518_v19 }
0x1105   : > { %14021 = vmatmul.mubr.msk.f32.gmra.mrb[72].mxu0 %vm8199_vm8, %v11770_v41 }
0x1106   : > { %14745 = vmatpush3.bf16.msra.mxu0 %v18518_v19  ;;  %14023 = vmatprep.mubr.msk.f32.mxu0 %vm8199_vm8, %v11771_v50 }
0x1107   : > { %14747 = vmatprep.subr.bf16.mxu0 %v18524_v35 }
0x1109   : > { %14024 = vmatmul.mubr.msk.f32.gmra.mrb[74].mxu0 %vm8199_vm8, %v11772_v13 }
0x110a   : > { %14749 = vmatpush3.bf16.msra.mxu0 %v18524_v35  ;;  %14062 = vmatprep.mubr.msk.f32.mxu0 %vm8199_vm8, %v11793_v6 }
0x110b   : > { %14759 = vmatprep.subr.bf16.mxu0 %v18507_v22 }
0x110d   : > { %14063 = vmatmul.mubr.msk.f32.vlgmr.msra.gmra.mrb[76].mxu0 %vm8199_vm8, %v11794_v37 }
0x110e   : > { %14761 = vmatpush3.bf16.msra.mxu0 %v18507_v22  ;;  %14065 = vmatprep.mubr.msk.f32.mxu0 %vm8199_vm8, %v11795_v40  ;;  %v11727_v40 = vld [vmem:[%s19157_s12 + $0x70] sm:$0xff] }
0x110f   : > { %14763 = vmatprep.subr.bf16.mxu0 %v18509_v44 }
0x1111   : > { %14066 = vmatmul.mubr.msk.f32.gmra.mrb[78].mxu0 %vm8199_vm8, %v11796_v57  ;;  %v11728_v57 = vld [vmem:[%s19157_s12 + $0x78] sm:$0xff] }
0x1112   : > { %14765 = vmatpush3.bf16.msra.mxu0 %v18509_v44  ;;  %14068 = vmatprep.mubr.msk.f32.mxu0 %vm8199_vm8, %v11797_v3 }
0x1113   : > { %14767 = vmatprep.subr.bf16.mxu0 %v18518_v19 }
0x1115   : > { %14069 = vmatmul.mubr.msk.f32.gmra.mrb[80].mxu0 %vm8199_vm8, %v11798_v42  ;;  %v14682_v42 = vpack.c.bf16 %v11728_v57, %v11727_v40 }
0x1116   : > { %14769 = vmatpush3.bf16.msra.mxu0 %v18518_v19  ;;  %14071 = vmatprep.mubr.msk.f32.mxu0 %vm8199_vm8, %v11799_v15 }
0x1117   : > { %14771 = vmatprep.subr.bf16.mxu0 %v18524_v35 }
0x1119   : > { %14072 = vmatmul.mubr.msk.f32.gmra.mrb[82].mxu0 %vm8199_vm8, %v11800_v60  ;;  %v14702_v60 = vpack.c.bf16 %v11754_v29, %v11753_v36  ;;  %v11867_v29 = vld [vmem:[%s19157_s12 + $0x110] sm:$0xff] }
0x111a   : > { %14773 = vmatpush3.bf16.msra.mxu0 %v18524_v35  ;;  %14110 = vmatprep.mubr.msk.f32.mxu0 %vm8199_vm8, %v11821_v51 }
0x111b   : > { %14783 = vmatprep.subr.bf16.mxu0 %v18507_v22 }
0x111d   : > { %14111 = vmatmul.mubr.msk.f32.vlgmr.msra.gmra.mrb[84].mxu0 %vm8199_vm8, %v11822_v0 }
0x111e   : > { %14785 = vmatpush3.bf16.msra.mxu0 %v18507_v22  ;;  %14113 = vmatprep.mubr.msk.f32.mxu0 %vm8199_vm8, %v11823_v11  ;;  %v11826_v22 = vld [vmem:[%s19156_s11 + $0x1e8] sm:$0xff] }
0x111f   : > { %14787 = vmatprep.subr.bf16.mxu0 %v18509_v44 }
0x1121   : > { %14114 = vmatmul.mubr.msk.f32.gmra.mrb[86].mxu0 %vm8199_vm8, %v11824_v12 }
0x1122   : > { %14789 = vmatpush3.bf16.msra.mxu0 %v18509_v44  ;;  %14116 = vmatprep.mubr.msk.f32.mxu0 %vm8199_vm8, %v11825_v7  ;;  %v11828_v44 = vld [vmem:[%s19156_s11 + $0x1f8] sm:$0xff] }
0x1123   : > { %14791 = vmatprep.subr.bf16.mxu0 %v18518_v19 }
0x1125   : > { %14117 = vmatmul.mubr.msk.f32.gmra.mrb[88].mxu0 %vm8199_vm8, %v11826_v22  ;;  %v11755_v22 = vld [vmem:[%s19157_s12 + $0x90] sm:$0xff] }
0x1126   : > { %14793 = vmatpush3.bf16.msra.mxu0 %v18518_v19  ;;  %14119 = vmatprep.mubr.msk.f32.mxu0 %vm8199_vm8, %v11827_v21  ;;  %v11850_v19 = vld [vmem:[%s19156_s11 + $0x208] sm:$0xff]  ;;  %v11756_v21 = vld [vmem:[%s19157_s12 + $0x98] sm:$0xff] }
0x1127   : > { %14795 = vmatprep.subr.bf16.mxu0 %v18524_v35 }
0x1129   : > { %14120 = vmatmul.mubr.msk.f32.gmra.mrb[90].mxu0 %vm8199_vm8, %v11828_v44 }
0x112a   : > { %14797 = vmatpush3.bf16.msra.mxu0 %v18524_v35  ;;  %14158 = vmatprep.mubr.msk.f32.mxu0 %vm8199_vm8, %v11849_v2  ;;  %v11853_v35 = vld [vmem:[%s19156_s11 + $0x220] sm:$0xff]  ;;  %v14706_v2 = vpack.c.bf16 %v11756_v21, %v11755_v22 }
0x112b   : > { %14807 = vmatprep.subr.bf16.mxu0 %v14806_v25 }
0x112d   : > { %14159 = vmatmul.mubr.msk.f32.vlgmr.msra.gmra.mrb[92].mxu0 %vm8199_vm8, %v11850_v19 }
0x112e   : > { %14161 = vmatprep.mubr.msk.f32.mxu0 %vm8199_vm8, %v11851_v53  ;;  %14809 = vmatpush3.bf16.msra.mxu0 %v14806_v25  ;;  %v11781_v53 = vld [vmem:[%s19157_s12 + $0xa0] sm:$0xff] }
0x1131   : > { %14162 = vmatmul.mubr.msk.f32.gmra.mrb[94].mxu0 %vm8199_vm8, %v11852_v32  ;;  %v11782_v32 = vld [vmem:[%s19157_s12 + $0xa8] sm:$0xff] }
0x1132   : > { %14164 = vmatprep.mubr.msk.f32.mxu0 %vm8199_vm8, %v11853_v35 }
0x1135   : > { %14165 = vmatmul.mubr.msk.f32.gmra.mrb[96].mxu0 %vm8199_vm8, %v11854_v38  ;;  %v14726_v38 = vpack.c.bf16 %v11782_v32, %v11781_v53 }
0x1136   : > { %14167 = vmatprep.mubr.msk.f32.mxu0 %vm8199_vm8, %v11855_v20 }
0x1139   : > { %14168 = vmatmul.mubr.msk.f32.gmra.mrb[98].mxu0 %vm8199_vm8, %v11856_v26 }
0x1190   : > { %v13804_v9 = vpop.f32.mrb[36].mxu0  ;;  %v13776_v17 = vpop.f32.mrb[156].mxu1 }
0x1191   : > { %v8432_v45 = vpop.f32.mrb[37].mxu0  ;;  %v8290_v33 = vpop.f32.mrb[157].mxu1 }
0x1192   : > { %13822 = vmatprep.mubr.msk.f32.mxu1 %vm4813_vm0, %v8432_v45  ;;  %v11784_v45 = vld [vmem:[%s19157_s12 + $0xb8] sm:$0xff] }
0x1193   : > { %13823 = vmatmul.mubr.msk.f32.vlgmr.msra.gmra.mrb[164].mxu1 %vm4813_vm0, %v13804_v9 }
0x1194   : > { %v13807_v56 = vpop.f32.mrb[38].mxu0  ;;  %14633 = vmatpush3.bf16.msra.mxu1 %v14630_v39  ;;  %v13779_v62 = vpop.f32.mrb[158].mxu1 }
0x1195   : > { %v8442_v18 = vpop.f32.mrb[39].mxu0  ;;  %14635 = vmatprep.subr.bf16.mxu1 %v14634_v55  ;;  %v8300_v47 = vpop.f32.mrb[159].mxu1 }
0x1196   : > { %13825 = vmatprep.mubr.msk.f32.mxu1 %vm4813_vm0, %v8442_v18 }
0x1197   : > { %13826 = vmatmul.mubr.msk.f32.gmra.mrb[166].mxu1 %vm4813_vm0, %v13807_v56  ;;  %v11810_v56 = vld [vmem:[%s19157_s12 + $0xc8] sm:$0xff] }
0x1198   : > { %v13810_v24 = vpop.f32.mrb[40].mxu0  ;;  %14637 = vmatpush3.bf16.msra.mxu1 %v14634_v55  ;;  %v13782_v27 = vpop.f32.mrb[160].mxu1  ;;  %v14750_v18 = vpack.c.bf16 %v11810_v56, %v11809_v10 }
0x1199   : > { %v8452_v8 = vpop.f32.mrb[41].mxu0  ;;  %14655 = vmatprep.subr.bf16.mxu1 %v14654_v63  ;;  %v8310_v61 = vpop.f32.mrb[161].mxu1 }
0x119a   : > { %13828 = vmatprep.mubr.msk.f32.mxu1 %vm4813_vm0, %v8452_v8 }
0x119b   : > { %13829 = vmatmul.mubr.msk.f32.gmra.mrb[168].mxu1 %vm4813_vm0, %v13810_v24 }
0x119c   : > { %v13813_v4 = vpop.f32.mrb[42].mxu0  ;;  %v13785_v54 = vpop.f32.mrb[162].mxu1 }
0x119d   : > { %v8462_v46 = vpop.f32.mrb[43].mxu0  ;;  %v8320_v59 = vpop.f32.mrb[163].mxu1 }
0x119e   : > { %13831 = vmatprep.mubr.msk.f32.mxu1 %vm4813_vm0, %v8462_v46 }
0x119f   : > { %13832 = vmatmul.mubr.msk.f32.gmra.mrb[170].mxu1 %vm4813_vm0, %v13813_v4  ;;  %v11812_v4 = vld [vmem:[%s19157_s12 + $0xd8] sm:$0xff] }
0x11a0   : > { %13842 = vmatprep.mubr.msk.f32.mxu1 %vm4813_vm0, %v8290_v33  ;;  %v13872_v23 = vpop.f32.mrb[44].mxu0 }
0x11a1   : > { %v8833_v16 = vpop.f32.mrb[45].mxu0 }
0x11a3   : > { %13843 = vmatmul.mubr.msk.f32.vlgmr.msra.gmra.mrb[164].mxu1 %vm4813_vm0, %v13776_v17  ;;  %v11783_v17 = vld [vmem:[%s19157_s12 + $0xb0] sm:$0xff] }
0x11a4   : > { %14657 = vmatpush3.bf16.msra.mxu1 %v14654_v63  ;;  %13845 = vmatprep.mubr.msk.f32.mxu1 %vm4813_vm0, %v8300_v47  ;;  %v13875_v48 = vpop.f32.mrb[46].mxu0  ;;  %v14730_v33 = vpack.c.bf16 %v11784_v45, %v11783_v17 }
0x11a5   : > { %14659 = vmatprep.subr.bf16.mxu1 %v14658_v28  ;;  %v8843_v41 = vpop.f32.mrb[47].mxu0 }
0x11a7   : > { %13846 = vmatmul.mubr.msk.f32.gmra.mrb[166].mxu1 %vm4813_vm0, %v13779_v62 }
0x11a8   : > { %13848 = vmatprep.mubr.msk.f32.mxu1 %vm4813_vm0, %v8310_v61  ;;  %14661 = vmatpush3.bf16.msra.mxu1 %v14658_v28  ;;  %v13878_v50 = vpop.f32.mrb[48].mxu0  ;;  %v11811_v61 = vld [vmem:[%s19157_s12 + $0xd0] sm:$0xff] }
0x11a9   : > { %14679 = vmatprep.subr.bf16.mxu1 %v14678_v31  ;;  %v8853_v13 = vpop.f32.mrb[49].mxu0  ;;  %v14754_v46 = vpack.c.bf16 %v11812_v4, %v11811_v61 }
0x11ab   : > { %13849 = vmatmul.mubr.msk.f32.gmra.mrb[168].mxu1 %vm4813_vm0, %v13782_v27 }
0x11ac   : > { %13851 = vmatprep.mubr.msk.f32.mxu1 %vm4813_vm0, %v8320_v59  ;;  %v13881_v6 = vpop.f32.mrb[50].mxu0 }
0x11ad   : > { %v8863_v37 = vpop.f32.mrb[51].mxu0 }
0x11af   : > { %13852 = vmatmul.mubr.msk.f32.gmra.mrb[170].mxu1 %vm4813_vm0, %v13785_v54 }
0x11b0   : > { %13890 = vmatprep.mubr.msk.f32.mxu1 %vm4813_vm0, %v8833_v16  ;;  %v13920_v3 = vpop.f32.mrb[52].mxu0 }
0x11b1   : > { %v9113_v15 = vpop.f32.mrb[53].mxu0 }
0x11b3   : > { %13891 = vmatmul.mubr.msk.f32.vlgmr.msra.gmra.mrb[164].mxu1 %vm4813_vm0, %v13872_v23 }
0x11b4   : > { %14681 = vmatpush3.bf16.msra.mxu1 %v14678_v31  ;;  %13893 = vmatprep.mubr.msk.f32.mxu1 %vm4813_vm0, %v8843_v41  ;;  %v13923_v39 = vpop.f32.mrb[54].mxu0 }
0x11b5   : > { %14683 = vmatprep.subr.bf16.mxu1 %v14682_v42  ;;  %v9123_v51 = vpop.f32.mrb[55].mxu0 }
0x11b7   : > { %13894 = vmatmul.mubr.msk.f32.gmra.mrb[166].mxu1 %vm4813_vm0, %v13875_v48  ;;  %v11840_v48 = vld [vmem:[%s19157_s12 + $0xf8] sm:$0xff] }
0x11b8   : > { %13896 = vmatprep.mubr.msk.f32.mxu1 %vm4813_vm0, %v8853_v13  ;;  %14685 = vmatpush3.bf16.msra.mxu1 %v14682_v42  ;;  %v13926_v0 = vpop.f32.mrb[56].mxu0  ;;  %v14778_v41 = vpack.c.bf16 %v11840_v48, %v11839_v5  ;;  %v11865_v13 = vld [vmem:[%s19157_s12 + $0x100] sm:$0xff] }
0x11b9   : > { %14703 = vmatprep.subr.bf16.mxu1 %v14702_v60  ;;  %v9133_v11 = vpop.f32.mrb[57].mxu0 }
0x11bb   : > { %13897 = vmatmul.mubr.msk.f32.gmra.mrb[168].mxu1 %vm4813_vm0, %v13878_v50 }
0x11bc   : > { %13899 = vmatprep.mubr.msk.f32.mxu1 %vm4813_vm0, %v8863_v37  ;;  %v13929_v12 = vpop.f32.mrb[58].mxu0 }
0x11bd   : > { %v9143_v7 = vpop.f32.mrb[59].mxu0 }
0x11bf   : > { %13900 = vmatmul.mubr.msk.f32.gmra.mrb[170].mxu1 %vm4813_vm0, %v13881_v6  ;;  %v11866_v6 = vld [vmem:[%s19157_s12 + $0x108] sm:$0xff] }
0x11c0   : > { %13938 = vmatprep.mubr.msk.f32.mxu1 %vm4813_vm0, %v9113_v15  ;;  %v13968_v44 = vpop.f32.mrb[60].mxu0  ;;  %v14798_v40 = vpack.c.bf16 %v11866_v6, %v11865_v13 }
0x11c1   : > { %v9393_v19 = vpop.f32.mrb[61].mxu0 }
0x11c3   : > { %13939 = vmatmul.mubr.msk.f32.vlgmr.msra.gmra.mrb[164].mxu1 %vm4813_vm0, %v13920_v3 }
0x11c4   : > { %14705 = vmatpush3.bf16.msra.mxu1 %v14702_v60  ;;  %13941 = vmatprep.mubr.msk.f32.mxu1 %vm4813_vm0, %v9123_v51  ;;  %v13971_v35 = vpop.f32.mrb[62].mxu0 }
0x11c5   : > { %14707 = vmatprep.subr.bf16.mxu1 %v14706_v2  ;;  %v9403_v20 = vpop.f32.mrb[63].mxu0 }
0x11c7   : > { %13942 = vmatmul.mubr.msk.f32.gmra.mrb[166].mxu1 %vm4813_vm0, %v13923_v39  ;;  %v11868_v39 = vld [vmem:[%s19157_s12 + $0x118] sm:$0xff] }
0x11c8   : > { %13944 = vmatprep.mubr.msk.f32.mxu1 %vm4813_vm0, %v9133_v11  ;;  %14709 = vmatpush3.bf16.msra.mxu1 %v14706_v2  ;;  %v13974_v26 = vpop.f32.mrb[64].mxu0  ;;  %v14802_v51 = vpack.c.bf16 %v11868_v39, %v11867_v29  ;;  %v11877_v2 = vld [vmem:[%s19158_s13] ss:$0 sm:$0xff] }
0x11c9   : > { %14727 = vmatprep.subr.bf16.mxu1 %v14726_v38  ;;  %v9413_v30 = vpop.f32.mrb[65].mxu0 }
0x11cb   : > { %13945 = vmatmul.mubr.msk.f32.gmra.mrb[168].mxu1 %vm4813_vm0, %v13926_v0 }
0x11cc   : > { %13947 = vmatprep.mubr.msk.f32.mxu1 %vm4813_vm0, %v9143_v7  ;;  %v13977_v34 = vpop.f32.mrb[66].mxu0 }
0x11cd   : > { %v9423_v9 = vpop.f32.mrb[67].mxu0 }
0x11cf   : > { %13948 = vmatmul.mubr.msk.f32.gmra.mrb[170].mxu1 %vm4813_vm0, %v13929_v12 }
0x11d0   : > { %13986 = vmatprep.mubr.msk.f32.mxu1 %vm4813_vm0, %v9393_v19  ;;  %v14016_v55 = vpop.f32.mrb[68].mxu0 }
0x11d1   : > { %v9673_v49 = vpop.f32.mrb[69].mxu0 }
0x11d3   : > { %13987 = vmatmul.mubr.msk.f32.vlgmr.msra.gmra.mrb[164].mxu1 %vm4813_vm0, %v13968_v44 }
0x11d4   : > { %14729 = vmatpush3.bf16.msra.mxu1 %v14726_v38  ;;  %13989 = vmatprep.mubr.msk.f32.mxu1 %vm4813_vm0, %v9403_v20  ;;  %v14019_v62 = vpop.f32.mrb[70].mxu0 }
0x11d5   : > { %14731 = vmatprep.subr.bf16.mxu1 %v14730_v33  ;;  %v9683_v63 = vpop.f32.mrb[71].mxu0 }
0x11d7   : > { %13990 = vmatmul.mubr.msk.f32.gmra.mrb[166].mxu1 %vm4813_vm0, %v13971_v35 }
0x11d8   : > { %13992 = vmatprep.mubr.msk.f32.mxu1 %vm4813_vm0, %v9413_v30  ;;  %14733 = vmatpush3.bf16.msra.mxu1 %v14730_v33  ;;  %v14022_v47 = vpop.f32.mrb[72].mxu0 }
0x11d9   : > { %14751 = vmatprep.subr.bf16.mxu1 %v14750_v18  ;;  %v9693_v24 = vpop.f32.mrb[73].mxu0 }
0x11db   : > { %13993 = vmatmul.mubr.msk.f32.gmra.mrb[168].mxu1 %vm4813_vm0, %v13974_v26 }
0x11dc   : > { %13995 = vmatprep.mubr.msk.f32.mxu1 %vm4813_vm0, %v9423_v9  ;;  %v14025_v27 = vpop.f32.mrb[74].mxu0 }
0x11dd   : > { %v9703_v8 = vpop.f32.mrb[75].mxu0 }
0x11df   : > { %13996 = vmatmul.mubr.msk.f32.gmra.mrb[170].mxu1 %vm4813_vm0, %v13977_v34 }
0x11e0   : > { %14034 = vmatprep.mubr.msk.f32.mxu1 %vm4813_vm0, %v9673_v49  ;;  %v14064_v54 = vpop.f32.mrb[76].mxu0 }
0x11e1   : > { %v9953_v59 = vpop.f32.mrb[77].mxu0 }
0x11e3   : > { %14035 = vmatmul.mubr.msk.f32.vlgmr.msra.gmra.mrb[164].mxu1 %vm4813_vm0, %v14016_v55 }
0x11e4   : > { %14753 = vmatpush3.bf16.msra.mxu1 %v14750_v18  ;;  %14037 = vmatprep.mubr.msk.f32.mxu1 %vm4813_vm0, %v9683_v63  ;;  %v14067_v14 = vpop.f32.mrb[78].mxu0 }
0x11e5   : > { %14755 = vmatprep.subr.bf16.mxu1 %v14754_v46  ;;  %v9963_v23 = vpop.f32.mrb[79].mxu0 }
0x11e7   : > { %14038 = vmatmul.mubr.msk.f32.gmra.mrb[166].mxu1 %vm4813_vm0, %v14019_v62  ;;  %v11886_v62 = vld [vmem:[%s19160_s15] ss:$0 sm:$0xff] }
0x11e8   : > { %14040 = vmatprep.mubr.msk.f32.mxu1 %vm4813_vm0, %v9693_v24  ;;  %14757 = vmatpush3.bf16.msra.mxu1 %v14754_v46  ;;  %v14070_v25 = vpop.f32.mrb[80].mxu0 }
0x11e9   : > { %14775 = vmatprep.subr.bf16.mxu1 %v14774_v43  ;;  %v9973_v28 = vpop.f32.mrb[81].mxu0 }
0x11eb   : > { %14041 = vmatmul.mubr.msk.f32.gmra.mrb[168].mxu1 %vm4813_vm0, %v14022_v47 }
0x11ec   : > { %14043 = vmatprep.mubr.msk.f32.mxu1 %vm4813_vm0, %v9703_v8  ;;  %v14073_v16 = vpop.f32.mrb[82].mxu0 }
0x11ed   : > { %v9983_v1 = vpop.f32.mrb[83].mxu0 }
0x11ef   : > { %14044 = vmatmul.mubr.msk.f32.gmra.mrb[170].mxu1 %vm4813_vm0, %v14025_v27 }
0x11f0   : > { %14082 = vmatprep.mubr.msk.f32.mxu1 %vm4813_vm0, %v9953_v59  ;;  %v14112_v31 = vpop.f32.mrb[84].mxu0 }
0x11f1   : > { %v10233_v50 = vpop.f32.mrb[85].mxu0 }
0x11f3   : > { %14083 = vmatmul.mubr.msk.f32.vlgmr.msra.gmra.mrb[164].mxu1 %vm4813_vm0, %v14064_v54 }
0x11f4   : > { %14777 = vmatpush3.bf16.msra.mxu1 %v14774_v43  ;;  %14085 = vmatprep.mubr.msk.f32.mxu1 %vm4813_vm0, %v9963_v23  ;;  %v14115_v37 = vpop.f32.mrb[86].mxu0 }
0x11f5   : > { %14779 = vmatprep.subr.bf16.mxu1 %v14778_v41  ;;  %v10243_v57 = vpop.f32.mrb[87].mxu0 }
0x11f7   : > { %14086 = vmatmul.mubr.msk.f32.gmra.mrb[166].mxu1 %vm4813_vm0, %v14067_v14 }
0x11f8   : > { %14088 = vmatprep.mubr.msk.f32.mxu1 %vm4813_vm0, %v9973_v28  ;;  %14781 = vmatpush3.bf16.msra.mxu1 %v14778_v41  ;;  %v14118_v3 = vpop.f32.mrb[88].mxu0 }
0x11f9   : > { %14799 = vmatprep.subr.bf16.mxu1 %v14798_v40  ;;  %v10253_v42 = vpop.f32.mrb[89].mxu0 }
0x11fb   : > { %14089 = vmatmul.mubr.msk.f32.gmra.mrb[168].mxu1 %vm4813_vm0, %v14070_v25 }
0x11fc   : > { %14091 = vmatprep.mubr.msk.f32.mxu1 %vm4813_vm0, %v9983_v1  ;;  %v14121_v15 = vpop.f32.mrb[90].mxu0 }
0x11fd   : > { %v10263_v36 = vpop.f32.mrb[91].mxu0 }
0x11ff   : > { %14092 = vmatmul.mubr.msk.f32.gmra.mrb[170].mxu1 %vm4813_vm0, %v14073_v16 }
0x1200   : > { %14130 = vmatprep.mubr.msk.f32.mxu1 %vm4813_vm0, %v10233_v50  ;;  %v14160_v60 = vpop.f32.mrb[92].mxu0 }
0x1201   : > { %v10513_v0 = vpop.f32.mrb[93].mxu0 }
0x1203   : > { %14131 = vmatmul.mubr.msk.f32.vlgmr.msra.gmra.mrb[164].mxu1 %vm4813_vm0, %v14112_v31 }
0x1204   : > { %14801 = vmatpush3.bf16.msra.mxu1 %v14798_v40  ;;  %14133 = vmatprep.mubr.msk.f32.mxu1 %vm4813_vm0, %v10243_v57  ;;  %v14163_v11 = vpop.f32.mrb[94].mxu0 }
0x1205   : > { %14803 = vmatprep.subr.bf16.mxu1 %v14802_v51  ;;  %v10523_v12 = vpop.f32.mrb[95].mxu0 }
0x1207   : > { %14134 = vmatmul.mubr.msk.f32.gmra.mrb[166].mxu1 %vm4813_vm0, %v14115_v37 }
0x1208   : > { %14136 = vmatprep.mubr.msk.f32.mxu1 %vm4813_vm0, %v10253_v42  ;;  %14805 = vmatpush3.bf16.msra.mxu1 %v14802_v51  ;;  %v14166_v7 = vpop.f32.mrb[96].mxu0 }
0x1209   : > { %v10533_v22 = vpop.f32.mrb[97].mxu0 }
0x120b   : > { %14137 = vmatmul.mubr.msk.f32.gmra.mrb[168].mxu1 %vm4813_vm0, %v14118_v3 }
0x120c   : > { %14139 = vmatprep.mubr.msk.f32.mxu1 %vm4813_vm0, %v10263_v36  ;;  %v14169_v21 = vpop.f32.mrb[98].mxu0 }
0x120d   : > { %v10543_v44 = vpop.f32.mrb[99].mxu0 }
0x120f   : > { %14140 = vmatmul.mubr.msk.f32.gmra.mrb[170].mxu1 %vm4813_vm0, %v14121_v15 }
0x1210   : > { %14178 = vmatprep.mubr.msk.f32.mxu1 %vm4813_vm0, %v10513_v0 }
0x1213   : > { %14179 = vmatmul.mubr.msk.f32.vlgmr.msra.gmra.mrb[164].mxu1 %vm4813_vm0, %v14160_v60 }
0x1214   : > { %14181 = vmatprep.mubr.msk.f32.mxu1 %vm4813_vm0, %v10523_v12 }
0x1217   : > { %14182 = vmatmul.mubr.msk.f32.gmra.mrb[166].mxu1 %vm4813_vm0, %v14163_v11 }
0x1218   : > { %14184 = vmatprep.mubr.msk.f32.mxu1 %vm4813_vm0, %v10533_v22 }
0x121b   : > { %14185 = vmatmul.mubr.msk.f32.gmra.mrb[168].mxu1 %vm4813_vm0, %v14166_v7 }
0x121c   : > { %14187 = vmatprep.mubr.msk.f32.mxu1 %vm4813_vm0, %v10543_v44 }
0x121f   : > { %14188 = vmatmul.mubr.msk.f32.gmra.mrb[170].mxu1 %vm4813_vm0, %v14169_v21 }
0x12e6   : > { %v14180_v19 = vpop.f32.mrb[164].mxu1 }
0x12e7   : > { %v10647_v53 = vpop.f32.mrb[165].mxu1  ;;  %v10702_v35 = vadd.f32 %v14180_v19, %v11877_v2 }
0x12e8   : > { %v10701_v32 = vadd.f32 %v11877_v2, %v10647_v53 }
0x12ea   : > { %v14183_v38 = vpop.f32.mrb[166].mxu1  ;;  %14194 = vmatprep.mubr.msk.f32.mxu0 %vm10711_vm9, %v10701_v32 }
0x12eb   : > { %v10657_v20 = vpop.f32.mrb[167].mxu1  ;;  %14195 = vmatmul.mubr.msk.f32.vlgmr.msra.gmra.mrb[100].mxu0 %vm10711_vm9, %v10702_v35  ;;  %v10704_v30 = vadd.f32 %v14183_v38, %v11877_v2 }
0x12ec   : > { %v10703_v26 = vadd.f32 %v11877_v2, %v10657_v20 }
0x12ee   : > { %v14186_v34 = vpop.f32.mrb[168].mxu1  ;;  %14197 = vmatprep.mubr.msk.f32.mxu0 %vm10711_vm9, %v10703_v26 }
0x12ef   : > { %v10667_v9 = vpop.f32.mrb[169].mxu1  ;;  %14198 = vmatmul.mubr.msk.f32.gmra.mrb[102].mxu0 %vm10711_vm9, %v10704_v30  ;;  %v10706_v45 = vadd.f32 %v14186_v34, %v11877_v2 }
0x12f0   : > { %v10705_v17 = vadd.f32 %v11877_v2, %v10667_v9 }
0x12f2   : > { %v14189_v55 = vpop.f32.mrb[170].mxu1  ;;  %14200 = vmatprep.mubr.msk.f32.mxu0 %vm10711_vm9, %v10705_v17 }
0x12f3   : > { %v10677_v33 = vpop.f32.mrb[171].mxu1  ;;  %14201 = vmatmul.mubr.msk.f32.gmra.mrb[104].mxu0 %vm10711_vm9, %v10706_v45  ;;  %v10708_v10 = vadd.f32 %v14189_v55, %v11877_v2 }
0x12f4   : > { %v10707_v49 = vadd.f32 %v11877_v2, %v10677_v33 }
0x12f6   : > { %14203 = vmatprep.mubr.msk.f32.mxu0 %vm10711_vm9, %v10707_v49 }
0x12f7   : > { %14204 = vmatmul.mubr.msk.f32.gmra.mrb[106].mxu0 %vm10711_vm9, %v10708_v10 }
0x13be   : > { %v14196_v56 = vpop.f32.mrb[100].mxu0 }
0x13bf   : > { %v10842_v18 = vmul.f32 2.0, %v14196_v56  ;;  %v10802_v63 = vpop.f32.mrb[101].mxu0 }
0x13c0   : > { %v10841_v47 = vmul.f32 2.0, %v10802_v63 }
0x13c1   : > { %v10857_v24 = vsub.f32 %v10842_v18, %v11886_v62 }
0x13c2   : > { %v14199_v27 = vpop.f32.mrb[102].mxu0  ;;  %v10856_v54 = vsub.f32 %v10841_v47, %v11886_v62 }
0x13c3   : > { %v10844_v8 = vmul.f32 2.0, %v14199_v27  ;;  %10866 = vmax.xlane.f32.xlu0 %v10857_v24  ;;  %v10812_v61 = vpop.f32.mrb[103].mxu0 }
0x13c4   : > { %v10843_v4 = vmul.f32 2.0, %v10812_v61 }
0x13c5   : > { %v10859_v46 = vsub.f32 %v10844_v8, %v11886_v62 }
0x13c6   : > { %v14202_v59 = vpop.f32.mrb[104].mxu0  ;;  %v10858_v43 = vsub.f32 %v10843_v4, %v11886_v62 }
0x13c7   : > { %10864 = vmax.xlane.f32.xlu0 %v10856_v54  ;;  %10870 = vmax.xlane.f32.xlu1 %v10859_v46  ;;  %v10822_v58 = vpop.f32.mrb[105].mxu0  ;;  %v10846_v14 = vmul.f32 2.0, %v14202_v59 }
0x13c8   : > { %v10845_v52 = vmul.f32 2.0, %v10822_v58 }
0x13c9   : > { %v10861_v5 = vsub.f32 %v10846_v14, %v11886_v62 }
0x13ca   : > { %v14205_v23 = vpop.f32.mrb[106].mxu0  ;;  %v10860_v25 = vsub.f32 %v10845_v52, %v11886_v62 }
0x13cb   : > { %10868 = vmax.xlane.f32.xlu1 %v10858_v43  ;;  %v10832_v28 = vpop.f32.mrb[107].mxu0  ;;  %v10848_v1 = vmul.f32 2.0, %v14205_v23 }
0x13cc   : > { %v10847_v16 = vmul.f32 2.0, %v10832_v28  ;;  %10872 = vmax.xlane.f32.xlu0 %v10860_v25 }
0x13cd   : > { %v10863_v31 = vsub.f32 %v10848_v1, %v11886_v62 }
0x13ce   : > { %v10862_v48 = vsub.f32 %v10847_v16, %v11886_v62 }
0x13cf   : > { %10874 = vmax.xlane.f32.xlu1 %v10861_v5 }
0x13d0   : > { %10876 = vmax.xlane.f32.xlu0 %v10862_v48 }
0x13d3   : > { %10878 = vmax.xlane.f32.xlu1 %v10863_v31 }
0x1450   : > { %v10867_v41 = vpop.xlane.xlu0 %10866 }
0x1451   : > { %v10881_v50 = vsub.f32 %v10857_v24, %v10867_v41 }
0x1453   : > { %v10890_v13 = vmul.f32 1.442695, %v10881_v50 }
0x1454   : > { %v10865_v6 = vpop.xlane.xlu0 %10864  ;;  %v10871_v37 = vpop.xlane.xlu1 %10870 }
0x1455   : > { %15403 = vpow2.f32 %v10890_v13  ;;  %v10880_v40 = vsub.f32 %v10856_v54, %v10865_v6  ;;  %v10883_v57 = vsub.f32 %v10859_v46, %v10871_v37 }
0x1457   : > { %v10888_v3 = vmul.f32 1.442695, %v10880_v40  ;;  %v10894_v42 = vmul.f32 1.442695, %v10883_v57 }
0x1458   : > { %v10869_v15 = vpop.xlane.xlu1 %10868 }
0x1459   : > { %15405 = vpow2.f32 %v10888_v3  ;;  %v10882_v36 = vsub.f32 %v10858_v43, %v10869_v15  ;;  %v10873_v29 = vpop.xlane.xlu0 %10872 }
0x145a   : > { %15407 = vpow2.f32 %v10894_v42  ;;  %v10884_v39 = vsub.f32 %v10860_v25, %v10873_v29 }
0x145b   : > { %v10892_v60 = vmul.f32 1.442695, %v10882_v36 }
0x145c   : > { %v10896_v51 = vmul.f32 1.442695, %v10884_v39  ;;  %v10875_v0 = vpop.xlane.xlu1 %10874 }
0x145d   : > { %15409 = vpow2.f32 %v10892_v60  ;;  %v10885_v11 = vsub.f32 %v10861_v5, %v10875_v0  ;;  %v10877_v12 = vpop.xlane.xlu0 %10876 }
0x145e   : > { %v10886_v7 = vsub.f32 %v10862_v48, %v10877_v12  ;;  %15411 = vpow2.f32 %v10896_v51 }
0x145f   : > { %v15404_v22 = vpop.eup %15403  ;;  %v10898_v21 = vmul.f32 1.442695, %v10885_v11 }
0x1460   : > { %v10900_v44 = vmul.f32 1.442695, %v10886_v7  ;;  %10906 = vadd.xlane.f32.xlu1 %v15404_v22  ;;  %v10879_v2 = vpop.xlane.xlu1 %10878 }
0x1461   : > { %15413 = vpow2.f32 %v10898_v21  ;;  %v10887_v19 = vsub.f32 %v10863_v31, %v10879_v2 }
0x1462   : > { %15415 = vpow2.f32 %v10900_v44 }
0x1463   : > { %v15406_v53 = vpop.eup %15405  ;;  %v10902_v32 = vmul.f32 1.442695, %v10887_v19 }
0x1464   : > { %v15408_v35 = vpop.eup %15407  ;;  %10904 = vadd.xlane.f32.xlu0 %v15406_v53 }
0x1465   : > { %15417 = vpow2.f32 %v10902_v32  ;;  %10910 = vadd.xlane.f32.xlu1 %v15408_v35 }
0x1467   : > { %v15410_v38 = vpop.eup %15409 }
0x1468   : > { %10908 = vadd.xlane.f32.xlu0 %v15410_v38  ;;  %v19068_v20 = vpop.eup %15411 }
0x146b   : > { %v15414_v26 = vpop.eup %15413 }
0x146c   : > { %10914 = vadd.xlane.f32.xlu1 %v15414_v26  ;;  %10912 = vadd.xlane.f32.xlu0 %v19068_v20  ;;  %v19071_v30 = vpop.eup %15415 }
0x146f   : > { %v19073_v34 = vpop.eup %15417 }
0x1470   : > { %10918 = vadd.xlane.f32.xlu1 %v19073_v34  ;;  %10916 = vadd.xlane.f32.xlu0 %v19071_v30 }
0x14ed   : > { %v10907_v9 = vpop.xlane.xlu1 %10906 }
0x14ee   : > { %15419 = vrcp.f32 %v10907_v9 }
0x14f1   : > { %v10905_v17 = vpop.xlane.xlu0 %10904 }
0x14f2   : > { %v10911_v45 = vpop.xlane.xlu1 %10910  ;;  %15421 = vrcp.f32 %v10905_v17 }
0x14f3   : > { %15423 = vrcp.f32 %v10911_v45 }
0x14f5   : > { %v10909_v55 = vpop.xlane.xlu0 %10908 }
0x14f6   : > { %15425 = vrcp.f32 %v10909_v55 }
0x14f8   : > { %v15420_v33 = vpop.eup %15419 }
0x14f9   : > { %v10929_v49 = vmul.f32 %v15420_v33, %v10907_v9  ;;  %v10915_v10 = vpop.xlane.xlu1 %10914  ;;  %v10913_v56 = vpop.xlane.xlu0 %10912 }
0x14fa   : > { %15427 = vrcp.f32 %v10915_v10 }
0x14fb   : > { %v10937_v62 = vsub.f32 2.0, %v10929_v49  ;;  %15429 = vrcp.f32 %v10913_v56 }
0x14fc   : > { %v15422_v18 = vpop.eup %15421 }
0x14fd   : > { %v15424_v63 = vpop.eup %15423  ;;  %v10945_v47 = vmul.f32 %v15420_v33, %v10937_v62  ;;  %v10928_v24 = vmul.f32 %v15422_v18, %v10905_v17  ;;  %v10919_v27 = vpop.xlane.xlu1 %10918 }
0x14fe   : > { %v10917_v8 = vpop.xlane.xlu0 %10916  ;;  %v10931_v61 = vmul.f32 %v15424_v63, %v10911_v45  ;;  %15431 = vrcp.f32 %v10919_v27 }
0x14ff   : > { %v10953_v4 = vmul.f32 %v15404_v22, %v10945_v47  ;;  %v10936_v54 = vsub.f32 2.0, %v10928_v24  ;;  %15433 = vrcp.f32 %v10917_v8 }
0x1500   : > { %v15426_v46 = vpop.eup %15425  ;;  %v10939_v59 = vsub.f32 2.0, %v10931_v61 }
0x1501   : > { %10961 = vst [vmem:[%s19080_s1 + $0x8] sm:$0xff] %v10953_v4  ;;  %v10944_v58 = vmul.f32 %v15422_v18, %v10936_v54  ;;  %v10930_v52 = vmul.f32 %v15426_v46, %v10909_v55 }
0x1502   : > { %v10947_v14 = vmul.f32 %v15424_v63, %v10939_v59 }
0x1503   : > { %v10952_v43 = vmul.f32 %v15406_v53, %v10944_v58  ;;  %v10938_v23 = vsub.f32 2.0, %v10930_v52 }
0x1504   : > { %v15428_v25 = vpop.eup %15427  ;;  %v10955_v28 = vmul.f32 %v15408_v35, %v10947_v14 }
0x1505   : > { %v15430_v16 = vpop.eup %15429  ;;  %10960 = vst [vmem:[%s19080_s1] sm:$0xff] %v10952_v43  ;;  %v10946_v1 = vmul.f32 %v15426_v46, %v10938_v23  ;;  %v10933_v5 = vmul.f32 %v15428_v25, %v10915_v10 }
0x1506   : > { %10963 = vst [vmem:[%s19080_s1 + $0x18] sm:$0xff] %v10955_v28  ;;  %v10932_v48 = vmul.f32 %v15430_v16, %v10913_v56 }
0x1507   : > { %v10954_v31 = vmul.f32 %v15410_v38, %v10946_v1  ;;  %v10941_v41 = vsub.f32 2.0, %v10933_v5 }
0x1508   : > { %v15432_v50 = vpop.eup %15431  ;;  %v10940_v13 = vsub.f32 2.0, %v10932_v48 }
0x1509   : > { %v15434_v6 = vpop.eup %15433  ;;  %10962 = vst [vmem:[%s19080_s1 + $0x10] sm:$0xff] %v10954_v31  ;;  %v10949_v37 = vmul.f32 %v15428_v25, %v10941_v41  ;;  %v10935_v40 = vmul.f32 %v15432_v50, %v10919_v27 }
0x150a   : > { %v10948_v57 = vmul.f32 %v15430_v16, %v10940_v13  ;;  %v10934_v3 = vmul.f32 %v15434_v6, %v10917_v8 }
0x150b   : > { %v10957_v42 = vmul.f32 %v15414_v26, %v10949_v37  ;;  %v10943_v15 = vsub.f32 2.0, %v10935_v40 }
0x150c   : > { %v10956_v36 = vmul.f32 %v19068_v20, %v10948_v57  ;;  %v10942_v29 = vsub.f32 2.0, %v10934_v3 }
0x150d   : > { %10965 = vst [vmem:[%s19080_s1 + $0x28] sm:$0xff] %v10957_v42  ;;  %v10951_v39 = vmul.f32 %v15432_v50, %v10943_v15 }
0x150e   : > { %10964 = vst [vmem:[%s19080_s1 + $0x20] sm:$0xff] %v10956_v36  ;;  %v10950_v60 = vmul.f32 %v15434_v6, %v10942_v29 }
0x150f   : > { %v10959_v51 = vmul.f32 %v19073_v34, %v10951_v39 }
0x1510   : > { %v10958_v0 = vmul.f32 %v19071_v30, %v10950_v60 }
0x1511   : > { %10967 = vst [vmem:[%s19080_s1 + $0x38] sm:$0xff] %v10959_v51 }
0x1512   : > { %10966 = vst [vmem:[%s19080_s1 + $0x30] sm:$0xff] %v10958_v0 }
0x1513   : > { %15448 = shalt.err (!%p15445_p3)
}
0x1514   : > { %s15449_s18 = scalar_lea.hbm %s19095_s28, 1024  ;;  %s15453_s30 = scalar_lea.hbm %s19161_s16, 2048 }
0x1515   : > { %p15450_p4 = scmp.ne.s32.totalorder %s19095_s28, %s15449_s18  ;;  %p15454_p9 = scmp.lt.u32.totalorder %s19095_s28, %s19161_s16 }
0x1516   : > { %p15455_p10 = scmp.lt.u32.totalorder %s15453_s30, %s15449_s18  ;;  %p15457_p12 = scmp.lt.u32.totalorder %s15449_s18, %s19095_s28 }
0x1517   : > { %p15451_p7 = pnand %p15450_p4, %p15628_p5 }
0x1518   : > { %p15456_p11 = por %p15455_p10, %p15454_p9 }
0x1519   : > { %p15452_p8 = pneg %p15451_p7 }
0x151a   : > { %p15458_p13 = por %p15457_p12, %p15456_p11 }
0x151c   : > { %p15459_p0 = pnand %p15458_p13, %p15452_p8 }
0x151e   : > { %15462 = shalt.err (!%p15459_p0)
}
0x151f   : > { %s15503_s23 = smov 128   ;;  %s15504_s2 = smov 8  }
0x1520   : > { %15195 = dma.vmem_to_hbm [thread:$0]  (%p15628_p5), %s19097_s20, 1024, %s19095_s28, %s19104_s25, %s15503_s23, %s15503_s23, %s15504_s2  }
0x1521 PF: > { %p15201_p1 = scmp.ge.s32.totalorder %s15497_s24, 2  ;;  %s10997_s1 = sand.u32 1, %s15485_s21  }
0x1522   : > { %s10998_s18 = scalar_lea.sflag [#allocation3], %s10997_s1 }
0x1523   : > { %p15198_p2 = pnand %p15201_p1, %p15632_p6 }
0x1525   : > { %15480 = dma.done.wait (!%p15198_p2), %s10998_s18, 1024  }
0x1526   : > { %15482 = vsyncadd (!%p15198_p2), %s10998_s18, 4294966272  ;;  %s19623_s26 = sld [smem:[#allocation5_spill]]  ;;  %s19624_s23 = sld [smem:[#allocation6_spill]] }
0x1527   : > { %p26_p3 = scmp.ge.s32.totalorder %s15615_s27, 4   ;;  %s19625_s21 = smov %s15489_s22 }
0x1528   : > { %s19627_s24 = smov %s15615_s27 }
0x1529   :  { %28 = sbr.rel (!%p26_p3) target bundleno = 7 (0x7), region = 159 }
0x152c   : > { %s19626_s22 = smov %s19623_s26 }
0x1530   :  { %11003 = vsyncpa [#allocation3], 1 }
0x1531   :  { %11005 = vsyncpa [#allocation3 + $0x1], 1 }

</bundles_post_ra>
